<compile_context>
chip_gen: v6e
topology: v6e:2x2x1
jax: 0.10.0
libtpu: 0.0.40
codegen_flags: <defaults>
</compile_context>

<pallas_src>
import functools

import jax
import jax.numpy as jnp
from jax.experimental import pallas as pl
from jax.experimental.pallas import tpu as pltpu

EPS = 1e-5            # torch layer_norm / GroupNorm default eps
NEG_INF = -1e30       # softmax mask value (avoid inf-inf NaNs)


def _vmem_limit_bytes():
    """~75% of physical VMEM (≈96 MiB v5e/v6e, ≈48 MiB v7x), with fallback."""
    try:
        cap = int(pltpu.get_tpu_info().vmem_capacity_bytes)
        return max(32 << 20, min(cap * 3 // 4, 100 << 20))
    except Exception:
        return 64 << 20


_VMEM_LIMIT = _vmem_limit_bytes()


def _gelu(x):
    # TODO(synk): HF wav2vec2 uses exact erf-GELU; tanh approximation kept for robust TPU lowering.
    return jax.nn.gelu(x, approximate=True)


def _round_up(x, m):
    return ((x + m - 1) // m) * m


def _pick_tile(dim, target, align):
    """Return (padded_dim, tile). Prefers the largest tile <= target that is a
    multiple of `align` and divides `dim` exactly (no padding / no wasted MXU
    work); falls back to padding dim up to a multiple of `target`."""
    if dim <= target:
        return dim, dim
    t = (target // align) * align
    while t >= align:
        if dim % t == 0:
            return dim, t
        t -= align
    return _round_up(dim, target), target


# --------------------------------------------------------------------------
# Tiled matmul + bias (+ optional fused GELU) — bf16 in/out, f32 accumulate
# --------------------------------------------------------------------------

def _matmul_kernel(a_ref, w_ref, b_ref, o_ref, acc_ref, *, act):
    @pl.when(pl.program_id(2) == 0)
    def _():
        acc_ref[...] = jnp.zeros_like(acc_ref)

    acc_ref[...] += jnp.dot(a_ref[...], w_ref[...],
                            preferred_element_type=jnp.float32)

    @pl.when(pl.program_id(2) == pl.num_programs(2) - 1)
    def _():
        y = acc_ref[...] + b_ref[...]
        if act == "gelu":
            y = _gelu(y)
        o_ref[...] = y.astype(o_ref.dtype)


def matmul_bias(a, w, b, act=None, *, out_dtype=jnp.bfloat16,
                tm_target=512, tn_target=256, tk_target=512):
    """y = a @ w + b (optionally fused GELU). a:[M,K] w:[K,N] b:[N] -> bf16 [M,N]."""
    M, K = a.shape
    K2, N = w.shape
    assert K == K2, (a.shape, w.shape)
    Mp, tm = _pick_tile(M, tm_target, 8)
    Np, tn = _pick_tile(N, tn_target, 128)
    Kp, tk = _pick_tile(K, tk_target, 128)

    a_p = a.astype(jnp.bfloat16)
    w_p = w.astype(jnp.bfloat16)
    if (Mp, Kp) != (M, K):
        a_p = jnp.pad(a_p, ((0, Mp - M), (0, Kp - K)))
    if (Kp, Np) != (K, N):
        w_p = jnp.pad(w_p, ((0, Kp - K), (0, Np - N)))
    b_p = b.astype(jnp.float32).reshape(1, N)
    if Np != N:
        b_p = jnp.pad(b_p, ((0, 0), (0, Np - N)))

    grid = (Mp // tm, Np // tn, Kp // tk)
    out = pl.pallas_call(
        functools.partial(_matmul_kernel, act=act),
        out_shape=jax.ShapeDtypeStruct((Mp, Np), out_dtype),
        grid=grid,
        in_specs=[pl.BlockSpec((tm, tk), lambda i, j, k: (i, k)),
                  pl.BlockSpec((tk, tn), lambda i, j, k: (k, j)),
                  pl.BlockSpec((1, tn), lambda i, j, k: (0, j))],
        out_specs=pl.BlockSpec((tm, tn), lambda i, j, k: (i, j)),
        scratch_shapes=[pltpu.VMEM((tm, tn), jnp.float32)],
        compiler_params=pltpu.CompilerParams(
            dimension_semantics=("parallel", "parallel", "arbitrary"),
            vmem_limit_bytes=_VMEM_LIMIT),
    )(a_p, w_p, b_p)
    if (Mp, Np) != (M, N):
        out = out[:M, :N]
    return out


# --------------------------------------------------------------------------
# Row layer norm (last dim), bf16 in/out, f32 stats, fused residual / GELU
# --------------------------------------------------------------------------

def _row_ln_kernel(x_ref, g_ref, b_ref, *rest, eps, act, has_residual):
    if has_residual:
        r_ref, o_ref = rest
    else:
        (o_ref,) = rest
    x = x_ref[...].astype(jnp.float32)
    if has_residual:
        x = x + r_ref[...].astype(jnp.float32)
    m = jnp.mean(x, axis=-1, keepdims=True)
    v = jnp.mean((x - m) ** 2, axis=-1, keepdims=True)
    y = (x - m) * jax.lax.rsqrt(v + eps) * g_ref[...] + b_ref[...]
    if act == "gelu":
        y = _gelu(y)
    o_ref[...] = y.astype(o_ref.dtype)


def row_layer_norm(x2d, gamma, beta, *, residual=None, act=None, eps=EPS,
                   tm_target=512):
    M, D = x2d.shape
    Mp, tm = _pick_tile(M, tm_target, 8)
    x = x2d.astype(jnp.bfloat16)
    if Mp != M:
        x = jnp.pad(x, ((0, Mp - M), (0, 0)))
    args = [x,
            gamma.reshape(1, D).astype(jnp.float32),
            beta.reshape(1, D).astype(jnp.float32)]
    in_specs = [pl.BlockSpec((tm, D), lambda i: (i, 0)),
                pl.BlockSpec((1, D), lambda i: (0, 0)),
                pl.BlockSpec((1, D), lambda i: (0, 0))]
    if residual is not None:
        r = residual.astype(jnp.bfloat16)
        if Mp != M:
            r = jnp.pad(r, ((0, Mp - M), (0, 0)))
        args.append(r)
        in_specs.append(pl.BlockSpec((tm, D), lambda i: (i, 0)))

    out = pl.pallas_call(
        functools.partial(_row_ln_kernel, eps=eps, act=act,
                          has_residual=residual is not None),
        out_shape=jax.ShapeDtypeStruct((Mp, D), jnp.bfloat16),
        grid=(Mp // tm,),
        in_specs=in_specs,
        out_specs=pl.BlockSpec((tm, D), lambda i: (i, 0)),
        compiler_params=pltpu.CompilerParams(
            dimension_semantics=("parallel",),
            vmem_limit_bytes=_VMEM_LIMIT),
    )(*args)
    return out[:M] if Mp != M else out


# --------------------------------------------------------------------------
# GroupNorm(groups == channels) over time + GELU, lane-dense [B, T, C],
# time-tiled two-pass (sum/sumsq -> normalize)
# --------------------------------------------------------------------------

def _gn_stats_kernel(x_ref, sum_ref, sq_ref):
    @pl.when(pl.program_id(1) == 0)
    def _():
        sum_ref[...] = jnp.zeros_like(sum_ref)
        sq_ref[...] = jnp.zeros_like(sq_ref)
    x = x_ref[0].astype(jnp.float32)                      # (tt, C)
    sum_ref[0] += jnp.sum(x, axis=0, keepdims=True)
    sq_ref[0] += jnp.sum(x * x, axis=0, keepdims=True)


def _gn_apply_kernel(x_ref, sum_ref, sq_ref, g_ref, b_ref, o_ref, *, eps, inv_count):
    x = x_ref[0].astype(jnp.float32)                      # (tt, C)
    m = sum_ref[0] * inv_count                            # (1, C)
    v = jnp.maximum(sq_ref[0] * inv_count - m * m, 0.0)
    y = (x - m) * jax.lax.rsqrt(v + eps) * g_ref[...] + b_ref[...]
    o_ref[0] = _gelu(y).astype(o_ref.dtype)


def group_norm_time_gelu(x_btc, gamma, beta, eps=EPS, tt_target=512):
    B, T, C = x_btc.shape
    Tp, tt = _pick_tile(T, tt_target, 8)
    x = x_btc.astype(jnp.bfloat16)
    if Tp != T:
        x = jnp.pad(x, ((0, 0), (0, Tp - T), (0, 0)))     # zero pad: sums unaffected
    gb = gamma.reshape(1, C).astype(jnp.float32)
    bb = beta.reshape(1, C).astype(jnp.float32)
    x_spec = pl.BlockSpec((1, tt, C), lambda b, t: (b, t, 0))
    stat_spec = pl.BlockSpec((1, 1, C), lambda b, t: (b, 0, 0))

    sums, sqs = pl.pallas_call(
        _gn_stats_kernel,
        out_shape=(jax.ShapeDtypeStruct((B, 1, C), jnp.float32),
                   jax.ShapeDtypeStruct((B, 1, C), jnp.float32)),
        grid=(B, Tp // tt),
        in_specs=[x_spec],
        out_specs=(stat_spec, stat_spec),
        compiler_params=pltpu.CompilerParams(
            dimension_semantics=("parallel", "arbitrary"),
            vmem_limit_bytes=_VMEM_LIMIT),
    )(x)

    out = pl.pallas_call(
        functools.partial(_gn_apply_kernel, eps=eps, inv_count=1.0 / T),
        out_shape=jax.ShapeDtypeStruct((B, Tp, C), jnp.bfloat16),
        grid=(B, Tp // tt),
        in_specs=[x_spec, stat_spec, stat_spec,
                  pl.BlockSpec((1, C), lambda b, t: (0, 0)),
                  pl.BlockSpec((1, C), lambda b, t: (0, 0))],
        out_specs=x_spec,
        compiler_params=pltpu.CompilerParams(
            dimension_semantics=("parallel", "parallel"),
            vmem_limit_bytes=_VMEM_LIMIT),
    )(x, sums, sqs, gb, bb)
    return out[:, :T] if Tp != T else out


# --------------------------------------------------------------------------
# Flash-style multi-head self-attention from the fused QKV tensor.
# Q/K/V are selected with the BlockSpec last-axis block index (0/1/2), so the
# fused [B, T, 3D] projection output feeds attention with no extra HBM copies.
# --------------------------------------------------------------------------

def _flash_attn_kernel(q_ref, k_ref, v_ref, o_ref, m_sc, l_sc, acc_sc, *,
                       scale, num_heads, head_dim, seq_len, padded_len):
    ki = pl.program_id(2)
    tk = k_ref.shape[1]

    @pl.when(ki == 0)
    def _():
        m_sc[...] = jnp.full(m_sc.shape, NEG_INF, jnp.float32)
        l_sc[...] = jnp.zeros_like(l_sc)
        acc_sc[...] = jnp.zeros_like(acc_sc)

    q = q_ref[0]                                           # (tq, D) bf16
    k = k_ref[0]                                           # (tk, D) bf16
    v = v_ref[0]

    if padded_len != seq_len:
        kpos = ki * tk + jax.lax.broadcasted_iota(jnp.int32, (1, tk), 1)
        key_valid = kpos < seq_len
    else:
        key_valid = None

    # TODO(synk): heads could be batched into one dot_general; kept as a small
    # static loop with direct scratch-slice writes for robust Mosaic lowering.
    for h in range(num_heads):
        lo = h * head_dim
        qh = q[:, lo:lo + head_dim]
        kh = k[:, lo:lo + head_dim]
        vh = v[:, lo:lo + head_dim]
        s = jax.lax.dot_general(qh, kh, (((1,), (1,)), ((), ())),
                                preferred_element_type=jnp.float32) * scale
        if key_valid is not None:
            s = jnp.where(key_valid, s, NEG_INF)
        m_prev = m_sc[h]                                   # (tq, 1)
        m_new = jnp.maximum(m_prev, jnp.max(s, axis=-1, keepdims=True))
        alpha = jnp.exp(m_prev - m_new)
        p = jnp.exp(s - m_new)
        l_sc[h] = alpha * l_sc[h] + jnp.sum(p, axis=-1, keepdims=True)
        acc_sc[h] = alpha * acc_sc[h] + jnp.dot(
            p.astype(jnp.bfloat16), vh, preferred_element_type=jnp.float32)
        m_sc[h] = m_new

    @pl.when(ki == pl.num_programs(2) - 1)
    def _():
        for h in range(num_heads):
            lo = h * head_dim
            o_ref[0, :, lo:lo + head_dim] = (
                acc_sc[h] * pl.reciprocal(l_sc[h], approx=True)
            ).astype(o_ref.dtype)


def multihead_attention_qkv(qkv, num_heads, scale, *, t_target=256):
    """qkv: [B, T, 3D] (fused projection output) -> [B, T, D] bf16."""
    B, T, D3 = qkv.shape
    D = D3 // 3
    dh = D // num_heads
    Tp, tt = _pick_tile(T, t_target, 8)
    x = qkv.astype(jnp.bfloat16)
    if Tp != T:
        x = jnp.pad(x, ((0, 0), (0, Tp - T), (0, 0)))

    q_spec = pl.BlockSpec((1, tt, D), lambda b, qi, ki: (b, qi, 0))
    k_spec = pl.BlockSpec((1, tt, D), lambda b, qi, ki: (b, ki, 1))
    v_spec = pl.BlockSpec((1, tt, D), lambda b, qi, ki: (b, ki, 2))

    out = pl.pallas_call(
        functools.partial(_flash_attn_kernel, scale=scale, num_heads=num_heads,
                          head_dim=dh, seq_len=T, padded_len=Tp),
        out_shape=jax.ShapeDtypeStruct((B, Tp, D), jnp.bfloat16),
        grid=(B, Tp // tt, Tp // tt),
        in_specs=[q_spec, k_spec, v_spec],
        out_specs=pl.BlockSpec((1, tt, D), lambda b, qi, ki: (b, qi, 0)),
        scratch_shapes=[pltpu.VMEM((num_heads, tt, 1), jnp.float32),
                        pltpu.VMEM((num_heads, tt, 1), jnp.float32),
                        pltpu.VMEM((num_heads, tt, dh), jnp.float32)],
        compiler_params=pltpu.CompilerParams(
            dimension_semantics=("parallel", "parallel", "arbitrary"),
            vmem_limit_bytes=_VMEM_LIMIT),
    )(x, x, x)
    return out[:, :T] if Tp != T else out


# --------------------------------------------------------------------------
# Global layer norm (F.layer_norm(x, x.shape), no affine):
# row+column tiled partial sums ('parallel' grid, reduced in JAX) + tiled apply
# --------------------------------------------------------------------------

def _gln_stats_kernel(x_ref, sum_ref, sq_ref):
    @pl.when(pl.program_id(1) == 0)
    def _():
        sum_ref[...] = jnp.zeros_like(sum_ref)
        sq_ref[...] = jnp.zeros_like(sq_ref)
    x = x_ref[...].astype(jnp.float32)
    sum_ref[...] += jnp.sum(x)          # scalar broadcast across the lane-dense block
    sq_ref[...] += jnp.sum(x * x)


def _gln_apply_kernel(x_ref, stats_ref, o_ref):
    mean = stats_ref[0]
    rstd = stats_ref[1]
    o_ref[...] = ((x_ref[...].astype(jnp.float32) - mean) * rstd).astype(o_ref.dtype)


def global_layer_norm(x, eps=EPS, out_dtype=jnp.float32,
                      tm_target=512, tn_target=1024):
    # TODO(synk): E[x^2]-mean^2 in f32 can lose precision for very large counts;
    # a Welford/Chan combination of per-block centered stats would be more robust.
    shape = x.shape
    lane = shape[-1]
    x2 = x.reshape(-1, lane)
    M, N = x2.shape
    Mp, tm = _pick_tile(M, tm_target, 8)
    Np, tn = _pick_tile(N, tn_target, 128)
    count = float(M * N)
    xp = x2
    if (Mp, Np) != (M, N):
        xp = jnp.pad(x2, ((0, Mp - M), (0, Np - N)))      # zeros do not bias the sums
    mb, nb = Mp // tm, Np // tn
    x_spec = pl.BlockSpec((tm, tn), lambda i, j: (i, j))
    part_spec = pl.BlockSpec((1, 1, 128), lambda i, j: (i, 0, 0))

    sums, sqs = pl.pallas_call(
        _gln_stats_kernel,
        out_shape=(jax.ShapeDtypeStruct((mb, 1, 128), jnp.float32),
                   jax.ShapeDtypeStruct((mb, 1, 128), jnp.float32)),
        grid=(mb, nb),
        in_specs=[x_spec],
        out_specs=(part_spec, part_spec),
        compiler_params=pltpu.CompilerParams(
            dimension_semantics=("parallel", "arbitrary"),
            vmem_limit_bytes=_VMEM_LIMIT),
    )(xp)

    total = jnp.sum(sums[:, 0, 0])
    total_sq = jnp.sum(sqs[:, 0, 0])
    mean = total / count
    var = jnp.maximum(total_sq / count - mean * mean, 0.0)
    stats = jnp.stack([mean, jax.lax.rsqrt(var + eps)])    # (2,) f32 -> SMEM

    out = pl.pallas_call(
        _gln_apply_kernel,
        out_shape=jax.ShapeDtypeStruct((Mp, Np), out_dtype),
        grid=(mb, nb),
        in_specs=[x_spec,
                  pl.BlockSpec(memory_space=pltpu.MemorySpace.SMEM)],
        out_specs=x_spec,
        compiler_params=pltpu.CompilerParams(
            dimension_semantics=("parallel", "parallel"),
            vmem_limit_bytes=_VMEM_LIMIT),
    )(xp, stats)
    if (Mp, Np) != (M, N):
        out = out[:M, :N]
    return out.reshape(shape)


# --------------------------------------------------------------------------
# JAX glue: im2col for 1-D conv (conv compute happens in the Pallas matmul)
# --------------------------------------------------------------------------

def im2col_1d(x_btc, kernel, stride):
    """x: [B, T, C] -> patches [B, T_out, kernel*C] (tap-major), keeps dtype (bf16)."""
    # TODO(synk): for very long waveforms, fuse im2col into the matmul kernel via
    # strided BlockSpecs (or use a grouped lax.conv) to avoid the kernel-x HBM blowup.
    B, T, C = x_btc.shape
    t_out = (T - kernel) // stride + 1
    idx = jnp.arange(t_out)[:, None] * stride + jnp.arange(kernel)[None, :]
    patches = x_btc[:, idx, :]                             # [B, T_out, k, C]
    return patches.reshape(B, t_out, kernel * C)


# --------------------------------------------------------------------------
# Small synthetic wav2vec2-style model (deterministic weights, no checkpoint)
# Lane-dense feature dims (128) so toy-size kernels still use full vregs.
# --------------------------------------------------------------------------

CFG = dict(
    batch=2, wav_len=400,
    conv_dims=(128, 128), conv_kernels=(10, 3), conv_strides=(5, 2),
    hidden=128, num_layers=4, num_heads=4, ffn=256,
    pos_conv_kernel=8, pos_conv_pad=4,
    normalize_wav=True, output_norm=True,
)


def init_params(key, cfg):
    D = cfg["hidden"]
    C0, C1 = cfg["conv_dims"]
    k0, k1 = cfg["conv_kernels"]
    F = cfg["ffn"]
    kp = cfg["pos_conv_kernel"]
    keys = iter(jax.random.split(key, 128))

    def dense(shape):
        # MXU-feed weights stored pre-cast to bf16 (no per-call converts).
        return (0.02 * jax.random.normal(next(keys), shape, jnp.float32)
                ).astype(jnp.bfloat16)

    params = dict(
        conv0_w=dense((k0 * 1, C0)), conv0_b=jnp.zeros((C0,), jnp.float32),
        gn_g=jnp.ones((C0,), jnp.float32), gn_b=jnp.zeros((C0,), jnp.float32),
        conv1_w=dense((k1 * C0, C1)), conv1_b=jnp.zeros((C1,), jnp.float32),
        fp_ln_g=jnp.ones((C1,), jnp.float32), fp_ln_b=jnp.zeros((C1,), jnp.float32),
        fp_w=dense((C1, D)), fp_b=jnp.zeros((D,), jnp.float32),
        # TODO(synk): real wav2vec2 pos-conv is grouped (groups=16) + weight-norm;
        # represented here as a dense im2col matmul weight.
        pos_w=dense((kp * D, D)), pos_b=jnp.zeros((D,), jnp.float32),
        enc_ln_g=jnp.ones((D,), jnp.float32), enc_ln_b=jnp.zeros((D,), jnp.float32),
        layers=[],
    )
    for _ in range(cfg["num_layers"]):
        params["layers"].append(dict(
            # QKV pre-fused into one [D, 3D] projection at init (no per-call concat)
            wqkv=dense((D, 3 * D)), bqkv=jnp.zeros((3 * D,), jnp.float32),
            wo=dense((D, D)), bo=jnp.zeros((D,), jnp.float32),
            ln1_g=jnp.ones((D,), jnp.float32), ln1_b=jnp.zeros((D,), jnp.float32),
            w_ffn1=dense((D, F)), b_ffn1=jnp.zeros((F,), jnp.float32),
            w_ffn2=dense((F, D)), b_ffn2=jnp.zeros((D,), jnp.float32),
            ln2_g=jnp.ones((D,), jnp.float32), ln2_b=jnp.zeros((D,), jnp.float32),
        ))
    return params


def extract_features(params, wav, cfg):
    B, _ = wav.shape
    D = cfg["hidden"]
    C0, C1 = cfg["conv_dims"]
    H = cfg["num_heads"]
    dh = D // H
    scale = dh ** -0.5

    # 1. wav = F.layer_norm(wav, wav.shape)  (global, no affine)
    if cfg["normalize_wav"]:
        wav = global_layer_norm(wav, out_dtype=jnp.bfloat16)
    else:
        wav = wav.astype(jnp.bfloat16)

    # 2. conv feature extractor (conv0 -> GroupNorm+GELU, conv1 -> GELU)
    x = wav[:, :, None]                                            # [B, T, 1] bf16
    p = im2col_1d(x, cfg["conv_kernels"][0], cfg["conv_strides"][0])
    _, T1, KC0 = p.shape
    h = matmul_bias(p.reshape(B * T1, KC0), params["conv0_w"], params["conv0_b"])
    h = group_norm_time_gelu(h.reshape(B, T1, C0), params["gn_g"], params["gn_b"])
    p = im2col_1d(h, cfg["conv_kernels"][1], cfg["conv_strides"][1])
    _, T2, KC1 = p.shape
    h = matmul_bias(p.reshape(B * T2, KC1), params["conv1_w"], params["conv1_b"],
                    act="gelu")                                     # [B*T2, C1] bf16

    # 3. feature projection: LayerNorm(C) + Linear(C -> D)
    h = row_layer_norm(h, params["fp_ln_g"], params["fp_ln_b"])
    hidden2d = matmul_bias(h, params["fp_w"], params["fp_b"])       # [B*T2, D] bf16

    # 4. encoder: positional conv embedding + (residual + layer norm) fused
    pad, kp = cfg["pos_conv_pad"], cfg["pos_conv_kernel"]
    xp = jnp.pad(hidden2d.reshape(B, T2, D), ((0, 0), (pad, pad), (0, 0)))
    pp = im2col_1d(xp, kp, 1)[:, :T2, :]                            # SamePad crop (even kernel)
    pos = matmul_bias(pp.reshape(B * T2, kp * D), params["pos_w"], params["pos_b"],
                      act="gelu")
    hidden2d = row_layer_norm(pos, params["enc_ln_g"], params["enc_ln_b"],
                              residual=hidden2d)

    all_hidden = [hidden2d.reshape(B, T2, D)]

    for layer in params["layers"]:
        x2 = hidden2d                                               # [B*T2, D] bf16
        # fused QKV projection, sliced inside the attention BlockSpecs
        qkv = matmul_bias(x2, layer["wqkv"], layer["bqkv"]).reshape(B, T2, 3 * D)
        ao = multihead_attention_qkv(qkv, H, scale)                 # [B, T2, D] bf16
        ao = matmul_bias(ao.reshape(B * T2, D), layer["wo"], layer["bo"])
        # post-LN blocks with residual fused into the LN kernel
        x2 = row_layer_norm(ao, layer["ln1_g"], layer["ln1_b"], residual=x2)
        ff = matmul_bias(x2, layer["w_ffn1"], layer["b_ffn1"], act="gelu")
        ff = matmul_bias(ff, layer["w_ffn2"], layer["b_ffn2"])
        x2 = row_layer_norm(ff, layer["ln2_g"], layer["ln2_b"], residual=x2)
        hidden2d = x2
        all_hidden.append(hidden2d.reshape(B, T2, D))

    # 5./6. global output norm in lane-dense [L+1, B, T, D] layout, then
    # rearrange to torch.stack(hidden_states, dim=3) -> [B, T, D, L+1].
    stacked = jnp.stack(all_hidden, axis=0)                         # [L+1, B, T, D] bf16
    if cfg["output_norm"]:
        stacked = global_layer_norm(stacked, out_dtype=jnp.float32)
    else:
        stacked = stacked.astype(jnp.float32)
    return jnp.transpose(stacked, (1, 2, 3, 0))                     # [B, T, D, L+1]


if __name__ == "__main__":
    key = jax.random.PRNGKey(0)
    pkey, xkey = jax.random.split(key)
    params = init_params(pkey, CFG)
    wav = jax.random.normal(xkey, (CFG["batch"], CFG["wav_len"]), jnp.float32)

    fwd = jax.jit(lambda p, w: extract_features(p, w, CFG))
    out = jax.block_until_ready(fwd(params, wav))

    T1 = (CFG["wav_len"] - CFG["conv_kernels"][0]) // CFG["conv_strides"][0] + 1
    T2 = (T1 - CFG["conv_kernels"][1]) // CFG["conv_strides"][1] + 1
    expected = (CFG["batch"], T2, CFG["hidden"], CFG["num_layers"] + 1)
    assert out.shape == expected, (out.shape, expected)
    assert bool(jnp.all(jnp.isfinite(out)))
    print("KERNEL_OK")
</pallas_src>

<mosaic_0001>
module attributes {stable_mosaic.version = 11 : i64} {
  func.func @_gln_stats_kernel(%arg0: i32, %arg1: i32, %arg2: memref<2x400xf32, #tpu.memory_space<vmem>>, %arg3: memref<1x1x128xf32, #tpu.memory_space<vmem>>, %arg4: memref<1x1x128xf32, #tpu.memory_space<vmem>>) attributes {dimension_semantics = [#tpu.dimension_semantics<parallel>, #tpu.dimension_semantics<arbitrary>], iteration_bounds = array<i64: 1, 1>, scalar_prefetch = 0 : i64, scratch_operands = 0 : i64, tpu.core_type = #tpu.core_type<tc>, window_params = [{transform_indices = @transform_0, window_bounds = array<i64: 2, 400>}, {transform_indices = @transform_1, window_bounds = array<i64: 1, 1, 128>}, {transform_indices = @transform_2, window_bounds = array<i64: 1, 1, 128>}]} {
    %c0_i32 = arith.constant 0 : i32
    %0 = arith.cmpi eq, %arg1, %c0_i32 : i32
    %1 = arith.extui %0 : i1 to i32
    %c0_i32_0 = arith.constant 0 : i32
    %2 = arith.cmpi ne, %1, %c0_i32_0 : i32
    scf.if %2 {
      %cst_15 = arith.constant 0.000000e+00 : f32
      %21 = vector.broadcast %cst_15 : f32 to vector<1x1x128xf32>
      %c0_16 = arith.constant 0 : index
      %c0_17 = arith.constant 0 : index
      %c0_18 = arith.constant 0 : index
      %22 = vector.load %arg3[%c0_16, %c0_17, %c0_18] : memref<1x1x128xf32, #tpu.memory_space<vmem>>, vector<1x1x128xf32>
      tpu.vector_store %arg3[%c0_16, %c0_17, %c0_18], %21 {strides = array<i32>} : memref<1x1x128xf32, #tpu.memory_space<vmem>>, vector<1x1x128xf32>,
      %cst_19 = arith.constant 0.000000e+00 : f32
      %23 = vector.broadcast %cst_19 : f32 to vector<1x1x128xf32>
      %c0_20 = arith.constant 0 : index
      %c0_21 = arith.constant 0 : index
      %c0_22 = arith.constant 0 : index
      %24 = vector.load %arg4[%c0_20, %c0_21, %c0_22] : memref<1x1x128xf32, #tpu.memory_space<vmem>>, vector<1x1x128xf32>
      tpu.vector_store %arg4[%c0_20, %c0_21, %c0_22], %23 {strides = array<i32>} : memref<1x1x128xf32, #tpu.memory_space<vmem>>, vector<1x1x128xf32>,
    } else {
    }
    %c0 = arith.constant 0 : index
    %c0_1 = arith.constant 0 : index
    %3 = vector.load %arg2[%c0, %c0_1] : memref<2x400xf32, #tpu.memory_space<vmem>>, vector<2x400xf32>
    %c0_2 = arith.constant 0 : index
    %c0_3 = arith.constant 0 : index
    %c0_4 = arith.constant 0 : index
    %4 = vector.load %arg3[%c0_2, %c0_3, %c0_4] : memref<1x1x128xf32, #tpu.memory_space<vmem>>, vector<1x1x128xf32>
    %5 = vector.shape_cast %3 : vector<2x400xf32> to vector<1x2x400xf32>
    %cst = arith.constant dense<0.000000e+00> : vector<1xf32>
    %6 = vector.multi_reduction <add>, %5, %cst [1, 2] : vector<1x2x400xf32> to vector<1xf32>
    %7 = vector.shape_cast %6 : vector<1xf32> to vector<1x1x1xf32>
    %8 = vector.extract %7[0, 0, 0] : f32 from vector<1x1x1xf32>
    %9 = vector.broadcast %8 : f32 to vector<1x1x128xf32>
    %10 = arith.addf %4, %9 : vector<1x1x128xf32>
    %c0_5 = arith.constant 0 : index
    %c0_6 = arith.constant 0 : index
    %c0_7 = arith.constant 0 : index
    %11 = vector.load %arg3[%c0_5, %c0_6, %c0_7] : memref<1x1x128xf32, #tpu.memory_space<vmem>>, vector<1x1x128xf32>
    tpu.vector_store %arg3[%c0_5, %c0_6, %c0_7], %10 {strides = array<i32>} : memref<1x1x128xf32, #tpu.memory_space<vmem>>, vector<1x1x128xf32>,
    %c0_8 = arith.constant 0 : index
    %c0_9 = arith.constant 0 : index
    %c0_10 = arith.constant 0 : index
    %12 = vector.load %arg4[%c0_8, %c0_9, %c0_10] : memref<1x1x128xf32, #tpu.memory_space<vmem>>, vector<1x1x128xf32>
    %13 = arith.mulf %3, %3 : vector<2x400xf32>
    %14 = vector.shape_cast %13 : vector<2x400xf32> to vector<1x2x400xf32>
    %cst_11 = arith.constant dense<0.000000e+00> : vector<1xf32>
    %15 = vector.multi_reduction <add>, %14, %cst_11 [1, 2] : vector<1x2x400xf32> to vector<1xf32>
    %16 = vector.shape_cast %15 : vector<1xf32> to vector<1x1x1xf32>
    %17 = vector.extract %16[0, 0, 0] : f32 from vector<1x1x1xf32>
    %18 = vector.broadcast %17 : f32 to vector<1x1x128xf32>
    %19 = arith.addf %12, %18 : vector<1x1x128xf32>
    %c0_12 = arith.constant 0 : index
    %c0_13 = arith.constant 0 : index
    %c0_14 = arith.constant 0 : index
    %20 = vector.load %arg4[%c0_12, %c0_13, %c0_14] : memref<1x1x128xf32, #tpu.memory_space<vmem>>, vector<1x1x128xf32>
    tpu.vector_store %arg4[%c0_12, %c0_13, %c0_14], %19 {strides = array<i32>} : memref<1x1x128xf32, #tpu.memory_space<vmem>>, vector<1x1x128xf32>,
    return
  }
  func.func @transform_0(%arg0: i32, %arg1: i32) -> (i32, i32) {
    %c0_i32 = arith.constant 0 : i32
    return %arg0, %arg1 : i32, i32
  }
  func.func @transform_1(%arg0: i32, %arg1: i32) -> (i32, i32, i32) {
    %c0_i32 = arith.constant 0 : i32
    %c0_i32_0 = arith.constant 0 : i32
    %c0_i32_1 = arith.constant 0 : i32
    return %arg0, %c0_i32, %c0_i32_0 : i32, i32, i32
  }
  func.func @transform_2(%arg0: i32, %arg1: i32) -> (i32, i32, i32) {
    %c0_i32 = arith.constant 0 : i32
    %c0_i32_0 = arith.constant 0 : i32
    %c0_i32_1 = arith.constant 0 : i32
    return %arg0, %c0_i32, %c0_i32_0 : i32, i32, i32
  }
}

module attributes {stable_mosaic.version = 11 : i64} {
  func.func @_gln_apply_kernel(%arg0: i32, %arg1: i32, %arg2: memref<2x400xf32, #tpu.memory_space<vmem>>, %arg3: memref<2xf32, #tpu.memory_space<smem>>, %arg4: memref<2x400xbf16, #tpu.memory_space<vmem>>) attributes {dimension_semantics = [#tpu.dimension_semantics<parallel>, #tpu.dimension_semantics<parallel>], iteration_bounds = array<i64: 1, 1>, scalar_prefetch = 0 : i64, scratch_operands = 0 : i64, tpu.core_type = #tpu.core_type<tc>, window_params = [{transform_indices = @transform_0, window_bounds = array<i64: 2, 400>}, {transform_indices = @transform_1, window_bounds = array<i64: 2>}, {transform_indices = @transform_2, window_bounds = array<i64: 2, 400>}]} {
    %c0 = arith.constant 0 : index
    %0 = memref.load %arg3[%c0] : memref<2xf32, #tpu.memory_space<smem>>
    %c1 = arith.constant 1 : index
    %1 = memref.load %arg3[%c1] : memref<2xf32, #tpu.memory_space<smem>>
    %c0_0 = arith.constant 0 : index
    %c0_1 = arith.constant 0 : index
    %2 = vector.load %arg2[%c0_0, %c0_1] : memref<2x400xf32, #tpu.memory_space<vmem>>, vector<2x400xf32>
    %3 = vector.broadcast %0 : f32 to vector<2x400xf32>
    %4 = arith.subf %2, %3 : vector<2x400xf32>
    %5 = vector.broadcast %1 : f32 to vector<2x400xf32>
    %6 = arith.mulf %4, %5 : vector<2x400xf32>
    %7 = arith.truncf %6 : vector<2x400xf32> to vector<2x400xbf16>
    %c0_2 = arith.constant 0 : index
    %c0_3 = arith.constant 0 : index
    %8 = vector.load %arg4[%c0_2, %c0_3] : memref<2x400xbf16, #tpu.memory_space<vmem>>, vector<2x400xbf16>
    tpu.vector_store %arg4[%c0_2, %c0_3], %7 {strides = array<i32>} : memref<2x400xbf16, #tpu.memory_space<vmem>>, vector<2x400xbf16>,
    return
  }
  func.func @transform_0(%arg0: i32, %arg1: i32) -> (i32, i32) {
    %c0_i32 = arith.constant 0 : i32
    return %arg0, %arg1 : i32, i32
  }
  func.func @transform_1(%arg0: i32, %arg1: i32) -> i32 {
    %c0_i32 = arith.constant 0 : i32
    %c0_i32_0 = arith.constant 0 : i32
    return %c0_i32 : i32
  }
  func.func @transform_2(%arg0: i32, %arg1: i32) -> (i32, i32) {
    %c0_i32 = arith.constant 0 : i32
    return %arg0, %arg1 : i32, i32
  }
}

module attributes {stable_mosaic.version = 11 : i64} {
  func.func @_matmul_kernel(%arg0: i32, %arg1: i32, %arg2: i32, %arg3: memref<158x10xbf16, #tpu.memory_space<vmem>>, %arg4: memref<10x128xbf16, #tpu.memory_space<vmem>>, %arg5: memref<1x128xf32, #tpu.memory_space<vmem>>, %arg6: memref<158x128xbf16, #tpu.memory_space<vmem>>, %arg7: memref<158x128xf32, #tpu.memory_space<vmem>>) attributes {dimension_semantics = [#tpu.dimension_semantics<parallel>, #tpu.dimension_semantics<parallel>, #tpu.dimension_semantics<arbitrary>], iteration_bounds = array<i64: 1, 1, 1>, scalar_prefetch = 0 : i64, scratch_operands = 1 : i64, tpu.core_type = #tpu.core_type<tc>, window_params = [{transform_indices = @transform_0, window_bounds = array<i64: 158, 10>}, {transform_indices = @transform_1, window_bounds = array<i64: 10, 128>}, {transform_indices = @transform_2, window_bounds = array<i64: 1, 128>}, {transform_indices = @transform_3, window_bounds = array<i64: 158, 128>}]} {
    %c0_i32 = arith.constant 0 : i32
    %0 = arith.cmpi eq, %arg2, %c0_i32 : i32
    %1 = arith.extui %0 : i1 to i32
    %c0_i32_0 = arith.constant 0 : i32
    %2 = arith.cmpi ne, %1, %c0_i32_0 : i32
    scf.if %2 {
      %cst_10 = arith.constant 0.000000e+00 : f32
      %12 = vector.broadcast %cst_10 : f32 to vector<158x128xf32>
      %c0_11 = arith.constant 0 : index
      %c0_12 = arith.constant 0 : index
      %13 = vector.load %arg7[%c0_11, %c0_12] : memref<158x128xf32, #tpu.memory_space<vmem>>, vector<158x128xf32>
      tpu.vector_store %arg7[%c0_11, %c0_12], %12 {strides = array<i32>} : memref<158x128xf32, #tpu.memory_space<vmem>>, vector<158x128xf32>,
    } else {
    }
    %c0 = arith.constant 0 : index
    %c0_1 = arith.constant 0 : index
    %3 = vector.load %arg7[%c0, %c0_1] : memref<158x128xf32, #tpu.memory_space<vmem>>, vector<158x128xf32>
    %c0_2 = arith.constant 0 : index
    %c0_3 = arith.constant 0 : index
    %4 = vector.load %arg3[%c0_2, %c0_3] : memref<158x10xbf16, #tpu.memory_space<vmem>>, vector<158x10xbf16>
    %c0_4 = arith.constant 0 : index
    %c0_5 = arith.constant 0 : index
    %5 = vector.load %arg4[%c0_4, %c0_5] : memref<10x128xbf16, #tpu.memory_space<vmem>>, vector<10x128xbf16>
    %cst = arith.constant dense<0.000000e+00> : vector<158x128xf32>
    %6 = tpu.matmul %4, %5, %cst {dimension_numbers = #tpu.dot_dimension_numbers<[1], [0], [0], [1], [0, 0, 1, 1], [], []>} : vector<158x10xbf16>, vector<10x128xbf16>, vector<158x128xf32> -> vector<158x128xf32>
    %7 = arith.addf %3, %6 : vector<158x128xf32>
    %c0_6 = arith.constant 0 : index
    %c0_7 = arith.constant 0 : index
    %8 = vector.load %arg7[%c0_6, %c0_7] : memref<158x128xf32, #tpu.memory_space<vmem>>, vector<158x128xf32>
    tpu.vector_store %arg7[%c0_6, %c0_7], %7 {strides = array<i32>} : memref<158x128xf32, #tpu.memory_space<vmem>>, vector<158x128xf32>,
    %c0_i32_8 = arith.constant 0 : i32
    %9 = arith.cmpi eq, %arg2, %c0_i32_8 : i32
    %10 = arith.extui %9 : i1 to i32
    %c0_i32_9 = arith.constant 0 : i32
    %11 = arith.cmpi ne, %10, %c0_i32_9 : i32
    scf.if %11 {
      %c0_10 = arith.constant 0 : index
      %c0_11 = arith.constant 0 : index
      %12 = vector.load %arg7[%c0_10, %c0_11] : memref<158x128xf32, #tpu.memory_space<vmem>>, vector<158x128xf32>
      %c0_12 = arith.constant 0 : index
      %c0_13 = arith.constant 0 : index
      %13 = vector.load %arg5[%c0_12, %c0_13] : memref<1x128xf32, #tpu.memory_space<vmem>>, vector<1x128xf32>
      %14 = vector.broadcast %13 : vector<1x128xf32> to vector<158x128xf32>
      %15 = arith.addf %12, %14 : vector<158x128xf32>
      %16 = arith.truncf %15 : vector<158x128xf32> to vector<158x128xbf16>
      %c0_14 = arith.constant 0 : index
      %c0_15 = arith.constant 0 : index
      %17 = vector.load %arg6[%c0_14, %c0_15] : memref<158x128xbf16, #tpu.memory_space<vmem>>, vector<158x128xbf16>
      tpu.vector_store %arg6[%c0_14, %c0_15], %16 {strides = array<i32>} : memref<158x128xbf16, #tpu.memory_space<vmem>>, vector<158x128xbf16>,
    } else {
    }
    return
  }
  func.func @transform_0(%arg0: i32, %arg1: i32, %arg2: i32) -> (i32, i32) {
    %c0_i32 = arith.constant 0 : i32
    return %arg0, %arg2 : i32, i32
  }
  func.func @transform_1(%arg0: i32, %arg1: i32, %arg2: i32) -> (i32, i32) {
    %c0_i32 = arith.constant 0 : i32
    return %arg2, %arg1 : i32, i32
  }
  func.func @transform_2(%arg0: i32, %arg1: i32, %arg2: i32) -> (i32, i32) {
    %c0_i32 = arith.constant 0 : i32
    %c0_i32_0 = arith.constant 0 : i32
    return %c0_i32, %arg1 : i32, i32
  }
  func.func @transform_3(%arg0: i32, %arg1: i32, %arg2: i32) -> (i32, i32) {
    %c0_i32 = arith.constant 0 : i32
    return %arg0, %arg1 : i32, i32
  }
}

module attributes {stable_mosaic.version = 11 : i64} {
  func.func @_gn_stats_kernel(%arg0: i32, %arg1: i32, %arg2: memref<1x79x128xbf16, #tpu.memory_space<vmem>>, %arg3: memref<1x1x128xf32, #tpu.memory_space<vmem>>, %arg4: memref<1x1x128xf32, #tpu.memory_space<vmem>>) attributes {dimension_semantics = [#tpu.dimension_semantics<parallel>, #tpu.dimension_semantics<arbitrary>], iteration_bounds = array<i64: 2, 1>, scalar_prefetch = 0 : i64, scratch_operands = 0 : i64, tpu.core_type = #tpu.core_type<tc>, window_params = [{transform_indices = @transform_0, window_bounds = array<i64: 1, 79, 128>}, {transform_indices = @transform_1, window_bounds = array<i64: 1, 1, 128>}, {transform_indices = @transform_2, window_bounds = array<i64: 1, 1, 128>}]} {
    %c0_i32 = arith.constant 0 : i32
    %0 = arith.cmpi eq, %arg1, %c0_i32 : i32
    %1 = arith.extui %0 : i1 to i32
    %c0_i32_0 = arith.constant 0 : i32
    %2 = arith.cmpi ne, %1, %c0_i32_0 : i32
    scf.if %2 {
      %cst_16 = arith.constant 0.000000e+00 : f32
      %23 = vector.broadcast %cst_16 : f32 to vector<1x1x128xf32>
      %c0_17 = arith.constant 0 : index
      %c0_18 = arith.constant 0 : index
      %c0_19 = arith.constant 0 : index
      %24 = vector.load %arg3[%c0_17, %c0_18, %c0_19] : memref<1x1x128xf32, #tpu.memory_space<vmem>>, vector<1x1x128xf32>
      tpu.vector_store %arg3[%c0_17, %c0_18, %c0_19], %23 {strides = array<i32>} : memref<1x1x128xf32, #tpu.memory_space<vmem>>, vector<1x1x128xf32>,
      %cst_20 = arith.constant 0.000000e+00 : f32
      %25 = vector.broadcast %cst_20 : f32 to vector<1x1x128xf32>
      %c0_21 = arith.constant 0 : index
      %c0_22 = arith.constant 0 : index
      %c0_23 = arith.constant 0 : index
      %26 = vector.load %arg4[%c0_21, %c0_22, %c0_23] : memref<1x1x128xf32, #tpu.memory_space<vmem>>, vector<1x1x128xf32>
      tpu.vector_store %arg4[%c0_21, %c0_22, %c0_23], %25 {strides = array<i32>} : memref<1x1x128xf32, #tpu.memory_space<vmem>>, vector<1x1x128xf32>,
    } else {
    }
    %c0 = arith.constant 0 : index
    %c0_1 = arith.constant 0 : index
    %c0_2 = arith.constant 0 : index
    %3 = vector.load %arg2[%c0, %c0_1, %c0_2] : memref<1x79x128xbf16, #tpu.memory_space<vmem>>, vector<1x79x128xbf16>
    %4 = vector.shape_cast %3 : vector<1x79x128xbf16> to vector<79x128xbf16>
    %5 = arith.extf %4 : vector<79x128xbf16> to vector<79x128xf32>
    %c0_3 = arith.constant 0 : index
    %c0_4 = arith.constant 0 : index
    %c0_5 = arith.constant 0 : index
    %6 = vector.load %arg3[%c0_3, %c0_4, %c0_5] : memref<1x1x128xf32, #tpu.memory_space<vmem>>, vector<1x1x128xf32>
    %7 = vector.shape_cast %6 : vector<1x1x128xf32> to vector<1x128xf32>
    %cst = arith.constant dense<0.000000e+00> : vector<128xf32>
    %8 = vector.multi_reduction <add>, %5, %cst [0] : vector<79x128xf32> to vector<128xf32>
    %9 = vector.shape_cast %8 : vector<128xf32> to vector<1x128xf32>
    %10 = arith.addf %7, %9 : vector<1x128xf32>
    %c0_6 = arith.constant 0 : index
    %c0_7 = arith.constant 0 : index
    %c0_8 = arith.constant 0 : index
    %11 = vector.load %arg3[%c0_6, %c0_7, %c0_8] : memref<1x1x128xf32, #tpu.memory_space<vmem>>, vector<1x1x128xf32>
    %12 = vector.shape_cast %11 : vector<1x1x128xf32> to vector<1x128xf32>
    %13 = vector.shape_cast %10 : vector<1x128xf32> to vector<1x1x128xf32>
    tpu.vector_store %arg3[%c0_6, %c0_7, %c0_8], %13 {strides = array<i32>} : memref<1x1x128xf32, #tpu.memory_space<vmem>>, vector<1x1x128xf32>,
    %c0_9 = arith.constant 0 : index
    %c0_10 = arith.constant 0 : index
    %c0_11 = arith.constant 0 : index
    %14 = vector.load %arg4[%c0_9, %c0_10, %c0_11] : memref<1x1x128xf32, #tpu.memory_space<vmem>>, vector<1x1x128xf32>
    %15 = vector.shape_cast %14 : vector<1x1x128xf32> to vector<1x128xf32>
    %16 = arith.mulf %5, %5 : vector<79x128xf32>
    %cst_12 = arith.constant dense<0.000000e+00> : vector<128xf32>
    %17 = vector.multi_reduction <add>, %16, %cst_12 [0] : vector<79x128xf32> to vector<128xf32>
    %18 = vector.shape_cast %17 : vector<128xf32> to vector<1x128xf32>
    %19 = arith.addf %15, %18 : vector<1x128xf32>
    %c0_13 = arith.constant 0 : index
    %c0_14 = arith.constant 0 : index
    %c0_15 = arith.constant 0 : index
    %20 = vector.load %arg4[%c0_13, %c0_14, %c0_15] : memref<1x1x128xf32, #tpu.memory_space<vmem>>, vector<1x1x128xf32>
    %21 = vector.shape_cast %20 : vector<1x1x128xf32> to vector<1x128xf32>
    %22 = vector.shape_cast %19 : vector<1x128xf32> to vector<1x1x128xf32>
    tpu.vector_store %arg4[%c0_13, %c0_14, %c0_15], %22 {strides = array<i32>} : memref<1x1x128xf32, #tpu.memory_space<vmem>>, vector<1x1x128xf32>,
    return
  }
  func.func @transform_0(%arg0: i32, %arg1: i32) -> (i32, i32, i32) {
    %c0_i32 = arith.constant 0 : i32
    %c0_i32_0 = arith.constant 0 : i32
    return %arg0, %arg1, %c0_i32 : i32, i32, i32
  }
  func.func @transform_1(%arg0: i32, %arg1: i32) -> (i32, i32, i32) {
    %c0_i32 = arith.constant 0 : i32
    %c0_i32_0 = arith.constant 0 : i32
    %c0_i32_1 = arith.constant 0 : i32
    return %arg0, %c0_i32, %c0_i32_0 : i32, i32, i32
  }
  func.func @transform_2(%arg0: i32, %arg1: i32) -> (i32, i32, i32) {
    %c0_i32 = arith.constant 0 : i32
    %c0_i32_0 = arith.constant 0 : i32
    %c0_i32_1 = arith.constant 0 : i32
    return %arg0, %c0_i32, %c0_i32_0 : i32, i32, i32
  }
}

module attributes {stable_mosaic.version = 11 : i64} {
  func.func @_gn_apply_kernel(%arg0: i32, %arg1: i32, %arg2: memref<1x79x128xbf16, #tpu.memory_space<vmem>>, %arg3: memref<1x1x128xf32, #tpu.memory_space<vmem>>, %arg4: memref<1x1x128xf32, #tpu.memory_space<vmem>>, %arg5: memref<1x128xf32, #tpu.memory_space<vmem>>, %arg6: memref<1x128xf32, #tpu.memory_space<vmem>>, %arg7: memref<1x79x128xbf16, #tpu.memory_space<vmem>>) attributes {dimension_semantics = [#tpu.dimension_semantics<parallel>, #tpu.dimension_semantics<parallel>], iteration_bounds = array<i64: 2, 1>, scalar_prefetch = 0 : i64, scratch_operands = 0 : i64, tpu.core_type = #tpu.core_type<tc>, window_params = [{transform_indices = @transform_0, window_bounds = array<i64: 1, 79, 128>}, {transform_indices = @transform_1, window_bounds = array<i64: 1, 1, 128>}, {transform_indices = @transform_2, window_bounds = array<i64: 1, 1, 128>}, {pipeline_mode = #tpu.pipeline_mode<synchronous>, transform_indices = @transform_3, window_bounds = array<i64: 1, 128>}, {pipeline_mode = #tpu.pipeline_mode<synchronous>, transform_indices = @transform_4, window_bounds = array<i64: 1, 128>}, {transform_indices = @transform_5, window_bounds = array<i64: 1, 79, 128>}]} {
    %c0 = arith.constant 0 : index
    %c0_0 = arith.constant 0 : index
    %c0_1 = arith.constant 0 : index
    %0 = vector.load %arg2[%c0, %c0_0, %c0_1] : memref<1x79x128xbf16, #tpu.memory_space<vmem>>, vector<1x79x128xbf16>
    %1 = vector.shape_cast %0 : vector<1x79x128xbf16> to vector<79x128xbf16>
    %2 = arith.extf %1 : vector<79x128xbf16> to vector<79x128xf32>
    %c0_2 = arith.constant 0 : index
    %c0_3 = arith.constant 0 : index
    %c0_4 = arith.constant 0 : index
    %3 = vector.load %arg3[%c0_2, %c0_3, %c0_4] : memref<1x1x128xf32, #tpu.memory_space<vmem>>, vector<1x1x128xf32>
    %4 = vector.shape_cast %3 : vector<1x1x128xf32> to vector<1x128xf32>
    %cst = arith.constant 0.0126582282 : f32
    %5 = vector.broadcast %cst : f32 to vector<1x128xf32>
    %6 = arith.mulf %4, %5 : vector<1x128xf32>
    %c0_5 = arith.constant 0 : index
    %c0_6 = arith.constant 0 : index
    %c0_7 = arith.constant 0 : index
    %7 = vector.load %arg4[%c0_5, %c0_6, %c0_7] : memref<1x1x128xf32, #tpu.memory_space<vmem>>, vector<1x1x128xf32>
    %8 = vector.shape_cast %7 : vector<1x1x128xf32> to vector<1x128xf32>
    %cst_8 = arith.constant 0.0126582282 : f32
    %9 = vector.broadcast %cst_8 : f32 to vector<1x128xf32>
    %10 = arith.mulf %8, %9 : vector<1x128xf32>
    %11 = arith.mulf %6, %6 : vector<1x128xf32>
    %12 = arith.subf %10, %11 : vector<1x128xf32>
    %cst_9 = arith.constant 0.000000e+00 : f32
    %13 = vector.broadcast %cst_9 : f32 to vector<1x128xf32>
    %14 = arith.maximumf %12, %13 : vector<1x128xf32>
    %15 = vector.broadcast %6 : vector<1x128xf32> to vector<79x128xf32>
    %16 = arith.subf %2, %15 : vector<79x128xf32>
    %cst_10 = arith.constant 9.99999974E-6 : f32
    %17 = vector.broadcast %cst_10 : f32 to vector<1x128xf32>
    %18 = arith.addf %14, %17 : vector<1x128xf32>
    %19 = math.rsqrt %18 : vector<1x128xf32>
    %20 = vector.broadcast %19 : vector<1x128xf32> to vector<79x128xf32>
    %21 = arith.mulf %16, %20 : vector<79x128xf32>
    %c0_11 = arith.constant 0 : index
    %c0_12 = arith.constant 0 : index
    %22 = vector.load %arg5[%c0_11, %c0_12] : memref<1x128xf32, #tpu.memory_space<vmem>>, vector<1x128xf32>
    %23 = vector.broadcast %22 : vector<1x128xf32> to vector<79x128xf32>
    %24 = arith.mulf %21, %23 : vector<79x128xf32>
    %c0_13 = arith.constant 0 : index
    %c0_14 = arith.constant 0 : index
    %25 = vector.load %arg6[%c0_13, %c0_14] : memref<1x128xf32, #tpu.memory_space<vmem>>, vector<1x128xf32>
    %26 = vector.broadcast %25 : vector<1x128xf32> to vector<79x128xf32>
    %27 = arith.addf %24, %26 : vector<79x128xf32>
    %28 = arith.mulf %27, %27 : vector<79x128xf32>
    %29 = arith.mulf %27, %28 : vector<79x128xf32>
    %cst_15 = arith.constant 4.471500e-02 : f32
    %30 = vector.broadcast %cst_15 : f32 to vector<79x128xf32>
    %31 = arith.mulf %30, %29 : vector<79x128xf32>
    %32 = arith.addf %27, %31 : vector<79x128xf32>
    %cst_16 = arith.constant 0.797884583 : f32
    %33 = vector.broadcast %cst_16 : f32 to vector<79x128xf32>
    %34 = arith.mulf %33, %32 : vector<79x128xf32>
    %35 = math.tanh %34 : vector<79x128xf32>
    %cst_17 = arith.constant 1.000000e+00 : f32
    %36 = vector.broadcast %cst_17 : f32 to vector<79x128xf32>
    %37 = arith.addf %36, %35 : vector<79x128xf32>
    %cst_18 = arith.constant 5.000000e-01 : f32
    %38 = vector.broadcast %cst_18 : f32 to vector<79x128xf32>
    %39 = arith.mulf %38, %37 : vector<79x128xf32>
    %40 = arith.mulf %27, %39 : vector<79x128xf32>
    %41 = arith.truncf %40 : vector<79x128xf32> to vector<79x128xbf16>
    %c0_19 = arith.constant 0 : index
    %c0_20 = arith.constant 0 : index
    %c0_21 = arith.constant 0 : index
    %42 = vector.load %arg7[%c0_19, %c0_20, %c0_21] : memref<1x79x128xbf16, #tpu.memory_space<vmem>>, vector<1x79x128xbf16>
    %43 = vector.shape_cast %42 : vector<1x79x128xbf16> to vector<79x128xbf16>
    %44 = vector.shape_cast %41 : vector<79x128xbf16> to vector<1x79x128xbf16>
    tpu.vector_store %arg7[%c0_19, %c0_20, %c0_21], %44 {strides = array<i32>} : memref<1x79x128xbf16, #tpu.memory_space<vmem>>, vector<1x79x128xbf16>,
    return
  }
  func.func @transform_0(%arg0: i32, %arg1: i32) -> (i32, i32, i32) {
    %c0_i32 = arith.constant 0 : i32
    %c0_i32_0 = arith.constant 0 : i32
    return %arg0, %arg1, %c0_i32 : i32, i32, i32
  }
  func.func @transform_1(%arg0: i32, %arg1: i32) -> (i32, i32, i32) {
    %c0_i32 = arith.constant 0 : i32
    %c0_i32_0 = arith.constant 0 : i32
    %c0_i32_1 = arith.constant 0 : i32
    return %arg0, %c0_i32, %c0_i32_0 : i32, i32, i32
  }
  func.func @transform_2(%arg0: i32, %arg1: i32) -> (i32, i32, i32) {
    %c0_i32 = arith.constant 0 : i32
    %c0_i32_0 = arith.constant 0 : i32
    %c0_i32_1 = arith.constant 0 : i32
    return %arg0, %c0_i32, %c0_i32_0 : i32, i32, i32
  }
  func.func @transform_3(%arg0: i32, %arg1: i32) -> (i32, i32) {
    %c0_i32 = arith.constant 0 : i32
    %c0_i32_0 = arith.constant 0 : i32
    %c0_i32_1 = arith.constant 0 : i32
    return %c0_i32, %c0_i32_0 : i32, i32
  }
  func.func @transform_4(%arg0: i32, %arg1: i32) -> (i32, i32) {
    %c0_i32 = arith.constant 0 : i32
    %c0_i32_0 = arith.constant 0 : i32
    %c0_i32_1 = arith.constant 0 : i32
    return %c0_i32, %c0_i32_0 : i32, i32
  }
  func.func @transform_5(%arg0: i32, %arg1: i32) -> (i32, i32, i32) {
    %c0_i32 = arith.constant 0 : i32
    %c0_i32_0 = arith.constant 0 : i32
    return %arg0, %arg1, %c0_i32 : i32, i32, i32
  }
}

module attributes {stable_mosaic.version = 11 : i64} {
  func.func @_row_ln_kernel(%arg0: i32, %arg1: memref<78x128xbf16, #tpu.memory_space<vmem>>, %arg2: memref<1x128xf32, #tpu.memory_space<vmem>>, %arg3: memref<1x128xf32, #tpu.memory_space<vmem>>, %arg4: memref<78x128xbf16, #tpu.memory_space<vmem>>) attributes {dimension_semantics = [#tpu.dimension_semantics<parallel>], iteration_bounds = array<i64: 1>, scalar_prefetch = 0 : i64, scratch_operands = 0 : i64, tpu.core_type = #tpu.core_type<tc>, window_params = [{transform_indices = @transform_0, window_bounds = array<i64: 78, 128>}, {pipeline_mode = #tpu.pipeline_mode<synchronous>, transform_indices = @transform_1, window_bounds = array<i64: 1, 128>}, {pipeline_mode = #tpu.pipeline_mode<synchronous>, transform_indices = @transform_2, window_bounds = array<i64: 1, 128>}, {transform_indices = @transform_3, window_bounds = array<i64: 78, 128>}]} {
    %c0 = arith.constant 0 : index
    %c0_0 = arith.constant 0 : index
    %0 = vector.load %arg1[%c0, %c0_0] : memref<78x128xbf16, #tpu.memory_space<vmem>>, vector<78x128xbf16>
    %1 = arith.extf %0 : vector<78x128xbf16> to vector<78x128xf32>
    %cst = arith.constant dense<0.000000e+00> : vector<78xf32>
    %2 = vector.multi_reduction <add>, %1, %cst [1] : vector<78x128xf32> to vector<78xf32>
    %3 = vector.shape_cast %2 : vector<78xf32> to vector<78x1xf32>
    %cst_1 = arith.constant 1.280000e+02 : f32
    %4 = vector.broadcast %cst_1 : f32 to vector<78x1xf32>
    %5 = arith.divf %3, %4 : vector<78x1xf32>
    %6 = vector.broadcast %5 : vector<78x1xf32> to vector<78x128xf32>
    %7 = arith.subf %1, %6 : vector<78x128xf32>
    %8 = arith.mulf %7, %7 : vector<78x128xf32>
    %cst_2 = arith.constant dense<0.000000e+00> : vector<78xf32>
    %9 = vector.multi_reduction <add>, %8, %cst_2 [1] : vector<78x128xf32> to vector<78xf32>
    %10 = vector.shape_cast %9 : vector<78xf32> to vector<78x1xf32>
    %cst_3 = arith.constant 1.280000e+02 : f32
    %11 = vector.broadcast %cst_3 : f32 to vector<78x1xf32>
    %12 = arith.divf %10, %11 : vector<78x1xf32>
    %13 = vector.broadcast %5 : vector<78x1xf32> to vector<78x128xf32>
    %14 = arith.subf %1, %13 : vector<78x128xf32>
    %cst_4 = arith.constant 9.99999974E-6 : f32
    %15 = vector.broadcast %cst_4 : f32 to vector<78x1xf32>
    %16 = arith.addf %12, %15 : vector<78x1xf32>
    %17 = math.rsqrt %16 : vector<78x1xf32>
    %18 = vector.broadcast %17 : vector<78x1xf32> to vector<78x128xf32>
    %19 = arith.mulf %14, %18 : vector<78x128xf32>
    %c0_5 = arith.constant 0 : index
    %c0_6 = arith.constant 0 : index
    %20 = vector.load %arg2[%c0_5, %c0_6] : memref<1x128xf32, #tpu.memory_space<vmem>>, vector<1x128xf32>
    %21 = vector.broadcast %20 : vector<1x128xf32> to vector<78x128xf32>
    %22 = arith.mulf %19, %21 : vector<78x128xf32>
    %c0_7 = arith.constant 0 : index
    %c0_8 = arith.constant 0 : index
    %23 = vector.load %arg3[%c0_7, %c0_8] : memref<1x128xf32, #tpu.memory_space<vmem>>, vector<1x128xf32>
    %24 = vector.broadcast %23 : vector<1x128xf32> to vector<78x128xf32>
    %25 = arith.addf %22, %24 : vector<78x128xf32>
    %26 = arith.truncf %25 : vector<78x128xf32> to vector<78x128xbf16>
    %c0_9 = arith.constant 0 : index
    %c0_10 = arith.constant 0 : index
    %27 = vector.load %arg4[%c0_9, %c0_10] : memref<78x128xbf16, #tpu.memory_space<vmem>>, vector<78x128xbf16>
    tpu.vector_store %arg4[%c0_9, %c0_10], %26 {strides = array<i32>} : memref<78x128xbf16, #tpu.memory_space<vmem>>, vector<78x128xbf16>,
    return
  }
  func.func @transform_0(%arg0: i32) -> (i32, i32) {
    %c0_i32 = arith.constant 0 : i32
    %c0_i32_0 = arith.constant 0 : i32
    return %arg0, %c0_i32 : i32, i32
  }
  func.func @transform_1(%arg0: i32) -> (i32, i32) {
    %c0_i32 = arith.constant 0 : i32
    %c0_i32_0 = arith.constant 0 : i32
    %c0_i32_1 = arith.constant 0 : i32
    return %c0_i32, %c0_i32_0 : i32, i32
  }
  func.func @transform_2(%arg0: i32) -> (i32, i32) {
    %c0_i32 = arith.constant 0 : i32
    %c0_i32_0 = arith.constant 0 : i32
    %c0_i32_1 = arith.constant 0 : i32
    return %c0_i32, %c0_i32_0 : i32, i32
  }
  func.func @transform_3(%arg0: i32) -> (i32, i32) {
    %c0_i32 = arith.constant 0 : i32
    %c0_i32_0 = arith.constant 0 : i32
    return %arg0, %c0_i32 : i32, i32
  }
}

module attributes {stable_mosaic.version = 11 : i64} {
  func.func @_matmul_kernel(%arg0: i32, %arg1: i32, %arg2: i32, %arg3: memref<78x384xbf16, #tpu.memory_space<vmem>>, %arg4: memref<384x128xbf16, #tpu.memory_space<vmem>>, %arg5: memref<1x128xf32, #tpu.memory_space<vmem>>, %arg6: memref<78x128xbf16, #tpu.memory_space<vmem>>, %arg7: memref<78x128xf32, #tpu.memory_space<vmem>>) attributes {dimension_semantics = [#tpu.dimension_semantics<parallel>, #tpu.dimension_semantics<parallel>, #tpu.dimension_semantics<arbitrary>], iteration_bounds = array<i64: 1, 1, 1>, scalar_prefetch = 0 : i64, scratch_operands = 1 : i64, tpu.core_type = #tpu.core_type<tc>, window_params = [{transform_indices = @transform_0, window_bounds = array<i64: 78, 384>}, {transform_indices = @transform_1, window_bounds = array<i64: 384, 128>}, {transform_indices = @transform_2, window_bounds = array<i64: 1, 128>}, {transform_indices = @transform_3, window_bounds = array<i64: 78, 128>}]} {
    %c0_i32 = arith.constant 0 : i32
    %0 = arith.cmpi eq, %arg2, %c0_i32 : i32
    %1 = arith.extui %0 : i1 to i32
    %c0_i32_0 = arith.constant 0 : i32
    %2 = arith.cmpi ne, %1, %c0_i32_0 : i32
    scf.if %2 {
      %cst_10 = arith.constant 0.000000e+00 : f32
      %12 = vector.broadcast %cst_10 : f32 to vector<78x128xf32>
      %c0_11 = arith.constant 0 : index
      %c0_12 = arith.constant 0 : index
      %13 = vector.load %arg7[%c0_11, %c0_12] : memref<78x128xf32, #tpu.memory_space<vmem>>, vector<78x128xf32>
      tpu.vector_store %arg7[%c0_11, %c0_12], %12 {strides = array<i32>} : memref<78x128xf32, #tpu.memory_space<vmem>>, vector<78x128xf32>,
    } else {
    }
    %c0 = arith.constant 0 : index
    %c0_1 = arith.constant 0 : index
    %3 = vector.load %arg7[%c0, %c0_1] : memref<78x128xf32, #tpu.memory_space<vmem>>, vector<78x128xf32>
    %c0_2 = arith.constant 0 : index
    %c0_3 = arith.constant 0 : index
    %4 = vector.load %arg3[%c0_2, %c0_3] : memref<78x384xbf16, #tpu.memory_space<vmem>>, vector<78x384xbf16>
    %c0_4 = arith.constant 0 : index
    %c0_5 = arith.constant 0 : index
    %5 = vector.load %arg4[%c0_4, %c0_5] : memref<384x128xbf16, #tpu.memory_space<vmem>>, vector<384x128xbf16>
    %cst = arith.constant dense<0.000000e+00> : vector<78x128xf32>
    %6 = tpu.matmul %4, %5, %cst {dimension_numbers = #tpu.dot_dimension_numbers<[1], [0], [0], [1], [0, 0, 1, 1], [], []>} : vector<78x384xbf16>, vector<384x128xbf16>, vector<78x128xf32> -> vector<78x128xf32>
    %7 = arith.addf %3, %6 : vector<78x128xf32>
    %c0_6 = arith.constant 0 : index
    %c0_7 = arith.constant 0 : index
    %8 = vector.load %arg7[%c0_6, %c0_7] : memref<78x128xf32, #tpu.memory_space<vmem>>, vector<78x128xf32>
    tpu.vector_store %arg7[%c0_6, %c0_7], %7 {strides = array<i32>} : memref<78x128xf32, #tpu.memory_space<vmem>>, vector<78x128xf32>,
    %c0_i32_8 = arith.constant 0 : i32
    %9 = arith.cmpi eq, %arg2, %c0_i32_8 : i32
    %10 = arith.extui %9 : i1 to i32
    %c0_i32_9 = arith.constant 0 : i32
    %11 = arith.cmpi ne, %10, %c0_i32_9 : i32
    scf.if %11 {
      %c0_10 = arith.constant 0 : index
      %c0_11 = arith.constant 0 : index
      %12 = vector.load %arg7[%c0_10, %c0_11] : memref<78x128xf32, #tpu.memory_space<vmem>>, vector<78x128xf32>
      %c0_12 = arith.constant 0 : index
      %c0_13 = arith.constant 0 : index
      %13 = vector.load %arg5[%c0_12, %c0_13] : memref<1x128xf32, #tpu.memory_space<vmem>>, vector<1x128xf32>
      %14 = vector.broadcast %13 : vector<1x128xf32> to vector<78x128xf32>
      %15 = arith.addf %12, %14 : vector<78x128xf32>
      %16 = arith.mulf %15, %15 : vector<78x128xf32>
      %17 = arith.mulf %15, %16 : vector<78x128xf32>
      %cst_14 = arith.constant 4.471500e-02 : f32
      %18 = vector.broadcast %cst_14 : f32 to vector<78x128xf32>
      %19 = arith.mulf %18, %17 : vector<78x128xf32>
      %20 = arith.addf %15, %19 : vector<78x128xf32>
      %cst_15 = arith.constant 0.797884583 : f32
      %21 = vector.broadcast %cst_15 : f32 to vector<78x128xf32>
      %22 = arith.mulf %21, %20 : vector<78x128xf32>
      %23 = math.tanh %22 : vector<78x128xf32>
      %cst_16 = arith.constant 1.000000e+00 : f32
      %24 = vector.broadcast %cst_16 : f32 to vector<78x128xf32>
      %25 = arith.addf %24, %23 : vector<78x128xf32>
      %cst_17 = arith.constant 5.000000e-01 : f32
      %26 = vector.broadcast %cst_17 : f32 to vector<78x128xf32>
      %27 = arith.mulf %26, %25 : vector<78x128xf32>
      %28 = arith.mulf %15, %27 : vector<78x128xf32>
      %29 = arith.truncf %28 : vector<78x128xf32> to vector<78x128xbf16>
      %c0_18 = arith.constant 0 : index
      %c0_19 = arith.constant 0 : index
      %30 = vector.load %arg6[%c0_18, %c0_19] : memref<78x128xbf16, #tpu.memory_space<vmem>>, vector<78x128xbf16>
      tpu.vector_store %arg6[%c0_18, %c0_19], %29 {strides = array<i32>} : memref<78x128xbf16, #tpu.memory_space<vmem>>, vector<78x128xbf16>,
    } else {
    }
    return
  }
  func.func @transform_0(%arg0: i32, %arg1: i32, %arg2: i32) -> (i32, i32) {
    %c0_i32 = arith.constant 0 : i32
    return %arg0, %arg2 : i32, i32
  }
  func.func @transform_1(%arg0: i32, %arg1: i32, %arg2: i32) -> (i32, i32) {
    %c0_i32 = arith.constant 0 : i32
    return %arg2, %arg1 : i32, i32
  }
  func.func @transform_2(%arg0: i32, %arg1: i32, %arg2: i32) -> (i32, i32) {
    %c0_i32 = arith.constant 0 : i32
    %c0_i32_0 = arith.constant 0 : i32
    return %c0_i32, %arg1 : i32, i32
  }
  func.func @transform_3(%arg0: i32, %arg1: i32, %arg2: i32) -> (i32, i32) {
    %c0_i32 = arith.constant 0 : i32
    return %arg0, %arg1 : i32, i32
  }
}

module attributes {stable_mosaic.version = 11 : i64} {
  func.func @_matmul_kernel(%arg0: i32, %arg1: i32, %arg2: i32, %arg3: memref<78x128xbf16, #tpu.memory_space<vmem>>, %arg4: memref<128x128xbf16, #tpu.memory_space<vmem>>, %arg5: memref<1x128xf32, #tpu.memory_space<vmem>>, %arg6: memref<78x128xbf16, #tpu.memory_space<vmem>>, %arg7: memref<78x128xf32, #tpu.memory_space<vmem>>) attributes {dimension_semantics = [#tpu.dimension_semantics<parallel>, #tpu.dimension_semantics<parallel>, #tpu.dimension_semantics<arbitrary>], iteration_bounds = array<i64: 1, 1, 1>, scalar_prefetch = 0 : i64, scratch_operands = 1 : i64, tpu.core_type = #tpu.core_type<tc>, window_params = [{transform_indices = @transform_0, window_bounds = array<i64: 78, 128>}, {transform_indices = @transform_1, window_bounds = array<i64: 128, 128>}, {transform_indices = @transform_2, window_bounds = array<i64: 1, 128>}, {transform_indices = @transform_3, window_bounds = array<i64: 78, 128>}]} {
    %c0_i32 = arith.constant 0 : i32
    %0 = arith.cmpi eq, %arg2, %c0_i32 : i32
    %1 = arith.extui %0 : i1 to i32
    %c0_i32_0 = arith.constant 0 : i32
    %2 = arith.cmpi ne, %1, %c0_i32_0 : i32
    scf.if %2 {
      %cst_10 = arith.constant 0.000000e+00 : f32
      %12 = vector.broadcast %cst_10 : f32 to vector<78x128xf32>
      %c0_11 = arith.constant 0 : index
      %c0_12 = arith.constant 0 : index
      %13 = vector.load %arg7[%c0_11, %c0_12] : memref<78x128xf32, #tpu.memory_space<vmem>>, vector<78x128xf32>
      tpu.vector_store %arg7[%c0_11, %c0_12], %12 {strides = array<i32>} : memref<78x128xf32, #tpu.memory_space<vmem>>, vector<78x128xf32>,
    } else {
    }
    %c0 = arith.constant 0 : index
    %c0_1 = arith.constant 0 : index
    %3 = vector.load %arg7[%c0, %c0_1] : memref<78x128xf32, #tpu.memory_space<vmem>>, vector<78x128xf32>
    %c0_2 = arith.constant 0 : index
    %c0_3 = arith.constant 0 : index
    %4 = vector.load %arg3[%c0_2, %c0_3] : memref<78x128xbf16, #tpu.memory_space<vmem>>, vector<78x128xbf16>
    %c0_4 = arith.constant 0 : index
    %c0_5 = arith.constant 0 : index
    %5 = vector.load %arg4[%c0_4, %c0_5] : memref<128x128xbf16, #tpu.memory_space<vmem>>, vector<128x128xbf16>
    %cst = arith.constant dense<0.000000e+00> : vector<78x128xf32>
    %6 = tpu.matmul %4, %5, %cst {dimension_numbers = #tpu.dot_dimension_numbers<[1], [0], [0], [1], [0, 0, 1, 1], [], []>} : vector<78x128xbf16>, vector<128x128xbf16>, vector<78x128xf32> -> vector<78x128xf32>
    %7 = arith.addf %3, %6 : vector<78x128xf32>
    %c0_6 = arith.constant 0 : index
    %c0_7 = arith.constant 0 : index
    %8 = vector.load %arg7[%c0_6, %c0_7] : memref<78x128xf32, #tpu.memory_space<vmem>>, vector<78x128xf32>
    tpu.vector_store %arg7[%c0_6, %c0_7], %7 {strides = array<i32>} : memref<78x128xf32, #tpu.memory_space<vmem>>, vector<78x128xf32>,
    %c0_i32_8 = arith.constant 0 : i32
    %9 = arith.cmpi eq, %arg2, %c0_i32_8 : i32
    %10 = arith.extui %9 : i1 to i32
    %c0_i32_9 = arith.constant 0 : i32
    %11 = arith.cmpi ne, %10, %c0_i32_9 : i32
    scf.if %11 {
      %c0_10 = arith.constant 0 : index
      %c0_11 = arith.constant 0 : index
      %12 = vector.load %arg7[%c0_10, %c0_11] : memref<78x128xf32, #tpu.memory_space<vmem>>, vector<78x128xf32>
      %c0_12 = arith.constant 0 : index
      %c0_13 = arith.constant 0 : index
      %13 = vector.load %arg5[%c0_12, %c0_13] : memref<1x128xf32, #tpu.memory_space<vmem>>, vector<1x128xf32>
      %14 = vector.broadcast %13 : vector<1x128xf32> to vector<78x128xf32>
      %15 = arith.addf %12, %14 : vector<78x128xf32>
      %16 = arith.truncf %15 : vector<78x128xf32> to vector<78x128xbf16>
      %c0_14 = arith.constant 0 : index
      %c0_15 = arith.constant 0 : index
      %17 = vector.load %arg6[%c0_14, %c0_15] : memref<78x128xbf16, #tpu.memory_space<vmem>>, vector<78x128xbf16>
      tpu.vector_store %arg6[%c0_14, %c0_15], %16 {strides = array<i32>} : memref<78x128xbf16, #tpu.memory_space<vmem>>, vector<78x128xbf16>,
    } else {
    }
    return
  }
  func.func @transform_0(%arg0: i32, %arg1: i32, %arg2: i32) -> (i32, i32) {
    %c0_i32 = arith.constant 0 : i32
    return %arg0, %arg2 : i32, i32
  }
  func.func @transform_1(%arg0: i32, %arg1: i32, %arg2: i32) -> (i32, i32) {
    %c0_i32 = arith.constant 0 : i32
    return %arg2, %arg1 : i32, i32
  }
  func.func @transform_2(%arg0: i32, %arg1: i32, %arg2: i32) -> (i32, i32) {
    %c0_i32 = arith.constant 0 : i32
    %c0_i32_0 = arith.constant 0 : i32
    return %c0_i32, %arg1 : i32, i32
  }
  func.func @transform_3(%arg0: i32, %arg1: i32, %arg2: i32) -> (i32, i32) {
    %c0_i32 = arith.constant 0 : i32
    return %arg0, %arg1 : i32, i32
  }
}

module attributes {stable_mosaic.version = 11 : i64} {
  func.func @_matmul_kernel(%arg0: i32, %arg1: i32, %arg2: i32, %arg3: memref<78x512xbf16, #tpu.memory_space<vmem>>, %arg4: memref<512x128xbf16, #tpu.memory_space<vmem>>, %arg5: memref<1x128xf32, #tpu.memory_space<vmem>>, %arg6: memref<78x128xbf16, #tpu.memory_space<vmem>>, %arg7: memref<78x128xf32, #tpu.memory_space<vmem>>) attributes {dimension_semantics = [#tpu.dimension_semantics<parallel>, #tpu.dimension_semantics<parallel>, #tpu.dimension_semantics<arbitrary>], iteration_bounds = array<i64: 1, 1, 2>, scalar_prefetch = 0 : i64, scratch_operands = 1 : i64, tpu.core_type = #tpu.core_type<tc>, window_params = [{transform_indices = @transform_0, window_bounds = array<i64: 78, 512>}, {transform_indices = @transform_1, window_bounds = array<i64: 512, 128>}, {transform_indices = @transform_2, window_bounds = array<i64: 1, 128>}, {transform_indices = @transform_3, window_bounds = array<i64: 78, 128>}]} {
    %c0_i32 = arith.constant 0 : i32
    %0 = arith.cmpi eq, %arg2, %c0_i32 : i32
    %1 = arith.extui %0 : i1 to i32
    %c0_i32_0 = arith.constant 0 : i32
    %2 = arith.cmpi ne, %1, %c0_i32_0 : i32
    scf.if %2 {
      %cst_9 = arith.constant 0.000000e+00 : f32
      %12 = vector.broadcast %cst_9 : f32 to vector<78x128xf32>
      %c0_10 = arith.constant 0 : index
      %c0_11 = arith.constant 0 : index
      %13 = vector.load %arg7[%c0_10, %c0_11] : memref<78x128xf32, #tpu.memory_space<vmem>>, vector<78x128xf32>
      tpu.vector_store %arg7[%c0_10, %c0_11], %12 {strides = array<i32>} : memref<78x128xf32, #tpu.memory_space<vmem>>, vector<78x128xf32>,
    } else {
    }
    %c0 = arith.constant 0 : index
    %c0_1 = arith.constant 0 : index
    %3 = vector.load %arg7[%c0, %c0_1] : memref<78x128xf32, #tpu.memory_space<vmem>>, vector<78x128xf32>
    %c0_2 = arith.constant 0 : index
    %c0_3 = arith.constant 0 : index
    %4 = vector.load %arg3[%c0_2, %c0_3] : memref<78x512xbf16, #tpu.memory_space<vmem>>, vector<78x512xbf16>
    %c0_4 = arith.constant 0 : index
    %c0_5 = arith.constant 0 : index
    %5 = vector.load %arg4[%c0_4, %c0_5] : memref<512x128xbf16, #tpu.memory_space<vmem>>, vector<512x128xbf16>
    %cst = arith.constant dense<0.000000e+00> : vector<78x128xf32>
    %6 = tpu.matmul %4, %5, %cst {dimension_numbers = #tpu.dot_dimension_numbers<[1], [0], [0], [1], [0, 0, 1, 1], [], []>} : vector<78x512xbf16>, vector<512x128xbf16>, vector<78x128xf32> -> vector<78x128xf32>
    %7 = arith.addf %3, %6 : vector<78x128xf32>
    %c0_6 = arith.constant 0 : index
    %c0_7 = arith.constant 0 : index
    %8 = vector.load %arg7[%c0_6, %c0_7] : memref<78x128xf32, #tpu.memory_space<vmem>>, vector<78x128xf32>
    tpu.vector_store %arg7[%c0_6, %c0_7], %7 {strides = array<i32>} : memref<78x128xf32, #tpu.memory_space<vmem>>, vector<78x128xf32>,
    %c1_i32 = arith.constant 1 : i32
    %9 = arith.cmpi eq, %arg2, %c1_i32 : i32
    %10 = arith.extui %9 : i1 to i32
    %c0_i32_8 = arith.constant 0 : i32
    %11 = arith.cmpi ne, %10, %c0_i32_8 : i32
    scf.if %11 {
      %c0_9 = arith.constant 0 : index
      %c0_10 = arith.constant 0 : index
      %12 = vector.load %arg7[%c0_9, %c0_10] : memref<78x128xf32, #tpu.memory_space<vmem>>, vector<78x128xf32>
      %c0_11 = arith.constant 0 : index
      %c0_12 = arith.constant 0 : index
      %13 = vector.load %arg5[%c0_11, %c0_12] : memref<1x128xf32, #tpu.memory_space<vmem>>, vector<1x128xf32>
      %14 = vector.broadcast %13 : vector<1x128xf32> to vector<78x128xf32>
      %15 = arith.addf %12, %14 : vector<78x128xf32>
      %16 = arith.mulf %15, %15 : vector<78x128xf32>
      %17 = arith.mulf %15, %16 : vector<78x128xf32>
      %cst_13 = arith.constant 4.471500e-02 : f32
      %18 = vector.broadcast %cst_13 : f32 to vector<78x128xf32>
      %19 = arith.mulf %18, %17 : vector<78x128xf32>
      %20 = arith.addf %15, %19 : vector<78x128xf32>
      %cst_14 = arith.constant 0.797884583 : f32
      %21 = vector.broadcast %cst_14 : f32 to vector<78x128xf32>
      %22 = arith.mulf %21, %20 : vector<78x128xf32>
      %23 = math.tanh %22 : vector<78x128xf32>
      %cst_15 = arith.constant 1.000000e+00 : f32
      %24 = vector.broadcast %cst_15 : f32 to vector<78x128xf32>
      %25 = arith.addf %24, %23 : vector<78x128xf32>
      %cst_16 = arith.constant 5.000000e-01 : f32
      %26 = vector.broadcast %cst_16 : f32 to vector<78x128xf32>
      %27 = arith.mulf %26, %25 : vector<78x128xf32>
      %28 = arith.mulf %15, %27 : vector<78x128xf32>
      %29 = arith.truncf %28 : vector<78x128xf32> to vector<78x128xbf16>
      %c0_17 = arith.constant 0 : index
      %c0_18 = arith.constant 0 : index
      %30 = vector.load %arg6[%c0_17, %c0_18] : memref<78x128xbf16, #tpu.memory_space<vmem>>, vector<78x128xbf16>
      tpu.vector_store %arg6[%c0_17, %c0_18], %29 {strides = array<i32>} : memref<78x128xbf16, #tpu.memory_space<vmem>>, vector<78x128xbf16>,
    } else {
    }
    return
  }
  func.func @transform_0(%arg0: i32, %arg1: i32, %arg2: i32) -> (i32, i32) {
    %c0_i32 = arith.constant 0 : i32
    return %arg0, %arg2 : i32, i32
  }
  func.func @transform_1(%arg0: i32, %arg1: i32, %arg2: i32) -> (i32, i32) {
    %c0_i32 = arith.constant 0 : i32
    return %arg2, %arg1 : i32, i32
  }
  func.func @transform_2(%arg0: i32, %arg1: i32, %arg2: i32) -> (i32, i32) {
    %c0_i32 = arith.constant 0 : i32
    %c0_i32_0 = arith.constant 0 : i32
    return %c0_i32, %arg1 : i32, i32
  }
  func.func @transform_3(%arg0: i32, %arg1: i32, %arg2: i32) -> (i32, i32) {
    %c0_i32 = arith.constant 0 : i32
    return %arg0, %arg1 : i32, i32
  }
}

module attributes {stable_mosaic.version = 11 : i64} {
  func.func @_row_ln_kernel(%arg0: i32, %arg1: memref<78x128xbf16, #tpu.memory_space<vmem>>, %arg2: memref<1x128xf32, #tpu.memory_space<vmem>>, %arg3: memref<1x128xf32, #tpu.memory_space<vmem>>, %arg4: memref<78x128xbf16, #tpu.memory_space<vmem>>, %arg5: memref<78x128xbf16, #tpu.memory_space<vmem>>) attributes {dimension_semantics = [#tpu.dimension_semantics<parallel>], iteration_bounds = array<i64: 1>, scalar_prefetch = 0 : i64, scratch_operands = 0 : i64, tpu.core_type = #tpu.core_type<tc>, window_params = [{transform_indices = @transform_0, window_bounds = array<i64: 78, 128>}, {pipeline_mode = #tpu.pipeline_mode<synchronous>, transform_indices = @transform_1, window_bounds = array<i64: 1, 128>}, {pipeline_mode = #tpu.pipeline_mode<synchronous>, transform_indices = @transform_2, window_bounds = array<i64: 1, 128>}, {transform_indices = @transform_3, window_bounds = array<i64: 78, 128>}, {transform_indices = @transform_4, window_bounds = array<i64: 78, 128>}]} {
    %c0 = arith.constant 0 : index
    %c0_0 = arith.constant 0 : index
    %0 = vector.load %arg1[%c0, %c0_0] : memref<78x128xbf16, #tpu.memory_space<vmem>>, vector<78x128xbf16>
    %1 = arith.extf %0 : vector<78x128xbf16> to vector<78x128xf32>
    %c0_1 = arith.constant 0 : index
    %c0_2 = arith.constant 0 : index
    %2 = vector.load %arg4[%c0_1, %c0_2] : memref<78x128xbf16, #tpu.memory_space<vmem>>, vector<78x128xbf16>
    %3 = arith.extf %2 : vector<78x128xbf16> to vector<78x128xf32>
    %4 = arith.addf %1, %3 : vector<78x128xf32>
    %cst = arith.constant dense<0.000000e+00> : vector<78xf32>
    %5 = vector.multi_reduction <add>, %4, %cst [1] : vector<78x128xf32> to vector<78xf32>
    %6 = vector.shape_cast %5 : vector<78xf32> to vector<78x1xf32>
    %cst_3 = arith.constant 1.280000e+02 : f32
    %7 = vector.broadcast %cst_3 : f32 to vector<78x1xf32>
    %8 = arith.divf %6, %7 : vector<78x1xf32>
    %9 = vector.broadcast %8 : vector<78x1xf32> to vector<78x128xf32>
    %10 = arith.subf %4, %9 : vector<78x128xf32>
    %11 = arith.mulf %10, %10 : vector<78x128xf32>
    %cst_4 = arith.constant dense<0.000000e+00> : vector<78xf32>
    %12 = vector.multi_reduction <add>, %11, %cst_4 [1] : vector<78x128xf32> to vector<78xf32>
    %13 = vector.shape_cast %12 : vector<78xf32> to vector<78x1xf32>
    %cst_5 = arith.constant 1.280000e+02 : f32
    %14 = vector.broadcast %cst_5 : f32 to vector<78x1xf32>
    %15 = arith.divf %13, %14 : vector<78x1xf32>
    %16 = vector.broadcast %8 : vector<78x1xf32> to vector<78x128xf32>
    %17 = arith.subf %4, %16 : vector<78x128xf32>
    %cst_6 = arith.constant 9.99999974E-6 : f32
    %18 = vector.broadcast %cst_6 : f32 to vector<78x1xf32>
    %19 = arith.addf %15, %18 : vector<78x1xf32>
    %20 = math.rsqrt %19 : vector<78x1xf32>
    %21 = vector.broadcast %20 : vector<78x1xf32> to vector<78x128xf32>
    %22 = arith.mulf %17, %21 : vector<78x128xf32>
    %c0_7 = arith.constant 0 : index
    %c0_8 = arith.constant 0 : index
    %23 = vector.load %arg2[%c0_7, %c0_8] : memref<1x128xf32, #tpu.memory_space<vmem>>, vector<1x128xf32>
    %24 = vector.broadcast %23 : vector<1x128xf32> to vector<78x128xf32>
    %25 = arith.mulf %22, %24 : vector<78x128xf32>
    %c0_9 = arith.constant 0 : index
    %c0_10 = arith.constant 0 : index
    %26 = vector.load %arg3[%c0_9, %c0_10] : memref<1x128xf32, #tpu.memory_space<vmem>>, vector<1x128xf32>
    %27 = vector.broadcast %26 : vector<1x128xf32> to vector<78x128xf32>
    %28 = arith.addf %25, %27 : vector<78x128xf32>
    %29 = arith.truncf %28 : vector<78x128xf32> to vector<78x128xbf16>
    %c0_11 = arith.constant 0 : index
    %c0_12 = arith.constant 0 : index
    %30 = vector.load %arg5[%c0_11, %c0_12] : memref<78x128xbf16, #tpu.memory_space<vmem>>, vector<78x128xbf16>
    tpu.vector_store %arg5[%c0_11, %c0_12], %29 {strides = array<i32>} : memref<78x128xbf16, #tpu.memory_space<vmem>>, vector<78x128xbf16>,
    return
  }
  func.func @transform_0(%arg0: i32) -> (i32, i32) {
    %c0_i32 = arith.constant 0 : i32
    %c0_i32_0 = arith.constant 0 : i32
    return %arg0, %c0_i32 : i32, i32
  }
  func.func @transform_1(%arg0: i32) -> (i32, i32) {
    %c0_i32 = arith.constant 0 : i32
    %c0_i32_0 = arith.constant 0 : i32
    %c0_i32_1 = arith.constant 0 : i32
    return %c0_i32, %c0_i32_0 : i32, i32
  }
  func.func @transform_2(%arg0: i32) -> (i32, i32) {
    %c0_i32 = arith.constant 0 : i32
    %c0_i32_0 = arith.constant 0 : i32
    %c0_i32_1 = arith.constant 0 : i32
    return %c0_i32, %c0_i32_0 : i32, i32
  }
  func.func @transform_3(%arg0: i32) -> (i32, i32) {
    %c0_i32 = arith.constant 0 : i32
    %c0_i32_0 = arith.constant 0 : i32
    return %arg0, %c0_i32 : i32, i32
  }
  func.func @transform_4(%arg0: i32) -> (i32, i32) {
    %c0_i32 = arith.constant 0 : i32
    %c0_i32_0 = arith.constant 0 : i32
    return %arg0, %c0_i32 : i32, i32
  }
}

module attributes {stable_mosaic.version = 11 : i64} {
  func.func @_matmul_kernel(%arg0: i32, %arg1: i32, %arg2: i32, %arg3: memref<78x128xbf16, #tpu.memory_space<vmem>>, %arg4: memref<128x128xbf16, #tpu.memory_space<vmem>>, %arg5: memref<1x128xf32, #tpu.memory_space<vmem>>, %arg6: memref<78x128xbf16, #tpu.memory_space<vmem>>, %arg7: memref<78x128xf32, #tpu.memory_space<vmem>>) attributes {dimension_semantics = [#tpu.dimension_semantics<parallel>, #tpu.dimension_semantics<parallel>, #tpu.dimension_semantics<arbitrary>], iteration_bounds = array<i64: 1, 3, 1>, scalar_prefetch = 0 : i64, scratch_operands = 1 : i64, tpu.core_type = #tpu.core_type<tc>, window_params = [{transform_indices = @transform_0, window_bounds = array<i64: 78, 128>}, {transform_indices = @transform_1, window_bounds = array<i64: 128, 128>}, {transform_indices = @transform_2, window_bounds = array<i64: 1, 128>}, {transform_indices = @transform_3, window_bounds = array<i64: 78, 128>}]} {
    %c0_i32 = arith.constant 0 : i32
    %0 = arith.cmpi eq, %arg2, %c0_i32 : i32
    %1 = arith.extui %0 : i1 to i32
    %c0_i32_0 = arith.constant 0 : i32
    %2 = arith.cmpi ne, %1, %c0_i32_0 : i32
    scf.if %2 {
      %cst_10 = arith.constant 0.000000e+00 : f32
      %12 = vector.broadcast %cst_10 : f32 to vector<78x128xf32>
      %c0_11 = arith.constant 0 : index
      %c0_12 = arith.constant 0 : index
      %13 = vector.load %arg7[%c0_11, %c0_12] : memref<78x128xf32, #tpu.memory_space<vmem>>, vector<78x128xf32>
      tpu.vector_store %arg7[%c0_11, %c0_12], %12 {strides = array<i32>} : memref<78x128xf32, #tpu.memory_space<vmem>>, vector<78x128xf32>,
    } else {
    }
    %c0 = arith.constant 0 : index
    %c0_1 = arith.constant 0 : index
    %3 = vector.load %arg7[%c0, %c0_1] : memref<78x128xf32, #tpu.memory_space<vmem>>, vector<78x128xf32>
    %c0_2 = arith.constant 0 : index
    %c0_3 = arith.constant 0 : index
    %4 = vector.load %arg3[%c0_2, %c0_3] : memref<78x128xbf16, #tpu.memory_space<vmem>>, vector<78x128xbf16>
    %c0_4 = arith.constant 0 : index
    %c0_5 = arith.constant 0 : index
    %5 = vector.load %arg4[%c0_4, %c0_5] : memref<128x128xbf16, #tpu.memory_space<vmem>>, vector<128x128xbf16>
    %cst = arith.constant dense<0.000000e+00> : vector<78x128xf32>
    %6 = tpu.matmul %4, %5, %cst {dimension_numbers = #tpu.dot_dimension_numbers<[1], [0], [0], [1], [0, 0, 1, 1], [], []>} : vector<78x128xbf16>, vector<128x128xbf16>, vector<78x128xf32> -> vector<78x128xf32>
    %7 = arith.addf %3, %6 : vector<78x128xf32>
    %c0_6 = arith.constant 0 : index
    %c0_7 = arith.constant 0 : index
    %8 = vector.load %arg7[%c0_6, %c0_7] : memref<78x128xf32, #tpu.memory_space<vmem>>, vector<78x128xf32>
    tpu.vector_store %arg7[%c0_6, %c0_7], %7 {strides = array<i32>} : memref<78x128xf32, #tpu.memory_space<vmem>>, vector<78x128xf32>,
    %c0_i32_8 = arith.constant 0 : i32
    %9 = arith.cmpi eq, %arg2, %c0_i32_8 : i32
    %10 = arith.extui %9 : i1 to i32
    %c0_i32_9 = arith.constant 0 : i32
    %11 = arith.cmpi ne, %10, %c0_i32_9 : i32
    scf.if %11 {
      %c0_10 = arith.constant 0 : index
      %c0_11 = arith.constant 0 : index
      %12 = vector.load %arg7[%c0_10, %c0_11] : memref<78x128xf32, #tpu.memory_space<vmem>>, vector<78x128xf32>
      %c0_12 = arith.constant 0 : index
      %c0_13 = arith.constant 0 : index
      %13 = vector.load %arg5[%c0_12, %c0_13] : memref<1x128xf32, #tpu.memory_space<vmem>>, vector<1x128xf32>
      %14 = vector.broadcast %13 : vector<1x128xf32> to vector<78x128xf32>
      %15 = arith.addf %12, %14 : vector<78x128xf32>
      %16 = arith.truncf %15 : vector<78x128xf32> to vector<78x128xbf16>
      %c0_14 = arith.constant 0 : index
      %c0_15 = arith.constant 0 : index
      %17 = vector.load %arg6[%c0_14, %c0_15] : memref<78x128xbf16, #tpu.memory_space<vmem>>, vector<78x128xbf16>
      tpu.vector_store %arg6[%c0_14, %c0_15], %16 {strides = array<i32>} : memref<78x128xbf16, #tpu.memory_space<vmem>>, vector<78x128xbf16>,
    } else {
    }
    return
  }
  func.func @transform_0(%arg0: i32, %arg1: i32, %arg2: i32) -> (i32, i32) {
    %c0_i32 = arith.constant 0 : i32
    return %arg0, %arg2 : i32, i32
  }
  func.func @transform_1(%arg0: i32, %arg1: i32, %arg2: i32) -> (i32, i32) {
    %c0_i32 = arith.constant 0 : i32
    return %arg2, %arg1 : i32, i32
  }
  func.func @transform_2(%arg0: i32, %arg1: i32, %arg2: i32) -> (i32, i32) {
    %c0_i32 = arith.constant 0 : i32
    %c0_i32_0 = arith.constant 0 : i32
    return %c0_i32, %arg1 : i32, i32
  }
  func.func @transform_3(%arg0: i32, %arg1: i32, %arg2: i32) -> (i32, i32) {
    %c0_i32 = arith.constant 0 : i32
    return %arg0, %arg1 : i32, i32
  }
}

module attributes {stable_mosaic.version = 11 : i64} {
  func.func @_flash_attn_kernel(%arg0: i32, %arg1: i32, %arg2: i32, %arg3: memref<1x39x128xbf16, #tpu.memory_space<vmem>>, %arg4: memref<1x39x128xbf16, #tpu.memory_space<vmem>>, %arg5: memref<1x39x128xbf16, #tpu.memory_space<vmem>>, %arg6: memref<1x39x128xbf16, #tpu.memory_space<vmem>>, %arg7: memref<4x39x1xf32, #tpu.memory_space<vmem>>, %arg8: memref<4x39x1xf32, #tpu.memory_space<vmem>>, %arg9: memref<4x39x32xf32, #tpu.memory_space<vmem>>) attributes {dimension_semantics = [#tpu.dimension_semantics<parallel>, #tpu.dimension_semantics<parallel>, #tpu.dimension_semantics<arbitrary>], iteration_bounds = array<i64: 2, 1, 1>, scalar_prefetch = 0 : i64, scratch_operands = 3 : i64, tpu.core_type = #tpu.core_type<tc>, window_params = [{transform_indices = @transform_0, window_bounds = array<i64: 1, 39, 128>}, {transform_indices = @transform_1, window_bounds = array<i64: 1, 39, 128>}, {transform_indices = @transform_2, window_bounds = array<i64: 1, 39, 128>}, {transform_indices = @transform_3, window_bounds = array<i64: 1, 39, 128>}]} {
    %c0_i32 = arith.constant 0 : i32
    %0 = arith.cmpi eq, %arg2, %c0_i32 : i32
    %1 = arith.extui %0 : i1 to i32
    %c0_i32_0 = arith.constant 0 : i32
    %2 = arith.cmpi ne, %1, %c0_i32_0 : i32
    scf.if %2 {
      %cst_99 = arith.constant -1.000000e+30 : f32
      %164 = vector.broadcast %cst_99 : f32 to vector<4x39x1xf32>
      %c0_100 = arith.constant 0 : index
      %c0_101 = arith.constant 0 : index
      %c0_102 = arith.constant 0 : index
      %165 = vector.load %arg7[%c0_100, %c0_101, %c0_102] : memref<4x39x1xf32, #tpu.memory_space<vmem>>, vector<4x39x1xf32>
      tpu.vector_store %arg7[%c0_100, %c0_101, %c0_102], %164 {strides = array<i32>} : memref<4x39x1xf32, #tpu.memory_space<vmem>>, vector<4x39x1xf32>,
      %cst_103 = arith.constant 0.000000e+00 : f32
      %166 = vector.broadcast %cst_103 : f32 to vector<4x39x1xf32>
      %c0_104 = arith.constant 0 : index
      %c0_105 = arith.constant 0 : index
      %c0_106 = arith.constant 0 : index
      %167 = vector.load %arg8[%c0_104, %c0_105, %c0_106] : memref<4x39x1xf32, #tpu.memory_space<vmem>>, vector<4x39x1xf32>
      tpu.vector_store %arg8[%c0_104, %c0_105, %c0_106], %166 {strides = array<i32>} : memref<4x39x1xf32, #tpu.memory_space<vmem>>, vector<4x39x1xf32>,
      %cst_107 = arith.constant 0.000000e+00 : f32
      %168 = vector.broadcast %cst_107 : f32 to vector<4x39x32xf32>
      %c0_108 = arith.constant 0 : index
      %c0_109 = arith.constant 0 : index
      %c0_110 = arith.constant 0 : index
      %169 = vector.load %arg9[%c0_108, %c0_109, %c0_110] : memref<4x39x32xf32, #tpu.memory_space<vmem>>, vector<4x39x32xf32>
      tpu.vector_store %arg9[%c0_108, %c0_109, %c0_110], %168 {strides = array<i32>} : memref<4x39x32xf32, #tpu.memory_space<vmem>>, vector<4x39x32xf32>,
    } else {
    }
    %c0 = arith.constant 0 : index
    %c0_1 = arith.constant 0 : index
    %c0_2 = arith.constant 0 : index
    %3 = vector.load %arg3[%c0, %c0_1, %c0_2] : memref<1x39x128xbf16, #tpu.memory_space<vmem>>, vector<1x39x128xbf16>
    %4 = vector.shape_cast %3 : vector<1x39x128xbf16> to vector<39x128xbf16>
    %c0_3 = arith.constant 0 : index
    %c0_4 = arith.constant 0 : index
    %c0_5 = arith.constant 0 : index
    %5 = vector.load %arg4[%c0_3, %c0_4, %c0_5] : memref<1x39x128xbf16, #tpu.memory_space<vmem>>, vector<1x39x128xbf16>
    %6 = vector.shape_cast %5 : vector<1x39x128xbf16> to vector<39x128xbf16>
    %c0_6 = arith.constant 0 : index
    %c0_7 = arith.constant 0 : index
    %c0_8 = arith.constant 0 : index
    %7 = vector.load %arg5[%c0_6, %c0_7, %c0_8] : memref<1x39x128xbf16, #tpu.memory_space<vmem>>, vector<1x39x128xbf16>
    %8 = vector.shape_cast %7 : vector<1x39x128xbf16> to vector<39x128xbf16>
    %9 = vector.extract_strided_slice %4 {offsets = [0, 0], sizes = [39, 32], strides = [1, 1]} : vector<39x128xbf16> to vector<39x32xbf16>
    %10 = vector.extract_strided_slice %6 {offsets = [0, 0], sizes = [39, 32], strides = [1, 1]} : vector<39x128xbf16> to vector<39x32xbf16>
    %11 = vector.extract_strided_slice %8 {offsets = [0, 0], sizes = [39, 32], strides = [1, 1]} : vector<39x128xbf16> to vector<39x32xbf16>
    %cst = arith.constant dense<0.000000e+00> : vector<39x39xf32>
    %12 = tpu.matmul %9, %10, %cst {dimension_numbers = #tpu.dot_dimension_numbers<[1], [1], [0], [0], [0, 0, 1, 0], [], []>} : vector<39x32xbf16>, vector<39x32xbf16>, vector<39x39xf32> -> vector<39x39xf32>
    %cst_9 = arith.constant 0.176776692 : f32
    %13 = vector.broadcast %cst_9 : f32 to vector<39x39xf32>
    %14 = arith.mulf %12, %13 : vector<39x39xf32>
    %c0_10 = arith.constant 0 : index
    %c0_11 = arith.constant 0 : index
    %c0_12 = arith.constant 0 : index
    %15 = vector.load %arg7[%c0_10, %c0_11, %c0_12] : memref<4x39x1xf32, #tpu.memory_space<vmem>>, vector<1x39x1xf32>
    %16 = vector.shape_cast %15 : vector<1x39x1xf32> to vector<39x1xf32>
    %cst_13 = arith.constant dense<0xFF800000> : vector<39xf32>
    %17 = vector.multi_reduction <maximumf>, %14, %cst_13 [1] : vector<39x39xf32> to vector<39xf32>
    %18 = vector.shape_cast %17 : vector<39xf32> to vector<39x1xf32>
    %19 = arith.maximumf %16, %18 : vector<39x1xf32>
    %20 = arith.subf %16, %19 : vector<39x1xf32>
    %21 = math.exp %20 : vector<39x1xf32>
    %22 = vector.broadcast %19 : vector<39x1xf32> to vector<39x39xf32>
    %23 = arith.subf %14, %22 : vector<39x39xf32>
    %24 = math.exp %23 : vector<39x39xf32>
    %c0_14 = arith.constant 0 : index
    %c0_15 = arith.constant 0 : index
    %c0_16 = arith.constant 0 : index
    %25 = vector.load %arg8[%c0_14, %c0_15, %c0_16] : memref<4x39x1xf32, #tpu.memory_space<vmem>>, vector<1x39x1xf32>
    %26 = vector.shape_cast %25 : vector<1x39x1xf32> to vector<39x1xf32>
    %27 = arith.mulf %21, %26 : vector<39x1xf32>
    %cst_17 = arith.constant dense<0.000000e+00> : vector<39xf32>
    %28 = vector.multi_reduction <add>, %24, %cst_17 [1] : vector<39x39xf32> to vector<39xf32>
    %29 = vector.shape_cast %28 : vector<39xf32> to vector<39x1xf32>
    %30 = arith.addf %27, %29 : vector<39x1xf32>
    %c0_18 = arith.constant 0 : index
    %c0_19 = arith.constant 0 : index
    %c0_20 = arith.constant 0 : index
    %31 = vector.load %arg8[%c0_18, %c0_19, %c0_20] : memref<4x39x1xf32, #tpu.memory_space<vmem>>, vector<1x39x1xf32>
    %32 = vector.shape_cast %31 : vector<1x39x1xf32> to vector<39x1xf32>
    %33 = vector.shape_cast %30 : vector<39x1xf32> to vector<1x39x1xf32>
    tpu.vector_store %arg8[%c0_18, %c0_19, %c0_20], %33 {strides = array<i32>} : memref<4x39x1xf32, #tpu.memory_space<vmem>>, vector<1x39x1xf32>,
    %c0_21 = arith.constant 0 : index
    %c0_22 = arith.constant 0 : index
    %c0_23 = arith.constant 0 : index
    %34 = vector.load %arg9[%c0_21, %c0_22, %c0_23] : memref<4x39x32xf32, #tpu.memory_space<vmem>>, vector<1x39x32xf32>
    %35 = vector.shape_cast %34 : vector<1x39x32xf32> to vector<39x32xf32>
    %36 = vector.broadcast %21 : vector<39x1xf32> to vector<39x32xf32>
    %37 = arith.mulf %36, %35 : vector<39x32xf32>
    %38 = arith.truncf %24 : vector<39x39xf32> to vector<39x39xbf16>
    %cst_24 = arith.constant dense<0.000000e+00> : vector<39x32xf32>
    %39 = tpu.matmul %38, %11, %cst_24 {dimension_numbers = #tpu.dot_dimension_numbers<[1], [0], [0], [1], [0, 0, 1, 1], [], []>} : vector<39x39xbf16>, vector<39x32xbf16>, vector<39x32xf32> -> vector<39x32xf32>
    %40 = arith.addf %37, %39 : vector<39x32xf32>
    %c0_25 = arith.constant 0 : index
    %c0_26 = arith.constant 0 : index
    %c0_27 = arith.constant 0 : index
    %41 = vector.load %arg9[%c0_25, %c0_26, %c0_27] : memref<4x39x32xf32, #tpu.memory_space<vmem>>, vector<1x39x32xf32>
    %42 = vector.shape_cast %41 : vector<1x39x32xf32> to vector<39x32xf32>
    %43 = vector.shape_cast %40 : vector<39x32xf32> to vector<1x39x32xf32>
    tpu.vector_store %arg9[%c0_25, %c0_26, %c0_27], %43 {strides = array<i32>} : memref<4x39x32xf32, #tpu.memory_space<vmem>>, vector<1x39x32xf32>,
    %c0_28 = arith.constant 0 : index
    %c0_29 = arith.constant 0 : index
    %c0_30 = arith.constant 0 : index
    %44 = vector.load %arg7[%c0_28, %c0_29, %c0_30] : memref<4x39x1xf32, #tpu.memory_space<vmem>>, vector<1x39x1xf32>
    %45 = vector.shape_cast %44 : vector<1x39x1xf32> to vector<39x1xf32>
    %46 = vector.shape_cast %19 : vector<39x1xf32> to vector<1x39x1xf32>
    tpu.vector_store %arg7[%c0_28, %c0_29, %c0_30], %46 {strides = array<i32>} : memref<4x39x1xf32, #tpu.memory_space<vmem>>, vector<1x39x1xf32>,
    %47 = vector.extract_strided_slice %4 {offsets = [0, 32], sizes = [39, 32], strides = [1, 1]} : vector<39x128xbf16> to vector<39x32xbf16>
    %48 = vector.extract_strided_slice %6 {offsets = [0, 32], sizes = [39, 32], strides = [1, 1]} : vector<39x128xbf16> to vector<39x32xbf16>
    %49 = vector.extract_strided_slice %8 {offsets = [0, 32], sizes = [39, 32], strides = [1, 1]} : vector<39x128xbf16> to vector<39x32xbf16>
    %cst_31 = arith.constant dense<0.000000e+00> : vector<39x39xf32>
    %50 = tpu.matmul %47, %48, %cst_31 {dimension_numbers = #tpu.dot_dimension_numbers<[1], [1], [0], [0], [0, 0, 1, 0], [], []>} : vector<39x32xbf16>, vector<39x32xbf16>, vector<39x39xf32> -> vector<39x39xf32>
    %cst_32 = arith.constant 0.176776692 : f32
    %51 = vector.broadcast %cst_32 : f32 to vector<39x39xf32>
    %52 = arith.mulf %50, %51 : vector<39x39xf32>
    %c1 = arith.constant 1 : index
    %c0_33 = arith.constant 0 : index
    %c0_34 = arith.constant 0 : index
    %53 = vector.load %arg7[%c1, %c0_33, %c0_34] : memref<4x39x1xf32, #tpu.memory_space<vmem>>, vector<1x39x1xf32>
    %54 = vector.shape_cast %53 : vector<1x39x1xf32> to vector<39x1xf32>
    %cst_35 = arith.constant dense<0xFF800000> : vector<39xf32>
    %55 = vector.multi_reduction <maximumf>, %52, %cst_35 [1] : vector<39x39xf32> to vector<39xf32>
    %56 = vector.shape_cast %55 : vector<39xf32> to vector<39x1xf32>
    %57 = arith.maximumf %54, %56 : vector<39x1xf32>
    %58 = arith.subf %54, %57 : vector<39x1xf32>
    %59 = math.exp %58 : vector<39x1xf32>
    %60 = vector.broadcast %57 : vector<39x1xf32> to vector<39x39xf32>
    %61 = arith.subf %52, %60 : vector<39x39xf32>
    %62 = math.exp %61 : vector<39x39xf32>
    %c1_36 = arith.constant 1 : index
    %c0_37 = arith.constant 0 : index
    %c0_38 = arith.constant 0 : index
    %63 = vector.load %arg8[%c1_36, %c0_37, %c0_38] : memref<4x39x1xf32, #tpu.memory_space<vmem>>, vector<1x39x1xf32>
    %64 = vector.shape_cast %63 : vector<1x39x1xf32> to vector<39x1xf32>
    %65 = arith.mulf %59, %64 : vector<39x1xf32>
    %cst_39 = arith.constant dense<0.000000e+00> : vector<39xf32>
    %66 = vector.multi_reduction <add>, %62, %cst_39 [1] : vector<39x39xf32> to vector<39xf32>
    %67 = vector.shape_cast %66 : vector<39xf32> to vector<39x1xf32>
    %68 = arith.addf %65, %67 : vector<39x1xf32>
    %c1_40 = arith.constant 1 : index
    %c0_41 = arith.constant 0 : index
    %c0_42 = arith.constant 0 : index
    %69 = vector.load %arg8[%c1_40, %c0_41, %c0_42] : memref<4x39x1xf32, #tpu.memory_space<vmem>>, vector<1x39x1xf32>
    %70 = vector.shape_cast %69 : vector<1x39x1xf32> to vector<39x1xf32>
    %71 = vector.shape_cast %68 : vector<39x1xf32> to vector<1x39x1xf32>
    tpu.vector_store %arg8[%c1_40, %c0_41, %c0_42], %71 {strides = array<i32>} : memref<4x39x1xf32, #tpu.memory_space<vmem>>, vector<1x39x1xf32>,
    %c1_43 = arith.constant 1 : index
    %c0_44 = arith.constant 0 : index
    %c0_45 = arith.constant 0 : index
    %72 = vector.load %arg9[%c1_43, %c0_44, %c0_45] : memref<4x39x32xf32, #tpu.memory_space<vmem>>, vector<1x39x32xf32>
    %73 = vector.shape_cast %72 : vector<1x39x32xf32> to vector<39x32xf32>
    %74 = vector.broadcast %59 : vector<39x1xf32> to vector<39x32xf32>
    %75 = arith.mulf %74, %73 : vector<39x32xf32>
    %76 = arith.truncf %62 : vector<39x39xf32> to vector<39x39xbf16>
    %cst_46 = arith.constant dense<0.000000e+00> : vector<39x32xf32>
    %77 = tpu.matmul %76, %49, %cst_46 {dimension_numbers = #tpu.dot_dimension_numbers<[1], [0], [0], [1], [0, 0, 1, 1], [], []>} : vector<39x39xbf16>, vector<39x32xbf16>, vector<39x32xf32> -> vector<39x32xf32>
    %78 = arith.addf %75, %77 : vector<39x32xf32>
    %c1_47 = arith.constant 1 : index
    %c0_48 = arith.constant 0 : index
    %c0_49 = arith.constant 0 : index
    %79 = vector.load %arg9[%c1_47, %c0_48, %c0_49] : memref<4x39x32xf32, #tpu.memory_space<vmem>>, vector<1x39x32xf32>
    %80 = vector.shape_cast %79 : vector<1x39x32xf32> to vector<39x32xf32>
    %81 = vector.shape_cast %78 : vector<39x32xf32> to vector<1x39x32xf32>
    tpu.vector_store %arg9[%c1_47, %c0_48, %c0_49], %81 {strides = array<i32>} : memref<4x39x32xf32, #tpu.memory_space<vmem>>, vector<1x39x32xf32>,
    %c1_50 = arith.constant 1 : index
    %c0_51 = arith.constant 0 : index
    %c0_52 = arith.constant 0 : index
    %82 = vector.load %arg7[%c1_50, %c0_51, %c0_52] : memref<4x39x1xf32, #tpu.memory_space<vmem>>, vector<1x39x1xf32>
    %83 = vector.shape_cast %82 : vector<1x39x1xf32> to vector<39x1xf32>
    %84 = vector.shape_cast %57 : vector<39x1xf32> to vector<1x39x1xf32>
    tpu.vector_store %arg7[%c1_50, %c0_51, %c0_52], %84 {strides = array<i32>} : memref<4x39x1xf32, #tpu.memory_space<vmem>>, vector<1x39x1xf32>,
    %85 = vector.extract_strided_slice %4 {offsets = [0, 64], sizes = [39, 32], strides = [1, 1]} : vector<39x128xbf16> to vector<39x32xbf16>
    %86 = vector.extract_strided_slice %6 {offsets = [0, 64], sizes = [39, 32], strides = [1, 1]} : vector<39x128xbf16> to vector<39x32xbf16>
    %87 = vector.extract_strided_slice %8 {offsets = [0, 64], sizes = [39, 32], strides = [1, 1]} : vector<39x128xbf16> to vector<39x32xbf16>
    %cst_53 = arith.constant dense<0.000000e+00> : vector<39x39xf32>
    %88 = tpu.matmul %85, %86, %cst_53 {dimension_numbers = #tpu.dot_dimension_numbers<[1], [1], [0], [0], [0, 0, 1, 0], [], []>} : vector<39x32xbf16>, vector<39x32xbf16>, vector<39x39xf32> -> vector<39x39xf32>
    %cst_54 = arith.constant 0.176776692 : f32
    %89 = vector.broadcast %cst_54 : f32 to vector<39x39xf32>
    %90 = arith.mulf %88, %89 : vector<39x39xf32>
    %c2 = arith.constant 2 : index
    %c0_55 = arith.constant 0 : index
    %c0_56 = arith.constant 0 : index
    %91 = vector.load %arg7[%c2, %c0_55, %c0_56] : memref<4x39x1xf32, #tpu.memory_space<vmem>>, vector<1x39x1xf32>
    %92 = vector.shape_cast %91 : vector<1x39x1xf32> to vector<39x1xf32>
    %cst_57 = arith.constant dense<0xFF800000> : vector<39xf32>
    %93 = vector.multi_reduction <maximumf>, %90, %cst_57 [1] : vector<39x39xf32> to vector<39xf32>
    %94 = vector.shape_cast %93 : vector<39xf32> to vector<39x1xf32>
    %95 = arith.maximumf %92, %94 : vector<39x1xf32>
    %96 = arith.subf %92, %95 : vector<39x1xf32>
    %97 = math.exp %96 : vector<39x1xf32>
    %98 = vector.broadcast %95 : vector<39x1xf32> to vector<39x39xf32>
    %99 = arith.subf %90, %98 : vector<39x39xf32>
    %100 = math.exp %99 : vector<39x39xf32>
    %c2_58 = arith.constant 2 : index
    %c0_59 = arith.constant 0 : index
    %c0_60 = arith.constant 0 : index
    %101 = vector.load %arg8[%c2_58, %c0_59, %c0_60] : memref<4x39x1xf32, #tpu.memory_space<vmem>>, vector<1x39x1xf32>
    %102 = vector.shape_cast %101 : vector<1x39x1xf32> to vector<39x1xf32>
    %103 = arith.mulf %97, %102 : vector<39x1xf32>
    %cst_61 = arith.constant dense<0.000000e+00> : vector<39xf32>
    %104 = vector.multi_reduction <add>, %100, %cst_61 [1] : vector<39x39xf32> to vector<39xf32>
    %105 = vector.shape_cast %104 : vector<39xf32> to vector<39x1xf32>
    %106 = arith.addf %103, %105 : vector<39x1xf32>
    %c2_62 = arith.constant 2 : index
    %c0_63 = arith.constant 0 : index
    %c0_64 = arith.constant 0 : index
    %107 = vector.load %arg8[%c2_62, %c0_63, %c0_64] : memref<4x39x1xf32, #tpu.memory_space<vmem>>, vector<1x39x1xf32>
    %108 = vector.shape_cast %107 : vector<1x39x1xf32> to vector<39x1xf32>
    %109 = vector.shape_cast %106 : vector<39x1xf32> to vector<1x39x1xf32>
    tpu.vector_store %arg8[%c2_62, %c0_63, %c0_64], %109 {strides = array<i32>} : memref<4x39x1xf32, #tpu.memory_space<vmem>>, vector<1x39x1xf32>,
    %c2_65 = arith.constant 2 : index
    %c0_66 = arith.constant 0 : index
    %c0_67 = arith.constant 0 : index
    %110 = vector.load %arg9[%c2_65, %c0_66, %c0_67] : memref<4x39x32xf32, #tpu.memory_space<vmem>>, vector<1x39x32xf32>
    %111 = vector.shape_cast %110 : vector<1x39x32xf32> to vector<39x32xf32>
    %112 = vector.broadcast %97 : vector<39x1xf32> to vector<39x32xf32>
    %113 = arith.mulf %112, %111 : vector<39x32xf32>
    %114 = arith.truncf %100 : vector<39x39xf32> to vector<39x39xbf16>
    %cst_68 = arith.constant dense<0.000000e+00> : vector<39x32xf32>
    %115 = tpu.matmul %114, %87, %cst_68 {dimension_numbers = #tpu.dot_dimension_numbers<[1], [0], [0], [1], [0, 0, 1, 1], [], []>} : vector<39x39xbf16>, vector<39x32xbf16>, vector<39x32xf32> -> vector<39x32xf32>
    %116 = arith.addf %113, %115 : vector<39x32xf32>
    %c2_69 = arith.constant 2 : index
    %c0_70 = arith.constant 0 : index
    %c0_71 = arith.constant 0 : index
    %117 = vector.load %arg9[%c2_69, %c0_70, %c0_71] : memref<4x39x32xf32, #tpu.memory_space<vmem>>, vector<1x39x32xf32>
    %118 = vector.shape_cast %117 : vector<1x39x32xf32> to vector<39x32xf32>
    %119 = vector.shape_cast %116 : vector<39x32xf32> to vector<1x39x32xf32>
    tpu.vector_store %arg9[%c2_69, %c0_70, %c0_71], %119 {strides = array<i32>} : memref<4x39x32xf32, #tpu.memory_space<vmem>>, vector<1x39x32xf32>,
    %c2_72 = arith.constant 2 : index
    %c0_73 = arith.constant 0 : index
    %c0_74 = arith.constant 0 : index
    %120 = vector.load %arg7[%c2_72, %c0_73, %c0_74] : memref<4x39x1xf32, #tpu.memory_space<vmem>>, vector<1x39x1xf32>
    %121 = vector.shape_cast %120 : vector<1x39x1xf32> to vector<39x1xf32>
    %122 = vector.shape_cast %95 : vector<39x1xf32> to vector<1x39x1xf32>
    tpu.vector_store %arg7[%c2_72, %c0_73, %c0_74], %122 {strides = array<i32>} : memref<4x39x1xf32, #tpu.memory_space<vmem>>, vector<1x39x1xf32>,
    %123 = vector.extract_strided_slice %4 {offsets = [0, 96], sizes = [39, 32], strides = [1, 1]} : vector<39x128xbf16> to vector<39x32xbf16>
    %124 = vector.extract_strided_slice %6 {offsets = [0, 96], sizes = [39, 32], strides = [1, 1]} : vector<39x128xbf16> to vector<39x32xbf16>
    %125 = vector.extract_strided_slice %8 {offsets = [0, 96], sizes = [39, 32], strides = [1, 1]} : vector<39x128xbf16> to vector<39x32xbf16>
    %cst_75 = arith.constant dense<0.000000e+00> : vector<39x39xf32>
    %126 = tpu.matmul %123, %124, %cst_75 {dimension_numbers = #tpu.dot_dimension_numbers<[1], [1], [0], [0], [0, 0, 1, 0], [], []>} : vector<39x32xbf16>, vector<39x32xbf16>, vector<39x39xf32> -> vector<39x39xf32>
    %cst_76 = arith.constant 0.176776692 : f32
    %127 = vector.broadcast %cst_76 : f32 to vector<39x39xf32>
    %128 = arith.mulf %126, %127 : vector<39x39xf32>
    %c3 = arith.constant 3 : index
    %c0_77 = arith.constant 0 : index
    %c0_78 = arith.constant 0 : index
    %129 = vector.load %arg7[%c3, %c0_77, %c0_78] : memref<4x39x1xf32, #tpu.memory_space<vmem>>, vector<1x39x1xf32>
    %130 = vector.shape_cast %129 : vector<1x39x1xf32> to vector<39x1xf32>
    %cst_79 = arith.constant dense<0xFF800000> : vector<39xf32>
    %131 = vector.multi_reduction <maximumf>, %128, %cst_79 [1] : vector<39x39xf32> to vector<39xf32>
    %132 = vector.shape_cast %131 : vector<39xf32> to vector<39x1xf32>
    %133 = arith.maximumf %130, %132 : vector<39x1xf32>
    %134 = arith.subf %130, %133 : vector<39x1xf32>
    %135 = math.exp %134 : vector<39x1xf32>
    %136 = vector.broadcast %133 : vector<39x1xf32> to vector<39x39xf32>
    %137 = arith.subf %128, %136 : vector<39x39xf32>
    %138 = math.exp %137 : vector<39x39xf32>
    %c3_80 = arith.constant 3 : index
    %c0_81 = arith.constant 0 : index
    %c0_82 = arith.constant 0 : index
    %139 = vector.load %arg8[%c3_80, %c0_81, %c0_82] : memref<4x39x1xf32, #tpu.memory_space<vmem>>, vector<1x39x1xf32>
    %140 = vector.shape_cast %139 : vector<1x39x1xf32> to vector<39x1xf32>
    %141 = arith.mulf %135, %140 : vector<39x1xf32>
    %cst_83 = arith.constant dense<0.000000e+00> : vector<39xf32>
    %142 = vector.multi_reduction <add>, %138, %cst_83 [1] : vector<39x39xf32> to vector<39xf32>
    %143 = vector.shape_cast %142 : vector<39xf32> to vector<39x1xf32>
    %144 = arith.addf %141, %143 : vector<39x1xf32>
    %c3_84 = arith.constant 3 : index
    %c0_85 = arith.constant 0 : index
    %c0_86 = arith.constant 0 : index
    %145 = vector.load %arg8[%c3_84, %c0_85, %c0_86] : memref<4x39x1xf32, #tpu.memory_space<vmem>>, vector<1x39x1xf32>
    %146 = vector.shape_cast %145 : vector<1x39x1xf32> to vector<39x1xf32>
    %147 = vector.shape_cast %144 : vector<39x1xf32> to vector<1x39x1xf32>
    tpu.vector_store %arg8[%c3_84, %c0_85, %c0_86], %147 {strides = array<i32>} : memref<4x39x1xf32, #tpu.memory_space<vmem>>, vector<1x39x1xf32>,
    %c3_87 = arith.constant 3 : index
    %c0_88 = arith.constant 0 : index
    %c0_89 = arith.constant 0 : index
    %148 = vector.load %arg9[%c3_87, %c0_88, %c0_89] : memref<4x39x32xf32, #tpu.memory_space<vmem>>, vector<1x39x32xf32>
    %149 = vector.shape_cast %148 : vector<1x39x32xf32> to vector<39x32xf32>
    %150 = vector.broadcast %135 : vector<39x1xf32> to vector<39x32xf32>
    %151 = arith.mulf %150, %149 : vector<39x32xf32>
    %152 = arith.truncf %138 : vector<39x39xf32> to vector<39x39xbf16>
    %cst_90 = arith.constant dense<0.000000e+00> : vector<39x32xf32>
    %153 = tpu.matmul %152, %125, %cst_90 {dimension_numbers = #tpu.dot_dimension_numbers<[1], [0], [0], [1], [0, 0, 1, 1], [], []>} : vector<39x39xbf16>, vector<39x32xbf16>, vector<39x32xf32> -> vector<39x32xf32>
    %154 = arith.addf %151, %153 : vector<39x32xf32>
    %c3_91 = arith.constant 3 : index
    %c0_92 = arith.constant 0 : index
    %c0_93 = arith.constant 0 : index
    %155 = vector.load %arg9[%c3_91, %c0_92, %c0_93] : memref<4x39x32xf32, #tpu.memory_space<vmem>>, vector<1x39x32xf32>
    %156 = vector.shape_cast %155 : vector<1x39x32xf32> to vector<39x32xf32>
    %157 = vector.shape_cast %154 : vector<39x32xf32> to vector<1x39x32xf32>
    tpu.vector_store %arg9[%c3_91, %c0_92, %c0_93], %157 {strides = array<i32>} : memref<4x39x32xf32, #tpu.memory_space<vmem>>, vector<1x39x32xf32>,
    %c3_94 = arith.constant 3 : index
    %c0_95 = arith.constant 0 : index
    %c0_96 = arith.constant 0 : index
    %158 = vector.load %arg7[%c3_94, %c0_95, %c0_96] : memref<4x39x1xf32, #tpu.memory_space<vmem>>, vector<1x39x1xf32>
    %159 = vector.shape_cast %158 : vector<1x39x1xf32> to vector<39x1xf32>
    %160 = vector.shape_cast %133 : vector<39x1xf32> to vector<1x39x1xf32>
    tpu.vector_store %arg7[%c3_94, %c0_95, %c0_96], %160 {strides = array<i32>} : memref<4x39x1xf32, #tpu.memory_space<vmem>>, vector<1x39x1xf32>,
    %c0_i32_97 = arith.constant 0 : i32
    %161 = arith.cmpi eq, %arg2, %c0_i32_97 : i32
    %162 = arith.extui %161 : i1 to i32
    %c0_i32_98 = arith.constant 0 : i32
    %163 = arith.cmpi ne, %162, %c0_i32_98 : i32
    scf.if %163 {
      %c0_99 = arith.constant 0 : index
      %c0_100 = arith.constant 0 : index
      %c0_101 = arith.constant 0 : index
      %164 = vector.load %arg9[%c0_99, %c0_100, %c0_101] : memref<4x39x32xf32, #tpu.memory_space<vmem>>, vector<1x39x32xf32>
      %165 = vector.shape_cast %164 : vector<1x39x32xf32> to vector<39x32xf32>
      %c0_102 = arith.constant 0 : index
      %c0_103 = arith.constant 0 : index
      %c0_104 = arith.constant 0 : index
      %166 = vector.load %arg8[%c0_102, %c0_103, %c0_104] : memref<4x39x1xf32, #tpu.memory_space<vmem>>, vector<1x39x1xf32>
      %167 = vector.shape_cast %166 : vector<1x39x1xf32> to vector<39x1xf32>
      %168 = tpu.reciprocal %167 {approx = true} : vector<39x1xf32> -> vector<39x1xf32>
      %169 = vector.broadcast %168 : vector<39x1xf32> to vector<39x32xf32>
      %170 = arith.mulf %165, %169 : vector<39x32xf32>
      %171 = arith.truncf %170 : vector<39x32xf32> to vector<39x32xbf16>
      %c0_105 = arith.constant 0 : index
      %c0_106 = arith.constant 0 : index
      %c0_107 = arith.constant 0 : index
      %172 = vector.load %arg6[%c0_105, %c0_106, %c0_107] : memref<1x39x128xbf16, #tpu.memory_space<vmem>>, vector<1x39x32xbf16>
      %173 = vector.shape_cast %172 : vector<1x39x32xbf16> to vector<39x32xbf16>
      %174 = vector.shape_cast %171 : vector<39x32xbf16> to vector<1x39x32xbf16>
      tpu.vector_store %arg6[%c0_105, %c0_106, %c0_107], %174 {strides = array<i32>} : memref<1x39x128xbf16, #tpu.memory_space<vmem>>, vector<1x39x32xbf16>,
      %c1_108 = arith.constant 1 : index
      %c0_109 = arith.constant 0 : index
      %c0_110 = arith.constant 0 : index
      %175 = vector.load %arg9[%c1_108, %c0_109, %c0_110] : memref<4x39x32xf32, #tpu.memory_space<vmem>>, vector<1x39x32xf32>
      %176 = vector.shape_cast %175 : vector<1x39x32xf32> to vector<39x32xf32>
      %c1_111 = arith.constant 1 : index
      %c0_112 = arith.constant 0 : index
      %c0_113 = arith.constant 0 : index
      %177 = vector.load %arg8[%c1_111, %c0_112, %c0_113] : memref<4x39x1xf32, #tpu.memory_space<vmem>>, vector<1x39x1xf32>
      %178 = vector.shape_cast %177 : vector<1x39x1xf32> to vector<39x1xf32>
      %179 = tpu.reciprocal %178 {approx = true} : vector<39x1xf32> -> vector<39x1xf32>
      %180 = vector.broadcast %179 : vector<39x1xf32> to vector<39x32xf32>
      %181 = arith.mulf %176, %180 : vector<39x32xf32>
      %182 = arith.truncf %181 : vector<39x32xf32> to vector<39x32xbf16>
      %c0_114 = arith.constant 0 : index
      %c0_115 = arith.constant 0 : index
      %c32 = arith.constant 32 : index
      %183 = vector.load %arg6[%c0_114, %c0_115, %c32] : memref<1x39x128xbf16, #tpu.memory_space<vmem>>, vector<1x39x32xbf16>
      %184 = vector.shape_cast %183 : vector<1x39x32xbf16> to vector<39x32xbf16>
      %185 = vector.shape_cast %182 : vector<39x32xbf16> to vector<1x39x32xbf16>
      tpu.vector_store %arg6[%c0_114, %c0_115, %c32], %185 {strides = array<i32>} : memref<1x39x128xbf16, #tpu.memory_space<vmem>>, vector<1x39x32xbf16>,
      %c2_116 = arith.constant 2 : index
      %c0_117 = arith.constant 0 : index
      %c0_118 = arith.constant 0 : index
      %186 = vector.load %arg9[%c2_116, %c0_117, %c0_118] : memref<4x39x32xf32, #tpu.memory_space<vmem>>, vector<1x39x32xf32>
      %187 = vector.shape_cast %186 : vector<1x39x32xf32> to vector<39x32xf32>
      %c2_119 = arith.constant 2 : index
      %c0_120 = arith.constant 0 : index
      %c0_121 = arith.constant 0 : index
      %188 = vector.load %arg8[%c2_119, %c0_120, %c0_121] : memref<4x39x1xf32, #tpu.memory_space<vmem>>, vector<1x39x1xf32>
      %189 = vector.shape_cast %188 : vector<1x39x1xf32> to vector<39x1xf32>
      %190 = tpu.reciprocal %189 {approx = true} : vector<39x1xf32> -> vector<39x1xf32>
      %191 = vector.broadcast %190 : vector<39x1xf32> to vector<39x32xf32>
      %192 = arith.mulf %187, %191 : vector<39x32xf32>
      %193 = arith.truncf %192 : vector<39x32xf32> to vector<39x32xbf16>
      %c0_122 = arith.constant 0 : index
      %c0_123 = arith.constant 0 : index
      %c64 = arith.constant 64 : index
      %194 = vector.load %arg6[%c0_122, %c0_123, %c64] : memref<1x39x128xbf16, #tpu.memory_space<vmem>>, vector<1x39x32xbf16>
      %195 = vector.shape_cast %194 : vector<1x39x32xbf16> to vector<39x32xbf16>
      %196 = vector.shape_cast %193 : vector<39x32xbf16> to vector<1x39x32xbf16>
      tpu.vector_store %arg6[%c0_122, %c0_123, %c64], %196 {strides = array<i32>} : memref<1x39x128xbf16, #tpu.memory_space<vmem>>, vector<1x39x32xbf16>,
      %c3_124 = arith.constant 3 : index
      %c0_125 = arith.constant 0 : index
      %c0_126 = arith.constant 0 : index
      %197 = vector.load %arg9[%c3_124, %c0_125, %c0_126] : memref<4x39x32xf32, #tpu.memory_space<vmem>>, vector<1x39x32xf32>
      %198 = vector.shape_cast %197 : vector<1x39x32xf32> to vector<39x32xf32>
      %c3_127 = arith.constant 3 : index
      %c0_128 = arith.constant 0 : index
      %c0_129 = arith.constant 0 : index
      %199 = vector.load %arg8[%c3_127, %c0_128, %c0_129] : memref<4x39x1xf32, #tpu.memory_space<vmem>>, vector<1x39x1xf32>
      %200 = vector.shape_cast %199 : vector<1x39x1xf32> to vector<39x1xf32>
      %201 = tpu.reciprocal %200 {approx = true} : vector<39x1xf32> -> vector<39x1xf32>
      %202 = vector.broadcast %201 : vector<39x1xf32> to vector<39x32xf32>
      %203 = arith.mulf %198, %202 : vector<39x32xf32>
      %204 = arith.truncf %203 : vector<39x32xf32> to vector<39x32xbf16>
      %c0_130 = arith.constant 0 : index
      %c0_131 = arith.constant 0 : index
      %c96 = arith.constant 96 : index
      %205 = vector.load %arg6[%c0_130, %c0_131, %c96] : memref<1x39x128xbf16, #tpu.memory_space<vmem>>, vector<1x39x32xbf16>
      %206 = vector.shape_cast %205 : vector<1x39x32xbf16> to vector<39x32xbf16>
      %207 = vector.shape_cast %204 : vector<39x32xbf16> to vector<1x39x32xbf16>
      tpu.vector_store %arg6[%c0_130, %c0_131, %c96], %207 {strides = array<i32>} : memref<1x39x128xbf16, #tpu.memory_space<vmem>>, vector<1x39x32xbf16>,
    } else {
    }
    return
  }
  func.func @transform_0(%arg0: i32, %arg1: i32, %arg2: i32) -> (i32, i32, i32) {
    %c0_i32 = arith.constant 0 : i32
    %c0_i32_0 = arith.constant 0 : i32
    return %arg0, %arg1, %c0_i32 : i32, i32, i32
  }
  func.func @transform_1(%arg0: i32, %arg1: i32, %arg2: i32) -> (i32, i32, i32) {
    %c1_i32 = arith.constant 1 : i32
    %c0_i32 = arith.constant 0 : i32
    return %arg0, %arg2, %c1_i32 : i32, i32, i32
  }
  func.func @transform_2(%arg0: i32, %arg1: i32, %arg2: i32) -> (i32, i32, i32) {
    %c2_i32 = arith.constant 2 : i32
    %c0_i32 = arith.constant 0 : i32
    return %arg0, %arg2, %c2_i32 : i32, i32, i32
  }
  func.func @transform_3(%arg0: i32, %arg1: i32, %arg2: i32) -> (i32, i32, i32) {
    %c0_i32 = arith.constant 0 : i32
    %c0_i32_0 = arith.constant 0 : i32
    return %arg0, %arg1, %c0_i32 : i32, i32, i32
  }
}

module attributes {stable_mosaic.version = 11 : i64} {
  func.func @_matmul_kernel(%arg0: i32, %arg1: i32, %arg2: i32, %arg3: memref<78x128xbf16, #tpu.memory_space<vmem>>, %arg4: memref<128x256xbf16, #tpu.memory_space<vmem>>, %arg5: memref<1x256xf32, #tpu.memory_space<vmem>>, %arg6: memref<78x256xbf16, #tpu.memory_space<vmem>>, %arg7: memref<78x256xf32, #tpu.memory_space<vmem>>) attributes {dimension_semantics = [#tpu.dimension_semantics<parallel>, #tpu.dimension_semantics<parallel>, #tpu.dimension_semantics<arbitrary>], iteration_bounds = array<i64: 1, 1, 1>, scalar_prefetch = 0 : i64, scratch_operands = 1 : i64, tpu.core_type = #tpu.core_type<tc>, window_params = [{transform_indices = @transform_0, window_bounds = array<i64: 78, 128>}, {transform_indices = @transform_1, window_bounds = array<i64: 128, 256>}, {transform_indices = @transform_2, window_bounds = array<i64: 1, 256>}, {transform_indices = @transform_3, window_bounds = array<i64: 78, 256>}]} {
    %c0_i32 = arith.constant 0 : i32
    %0 = arith.cmpi eq, %arg2, %c0_i32 : i32
    %1 = arith.extui %0 : i1 to i32
    %c0_i32_0 = arith.constant 0 : i32
    %2 = arith.cmpi ne, %1, %c0_i32_0 : i32
    scf.if %2 {
      %cst_10 = arith.constant 0.000000e+00 : f32
      %12 = vector.broadcast %cst_10 : f32 to vector<78x256xf32>
      %c0_11 = arith.constant 0 : index
      %c0_12 = arith.constant 0 : index
      %13 = vector.load %arg7[%c0_11, %c0_12] : memref<78x256xf32, #tpu.memory_space<vmem>>, vector<78x256xf32>
      tpu.vector_store %arg7[%c0_11, %c0_12], %12 {strides = array<i32>} : memref<78x256xf32, #tpu.memory_space<vmem>>, vector<78x256xf32>,
    } else {
    }
    %c0 = arith.constant 0 : index
    %c0_1 = arith.constant 0 : index
    %3 = vector.load %arg7[%c0, %c0_1] : memref<78x256xf32, #tpu.memory_space<vmem>>, vector<78x256xf32>
    %c0_2 = arith.constant 0 : index
    %c0_3 = arith.constant 0 : index
    %4 = vector.load %arg3[%c0_2, %c0_3] : memref<78x128xbf16, #tpu.memory_space<vmem>>, vector<78x128xbf16>
    %c0_4 = arith.constant 0 : index
    %c0_5 = arith.constant 0 : index
    %5 = vector.load %arg4[%c0_4, %c0_5] : memref<128x256xbf16, #tpu.memory_space<vmem>>, vector<128x256xbf16>
    %cst = arith.constant dense<0.000000e+00> : vector<78x256xf32>
    %6 = tpu.matmul %4, %5, %cst {dimension_numbers = #tpu.dot_dimension_numbers<[1], [0], [0], [1], [0, 0, 1, 1], [], []>} : vector<78x128xbf16>, vector<128x256xbf16>, vector<78x256xf32> -> vector<78x256xf32>
    %7 = arith.addf %3, %6 : vector<78x256xf32>
    %c0_6 = arith.constant 0 : index
    %c0_7 = arith.constant 0 : index
    %8 = vector.load %arg7[%c0_6, %c0_7] : memref<78x256xf32, #tpu.memory_space<vmem>>, vector<78x256xf32>
    tpu.vector_store %arg7[%c0_6, %c0_7], %7 {strides = array<i32>} : memref<78x256xf32, #tpu.memory_space<vmem>>, vector<78x256xf32>,
    %c0_i32_8 = arith.constant 0 : i32
    %9 = arith.cmpi eq, %arg2, %c0_i32_8 : i32
    %10 = arith.extui %9 : i1 to i32
    %c0_i32_9 = arith.constant 0 : i32
    %11 = arith.cmpi ne, %10, %c0_i32_9 : i32
    scf.if %11 {
      %c0_10 = arith.constant 0 : index
      %c0_11 = arith.constant 0 : index
      %12 = vector.load %arg7[%c0_10, %c0_11] : memref<78x256xf32, #tpu.memory_space<vmem>>, vector<78x256xf32>
      %c0_12 = arith.constant 0 : index
      %c0_13 = arith.constant 0 : index
      %13 = vector.load %arg5[%c0_12, %c0_13] : memref<1x256xf32, #tpu.memory_space<vmem>>, vector<1x256xf32>
      %14 = vector.broadcast %13 : vector<1x256xf32> to vector<78x256xf32>
      %15 = arith.addf %12, %14 : vector<78x256xf32>
      %16 = arith.mulf %15, %15 : vector<78x256xf32>
      %17 = arith.mulf %15, %16 : vector<78x256xf32>
      %cst_14 = arith.constant 4.471500e-02 : f32
      %18 = vector.broadcast %cst_14 : f32 to vector<78x256xf32>
      %19 = arith.mulf %18, %17 : vector<78x256xf32>
      %20 = arith.addf %15, %19 : vector<78x256xf32>
      %cst_15 = arith.constant 0.797884583 : f32
      %21 = vector.broadcast %cst_15 : f32 to vector<78x256xf32>
      %22 = arith.mulf %21, %20 : vector<78x256xf32>
      %23 = math.tanh %22 : vector<78x256xf32>
      %cst_16 = arith.constant 1.000000e+00 : f32
      %24 = vector.broadcast %cst_16 : f32 to vector<78x256xf32>
      %25 = arith.addf %24, %23 : vector<78x256xf32>
      %cst_17 = arith.constant 5.000000e-01 : f32
      %26 = vector.broadcast %cst_17 : f32 to vector<78x256xf32>
      %27 = arith.mulf %26, %25 : vector<78x256xf32>
      %28 = arith.mulf %15, %27 : vector<78x256xf32>
      %29 = arith.truncf %28 : vector<78x256xf32> to vector<78x256xbf16>
      %c0_18 = arith.constant 0 : index
      %c0_19 = arith.constant 0 : index
      %30 = vector.load %arg6[%c0_18, %c0_19] : memref<78x256xbf16, #tpu.memory_space<vmem>>, vector<78x256xbf16>
      tpu.vector_store %arg6[%c0_18, %c0_19], %29 {strides = array<i32>} : memref<78x256xbf16, #tpu.memory_space<vmem>>, vector<78x256xbf16>,
    } else {
    }
    return
  }
  func.func @transform_0(%arg0: i32, %arg1: i32, %arg2: i32) -> (i32, i32) {
    %c0_i32 = arith.constant 0 : i32
    return %arg0, %arg2 : i32, i32
  }
  func.func @transform_1(%arg0: i32, %arg1: i32, %arg2: i32) -> (i32, i32) {
    %c0_i32 = arith.constant 0 : i32
    return %arg2, %arg1 : i32, i32
  }
  func.func @transform_2(%arg0: i32, %arg1: i32, %arg2: i32) -> (i32, i32) {
    %c0_i32 = arith.constant 0 : i32
    %c0_i32_0 = arith.constant 0 : i32
    return %c0_i32, %arg1 : i32, i32
  }
  func.func @transform_3(%arg0: i32, %arg1: i32, %arg2: i32) -> (i32, i32) {
    %c0_i32 = arith.constant 0 : i32
    return %arg0, %arg1 : i32, i32
  }
}

module attributes {stable_mosaic.version = 11 : i64} {
  func.func @_matmul_kernel(%arg0: i32, %arg1: i32, %arg2: i32, %arg3: memref<78x256xbf16, #tpu.memory_space<vmem>>, %arg4: memref<256x128xbf16, #tpu.memory_space<vmem>>, %arg5: memref<1x128xf32, #tpu.memory_space<vmem>>, %arg6: memref<78x128xbf16, #tpu.memory_space<vmem>>, %arg7: memref<78x128xf32, #tpu.memory_space<vmem>>) attributes {dimension_semantics = [#tpu.dimension_semantics<parallel>, #tpu.dimension_semantics<parallel>, #tpu.dimension_semantics<arbitrary>], iteration_bounds = array<i64: 1, 1, 1>, scalar_prefetch = 0 : i64, scratch_operands = 1 : i64, tpu.core_type = #tpu.core_type<tc>, window_params = [{transform_indices = @transform_0, window_bounds = array<i64: 78, 256>}, {transform_indices = @transform_1, window_bounds = array<i64: 256, 128>}, {transform_indices = @transform_2, window_bounds = array<i64: 1, 128>}, {transform_indices = @transform_3, window_bounds = array<i64: 78, 128>}]} {
    %c0_i32 = arith.constant 0 : i32
    %0 = arith.cmpi eq, %arg2, %c0_i32 : i32
    %1 = arith.extui %0 : i1 to i32
    %c0_i32_0 = arith.constant 0 : i32
    %2 = arith.cmpi ne, %1, %c0_i32_0 : i32
    scf.if %2 {
      %cst_10 = arith.constant 0.000000e+00 : f32
      %12 = vector.broadcast %cst_10 : f32 to vector<78x128xf32>
      %c0_11 = arith.constant 0 : index
      %c0_12 = arith.constant 0 : index
      %13 = vector.load %arg7[%c0_11, %c0_12] : memref<78x128xf32, #tpu.memory_space<vmem>>, vector<78x128xf32>
      tpu.vector_store %arg7[%c0_11, %c0_12], %12 {strides = array<i32>} : memref<78x128xf32, #tpu.memory_space<vmem>>, vector<78x128xf32>,
    } else {
    }
    %c0 = arith.constant 0 : index
    %c0_1 = arith.constant 0 : index
    %3 = vector.load %arg7[%c0, %c0_1] : memref<78x128xf32, #tpu.memory_space<vmem>>, vector<78x128xf32>
    %c0_2 = arith.constant 0 : index
    %c0_3 = arith.constant 0 : index
    %4 = vector.load %arg3[%c0_2, %c0_3] : memref<78x256xbf16, #tpu.memory_space<vmem>>, vector<78x256xbf16>
    %c0_4 = arith.constant 0 : index
    %c0_5 = arith.constant 0 : index
    %5 = vector.load %arg4[%c0_4, %c0_5] : memref<256x128xbf16, #tpu.memory_space<vmem>>, vector<256x128xbf16>
    %cst = arith.constant dense<0.000000e+00> : vector<78x128xf32>
    %6 = tpu.matmul %4, %5, %cst {dimension_numbers = #tpu.dot_dimension_numbers<[1], [0], [0], [1], [0, 0, 1, 1], [], []>} : vector<78x256xbf16>, vector<256x128xbf16>, vector<78x128xf32> -> vector<78x128xf32>
    %7 = arith.addf %3, %6 : vector<78x128xf32>
    %c0_6 = arith.constant 0 : index
    %c0_7 = arith.constant 0 : index
    %8 = vector.load %arg7[%c0_6, %c0_7] : memref<78x128xf32, #tpu.memory_space<vmem>>, vector<78x128xf32>
    tpu.vector_store %arg7[%c0_6, %c0_7], %7 {strides = array<i32>} : memref<78x128xf32, #tpu.memory_space<vmem>>, vector<78x128xf32>,
    %c0_i32_8 = arith.constant 0 : i32
    %9 = arith.cmpi eq, %arg2, %c0_i32_8 : i32
    %10 = arith.extui %9 : i1 to i32
    %c0_i32_9 = arith.constant 0 : i32
    %11 = arith.cmpi ne, %10, %c0_i32_9 : i32
    scf.if %11 {
      %c0_10 = arith.constant 0 : index
      %c0_11 = arith.constant 0 : index
      %12 = vector.load %arg7[%c0_10, %c0_11] : memref<78x128xf32, #tpu.memory_space<vmem>>, vector<78x128xf32>
      %c0_12 = arith.constant 0 : index
      %c0_13 = arith.constant 0 : index
      %13 = vector.load %arg5[%c0_12, %c0_13] : memref<1x128xf32, #tpu.memory_space<vmem>>, vector<1x128xf32>
      %14 = vector.broadcast %13 : vector<1x128xf32> to vector<78x128xf32>
      %15 = arith.addf %12, %14 : vector<78x128xf32>
      %16 = arith.truncf %15 : vector<78x128xf32> to vector<78x128xbf16>
      %c0_14 = arith.constant 0 : index
      %c0_15 = arith.constant 0 : index
      %17 = vector.load %arg6[%c0_14, %c0_15] : memref<78x128xbf16, #tpu.memory_space<vmem>>, vector<78x128xbf16>
      tpu.vector_store %arg6[%c0_14, %c0_15], %16 {strides = array<i32>} : memref<78x128xbf16, #tpu.memory_space<vmem>>, vector<78x128xbf16>,
    } else {
    }
    return
  }
  func.func @transform_0(%arg0: i32, %arg1: i32, %arg2: i32) -> (i32, i32) {
    %c0_i32 = arith.constant 0 : i32
    return %arg0, %arg2 : i32, i32
  }
  func.func @transform_1(%arg0: i32, %arg1: i32, %arg2: i32) -> (i32, i32) {
    %c0_i32 = arith.constant 0 : i32
    return %arg2, %arg1 : i32, i32
  }
  func.func @transform_2(%arg0: i32, %arg1: i32, %arg2: i32) -> (i32, i32) {
    %c0_i32 = arith.constant 0 : i32
    %c0_i32_0 = arith.constant 0 : i32
    return %c0_i32, %arg1 : i32, i32
  }
  func.func @transform_3(%arg0: i32, %arg1: i32, %arg2: i32) -> (i32, i32) {
    %c0_i32 = arith.constant 0 : i32
    return %arg0, %arg1 : i32, i32
  }
}

module attributes {stable_mosaic.version = 11 : i64} {
  func.func @_gln_stats_kernel(%arg0: i32, %arg1: i32, %arg2: memref<390x128xbf16, #tpu.memory_space<vmem>>, %arg3: memref<1x1x128xf32, #tpu.memory_space<vmem>>, %arg4: memref<1x1x128xf32, #tpu.memory_space<vmem>>) attributes {dimension_semantics = [#tpu.dimension_semantics<parallel>, #tpu.dimension_semantics<arbitrary>], iteration_bounds = array<i64: 1, 1>, scalar_prefetch = 0 : i64, scratch_operands = 0 : i64, tpu.core_type = #tpu.core_type<tc>, window_params = [{transform_indices = @transform_0, window_bounds = array<i64: 390, 128>}, {transform_indices = @transform_1, window_bounds = array<i64: 1, 1, 128>}, {transform_indices = @transform_2, window_bounds = array<i64: 1, 1, 128>}]} {
    %c0_i32 = arith.constant 0 : i32
    %0 = arith.cmpi eq, %arg1, %c0_i32 : i32
    %1 = arith.extui %0 : i1 to i32
    %c0_i32_0 = arith.constant 0 : i32
    %2 = arith.cmpi ne, %1, %c0_i32_0 : i32
    scf.if %2 {
      %cst_15 = arith.constant 0.000000e+00 : f32
      %22 = vector.broadcast %cst_15 : f32 to vector<1x1x128xf32>
      %c0_16 = arith.constant 0 : index
      %c0_17 = arith.constant 0 : index
      %c0_18 = arith.constant 0 : index
      %23 = vector.load %arg3[%c0_16, %c0_17, %c0_18] : memref<1x1x128xf32, #tpu.memory_space<vmem>>, vector<1x1x128xf32>
      tpu.vector_store %arg3[%c0_16, %c0_17, %c0_18], %22 {strides = array<i32>} : memref<1x1x128xf32, #tpu.memory_space<vmem>>, vector<1x1x128xf32>,
      %cst_19 = arith.constant 0.000000e+00 : f32
      %24 = vector.broadcast %cst_19 : f32 to vector<1x1x128xf32>
      %c0_20 = arith.constant 0 : index
      %c0_21 = arith.constant 0 : index
      %c0_22 = arith.constant 0 : index
      %25 = vector.load %arg4[%c0_20, %c0_21, %c0_22] : memref<1x1x128xf32, #tpu.memory_space<vmem>>, vector<1x1x128xf32>
      tpu.vector_store %arg4[%c0_20, %c0_21, %c0_22], %24 {strides = array<i32>} : memref<1x1x128xf32, #tpu.memory_space<vmem>>, vector<1x1x128xf32>,
    } else {
    }
    %c0 = arith.constant 0 : index
    %c0_1 = arith.constant 0 : index
    %3 = vector.load %arg2[%c0, %c0_1] : memref<390x128xbf16, #tpu.memory_space<vmem>>, vector<390x128xbf16>
    %4 = arith.extf %3 : vector<390x128xbf16> to vector<390x128xf32>
    %c0_2 = arith.constant 0 : index
    %c0_3 = arith.constant 0 : index
    %c0_4 = arith.constant 0 : index
    %5 = vector.load %arg3[%c0_2, %c0_3, %c0_4] : memref<1x1x128xf32, #tpu.memory_space<vmem>>, vector<1x1x128xf32>
    %6 = vector.shape_cast %4 : vector<390x128xf32> to vector<1x390x128xf32>
    %cst = arith.constant dense<0.000000e+00> : vector<1xf32>
    %7 = vector.multi_reduction <add>, %6, %cst [1, 2] : vector<1x390x128xf32> to vector<1xf32>
    %8 = vector.shape_cast %7 : vector<1xf32> to vector<1x1x1xf32>
    %9 = vector.extract %8[0, 0, 0] : f32 from vector<1x1x1xf32>
    %10 = vector.broadcast %9 : f32 to vector<1x1x128xf32>
    %11 = arith.addf %5, %10 : vector<1x1x128xf32>
    %c0_5 = arith.constant 0 : index
    %c0_6 = arith.constant 0 : index
    %c0_7 = arith.constant 0 : index
    %12 = vector.load %arg3[%c0_5, %c0_6, %c0_7] : memref<1x1x128xf32, #tpu.memory_space<vmem>>, vector<1x1x128xf32>
    tpu.vector_store %arg3[%c0_5, %c0_6, %c0_7], %11 {strides = array<i32>} : memref<1x1x128xf32, #tpu.memory_space<vmem>>, vector<1x1x128xf32>,
    %c0_8 = arith.constant 0 : index
    %c0_9 = arith.constant 0 : index
    %c0_10 = arith.constant 0 : index
    %13 = vector.load %arg4[%c0_8, %c0_9, %c0_10] : memref<1x1x128xf32, #tpu.memory_space<vmem>>, vector<1x1x128xf32>
    %14 = arith.mulf %4, %4 : vector<390x128xf32>
    %15 = vector.shape_cast %14 : vector<390x128xf32> to vector<1x390x128xf32>
    %cst_11 = arith.constant dense<0.000000e+00> : vector<1xf32>
    %16 = vector.multi_reduction <add>, %15, %cst_11 [1, 2] : vector<1x390x128xf32> to vector<1xf32>
    %17 = vector.shape_cast %16 : vector<1xf32> to vector<1x1x1xf32>
    %18 = vector.extract %17[0, 0, 0] : f32 from vector<1x1x1xf32>
    %19 = vector.broadcast %18 : f32 to vector<1x1x128xf32>
    %20 = arith.addf %13, %19 : vector<1x1x128xf32>
    %c0_12 = arith.constant 0 : index
    %c0_13 = arith.constant 0 : index
    %c0_14 = arith.constant 0 : index
    %21 = vector.load %arg4[%c0_12, %c0_13, %c0_14] : memref<1x1x128xf32, #tpu.memory_space<vmem>>, vector<1x1x128xf32>
    tpu.vector_store %arg4[%c0_12, %c0_13, %c0_14], %20 {strides = array<i32>} : memref<1x1x128xf32, #tpu.memory_space<vmem>>, vector<1x1x128xf32>,
    return
  }
  func.func @transform_0(%arg0: i32, %arg1: i32) -> (i32, i32) {
    %c0_i32 = arith.constant 0 : i32
    return %arg0, %arg1 : i32, i32
  }
  func.func @transform_1(%arg0: i32, %arg1: i32) -> (i32, i32, i32) {
    %c0_i32 = arith.constant 0 : i32
    %c0_i32_0 = arith.constant 0 : i32
    %c0_i32_1 = arith.constant 0 : i32
    return %arg0, %c0_i32, %c0_i32_0 : i32, i32, i32
  }
  func.func @transform_2(%arg0: i32, %arg1: i32) -> (i32, i32, i32) {
    %c0_i32 = arith.constant 0 : i32
    %c0_i32_0 = arith.constant 0 : i32
    %c0_i32_1 = arith.constant 0 : i32
    return %arg0, %c0_i32, %c0_i32_0 : i32, i32, i32
  }
}

module attributes {stable_mosaic.version = 11 : i64} {
  func.func @_gln_apply_kernel(%arg0: i32, %arg1: i32, %arg2: memref<390x128xbf16, #tpu.memory_space<vmem>>, %arg3: memref<2xf32, #tpu.memory_space<smem>>, %arg4: memref<390x128xf32, #tpu.memory_space<vmem>>) attributes {dimension_semantics = [#tpu.dimension_semantics<parallel>, #tpu.dimension_semantics<parallel>], iteration_bounds = array<i64: 1, 1>, scalar_prefetch = 0 : i64, scratch_operands = 0 : i64, tpu.core_type = #tpu.core_type<tc>, window_params = [{transform_indices = @transform_0, window_bounds = array<i64: 390, 128>}, {transform_indices = @transform_1, window_bounds = array<i64: 2>}, {transform_indices = @transform_2, window_bounds = array<i64: 390, 128>}]} {
    %c0 = arith.constant 0 : index
    %0 = memref.load %arg3[%c0] : memref<2xf32, #tpu.memory_space<smem>>
    %c1 = arith.constant 1 : index
    %1 = memref.load %arg3[%c1] : memref<2xf32, #tpu.memory_space<smem>>
    %c0_0 = arith.constant 0 : index
    %c0_1 = arith.constant 0 : index
    %2 = vector.load %arg2[%c0_0, %c0_1] : memref<390x128xbf16, #tpu.memory_space<vmem>>, vector<390x128xbf16>
    %3 = arith.extf %2 : vector<390x128xbf16> to vector<390x128xf32>
    %4 = vector.broadcast %0 : f32 to vector<390x128xf32>
    %5 = arith.subf %3, %4 : vector<390x128xf32>
    %6 = vector.broadcast %1 : f32 to vector<390x128xf32>
    %7 = arith.mulf %5, %6 : vector<390x128xf32>
    %c0_2 = arith.constant 0 : index
    %c0_3 = arith.constant 0 : index
    %8 = vector.load %arg4[%c0_2, %c0_3] : memref<390x128xf32, #tpu.memory_space<vmem>>, vector<390x128xf32>
    tpu.vector_store %arg4[%c0_2, %c0_3], %7 {strides = array<i32>} : memref<390x128xf32, #tpu.memory_space<vmem>>, vector<390x128xf32>,
    return
  }
  func.func @transform_0(%arg0: i32, %arg1: i32) -> (i32, i32) {
    %c0_i32 = arith.constant 0 : i32
    return %arg0, %arg1 : i32, i32
  }
  func.func @transform_1(%arg0: i32, %arg1: i32) -> i32 {
    %c0_i32 = arith.constant 0 : i32
    %c0_i32_0 = arith.constant 0 : i32
    return %c0_i32 : i32
  }
  func.func @transform_2(%arg0: i32, %arg1: i32) -> (i32, i32) {
    %c0_i32 = arith.constant 0 : i32
    return %arg0, %arg1 : i32, i32
  }
}

</mosaic_0001>

<bundles_post_ra>
// kernel: _lambda_.40
= control target key start
LH: loop header
LB: loop body
LE: loop exit
PB: predicated region body
PF: predicated region fallthrough
CT: control target
= control target key end

     0   :  { %v23_v0 = vlaneseq  ;;  %v119_v2 = vmov 1983009808   ;;  %vm40_vm0 = vcmask 1041408   ;;  %vm46_vm1 = vcmask 123904   ;;  %s163_s0 = inlined_call_operand.vmem [shape: f32[2,400], index: 0, kind: input, shape index: {}]   ;;  %s164_s1 = inlined_call_operand.vmem [shape: f32[1,1,128], index: 1, kind: output, shape index: {0}]   ;;  %s165_s2 = inlined_call_operand.vmem [shape: f32[1,1,128], index: 2, kind: output, shape index: {1}]  }
   0x1   :  { %v16_v1 = vld [vmem:[%s163_s0] sm:$0xff]  ;;  %v21_v3 = vunpack.c.l.s4 %v119_v2  ;;  %v120_v32 = vmov 0.0  }
   0x2   :  { %v24_v4 = vshrl.u32 %v23_v0, 7  ;;  %v62_v5 = vmul.f32 %v16_v1, %v16_v1  ;;  %v19_v6 = vcombine.high %v16_v1, %v16_v1  ;;  %14 = vst [vmem:[%s164_s1] sm:$0x1] %v120_v32  ;;  %15 = vst [vmem:[%s165_s2] sm:$0x1] %v120_v32 }
   0x3   :  { %v22_v7 = vunpack.c.0.s8 %v21_v3 }
   0x4   :  { %v64_v8 = vcombine.high %v62_v5, %v62_v5 }
   0x5   :  { %v25_v9 = vsub.s32 %v22_v7, %v24_v4 }
   0x7   :  { %v26_v10 = vrot.slane %v16_v1, %v25_v9  ;;  %v33_v11 = vrot.slane %v19_v6, %v25_v9  ;;  %v71_v12 = vrot.slane %v62_v5, %v25_v9  ;;  %v78_v13 = vrot.slane %v64_v8, %v25_v9 }
   0x9   :  { %v34_v14 = vcombine.high %v26_v10, %v26_v10  ;;  %v35_v15 = vcombine.high %v33_v11, %v33_v11  ;;  %v41_v16 = vsel %vm40_vm0, %v26_v10, 0.0  ;;  %v79_v17 = vcombine.high %v71_v12, %v71_v12  ;;  %v17_v47 = vld [vmem:[%s164_s1] sm:$0x1] }
   0xa   :  { %v85_v18 = vsel %vm40_vm0, %v71_v12, 0.0  ;;  %v44_v20 = vsel %vm40_vm0, %v33_v11, 0.0  ;;  %v80_v21 = vcombine.high %v78_v13, %v78_v13  ;;  %v88_v24 = vsel %vm40_vm0, %v78_v13, 0.0  ;;  %v61_v50 = vld [vmem:[%s165_s2] sm:$0x1] }
   0xb   :  { %v42_v19 = vsel %vm40_vm0, %v34_v14, 0.0  ;;  %v86_v23 = vsel %vm40_vm0, %v79_v17, 0.0  ;;  %v47_v25 = vsel %vm46_vm1, %v35_v15, 0.0 }
   0xc   :  { %v43_v22 = vadd.f32 %v42_v19, %v41_v16  ;;  %v87_v26 = vadd.f32 %v86_v23, %v85_v18  ;;  %v90_v29 = vsel %vm46_vm1, %v80_v21, 0.0 }
   0xe   :  { %v45_v27 = vadd.f32 %v44_v20, %v43_v22  ;;  %v89_v28 = vadd.f32 %v88_v24, %v87_v26 }
  0x10   :  { %v48_v30 = vadd.f32 %v47_v25, %v45_v27  ;;  %v91_v31 = vadd.f32 %v90_v29, %v89_v28 }
  0x12   :  { %49 = vadd.xlane.f32.xlu0 %v48_v30 }
  0x16   :  { %92 = vadd.xlane.f32.xlu0 %v91_v31 }
  0x9b   :  { %v50_v33 = vpop.xlane.xlu0 %49 }
  0x9c   :  { %v51_v34 = vrot.slane %v50_v33, 4 }
  0x9e   :  { %v52_v35 = vadd.f32 %v51_v34, %v50_v33 }
  0x9f   :  { %v93_v36 = vpop.xlane.xlu0 %92 }
  0xa0   :  { %v53_v37 = vrot.slane %v52_v35, 2  ;;  %v94_v38 = vrot.slane %v93_v36, 4 }
  0xa2   :  { %v95_v39 = vadd.f32 %v94_v38, %v93_v36  ;;  %v54_v40 = vadd.f32 %v53_v37, %v52_v35 }
  0xa4   :  { %v96_v41 = vrot.slane %v95_v39, 2  ;;  %v55_v42 = vrot.slane %v54_v40, 1 }
  0xa6   :  { %v97_v43 = vadd.f32 %v96_v41, %v95_v39  ;;  %v56_v44 = vadd.f32 %v55_v42, %v54_v40 }
  0xa8   :  { %112 = vpush %v56_v44  ;;  %v98_v45 = vrot.slane %v97_v43, 1 }
  0xaa   :  { %v99_v46 = vadd.f32 %v98_v45, %v97_v43 }
  0xac   :  { %114 = vpush %v99_v46 }
  0xd9   :  { %s113_s16 = spop %112 }
  0xda   :  { %v58_v48 = vstv %s113_s16 }
  0xdb   :  { %v59_v49 = vadd.f32 %v58_v48, %v17_v47 }
  0xdd   :  { %60 = vst [vmem:[%s164_s1] sm:$0x1] %v59_v49  ;;  %s115_s21 = spop %114 }
  0xde   :  { %v101_v51 = vstv %s115_s21 }
  0xdf   :  { %v102_v52 = vadd.f32 %v101_v51, %v61_v50 }
  0xe1   :  { %103 = vst [vmem:[%s165_s2] sm:$0x1] %v102_v52 }

// kernel: _lambda_.41
= control target key start
LH: loop header
LB: loop body
LE: loop exit
PB: predicated region body
PF: predicated region fallthrough
CT: control target
= control target key end

     0   :  { %7 = vsyncpa [#allocation3], 0  ;;  %s146_s0 = inlined_call_operand.vmem [shape: f32[2,400], index: 0, kind: input, shape index: {}]   ;;  %s147_s1 = inlined_call_operand.vmem [shape: f32[2], index: 1, kind: input, shape index: {}]   ;;  %s148_s2 = inlined_call_operand.vmem [shape: bf16[2,400], index: 2, kind: output, shape index: {}]  }
   0x1   :  { %s16_s11 = sshll.u32 %s147_s1, 4  ;;  %s17_s11 = int_to_ptr.vmem [resolvable:$true] %s16_s11 }
   0x2   :  { %s105_s12 = scalar_lea.vmem %s17_s11, 16  ;;  %p110_p1 = scmp.lt.s32.totalorder %s17_s11, %s17_s11 }
   0x3   :  { %p106_p0 = scmp.ne.s32.totalorder %s17_s11, %s105_s12  ;;  %p111_p2 = scmp.lt.s32.totalorder %s105_s12, %s105_s12 }
   0x5   :  { %p112_p3 = por %p111_p2, %p110_p1 }
   0x7   :  { %p113_p4 = pnand %p112_p3, %p106_p0 }
   0x9   :  { %116 = shalt.err (!%p113_p4)
}
   0xa   :  { %s119_s13 = smov [#allocation2]  }
   0xb   :  { %19 = dma.vmem_to_smem %s17_s11, 16, %s119_s13, [#allocation3]  }
   0xc   :  { %117 = dma.done.wait [#allocation3], 16  }
   0xd   :  { %118 = vsyncadd [#allocation3], 4294967280 }
   0xe   :  { %23 = sfence }
   0xf   :  { %s24_s14 = sld [smem:[#allocation2]]  ;;  %v36_v0 = vlaneseq  ;;  %v120_v1 = vmov 1983009808   ;;  %v26_v5 = vld [vmem:[%s146_s0] sm:$0xff]  ;;  %v121_v6 = vmov 1966171168  }
  0x10   :  { %s99_s15 = sld [smem:[#allocation2 + $0x1]]  ;;  %v34_v2 = vunpack.c.l.s4 %v120_v1  ;;  %v64_v7 = vunpack.c.l.s4 %v121_v6  ;;  %vm86_vm0 = vcmask 1040384   ;;  %vm87_vm1 = vcmask 1041409  }
  0x11   :  { %v37_v4 = vshrl.u32 %v36_v0, 7  ;;  %vm88_vm2 = vmor %vm87_vm1, %vm86_vm0  ;;  %vm89_vm3 = vcmask 1042434   ;;  %vm91_vm5 = vcmask 125955  }
  0x12   :  { %v35_v3 = vunpack.c.0.s8 %v34_v2  ;;  %v65_v13 = vunpack.c.0.s8 %v64_v7  ;;  %vm90_vm4 = vmor %vm89_vm3, %vm88_vm2 }
  0x13   :  { %vm92_vm6 = vmor %vm91_vm5, %vm90_vm4 }
  0x14   :  { %v38_v11 = vsub.s32 %v35_v3, %v37_v4  ;;  %v68_v18 = vsub.s32 %v65_v13, %v37_v4 }
  0x15   :  { %v27_v8 = vstv %s24_s14 }
  0x16   :  { %v28_v9 = vsub.f32 %v26_v5, %v27_v8  ;;  %v29_v10 = vstv %s99_s15 }
  0x18   :  { %v30_v12 = vmul.f32 %v29_v10, %v28_v9 }
  0x1a   :  { %v32_v14 = vcombine.high %v30_v12, %v30_v12  ;;  %v39_v15 = vrot.slane %v30_v12, %v38_v11 }
  0x1c   :  { %v46_v16 = vrot.slane %v32_v14, %v38_v11  ;;  %v47_v17 = vcombine.high %v39_v15, %v39_v15 }
  0x1e   :  { %v48_v19 = vcombine.high %v46_v16, %v46_v16  ;;  %v100_v20 = vpack.c.bf16 %v47_v17, %v39_v15 }
  0x20   :  { %v101_v21 = vpack.c.bf16 %v48_v19, %v46_v16  ;;  %v69_v22 = vrot.slane %v100_v20, %v68_v18 }
  0x22   :  { %v76_v23 = vrot.slane %v101_v21, %v68_v18 }
  0x24   :  { %v77_v24 = vcombine.low %v69_v22, %v76_v23 }
  0x26   :  { %v84_v25 = vrot.slane %v77_v24, %v68_v18 }
  0x28   :  { %93 = vst.msk [vmem:[%s148_s2] sm:$0xf] %vm92_vm6, %v84_v25 }
  0x29   :  { %98 = vsyncpa [#allocation3], 1 }

// kernel: _lambda_.42
= control target key start
LH: loop header
LB: loop body
LE: loop exit
PB: predicated region body
PF: predicated region fallthrough
CT: control target
= control target key end

     0   :  { %vm167_vm0 = vcmask 1044480   ;;  %v642_v1 = vmov 0.0   ;;  %vm136_vm1 = vcmask 80896   ;;  %s742_s1 = inlined_call_operand.vmem [shape: bf16[10,128], index: 1, kind: input, shape index: {}]   ;;  %s743_s0 = inlined_call_operand.vmem [shape: bf16[158,10], index: 0, kind: input, shape index: {}]   ;;  %s744_s2 = inlined_call_operand.vmem [shape: f32[1,128], index: 2, kind: input, shape index: {}]   ;;  %s745_s3 = inlined_call_operand.vmem [shape: bf16[158,128], index: 3, kind: output, shape index: {}]  }
   0x1   :  { %v631_v0 = vld [vmem:[%s742_s1] sm:$0x1f]   ;;  %38 = vst [vmem:[#allocation2 + $0x90] sm:$0x3f] %v642_v1  ;;  %v633_v4 = vld [vmem:[%s743_s0 + $0x8] sm:$0xff]   ;;  %v634_v5 = vld [vmem:[%s743_s0 + $0x30] sm:$0xff]  }
   0x2   :  { %v632_v2 = vld [vmem:[%s743_s0] sm:$0xff]   ;;  %628 = vmatprep.subr.msk.bf16.mxu0 %vm167_vm0, %v631_v0  ;;  %v169_v3 = vsel %vm167_vm0, %v631_v0, 0  ;;  %629 = vmatprep.subr.msk.bf16.mxu1 %vm167_vm0, %v631_v0  ;;  %v635_v6 = vld [vmem:[%s743_s0 + $0x38] sm:$0xff]   ;;  %v636_v7 = vld [vmem:[%s743_s0 + $0x10] sm:$0xff]  }
   0x3   :  { %605 = vmatpush3.bf16.msra.mxu0 %v169_v3  ;;  %627 = vmatpush3.bf16.msra.mxu1 %v169_v3  ;;  %v638_v8 = vld [vmem:[%s743_s0 + $0x40] sm:$0xff]   ;;  %v637_v9 = vld [vmem:[%s743_s0 + $0x18] sm:$0xff]   ;;  %v639_v10 = vld [vmem:[%s743_s0 + $0x48] sm:$0x7f]  }
   0x4   :  { %606 = vmatprep.mubr.msk.bf16.mxu0 %vm136_vm1, %v632_v2  ;;  %618 = vmatprep.mubr.msk.bf16.mxu1 %vm136_vm1, %v634_v5  ;;  %v640_v11 = vld [vmem:[%s743_s0 + $0x20] sm:$0xff]   ;;  %v641_v12 = vld [vmem:[%s743_s0 + $0x28] sm:$0xff]  }
   0x5   :  { %v499_v17 = vld [vmem:[%s744_s2] ss:$0 sm:$0xff] }
   0x6   :  { %607 = vmatmul.mubr.msk.bf16.vlgmr.msra.gmra.mxu0 %vm136_vm1, %v633_v4  ;;  %619 = vmatmul.mubr.msk.bf16.vlgmr.msra.gmra.mxu1 %vm136_vm1, %v635_v6 }
   0x7   :  { %610 = vmatprep.mubr.msk.bf16.mxu0 %vm136_vm1, %v636_v7  ;;  %622 = vmatprep.mubr.msk.bf16.mxu1 %vm136_vm1, %v638_v8 }
   0x8   :  { %v58_v36 = vld [vmem:[#allocation2 + $0x90] sm:$0x3f] }
   0xe   :  { %611 = vmatmul.mubr.msk.bf16.gmra.mxu0 %vm136_vm1, %v637_v9  ;;  %623 = vmatmul.mubr.msk.bf16.gmra.mxu1 %vm136_vm1, %v639_v10 }
   0xf   :  { %614 = vmatprep.mubr.msk.bf16.mxu0 %vm136_vm1, %v640_v11 }
  0x16   :  { %615 = vmatmul.mubr.msk.bf16.gmra.mxu0 %vm136_vm1, %v641_v12 }
  0xc6   :  { %v608_v13 = vpop.f32.mrf.mxu0  ;;  %v620_v14 = vpop.f32.mrf.mxu1 }
  0xc7   :  { %v356_v20 = vadd.f32 %v608_v13, %v499_v17  ;;  %v368_v21 = vadd.f32 %v620_v14, %v499_v17 }
  0xc8   :  { %v205_v15 = vpop.f32.mrf.mxu0  ;;  %v253_v16 = vpop.f32.mrf.mxu1 }
  0xc9   :  { %v354_v26 = vadd.f32 %v499_v17, %v205_v15  ;;  %v366_v32 = vadd.f32 %v499_v17, %v253_v16 }
  0xca   :  { %v609_v18 = vpop.f32.mrf.mxu0  ;;  %v621_v19 = vpop.f32.mrf.mxu1 }
  0xcb   :  { %v357_v24 = vadd.f32 %v609_v18, %v499_v17  ;;  %v369_v25 = vadd.f32 %v621_v19, %v499_v17 }
  0xcc   :  { %v208_v22 = vpop.f32.mrf.mxu0  ;;  %v256_v23 = vpop.f32.mrf.mxu1 }
  0xcd   :  { %v548_v29 = vpack.c.bf16 %v357_v24, %v356_v20  ;;  %v355_v30 = vadd.f32 %v499_v17, %v208_v22  ;;  %v578_v31 = vpack.c.bf16 %v369_v25, %v368_v21  ;;  %v367_v33 = vadd.f32 %v499_v17, %v256_v23 }
  0xce   :  { %v612_v27 = vpop.f32.mrf.mxu0  ;;  %v624_v28 = vpop.f32.mrf.mxu1 }
  0xcf   :  { %585 = vst [vmem:[%s745_s3 + $0x8] sm:$0xff] %v548_v29   ;;  %v543_v37 = vpack.c.bf16 %v355_v30, %v354_v26  ;;  %591 = vst [vmem:[%s745_s3 + $0x38] sm:$0xff] %v578_v31   ;;  %v573_v38 = vpack.c.bf16 %v367_v33, %v366_v32  ;;  %v372_v39 = vadd.f32 %v624_v28, %v499_v17 }
  0xd0   :  { %v221_v34 = vpop.f32.mrf.mxu0  ;;  %v269_v35 = vpop.f32.mrf.mxu1  ;;  %v360_v46 = vadd.f32 %v612_v27, %v499_v17 }
  0xd1   :  { %544 = vst [vmem:[%s745_s3] sm:$0xff] %v543_v37   ;;  %590 = vst [vmem:[%s745_s3 + $0x30] sm:$0xff] %v573_v38   ;;  %v538_v43 = vpack.c.bf16 %v372_v39, %v372_v39  ;;  %v358_v48 = vadd.f32 %v499_v17, %v221_v34  ;;  %v370_v49 = vadd.f32 %v499_v17, %v269_v35 }
  0xd2   :  { %v613_v40 = vpop.f32.mrf.mxu0  ;;  %v625_v41 = vpop.f32.mrf.mxu1 }
  0xd3   :  { %v303_v42 = vadd.f32 %v625_v41, %v58_v36  ;;  %v361_v47 = vadd.f32 %v613_v40, %v499_v17  ;;  %472 = vst [vmem:[%s745_s3 + $0x48] sm:$0xf] %v538_v43 }
  0xd4   :  { %v224_v44 = vpop.f32.mrf.mxu0  ;;  %v272_v45 = vpop.f32.mrf.mxu1 }
  0xd5   :  { %323 = vst [vmem:[#allocation2 + $0x90] sm:$0x3f] %v303_v42  ;;  %v558_v51 = vpack.c.bf16 %v361_v47, %v360_v46  ;;  %v359_v52 = vadd.f32 %v499_v17, %v224_v44  ;;  %v371_v53 = vadd.f32 %v499_v17, %v272_v45 }
  0xd6   :  { %v616_v50 = vpop.f32.mrf.mxu0 }
  0xd7   :  { %587 = vst [vmem:[%s745_s3 + $0x18] sm:$0xff] %v558_v51   ;;  %v553_v55 = vpack.c.bf16 %v359_v52, %v358_v48  ;;  %v583_v56 = vpack.c.bf16 %v371_v53, %v370_v49  ;;  %v364_v61 = vadd.f32 %v616_v50, %v499_v17 }
  0xd8   :  { %v237_v54 = vpop.f32.mrf.mxu0 }
  0xd9   :  { %586 = vst [vmem:[%s745_s3 + $0x10] sm:$0xff] %v553_v55   ;;  %592 = vst [vmem:[%s745_s3 + $0x40] sm:$0xff] %v583_v56   ;;  %v362_v0 = vadd.f32 %v499_v17, %v237_v54 }
  0xda   :  { %v617_v57 = vpop.f32.mrf.mxu0 }
  0xdb   :  { %v365_v62 = vadd.f32 %v617_v57, %v499_v17 }
  0xdc   :  { %v346_v58 = vld [vmem:[#allocation2 + $0x90] sm:$0x3f]  ;;  %v240_v59 = vpop.f32.mrf.mxu0 }
  0xdd   :  { %v373_v60 = vadd.f32 %v499_v17, %v346_v58  ;;  %v568_v1 = vpack.c.bf16 %v365_v62, %v364_v61  ;;  %v363_v2 = vadd.f32 %v499_v17, %v240_v59 }
  0xdf   :  { %v539_v63 = vpack.c.bf16 %v373_v60, %v373_v60  ;;  %589 = vst [vmem:[%s745_s3 + $0x28] sm:$0xff] %v568_v1   ;;  %v563_v3 = vpack.c.bf16 %v363_v2, %v362_v0 }
  0xe1   :  { %473 = vst [vmem:[%s745_s3 + $0x4c] sm:$0x7] %v539_v63  ;;  %588 = vst [vmem:[%s745_s3 + $0x20] sm:$0xff] %v563_v3  }

// kernel: _lambda_.43
= control target key start
LH: loop header
LB: loop body
LE: loop exit
PB: predicated region body
PF: predicated region fallthrough
CT: control target
= control target key end

     0   :  { %s436_s9 = smov 0   ;;  %s438_s10 = smov 0   ;;  %s482_s0 = inlined_call_operand.vmem [shape: bf16[2,79,128], index: 0, kind: input, shape index: {}]   ;;  %s483_s1 = inlined_call_operand.vmem [shape: f32[2,1,128], index: 1, kind: output, shape index: {0}]   ;;  %s484_s2 = inlined_call_operand.vmem [shape: f32[2,1,128], index: 2, kind: output, shape index: {1}]  }
   0x1   :  { %s440_s11 = smov 0  }
   0x2 LB: > { %s25_s12 = sadd.s32 1, %s414_s10  ;;  %p342_p0 = scmp.ge.s32.totalorder %s418_s11, 1  ;;  %s418_s11 = sphi %s440_s11, %s13_s11   ;;  %s414_s10 = sphi %s438_s10, %s486_s10   ;;  %s410_s9 = sphi %s436_s9, %s485_s9  }
   0x3   : > { %p27_p1 = scmp.ge.s32.totalorder %s25_s12, 2  ;;  %p134_p2 = scmp.lt.s32.totalorder %s418_s11, 3 }
   0x5   : > { %s488_s12 = smov (%p27_p1, %s25_s12), 0  ;;  %p135_p3 = pnand %p342_p0, %p134_p2 }
   0x6   : > { %p162_p4 = scmp.lt.s32.totalorder (!%p135_p3), %s410_s9, 1 }
   0x7   : > { %138 = sbr.rel (%p135_p3) target bundleno = 54 (0x36), region = 24 }
   0xc   : > { %s490_s9 = smov (!%p162_p4, %s410_s9), 1  ;;  %v420_v0 = vmov 0.0   ;;  %vm212_vm0 = vcmask 1046528  }
   0xd   : > { %s370_s13 = smul.u32 40, %s490_s9  ;;  %s457_s16 = scalar_lea.vmem %s483_s1, %s490_s9 }
   0xe   : > { %181 = vst [vmem:[%s457_s16] sm:$0x1] %v420_v0  ;;  %s463_s19 = scalar_lea.vmem %s484_s2, %s490_s9 }
   0xf   : > { %s169_s22 = scalar_lea.vmem %s482_s0, %s370_s13  ;;  %182 = vst [vmem:[%s463_s19] sm:$0x1] %v420_v0 }
  0x10   : > { %v347_v1 = vld [vmem:[%s169_s22] sm:$0xff]   ;;  %v366_v2 = vld [vmem:[%s169_s22 + $0x8] sm:$0xff]   ;;  %v367_v3 = vld [vmem:[%s169_s22 + $0x10] sm:$0xff]  }
  0x11   : > { %v348_v4 = vunpack.c.l.bf16 %v347_v1  ;;  %v349_v5 = vunpack.c.h.bf16 %v347_v1  ;;  %v352_v6 = vunpack.c.l.bf16 %v366_v2  ;;  %v353_v7 = vunpack.c.h.bf16 %v366_v2  ;;  %v368_v13 = vld [vmem:[%s169_s22 + $0x18] sm:$0xff]   ;;  %v369_v22 = vld [vmem:[%s169_s22 + $0x20] sm:$0xff]  }
  0x12   : > { %v356_v8 = vunpack.c.l.bf16 %v367_v3  ;;  %v357_v14 = vunpack.c.h.bf16 %v367_v3  ;;  %v360_v18 = vunpack.c.l.bf16 %v368_v13  ;;  %v361_v26 = vunpack.c.h.bf16 %v368_v13 }
  0x13   : > { %v204_v9 = vadd.f32 %v349_v5, %v348_v4  ;;  %v224_v10 = vmul.f32 %v348_v4, %v348_v4  ;;  %v225_v11 = vmul.f32 %v349_v5, %v349_v5  ;;  %v226_v12 = vmul.f32 %v352_v6, %v352_v6 }
  0x14   : > { %v227_v16 = vmul.f32 %v353_v7, %v353_v7  ;;  %v228_v20 = vmul.f32 %v356_v8, %v356_v8  ;;  %v229_v24 = vmul.f32 %v357_v14, %v357_v14  ;;  %v365_v27 = vunpack.c.h.bf16 %v369_v22 }
  0x15   : > { %v205_v15 = vadd.f32 %v352_v6, %v204_v9  ;;  %v234_v17 = vadd.f32 %v225_v11, %v224_v10  ;;  %v364_v28 = vunpack.c.l.bf16 %v369_v22  ;;  %v230_v30 = vmul.f32 %v360_v18, %v360_v18  ;;  %v203_v55 = vld [vmem:[%s457_s16] sm:$0x1] }
  0x16   : > { %v231_v33 = vmul.f32 %v361_v26, %v361_v26  ;;  %v233_v35 = vmul.f32 %v365_v27, %v365_v27  ;;  %v213_v39 = vsel %vm212_vm0, %v365_v27, 0.0  ;;  %v223_v58 = vld [vmem:[%s463_s19] sm:$0x1] }
  0x17   : > { %v206_v19 = vadd.f32 %v353_v7, %v205_v15  ;;  %v235_v21 = vadd.f32 %v234_v17, %v226_v12  ;;  %v232_v37 = vmul.f32 %v364_v28, %v364_v28 }
  0x18   : > { %v242_v42 = vsel %vm212_vm0, %v233_v35, 0.0 }
  0x19   : > { %v207_v23 = vadd.f32 %v356_v8, %v206_v19  ;;  %v236_v25 = vadd.f32 %v235_v21, %v227_v16 }
  0x1b   : > { %v208_v29 = vadd.f32 %v357_v14, %v207_v23  ;;  %v237_v31 = vadd.f32 %v236_v25, %v228_v20 }
  0x1d   : > { %v209_v32 = vadd.f32 %v360_v18, %v208_v29  ;;  %v238_v34 = vadd.f32 %v237_v31, %v229_v24 }
  0x1f   : > { %v210_v36 = vadd.f32 %v361_v26, %v209_v32  ;;  %v239_v38 = vadd.f32 %v238_v34, %v230_v30 }
  0x21   : > { %v211_v40 = vadd.f32 %v364_v28, %v210_v36  ;;  %v240_v41 = vadd.f32 %v239_v38, %v231_v33 }
  0x23   : > { %v214_v43 = vadd.f32 %v213_v39, %v211_v40  ;;  %v241_v44 = vadd.f32 %v240_v41, %v232_v37 }
  0x25   : > { %v215_v45 = vrot.slane %v214_v43, 4  ;;  %v243_v46 = vadd.f32 %v242_v42, %v241_v44 }
  0x27   : > { %v216_v47 = vadd.f32 %v215_v45, %v214_v43  ;;  %v244_v48 = vrot.slane %v243_v46, 4 }
  0x29   : > { %v217_v49 = vrot.slane %v216_v47, 2  ;;  %v245_v50 = vadd.f32 %v244_v48, %v243_v46 }
  0x2b   : > { %v218_v51 = vadd.f32 %v217_v49, %v216_v47  ;;  %v246_v52 = vrot.slane %v245_v50, 2 }
  0x2d   : > { %v219_v53 = vrot.slane %v218_v51, 1  ;;  %v247_v54 = vadd.f32 %v246_v52, %v245_v50 }
  0x2f   : > { %v220_v56 = vadd.f32 %v219_v53, %v218_v51  ;;  %v248_v57 = vrot.slane %v247_v54, 1 }
  0x31   : > { %v221_v59 = vadd.f32 %v220_v56, %v203_v55  ;;  %v249_v60 = vadd.f32 %v248_v57, %v247_v54 }
  0x33   : > { %222 = vst [vmem:[%s457_s16] sm:$0x1] %v221_v59  ;;  %v250_v61 = vadd.f32 %v249_v60, %v223_v58 }
  0x35   : > { %251 = vst [vmem:[%s463_s19] sm:$0x1] %v250_v61 }
  0x36 PF: > { %s13_s11 = sadd.s32 1, %s418_s11   ;;  %s485_s9 = smov %s414_s10 }
  0x37   : > { %p10_p5 = scmp.ge.s32.totalorder %s13_s11, 4   ;;  %s486_s10 = smov %s488_s12 }
  0x39   :  { %12 = sbr.rel (!%p10_p5) target bundleno = 2 (0x2), region = 70 }

// kernel: _lambda_.44
= control target key start
LH: loop header
LB: loop body
LE: loop exit
PB: predicated region body
PF: predicated region fallthrough
CT: control target
= control target key end

     0   :  { %s816_s18 = smov 0   ;;  %s818_s19 = smov 0   ;;  %s964_s0 = inlined_call_operand.vmem [shape: bf16[2,79,128], index: 0, kind: input, shape index: {}]   ;;  %s965_s1 = inlined_call_operand.vmem [shape: f32[2,1,128], index: 1, kind: input, shape index: {}]   ;;  %s966_s2 = inlined_call_operand.vmem [shape: f32[2,1,128], index: 2, kind: input, shape index: {}]   ;;  %s967_s3 = inlined_call_operand.vmem [shape: f32[1,128], index: 3, kind: input, shape index: {}]   ;;  %s968_s4 = inlined_call_operand.vmem [shape: f32[1,128], index: 4, kind: input, shape index: {}]   ;;  %s969_s5 = inlined_call_operand.vmem [shape: bf16[2,79,128], index: 5, kind: output, shape index: {}]  }
   0x1   :  { %s820_s20 = smov 0  }
   0x2 LB: > { %s27_s21 = sadd.s32 1, %s780_s19  ;;  %p641_p0 = scmp.ge.s32.totalorder %s784_s20, 1  ;;  %s784_s20 = sphi %s820_s20, %s15_s20   ;;  %s780_s19 = sphi %s818_s19, %s971_s19   ;;  %s776_s18 = sphi %s816_s18, %s970_s18  }
   0x3   : > { %p29_p1 = scmp.ge.s32.totalorder %s27_s21, 2  ;;  %p224_p2 = scmp.lt.s32.totalorder %s784_s20, 3 }
   0x5   : > { %s973_s21 = smov (%p29_p1, %s27_s21), 0  ;;  %p225_p3 = pnand %p641_p0, %p224_p2 }
   0x6   : > { %p267_p4 = scmp.lt.s32.totalorder (!%p225_p3), %s776_s18, 1 }
   0x7   : > { %228 = sbr.rel (%p225_p3) target bundleno = 95 (0x5f), region = 40 }
   0xc   : > { %s975_s18 = smov (!%p267_p4, %s776_s18), 1  ;;  %v320_v7 = vlaneseq  ;;  %v853_v37 = vld [vmem:[%s967_s3] ss:$0 sm:$0xff]  ;;  %vm526_vm0 = vcmask 1043456   ;;  %vm527_vm1 = vsmask.f32 3328 }
   0xd   : > { %s278_s24 = scalar_lea.vmem %s965_s1, %s975_s18  ;;  %s281_s27 = scalar_lea.vmem %s966_s2, %s975_s18  ;;  %v858_v44 = vld [vmem:[%s968_s4] ss:$0 sm:$0xff]  ;;  %vm528_vm2 = vmand %vm526_vm0, %vm527_vm1 }
   0xe   : > { %v312_v0 = vld [vmem:[%s278_s24] sm:$0x1]  ;;  %s715_s28 = smul.u32 40, %s975_s18  ;;  %v321_v9 = vshrl.u32 %v320_v7, 7 }
   0xf   : > { %v313_v1 = vmul.f32 0.012658228, %v312_v0  ;;  %v314_v2 = vld [vmem:[%s281_s27] sm:$0x1] }
  0x10   : > { %v315_v3 = vmul.f32 0.012658228, %v314_v2  ;;  %s274_s6 = scalar_lea.vmem %s964_s0, %s715_s28  ;;  %v322_v11 = vsub.s32 0, %v321_v9  ;;  %s290_s13 = scalar_lea.vmem %s969_s5, %s715_s28 }
  0x11   : > { %v316_v4 = vmul.f32 %v313_v1, %v313_v1  ;;  %v669_v10 = vld [vmem:[%s274_s6] sm:$0xff]   ;;  %v708_v12 = vld [vmem:[%s274_s6 + $0x8] sm:$0xff]   ;;  %v709_v13 = vld [vmem:[%s274_s6 + $0x10] sm:$0xff]  }
  0x12   : > { %v710_v14 = vld [vmem:[%s274_s6 + $0x18] sm:$0xff]   ;;  %v670_v15 = vunpack.c.l.bf16 %v669_v10  ;;  %v671_v16 = vunpack.c.h.bf16 %v669_v10  ;;  %v323_v17 = vrot.slane %v313_v1, %v322_v11  ;;  %v674_v18 = vunpack.c.l.bf16 %v708_v12  ;;  %v711_v20 = vld [vmem:[%s274_s6 + $0x20] sm:$0xff]  }
  0x13   : > { %v317_v5 = vsub.f32 %v315_v3, %v316_v4  ;;  %v675_v19 = vunpack.c.h.bf16 %v708_v12  ;;  %v678_v21 = vunpack.c.l.bf16 %v709_v13  ;;  %v679_v22 = vunpack.c.h.bf16 %v709_v13 }
  0x14   : > { %v682_v23 = vunpack.c.l.bf16 %v710_v14  ;;  %v683_v24 = vunpack.c.h.bf16 %v710_v14  ;;  %v686_v25 = vunpack.c.l.bf16 %v711_v20  ;;  %v687_v26 = vunpack.c.h.bf16 %v711_v20 }
  0x15   : > { %v318_v6 = vmax.f32 %v317_v5, 0.0  ;;  %v325_v27 = vsub.f32 %v670_v15, %v323_v17  ;;  %v326_v28 = vsub.f32 %v671_v16, %v323_v17  ;;  %v327_v29 = vsub.f32 %v674_v18, %v323_v17 }
  0x16   : > { %v328_v30 = vsub.f32 %v675_v19, %v323_v17  ;;  %v329_v32 = vsub.f32 %v678_v21, %v323_v17  ;;  %v330_v33 = vsub.f32 %v679_v22, %v323_v17  ;;  %v331_v34 = vsub.f32 %v682_v23, %v323_v17 }
  0x17   : > { %v335_v8 = vadd.f32 1e-05, %v318_v6  ;;  %v332_v35 = vsub.f32 %v683_v24, %v323_v17  ;;  %v333_v38 = vsub.f32 %v686_v25, %v323_v17  ;;  %v334_v39 = vsub.f32 %v687_v26, %v323_v17 }
  0x19   : > { %740 = vrsqrt.f32 %v335_v8 }
  0x26   : > { %v741_v31 = vpop.eup %740 }
  0x27   : > { %v341_v36 = vrot.slane %v741_v31, %v322_v11 }
  0x29   : > { %v343_v40 = vmul.f32 %v341_v36, %v325_v27  ;;  %v344_v41 = vmul.f32 %v341_v36, %v326_v28  ;;  %v345_v42 = vmul.f32 %v341_v36, %v327_v29  ;;  %v346_v43 = vmul.f32 %v341_v36, %v328_v30 }
  0x2a   : > { %v347_v45 = vmul.f32 %v341_v36, %v329_v32  ;;  %v348_v46 = vmul.f32 %v341_v36, %v330_v33  ;;  %v349_v47 = vmul.f32 %v341_v36, %v331_v34  ;;  %v350_v48 = vmul.f32 %v341_v36, %v332_v35 }
  0x2b   : > { %v360_v49 = vmul.f32 %v853_v37, %v343_v40  ;;  %v361_v50 = vmul.f32 %v853_v37, %v344_v41  ;;  %v362_v51 = vmul.f32 %v853_v37, %v345_v42  ;;  %v363_v52 = vmul.f32 %v853_v37, %v346_v43 }
  0x2c   : > { %v364_v53 = vmul.f32 %v853_v37, %v347_v45  ;;  %v365_v54 = vmul.f32 %v853_v37, %v348_v46  ;;  %v366_v55 = vmul.f32 %v853_v37, %v349_v47  ;;  %v367_v56 = vmul.f32 %v853_v37, %v350_v48 }
  0x2d   : > { %v869_v57 = vadd.f32 %v858_v44, %v360_v49  ;;  %v872_v58 = vadd.f32 %v858_v44, %v361_v50  ;;  %v875_v59 = vadd.f32 %v858_v44, %v362_v51  ;;  %v878_v60 = vadd.f32 %v858_v44, %v363_v52 }
  0x2e   : > { %v881_v61 = vadd.f32 %v858_v44, %v364_v53  ;;  %v884_v62 = vadd.f32 %v858_v44, %v365_v54  ;;  %v887_v63 = vadd.f32 %v858_v44, %v366_v55  ;;  %v890_v0 = vadd.f32 %v858_v44, %v367_v56 }
  0x2f   : > { %v387_v1 = vmul.f32 %v869_v57, %v869_v57  ;;  %v388_v2 = vmul.f32 %v872_v58, %v872_v58  ;;  %v389_v3 = vmul.f32 %v875_v59, %v875_v59  ;;  %v390_v4 = vmul.f32 %v878_v60, %v878_v60 }
  0x30   : > { %v391_v5 = vmul.f32 %v881_v61, %v881_v61  ;;  %v392_v6 = vmul.f32 %v884_v62, %v884_v62  ;;  %v393_v7 = vmul.f32 %v887_v63, %v887_v63  ;;  %v394_v8 = vmul.f32 %v890_v0, %v890_v0 }
  0x31   : > { %v397_v9 = vmul.f32 %v387_v1, %v869_v57  ;;  %v398_v10 = vmul.f32 %v388_v2, %v872_v58  ;;  %v399_v11 = vmul.f32 %v389_v3, %v875_v59  ;;  %v400_v12 = vmul.f32 %v390_v4, %v878_v60 }
  0x32   : > { %v401_v13 = vmul.f32 %v391_v5, %v881_v61  ;;  %v402_v14 = vmul.f32 %v392_v6, %v884_v62  ;;  %v403_v15 = vmul.f32 %v393_v7, %v887_v63  ;;  %v404_v16 = vmul.f32 %v394_v8, %v890_v0 }
  0x33   : > { %v407_v17 = vmul.f32 0.044715, %v397_v9  ;;  %v408_v18 = vmul.f32 0.044715, %v398_v10  ;;  %v409_v19 = vmul.f32 0.044715, %v399_v11  ;;  %v351_v20 = vmul.f32 %v341_v36, %v333_v38 }
  0x34   : > { %v410_v21 = vmul.f32 0.044715, %v400_v12  ;;  %v411_v22 = vmul.f32 0.044715, %v401_v13  ;;  %v412_v23 = vmul.f32 0.044715, %v402_v14  ;;  %v352_v24 = vmul.f32 %v341_v36, %v334_v39 }
  0x35   : > { %v417_v25 = vadd.f32 %v407_v17, %v869_v57  ;;  %v418_v26 = vadd.f32 %v408_v18, %v872_v58  ;;  %v419_v27 = vadd.f32 %v409_v19, %v875_v59  ;;  %v413_v28 = vmul.f32 0.044715, %v403_v15 }
  0x36   : > { %v420_v29 = vadd.f32 %v410_v21, %v878_v60  ;;  %v421_v30 = vadd.f32 %v411_v22, %v881_v61  ;;  %v422_v31 = vadd.f32 %v412_v23, %v884_v62  ;;  %v414_v32 = vmul.f32 0.044715, %v404_v16 }
  0x37   : > { %v427_v33 = vmul.f32 0.7978846, %v417_v25  ;;  %v428_v34 = vmul.f32 0.7978846, %v418_v26  ;;  %v429_v35 = vmul.f32 0.7978846, %v419_v27  ;;  %v423_v38 = vadd.f32 %v413_v28, %v887_v63 }
  0x38   : > { %v430_v36 = vmul.f32 0.7978846, %v420_v29  ;;  %v424_v39 = vadd.f32 %v414_v32, %v890_v0  ;;  %v431_v40 = vmul.f32 0.7978846, %v421_v30  ;;  %v368_v41 = vmul.f32 %v853_v37, %v351_v20 }
  0x39   : > { %742 = vtanh.f32 %v427_v33  ;;  %v369_v42 = vmul.f32 %v853_v37, %v352_v24  ;;  %v432_v43 = vmul.f32 0.7978846, %v422_v31  ;;  %v433_v45 = vmul.f32 0.7978846, %v423_v38 }
  0x3a   : > { %744 = vtanh.f32 %v428_v34  ;;  %v927_v46 = vadd.f32 %v858_v44, %v368_v41  ;;  %v434_v48 = vmul.f32 0.7978846, %v424_v39 }
  0x3b   : > { %746 = vtanh.f32 %v429_v35  ;;  %v930_v47 = vadd.f32 %v858_v44, %v369_v42 }
  0x3c   : > { %748 = vtanh.f32 %v430_v36  ;;  %v395_v49 = vmul.f32 %v927_v46, %v927_v46 }
  0x3d   : > { %750 = vtanh.f32 %v431_v40  ;;  %v396_v50 = vmul.f32 %v930_v47, %v930_v47  ;;  %v529_v40 = vld [vmem:[%s290_s13 + $0x24] sm:$0xf] }
  0x3e   : > { %752 = vtanh.f32 %v432_v43  ;;  %v405_v37 = vmul.f32 %v395_v49, %v927_v46 }
  0x3f   : > { %754 = vtanh.f32 %v433_v45  ;;  %v406_v51 = vmul.f32 %v396_v50, %v930_v47 }
  0x40   : > { %756 = vtanh.f32 %v434_v48  ;;  %v415_v52 = vmul.f32 0.044715, %v405_v37 }
  0x41   : > { %v416_v53 = vmul.f32 0.044715, %v406_v51 }
  0x42   : > { %v425_v44 = vadd.f32 %v415_v52, %v927_v46 }
  0x43   : > { %v426_v54 = vadd.f32 %v416_v53, %v930_v47 }
  0x44   : > { %v435_v55 = vmul.f32 0.7978846, %v425_v44 }
  0x45   : > { %v436_v56 = vmul.f32 0.7978846, %v426_v54 }
  0x46   : > { %v743_v1 = vpop.eup %742  ;;  %758 = vtanh.f32 %v435_v55 }
  0x47   : > { %v745_v2 = vpop.eup %744  ;;  %v447_v3 = vadd.f32 1.0, %v743_v1  ;;  %760 = vtanh.f32 %v436_v56 }
  0x48   : > { %v747_v4 = vpop.eup %746  ;;  %v448_v5 = vadd.f32 1.0, %v745_v2 }
  0x49   : > { %v749_v6 = vpop.eup %748  ;;  %v457_v7 = vmul.f32 0.5, %v447_v3  ;;  %v449_v8 = vadd.f32 1.0, %v747_v4 }
  0x4a   : > { %v751_v9 = vpop.eup %750  ;;  %v458_v10 = vmul.f32 0.5, %v448_v5  ;;  %v450_v11 = vadd.f32 1.0, %v749_v6 }
  0x4b   : > { %v753_v12 = vpop.eup %752  ;;  %v467_v13 = vmul.f32 %v457_v7, %v869_v57  ;;  %v459_v14 = vmul.f32 0.5, %v449_v8  ;;  %v451_v15 = vadd.f32 1.0, %v751_v9 }
  0x4c   : > { %v755_v16 = vpop.eup %754  ;;  %v468_v17 = vmul.f32 %v458_v10, %v872_v58  ;;  %v460_v18 = vmul.f32 0.5, %v450_v11  ;;  %v452_v19 = vadd.f32 1.0, %v753_v12 }
  0x4d   : > { %v757_v20 = vpop.eup %756  ;;  %v469_v21 = vmul.f32 %v459_v14, %v875_v59  ;;  %v461_v22 = vmul.f32 0.5, %v451_v15  ;;  %v453_v23 = vadd.f32 1.0, %v755_v16 }
  0x4e   : > { %v691_v24 = vpack.c.bf16 %v468_v17, %v467_v13  ;;  %v470_v25 = vmul.f32 %v460_v18, %v878_v60  ;;  %v462_v26 = vmul.f32 0.5, %v452_v19  ;;  %v454_v27 = vadd.f32 1.0, %v757_v20 }
  0x4f   : > { %v471_v57 = vmul.f32 %v461_v22, %v881_v61  ;;  %v463_v58 = vmul.f32 0.5, %v453_v23 }
  0x50   : > { %692 = vst [vmem:[%s290_s13] sm:$0xff] %v691_v24   ;;  %v696_v28 = vpack.c.bf16 %v470_v25, %v469_v21  ;;  %v472_v29 = vmul.f32 %v462_v26, %v884_v62  ;;  %v464_v59 = vmul.f32 0.5, %v454_v27 }
  0x51   : > { %v473_v30 = vmul.f32 %v463_v58, %v887_v63 }
  0x52   : > { %712 = vst [vmem:[%s290_s13 + $0x8] sm:$0xff] %v696_v28   ;;  %v701_v31 = vpack.c.bf16 %v472_v29, %v471_v57  ;;  %v474_v60 = vmul.f32 %v464_v59, %v890_v0 }
  0x53   : > { %v759_v32 = vpop.eup %758 }
  0x54   : > { %713 = vst [vmem:[%s290_s13 + $0x10] sm:$0xff] %v701_v31   ;;  %v706_v33 = vpack.c.bf16 %v474_v60, %v473_v30  ;;  %v761_v34 = vpop.eup %760  ;;  %v455_v35 = vadd.f32 1.0, %v759_v32 }
  0x55   : > { %v456_v38 = vadd.f32 1.0, %v761_v34 }
  0x56   : > { %714 = vst [vmem:[%s290_s13 + $0x18] sm:$0xff] %v706_v33   ;;  %v465_v61 = vmul.f32 0.5, %v455_v35 }
  0x57   : > { %v466_v36 = vmul.f32 0.5, %v456_v38 }
  0x58   : > { %v475_v62 = vmul.f32 %v465_v61, %v927_v46 }
  0x59   : > { %v476_v39 = vmul.f32 %v466_v36, %v930_v47 }
  0x5a   : > { %v666_v63 = vpack.c.bf16 %v475_v62, %v475_v62 }
  0x5b   : > { %v667_v41 = vpack.c.bf16 %v476_v39, %v476_v39 }
  0x5c   : > { %525 = vst [vmem:[%s290_s13 + $0x20] sm:$0xf] %v666_v63 }
  0x5d   : > { %v530_v0 = vsel %vm528_vm2, %v667_v41, %v529_v40 }
  0x5e   : > { %531 = vst [vmem:[%s290_s13 + $0x24] sm:$0xf] %v530_v0 }
  0x5f PF: > { %s15_s20 = sadd.s32 1, %s784_s20   ;;  %s970_s18 = smov %s780_s19 }
  0x60   : > { %p12_p5 = scmp.ge.s32.totalorder %s15_s20, 4   ;;  %s971_s19 = smov %s973_s21 }
  0x62   :  { %14 = sbr.rel (!%p12_p5) target bundleno = 2 (0x2), region = 76 }

// kernel: _lambda_.46
= control target key start
LH: loop header
LB: loop body
LE: loop exit
PB: predicated region body
PF: predicated region fallthrough
CT: control target
= control target key end

     0   :  { %vm52_vm0 = vcmask 1045504   ;;  %s437_s0 = inlined_call_operand.vmem [shape: bf16[78,128], index: 0, kind: input, shape index: {}]   ;;  %s438_s1 = inlined_call_operand.vmem [shape: f32[1,128], index: 1, kind: input, shape index: {}]   ;;  %s439_s2 = inlined_call_operand.vmem [shape: f32[1,128], index: 2, kind: input, shape index: {}]   ;;  %s440_s3 = inlined_call_operand.vmem [shape: bf16[78,128], index: 3, kind: output, shape index: {}]  }
   0x1   :  { %v259_v0 = vld [vmem:[%s437_s0] sm:$0xff]   ;;  %v294_v1 = vld [vmem:[%s437_s0 + $0x8] sm:$0xff]   ;;  %v295_v8 = vld [vmem:[%s437_s0 + $0x10] sm:$0xff]  }
   0x2   :  { %v349_v2 = vld [vmem:[%s437_s0 + $0x24] sm:$0x7]  ;;  %v261_v3 = vunpack.c.h.bf16 %v259_v0  ;;  %v260_v4 = vunpack.c.l.bf16 %v259_v0  ;;  %v264_v6 = vunpack.c.l.bf16 %v294_v1  ;;  %v268_v9 = vunpack.c.l.bf16 %v295_v8  ;;  %v296_v11 = vld [vmem:[%s437_s0 + $0x18] sm:$0xff]   ;;  %v22_v14 = vld [vmem:[%s437_s0 + $0x20] sm:$0xf] }
   0x3   :  { %v33_v5 = vunpack.c.l.bf16 %v349_v2  ;;  %v265_v10 = vunpack.c.h.bf16 %v294_v1  ;;  %v272_v12 = vunpack.c.l.bf16 %v296_v11  ;;  %v269_v13 = vunpack.c.h.bf16 %v295_v8 }
   0x4   :  { %36 = vadd.xlane.f32.xlu1 %v261_v3  ;;  %34 = vadd.xlane.f32.xlu0 %v260_v4  ;;  %v32_v15 = vunpack.c.l.bf16 %v22_v14  ;;  %v273_v16 = vunpack.c.h.bf16 %v296_v11 }
   0x5   :  { %v53_v7 = vsel %vm52_vm0, %v33_v5, 0.0 }
   0x8   :  { %38 = vadd.xlane.f32.xlu1 %v264_v6  ;;  %54 = vadd.xlane.f32.xlu0 %v53_v7 }
   0xc   :  { %42 = vadd.xlane.f32.xlu1 %v268_v9  ;;  %40 = vadd.xlane.f32.xlu0 %v265_v10 }
  0x10   :  { %46 = vadd.xlane.f32.xlu1 %v272_v12  ;;  %44 = vadd.xlane.f32.xlu0 %v269_v13 }
  0x14   :  { %50 = vadd.xlane.f32.xlu1 %v32_v15  ;;  %48 = vadd.xlane.f32.xlu0 %v273_v16 }
  0x8d   :  { %v37_v17 = vpop.xlane.xlu1 %36  ;;  %v35_v18 = vpop.xlane.xlu0 %34 }
  0x8e   :  { %v58_v19 = vmul.f32 0.0078125, %v37_v17  ;;  %v57_v20 = vmul.f32 0.0078125, %v35_v18 }
  0x90   :  { %v362_v21 = vsub.f32 %v261_v3, %v58_v19  ;;  %v364_v22 = vsub.f32 %v260_v4, %v57_v20  ;;  %v236_v20 = vld [vmem:[%s438_s1] ss:$0 sm:$0xff] }
  0x91   :  { %v39_v23 = vpop.xlane.xlu1 %38  ;;  %v55_v24 = vpop.xlane.xlu0 %54 }
  0x92   :  { %v59_v25 = vmul.f32 0.0078125, %v39_v23  ;;  %v78_v26 = vmul.f32 %v362_v21, %v362_v21  ;;  %v77_v27 = vmul.f32 %v364_v22, %v364_v22  ;;  %v66_v42 = vmul.f32 0.0078125, %v55_v24 }
  0x94   :  { %v370_v28 = vsub.f32 %v264_v6, %v59_v25  ;;  %89 = vadd.xlane.f32.xlu1 %v78_v26  ;;  %87 = vadd.xlane.f32.xlu0 %v77_v27  ;;  %v390_v51 = vsub.f32 %v33_v5, %v66_v42  ;;  %v237_v27 = vld [vmem:[%s439_s2] ss:$0 sm:$0xff] }
  0x95   :  { %v43_v29 = vpop.xlane.xlu1 %42  ;;  %v41_v30 = vpop.xlane.xlu0 %40 }
  0x96   :  { %v61_v31 = vmul.f32 0.0078125, %v43_v29  ;;  %v60_v32 = vmul.f32 0.0078125, %v41_v30  ;;  %v79_v33 = vmul.f32 %v370_v28, %v370_v28  ;;  %v86_v56 = vmul.f32 %v390_v51, %v390_v51 }
  0x98   :  { %v374_v34 = vsub.f32 %v268_v9, %v61_v31  ;;  %v376_v35 = vsub.f32 %v265_v10, %v60_v32  ;;  %91 = vadd.xlane.f32.xlu0 %v79_v33  ;;  %v105_v57 = vsel %vm52_vm0, %v86_v56, 0.0 }
  0x99   :  { %v47_v36 = vpop.xlane.xlu1 %46  ;;  %v45_v37 = vpop.xlane.xlu0 %44 }
  0x9a   :  { %v63_v38 = vmul.f32 0.0078125, %v47_v36  ;;  %v62_v39 = vmul.f32 0.0078125, %v45_v37  ;;  %v81_v40 = vmul.f32 %v374_v34, %v374_v34  ;;  %v80_v41 = vmul.f32 %v376_v35, %v376_v35 }
  0x9c   :  { %v382_v43 = vsub.f32 %v272_v12, %v63_v38  ;;  %v384_v44 = vsub.f32 %v269_v13, %v62_v39  ;;  %95 = vadd.xlane.f32.xlu0 %v81_v40  ;;  %93 = vadd.xlane.f32.xlu1 %v80_v41 }
  0x9d   :  { %v51_v45 = vpop.xlane.xlu1 %50  ;;  %v49_v46 = vpop.xlane.xlu0 %48 }
  0x9e   :  { %v65_v47 = vmul.f32 0.0078125, %v51_v45  ;;  %v64_v48 = vmul.f32 0.0078125, %v49_v46  ;;  %v83_v49 = vmul.f32 %v382_v43, %v382_v43  ;;  %v82_v50 = vmul.f32 %v384_v44, %v384_v44 }
  0xa0   :  { %v392_v52 = vsub.f32 %v32_v15, %v65_v47  ;;  %v394_v53 = vsub.f32 %v273_v16, %v64_v48  ;;  %99 = vadd.xlane.f32.xlu0 %v83_v49  ;;  %97 = vadd.xlane.f32.xlu1 %v82_v50 }
  0xa2   :  { %v85_v54 = vmul.f32 %v392_v52, %v392_v52  ;;  %v84_v55 = vmul.f32 %v394_v53, %v394_v53 }
  0xa4   :  { %103 = vadd.xlane.f32.xlu0 %v85_v54  ;;  %101 = vadd.xlane.f32.xlu1 %v84_v55 }
  0xa8   :  { %106 = vadd.xlane.f32.xlu1 %v105_v57 }
 0x11d   :  { %v90_v58 = vpop.xlane.xlu1 %89  ;;  %v88_v59 = vpop.xlane.xlu0 %87 }
 0x11e   :  { %v109_v60 = vmul.f32 0.0078125, %v90_v58  ;;  %v108_v61 = vmul.f32 0.0078125, %v88_v59 }
 0x120   :  { %v119_v62 = vadd.f32 1e-05, %v109_v60  ;;  %v118_v63 = vadd.f32 1e-05, %v108_v61 }
 0x121   :  { %v92_v0 = vpop.xlane.xlu0 %91 }
 0x122   :  { %300 = vrsqrt.f32 %v119_v62  ;;  %v110_v1 = vmul.f32 0.0078125, %v92_v0 }
 0x123   :  { %302 = vrsqrt.f32 %v118_v63 }
 0x124   :  { %v120_v2 = vadd.f32 1e-05, %v110_v1 }
 0x125   :  { %v94_v3 = vpop.xlane.xlu1 %93  ;;  %v96_v4 = vpop.xlane.xlu0 %95 }
 0x126   :  { %304 = vrsqrt.f32 %v120_v2  ;;  %v111_v5 = vmul.f32 0.0078125, %v94_v3  ;;  %v112_v6 = vmul.f32 0.0078125, %v96_v4 }
 0x128   :  { %v121_v7 = vadd.f32 1e-05, %v111_v5  ;;  %v122_v8 = vadd.f32 1e-05, %v112_v6 }
 0x129   :  { %v98_v9 = vpop.xlane.xlu1 %97  ;;  %v100_v10 = vpop.xlane.xlu0 %99 }
 0x12a   :  { %306 = vrsqrt.f32 %v121_v7  ;;  %v113_v11 = vmul.f32 0.0078125, %v98_v9  ;;  %v114_v12 = vmul.f32 0.0078125, %v100_v10 }
 0x12b   :  { %308 = vrsqrt.f32 %v122_v8 }
 0x12c   :  { %v123_v13 = vadd.f32 1e-05, %v113_v11  ;;  %v124_v14 = vadd.f32 1e-05, %v114_v12 }
 0x12d   :  { %v102_v15 = vpop.xlane.xlu1 %101  ;;  %v104_v16 = vpop.xlane.xlu0 %103 }
 0x12e   :  { %310 = vrsqrt.f32 %v123_v13  ;;  %v115_v17 = vmul.f32 0.0078125, %v102_v15  ;;  %v116_v18 = vmul.f32 0.0078125, %v104_v16 }
 0x12f   :  { %v301_v19 = vpop.eup %300  ;;  %312 = vrsqrt.f32 %v124_v14 }
 0x130   :  { %v303_v23 = vpop.eup %302  ;;  %v139_v24 = vmul.f32 %v301_v19, %v362_v21  ;;  %v125_v25 = vadd.f32 1e-05, %v115_v17  ;;  %v126_v26 = vadd.f32 1e-05, %v116_v18 }
 0x131   :  { %v138_v29 = vmul.f32 %v303_v23, %v364_v22  ;;  %v107_v30 = vpop.xlane.xlu1 %106 }
 0x132   :  { %v156_v31 = vmul.f32 %v236_v20, %v139_v24  ;;  %314 = vrsqrt.f32 %v125_v25  ;;  %v117_v32 = vmul.f32 0.0078125, %v107_v30 }
 0x133   :  { %v305_v33 = vpop.eup %304  ;;  %v155_v36 = vmul.f32 %v236_v20, %v138_v29  ;;  %316 = vrsqrt.f32 %v126_v26 }
 0x134   :  { %v173_v37 = vadd.f32 %v237_v27, %v156_v31  ;;  %v140_v38 = vmul.f32 %v305_v33, %v370_v28  ;;  %v127_v39 = vadd.f32 1e-05, %v117_v32 }
 0x135   :  { %v172_v21 = vadd.f32 %v237_v27, %v155_v36 }
 0x136   :  { %318 = vrsqrt.f32 %v127_v39  ;;  %v157_v45 = vmul.f32 %v236_v20, %v140_v38 }
 0x137   :  { %v307_v40 = vpop.eup %306  ;;  %v277_v41 = vpack.c.bf16 %v173_v37, %v172_v21 }
 0x138   :  { %v309_v42 = vpop.eup %308  ;;  %v141_v46 = vmul.f32 %v307_v40, %v376_v35  ;;  %v174_v50 = vadd.f32 %v237_v27, %v157_v45 }
 0x139   :  { %278 = vst [vmem:[%s440_s3] sm:$0xff] %v277_v41   ;;  %v142_v22 = vmul.f32 %v309_v42, %v374_v34 }
 0x13a   :  { %v158_v47 = vmul.f32 %v236_v20, %v141_v46 }
 0x13b   :  { %v311_v48 = vpop.eup %310  ;;  %v159_v54 = vmul.f32 %v236_v20, %v142_v22 }
 0x13c   :  { %v313_v49 = vpop.eup %312  ;;  %v175_v28 = vadd.f32 %v237_v27, %v158_v47  ;;  %v143_v55 = vmul.f32 %v311_v48, %v384_v44 }
 0x13d   :  { %v144_v56 = vmul.f32 %v313_v49, %v382_v43  ;;  %v176_v60 = vadd.f32 %v237_v27, %v159_v54 }
 0x13e   :  { %v282_v57 = vpack.c.bf16 %v175_v28, %v174_v50  ;;  %v160_v58 = vmul.f32 %v236_v20, %v143_v55 }
 0x13f   :  { %v315_v59 = vpop.eup %314  ;;  %v161_v61 = vmul.f32 %v236_v20, %v144_v56 }
 0x140   :  { %v317_v35 = vpop.eup %316  ;;  %297 = vst [vmem:[%s440_s3 + $0x8] sm:$0xff] %v282_v57   ;;  %v177_v34 = vadd.f32 %v237_v27, %v160_v58  ;;  %v145_v62 = vmul.f32 %v315_v59, %v394_v53 }
 0x141   :  { %v146_v63 = vmul.f32 %v317_v35, %v392_v52  ;;  %v178_v43 = vadd.f32 %v237_v27, %v161_v61 }
 0x142   :  { %v287_v0 = vpack.c.bf16 %v177_v34, %v176_v60  ;;  %v162_v1 = vmul.f32 %v236_v20, %v145_v62 }
 0x143   :  { %v319_v44 = vpop.eup %318  ;;  %v163_v2 = vmul.f32 %v236_v20, %v146_v63 }
 0x144   :  { %298 = vst [vmem:[%s440_s3 + $0x10] sm:$0xff] %v287_v0   ;;  %v179_v3 = vadd.f32 %v237_v27, %v162_v1  ;;  %v147_v4 = vmul.f32 %v319_v44, %v390_v51 }
 0x145   :  { %v180_v5 = vadd.f32 %v237_v27, %v163_v2 }
 0x146   :  { %v292_v6 = vpack.c.bf16 %v179_v3, %v178_v43  ;;  %v164_v7 = vmul.f32 %v236_v20, %v147_v4 }
 0x147   :  { %v256_v8 = vpack.c.bf16 %v180_v5, %v180_v5 }
 0x148   :  { %299 = vst [vmem:[%s440_s3 + $0x18] sm:$0xff] %v292_v6   ;;  %v181_v52 = vadd.f32 %v237_v27, %v164_v7 }
 0x149   :  { %230 = vst [vmem:[%s440_s3 + $0x20] sm:$0xf] %v256_v8 }
 0x14a   :  { %v257_v53 = vpack.c.bf16 %v181_v52, %v181_v52 }
 0x14c   :  { %231 = vst [vmem:[%s440_s3 + $0x24] sm:$0x7] %v257_v53 }

// kernel: _lambda_.47
= control target key start
LH: loop header
LB: loop body
LE: loop exit
PB: predicated region body
PF: predicated region fallthrough
CT: control target
= control target key end

     0   :  { %v457_v0 = vmov 0.0   ;;  %vm458_vm0 = vmmov 0   ;;  %s544_s1 = inlined_call_operand.vmem [shape: bf16[128,128], index: 1, kind: input, shape index: {}]   ;;  %s545_s0 = inlined_call_operand.vmem [shape: bf16[78,128], index: 0, kind: input, shape index: {}]   ;;  %s546_s2 = inlined_call_operand.vmem [shape: f32[1,128], index: 2, kind: input, shape index: {}]   ;;  %s547_s3 = inlined_call_operand.vmem [shape: bf16[78,128], index: 3, kind: output, shape index: {}]  }
   0x1   :  { %390 = vmatprep.subr.bf16.mxu0 %v457_v0  ;;  %28 = vst [vmem:[#allocation2 + $0x38] sm:$0x3f] %v457_v0  ;;  %v444_v1 = vld [vmem:[%s544_s1 + $0x38] sm:$0xff]   ;;  %426 = vmatprep.subr.bf16.mxu1 %v457_v0  ;;  %v445_v2 = vld [vmem:[%s544_s1 + $0x30] sm:$0xff]   ;;  %v446_v3 = vld [vmem:[%s544_s1 + $0x28] sm:$0xff]  }
   0x2   :  { %406 = vmatprep.mubr.msk.bf16.mxu0 %vm458_vm0, %v457_v0  ;;  %418 = vmatprep.mubr.msk.bf16.mxu1 %vm458_vm0, %v457_v0  ;;  %v447_v4 = vld [vmem:[%s544_s1 + $0x20] sm:$0xff]   ;;  %v448_v5 = vld [vmem:[%s544_s1 + $0x18] sm:$0xff]   ;;  %v449_v6 = vld [vmem:[%s544_s1 + $0x10] sm:$0xff]  }
   0x3   :  { %391 = vmatpush3.bf16.msra.mxu0 %v444_v1  ;;  %434 = vmatpush3.bf16.msra.mxu1 %v444_v1  ;;  %v450_v7 = vld [vmem:[%s544_s1 + $0x8] sm:$0xff]   ;;  %v451_v8 = vld [vmem:[%s544_s1] sm:$0xff]   ;;  %v453_v10 = vld [vmem:[%s545_s0 + $0x18] sm:$0xff]  }
   0x4   :  { %392 = vmatprep.subr.bf16.mxu0 %v457_v0  ;;  %427 = vmatprep.subr.bf16.mxu1 %v457_v0  ;;  %v452_v9 = vld [vmem:[%s545_s0] sm:$0xff]   ;;  %v454_v11 = vld [vmem:[%s545_s0 + $0x8] sm:$0xff]   ;;  %v456_v13 = vld [vmem:[%s545_s0 + $0x10] sm:$0xff]  }
   0x5   :  { %v455_v12 = vld [vmem:[%s545_s0 + $0x20] sm:$0x7f]  }
   0x6   :  { %v333_v18 = vld [vmem:[%s546_s2] ss:$0 sm:$0xff] }
   0x7   :  { %393 = vmatpush3.bf16.msra.mxu0 %v445_v2  ;;  %435 = vmatpush3.bf16.msra.mxu1 %v445_v2 }
   0x8   :  { %394 = vmatprep.subr.bf16.mxu0 %v457_v0  ;;  %428 = vmatprep.subr.bf16.mxu1 %v457_v0  ;;  %v38_v33 = vld [vmem:[#allocation2 + $0x38] sm:$0x3f] }
   0xb   :  { %395 = vmatpush3.bf16.msra.mxu0 %v446_v3  ;;  %436 = vmatpush3.bf16.msra.mxu1 %v446_v3 }
   0xc   :  { %396 = vmatprep.subr.bf16.mxu0 %v457_v0  ;;  %429 = vmatprep.subr.bf16.mxu1 %v457_v0 }
   0xf   :  { %397 = vmatpush3.bf16.msra.mxu0 %v447_v4  ;;  %437 = vmatpush3.bf16.msra.mxu1 %v447_v4 }
  0x10   :  { %398 = vmatprep.subr.bf16.mxu0 %v457_v0  ;;  %430 = vmatprep.subr.bf16.mxu1 %v457_v0 }
  0x13   :  { %399 = vmatpush3.bf16.msra.mxu0 %v448_v5  ;;  %438 = vmatpush3.bf16.msra.mxu1 %v448_v5 }
  0x14   :  { %400 = vmatprep.subr.bf16.mxu0 %v457_v0  ;;  %431 = vmatprep.subr.bf16.mxu1 %v457_v0 }
  0x17   :  { %401 = vmatpush3.bf16.msra.mxu0 %v449_v6  ;;  %439 = vmatpush3.bf16.msra.mxu1 %v449_v6 }
  0x18   :  { %402 = vmatprep.subr.bf16.mxu0 %v457_v0  ;;  %432 = vmatprep.subr.bf16.mxu1 %v457_v0 }
  0x1b   :  { %403 = vmatpush3.bf16.msra.mxu0 %v450_v7  ;;  %440 = vmatpush3.bf16.msra.mxu1 %v450_v7 }
  0x1c   :  { %404 = vmatprep.subr.bf16.mxu0 %v457_v0  ;;  %433 = vmatprep.subr.bf16.mxu1 %v457_v0 }
  0x1f   :  { %405 = vmatpush3.bf16.msra.mxu0 %v451_v8  ;;  %441 = vmatpush3.bf16.msra.mxu1 %v451_v8 }
  0x22   :  { %407 = vmatmul.mubr.bf16.vlgmr.msra.gmra.mxu0 %v452_v9  ;;  %419 = vmatmul.mubr.bf16.vlgmr.msra.gmra.mxu1 %v453_v10 }
  0x23   :  { %410 = vmatprep.mubr.msk.bf16.mxu0 %vm458_vm0, %v457_v0  ;;  %422 = vmatprep.mubr.msk.bf16.mxu1 %vm458_vm0, %v457_v0 }
  0x2a   :  { %411 = vmatmul.mubr.bf16.gmra.mxu0 %v454_v11  ;;  %423 = vmatmul.mubr.bf16.gmra.mxu1 %v455_v12 }
  0x2b   :  { %414 = vmatprep.mubr.msk.bf16.mxu0 %vm458_vm0, %v457_v0 }
  0x32   :  { %415 = vmatmul.mubr.bf16.gmra.mxu0 %v456_v13 }
  0xe2   :  { %v177_v14 = vpop.f32.mrf.mxu0  ;;  %v201_v15 = vpop.f32.mrf.mxu1 }
  0xe3   :  { %v256_v23 = vadd.f32 %v333_v18, %v177_v14  ;;  %v262_v24 = vadd.f32 %v333_v18, %v201_v15 }
  0xe4   :  { %v408_v16 = vpop.f32.mrf.mxu0  ;;  %v420_v17 = vpop.f32.mrf.mxu1 }
  0xe6   :  { %v180_v19 = vpop.f32.mrf.mxu0  ;;  %v204_v20 = vpop.f32.mrf.mxu1 }
  0xe7   :  { %v257_v25 = vadd.f32 %v333_v18, %v180_v19  ;;  %v263_v26 = vadd.f32 %v333_v18, %v204_v20 }
  0xe8   :  { %v409_v21 = vpop.f32.mrf.mxu0  ;;  %v421_v22 = vpop.f32.mrf.mxu1 }
  0xe9   :  { %v357_v29 = vpack.c.bf16 %v257_v25, %v256_v23  ;;  %v372_v30 = vpack.c.bf16 %v263_v26, %v262_v24 }
  0xea   :  { %v185_v27 = vpop.f32.mrf.mxu0  ;;  %v209_v28 = vpop.f32.mrf.mxu1 }
  0xeb   :  { %358 = vst [vmem:[%s547_s3] sm:$0xff] %v357_v29   ;;  %376 = vst [vmem:[%s547_s3 + $0x18] sm:$0xff] %v372_v30   ;;  %v264_v34 = vadd.f32 %v333_v18, %v209_v28  ;;  %v258_v41 = vadd.f32 %v333_v18, %v185_v27 }
  0xec   :  { %v412_v31 = vpop.f32.mrf.mxu0  ;;  %v424_v32 = vpop.f32.mrf.mxu1 }
  0xed   :  { %v352_v37 = vpack.c.bf16 %v264_v34, %v264_v34 }
  0xee   :  { %v188_v35 = vpop.f32.mrf.mxu0  ;;  %v212_v36 = vpop.f32.mrf.mxu1 }
  0xef   :  { %v225_v38 = vadd.f32 %v212_v36, %v38_v33  ;;  %314 = vst [vmem:[%s547_s3 + $0x20] sm:$0xf] %v352_v37  ;;  %v259_v42 = vadd.f32 %v333_v18, %v188_v35 }
  0xf0   :  { %v413_v39 = vpop.f32.mrf.mxu0  ;;  %v425_v40 = vpop.f32.mrf.mxu1 }
  0xf1   :  { %235 = vst [vmem:[#allocation2 + $0x38] sm:$0x3f] %v225_v38  ;;  %v362_v44 = vpack.c.bf16 %v259_v42, %v258_v41 }
  0xf2   :  { %v193_v43 = vpop.f32.mrf.mxu0 }
  0xf3   :  { %374 = vst [vmem:[%s547_s3 + $0x8] sm:$0xff] %v362_v44   ;;  %v260_v50 = vadd.f32 %v333_v18, %v193_v43 }
  0xf4   :  { %v416_v45 = vpop.f32.mrf.mxu0 }
  0xf6   :  { %v196_v46 = vpop.f32.mrf.mxu0 }
  0xf7   :  { %v261_v51 = vadd.f32 %v333_v18, %v196_v46 }
  0xf8   :  { %v248_v47 = vld [vmem:[#allocation2 + $0x38] sm:$0x3f]  ;;  %v417_v48 = vpop.f32.mrf.mxu0 }
  0xf9   :  { %v265_v49 = vadd.f32 %v333_v18, %v248_v47  ;;  %v367_v53 = vpack.c.bf16 %v261_v51, %v260_v50 }
  0xfb   :  { %v353_v52 = vpack.c.bf16 %v265_v49, %v265_v49  ;;  %375 = vst [vmem:[%s547_s3 + $0x10] sm:$0xff] %v367_v53  }
  0xfd   :  { %315 = vst [vmem:[%s547_s3 + $0x24] sm:$0x7] %v353_v52 }

// kernel: _lambda_.45
= control target key start
LH: loop header
LB: loop body
LE: loop exit
PB: predicated region body
PF: predicated region fallthrough
CT: control target
= control target key end

     0   :  { %v915_v0 = vmov 0.0   ;;  %vm916_vm0 = vmmov 0   ;;  %s1162_s1 = inlined_call_operand.vmem [shape: bf16[384,128], index: 1, kind: input, shape index: {}]   ;;  %s1163_s0 = inlined_call_operand.vmem [shape: bf16[78,384], index: 0, kind: input, shape index: {}]   ;;  %s1164_s2 = inlined_call_operand.vmem [shape: f32[1,128], index: 2, kind: input, shape index: {}]   ;;  %s1165_s3 = inlined_call_operand.vmem [shape: bf16[78,128], index: 3, kind: output, shape index: {}]  }
   0x1   :  { %813 = vmatprep.subr.bf16.mxu1 %v915_v0  ;;  %28 = vst [vmem:[#allocation2 + $0x38] sm:$0x3f] %v915_v0  ;;  %v851_v1 = vld [vmem:[%s1162_s1 + $0x78] sm:$0xff]   ;;  %829 = vmatprep.mubr.msk.bf16.mxu1 %vm916_vm0, %v915_v0  ;;  %v854_v4 = vld [vmem:[%s1162_s1 + $0x70] sm:$0xff]   ;;  %v857_v7 = vld [vmem:[%s1162_s1 + $0x68] sm:$0xff]  }
   0x2   :  { %v852_v2 = vld [vmem:[%s1162_s1 + $0xb8] sm:$0xff]   ;;  %754 = vmatprep.subr.bf16.mxu0 %v851_v1  ;;  %v855_v5 = vld [vmem:[%s1162_s1 + $0xb0] sm:$0xff]   ;;  %v858_v8 = vld [vmem:[%s1162_s1 + $0xa8] sm:$0xff]  }
   0x3   :  { %v853_v3 = vld [vmem:[%s1162_s1 + $0x38] sm:$0xff]   ;;  %814 = vmatpush3.bf16.msra.mxu1 %v852_v2  ;;  %v856_v6 = vld [vmem:[%s1162_s1 + $0x30] sm:$0xff]   ;;  %v859_v9 = vld [vmem:[%s1162_s1 + $0x28] sm:$0xff]  }
   0x4   :  { %755 = vmatpush3.bf16.msra.mxu0 %v853_v3  ;;  %815 = vmatprep.subr.bf16.mxu1 %v915_v0  ;;  %v860_v10 = vld [vmem:[%s1162_s1 + $0x60] sm:$0xff]   ;;  %v863_v13 = vld [vmem:[%s1162_s1 + $0x58] sm:$0xff]   ;;  %v866_v16 = vld [vmem:[%s1162_s1 + $0x50] sm:$0xff]  }
   0x5   :  { %756 = vmatprep.subr.bf16.mxu0 %v854_v4  ;;  %v861_v11 = vld [vmem:[%s1162_s1 + $0xa0] sm:$0xff]   ;;  %v864_v14 = vld [vmem:[%s1162_s1 + $0x98] sm:$0xff]   ;;  %v867_v17 = vld [vmem:[%s1162_s1 + $0x90] sm:$0xff]  }
   0x6   :  { %v862_v12 = vld [vmem:[%s1162_s1 + $0x20] sm:$0xff]   ;;  %v865_v15 = vld [vmem:[%s1162_s1 + $0x18] sm:$0xff]   ;;  %v868_v18 = vld [vmem:[%s1162_s1 + $0x10] sm:$0xff]  }
   0x7   :  { %816 = vmatpush3.bf16.msra.mxu1 %v855_v5  ;;  %v869_v19 = vld [vmem:[%s1162_s1 + $0x48] sm:$0xff]   ;;  %v872_v22 = vld [vmem:[%s1162_s1 + $0x40] sm:$0xff]   ;;  %v886_v33 = vld [vmem:[%s1163_s0 + $0x30] ss:$12 sps:$4 sm:$0xff]  }
   0x8   :  { %757 = vmatpush3.bf16.msra.mxu0 %v856_v6  ;;  %817 = vmatprep.subr.bf16.mxu1 %v915_v0  ;;  %v870_v20 = vld [vmem:[%s1162_s1 + $0x88] sm:$0xff]   ;;  %v877_v23 = vld [vmem:[%s1163_s0 + $0x4] ss:$12 sps:$4 sm:$0xff]   ;;  %v883_v31 = vld [vmem:[%s1163_s0 + $0x34] ss:$12 sps:$4 sm:$0xff]  }
   0x9   :  { %758 = vmatprep.subr.bf16.mxu0 %v857_v7  ;;  %v871_v21 = vld [vmem:[%s1162_s1 + $0x8] sm:$0xff]   ;;  %v873_v24 = vld [vmem:[%s1162_s1 + $0x80] sm:$0xff]   ;;  %363 = vmatprep.mubr.bf16.mxu0 %v877_v23  ;;  %v889_v35 = vld [vmem:[%s1163_s0 + $0x50] ss:$12 sps:$4 sm:$0xff]  }
   0xa   :  { %v874_v25 = vld [vmem:[%s1162_s1] sm:$0xff]   ;;  %v878_v26 = vld [vmem:[%s1163_s0 + $0x8] ss:$12 sps:$4 sm:$0xff]   ;;  %v887_v34 = vld [vmem:[%s1163_s0 + $0x4c] ss:$12 sps:$4 sm:$0xff]  }
   0xb   :  { %818 = vmatpush3.bf16.msra.mxu1 %v858_v8  ;;  %v875_v27 = vld [vmem:[%s1163_s0] ss:$12 sps:$4 sm:$0xff]   ;;  %v879_v28 = vld [vmem:[%s1163_s0 + $0x1c] ss:$12 sps:$4 sm:$0xff]   ;;  %v882_v30 = vld [vmem:[%s1163_s0 + $0x18] ss:$12 sps:$4 sm:$0xff]  }
   0xc   :  { %759 = vmatpush3.bf16.msra.mxu0 %v859_v9  ;;  %819 = vmatprep.subr.bf16.mxu1 %v915_v0  ;;  %v881_v29 = vld [vmem:[%s1163_s0 + $0x20] ss:$12 sps:$4 sm:$0xff]   ;;  %v885_v32 = vld [vmem:[%s1163_s0 + $0x38] ss:$12 sps:$4 sm:$0xff]   ;;  %v890_v36 = vld [vmem:[%s1163_s0 + $0x48] ss:$12 sps:$4 sm:$0xff]  }
   0xd   :  { %760 = vmatprep.subr.bf16.mxu0 %v860_v10  ;;  %v891_v37 = vld [vmem:[%s1163_s0 + $0x64] ss:$12 sps:$4 sm:$0x7f]   ;;  %v893_v38 = vld [vmem:[%s1163_s0 + $0x68] ss:$12 sps:$4 sm:$0x7f]  }
   0xe   :  { %v894_v39 = vld [vmem:[%s1163_s0 + $0x60] ss:$12 sps:$4 sm:$0x7f]  }
   0xf   :  { %820 = vmatpush3.bf16.msra.mxu1 %v861_v11  ;;  %v1076_v49 = vld [vmem:[%s1164_s2] ss:$0 sm:$0xff] }
  0x10   :  { %761 = vmatpush3.bf16.msra.mxu0 %v862_v12  ;;  %821 = vmatprep.subr.bf16.mxu1 %v915_v0 }
  0x11   :  { %762 = vmatprep.subr.bf16.mxu0 %v863_v13 }
  0x13   :  { %822 = vmatpush3.bf16.msra.mxu1 %v864_v14 }
  0x14   :  { %763 = vmatpush3.bf16.msra.mxu0 %v865_v15  ;;  %823 = vmatprep.subr.bf16.mxu1 %v915_v0 }
  0x15   :  { %764 = vmatprep.subr.bf16.mxu0 %v866_v16 }
  0x17   :  { %824 = vmatpush3.bf16.msra.mxu1 %v867_v17 }
  0x18   :  { %765 = vmatpush3.bf16.msra.mxu0 %v868_v18  ;;  %825 = vmatprep.subr.bf16.mxu1 %v915_v0 }
  0x19   :  { %766 = vmatprep.subr.bf16.mxu0 %v869_v19 }
  0x1b   :  { %826 = vmatpush3.bf16.msra.mxu1 %v870_v20 }
  0x1c   :  { %767 = vmatpush3.bf16.msra.mxu0 %v871_v21  ;;  %827 = vmatprep.subr.bf16.mxu1 %v915_v0 }
  0x1d   :  { %768 = vmatprep.subr.bf16.mxu0 %v872_v22 }
  0x1f   :  { %828 = vmatpush3.bf16.msra.mxu1 %v873_v24 }
  0x20   :  { %769 = vmatpush3.bf16.msra.mxu0 %v874_v25 }
  0x22   :  { %830 = vmatmul.mubr.bf16.vlgmr.msra.gmra.mxu1 %v878_v26 }
  0x23   :  { %364 = vmatmul.mubr.bf16.vlgmr.msra.gmra.mxu0 %v875_v27  ;;  %833 = vmatprep.mubr.msk.bf16.mxu1 %vm916_vm0, %v915_v0 }
  0x24   :  { %371 = vmatprep.mubr.bf16.mxu0 %v879_v28 }
  0x2a   :  { %834 = vmatmul.mubr.bf16.gmra.mxu1 %v881_v29 }
  0x2b   :  { %372 = vmatmul.mubr.bf16.gmra.mxu0 %v882_v30  ;;  %837 = vmatprep.mubr.msk.bf16.mxu1 %vm916_vm0, %v915_v0 }
  0x2c   :  { %379 = vmatprep.mubr.bf16.mxu0 %v883_v31 }
  0x32   :  { %838 = vmatmul.mubr.bf16.gmra.mxu1 %v885_v32 }
  0x33   :  { %380 = vmatmul.mubr.bf16.gmra.mxu0 %v886_v33  ;;  %841 = vmatprep.mubr.msk.bf16.mxu1 %vm916_vm0, %v915_v0 }
  0x34   :  { %387 = vmatprep.mubr.bf16.mxu0 %v887_v34 }
  0x3a   :  { %842 = vmatmul.mubr.bf16.gmra.mxu1 %v889_v35 }
  0x3b   :  { %388 = vmatmul.mubr.bf16.gmra.mxu0 %v890_v36  ;;  %845 = vmatprep.mubr.msk.bf16.mxu1 %vm916_vm0, %v915_v0 }
  0x3c   :  { %395 = vmatprep.mubr.bf16.mxu0 %v891_v37 }
  0x42   :  { %846 = vmatmul.mubr.bf16.gmra.mxu1 %v893_v38 }
  0x43   :  { %396 = vmatmul.mubr.bf16.gmra.mxu0 %v894_v39 }
  0xe2   :  { %v438_v40 = vpop.f32.mrf.mxu1 }
  0xe3   :  { %v770_v41 = vpop.f32.mrf.mxu0 }
  0xe4   :  { %v831_v42 = vpop.f32.mrf.mxu1 }
  0xe5   :  { %v771_v43 = vpop.f32.mrf.mxu0 }
  0xe6   :  { %v772_v44 = vadd.f32 %v771_v43, %v770_v41  ;;  %v441_v45 = vpop.f32.mrf.mxu1 }
  0xe7   :  { %v773_v46 = vpop.f32.mrf.mxu0 }
  0xe8   :  { %v439_v47 = vadd.f32 %v772_v44, %v438_v40  ;;  %v832_v48 = vpop.f32.mrf.mxu1 }
  0xe9   :  { %v774_v50 = vpop.f32.mrf.mxu0 }
  0xea   :  { %v775_v51 = vadd.f32 %v774_v50, %v773_v46  ;;  %v446_v52 = vpop.f32.mrf.mxu1  ;;  %v1079_v54 = vadd.f32 %v1076_v49, %v439_v47 }
  0xeb   :  { %v776_v53 = vpop.f32.mrf.mxu0 }
  0xec   :  { %v442_v55 = vadd.f32 %v775_v51, %v441_v45  ;;  %v835_v56 = vpop.f32.mrf.mxu1  ;;  %v527_v58 = vmul.f32 %v1079_v54, %v1079_v54 }
  0xed   :  { %v777_v57 = vpop.f32.mrf.mxu0 }
  0xee   :  { %v778_v59 = vadd.f32 %v777_v57, %v776_v53  ;;  %v449_v60 = vpop.f32.mrf.mxu1  ;;  %v537_v62 = vmul.f32 %v527_v58, %v1079_v54  ;;  %v1085_v63 = vadd.f32 %v1076_v49, %v442_v55 }
  0xef   :  { %v779_v61 = vpop.f32.mrf.mxu0 }
  0xf0   :  { %v447_v0 = vadd.f32 %v778_v59, %v446_v52  ;;  %v836_v1 = vpop.f32.mrf.mxu1  ;;  %v547_v3 = vmul.f32 0.044715, %v537_v62  ;;  %v528_v4 = vmul.f32 %v1085_v63, %v1085_v63 }
  0xf1   :  { %v780_v2 = vpop.f32.mrf.mxu0 }
  0xf2   :  { %v781_v5 = vadd.f32 %v780_v2, %v779_v61  ;;  %v454_v6 = vpop.f32.mrf.mxu1  ;;  %v557_v8 = vadd.f32 %v547_v3, %v1079_v54  ;;  %v538_v9 = vmul.f32 %v528_v4, %v1085_v63  ;;  %v1092_v10 = vadd.f32 %v1076_v49, %v447_v0 }
  0xf3   :  { %v782_v7 = vpop.f32.mrf.mxu0 }
  0xf4   :  { %v450_v11 = vadd.f32 %v781_v5, %v449_v60  ;;  %v839_v12 = vpop.f32.mrf.mxu1  ;;  %v567_v14 = vmul.f32 0.7978846, %v557_v8  ;;  %v548_v15 = vmul.f32 0.044715, %v538_v9  ;;  %v529_v16 = vmul.f32 %v1092_v10, %v1092_v10 }
  0xf5   :  { %v783_v13 = vpop.f32.mrf.mxu0 }
  0xf6   :  { %v457_v17 = vpop.f32.mrf.mxu1  ;;  %v784_v18 = vadd.f32 %v783_v13, %v782_v7  ;;  %895 = vtanh.f32 %v567_v14  ;;  %v558_v20 = vadd.f32 %v548_v15, %v1085_v63  ;;  %v539_v21 = vmul.f32 %v529_v16, %v1092_v10 }
  0xf7   :  { %v785_v19 = vpop.f32.mrf.mxu0  ;;  %v1099_v22 = vadd.f32 %v1076_v49, %v450_v11 }
  0xf8   :  { %v840_v23 = vpop.f32.mrf.mxu1  ;;  %v455_v24 = vadd.f32 %v784_v18, %v454_v6  ;;  %v568_v26 = vmul.f32 0.7978846, %v558_v20  ;;  %v549_v27 = vmul.f32 0.044715, %v539_v21 }
  0xf9   :  { %v786_v25 = vpop.f32.mrf.mxu0  ;;  %v530_v28 = vmul.f32 %v1099_v22, %v1099_v22 }
  0xfa   :  { %v787_v29 = vadd.f32 %v786_v25, %v785_v19  ;;  %v462_v30 = vpop.f32.mrf.mxu1  ;;  %897 = vtanh.f32 %v568_v26  ;;  %v559_v32 = vadd.f32 %v549_v27, %v1092_v10  ;;  %v1106_v36 = vadd.f32 %v1076_v49, %v455_v24  ;;  %v38_v26 = vld [vmem:[#allocation2 + $0x38] sm:$0x3f] }
  0xfb   :  { %v788_v31 = vpop.f32.mrf.mxu0  ;;  %v540_v33 = vmul.f32 %v530_v28, %v1099_v22 }
  0xfc   :  { %v458_v34 = vadd.f32 %v787_v29, %v457_v17  ;;  %v843_v35 = vpop.f32.mrf.mxu1  ;;  %v569_v38 = vmul.f32 0.7978846, %v559_v32  ;;  %v531_v42 = vmul.f32 %v1106_v36, %v1106_v36 }
  0xfd   :  { %v789_v37 = vpop.f32.mrf.mxu0  ;;  %v550_v39 = vmul.f32 0.044715, %v540_v33 }
  0xfe   :  { %v790_v40 = vadd.f32 %v789_v37, %v788_v31  ;;  %v465_v41 = vpop.f32.mrf.mxu1  ;;  %899 = vtanh.f32 %v569_v38  ;;  %v1112_v45 = vadd.f32 %v1076_v49, %v458_v34  ;;  %v541_v48 = vmul.f32 %v531_v42, %v1106_v36 }
  0xff   :  { %v791_v43 = vpop.f32.mrf.mxu0  ;;  %v560_v44 = vadd.f32 %v550_v39, %v1099_v22 }
 0x100   :  { %v463_v46 = vadd.f32 %v790_v40, %v462_v30  ;;  %v844_v47 = vpop.f32.mrf.mxu1  ;;  %v532_v52 = vmul.f32 %v1112_v45, %v1112_v45  ;;  %v551_v56 = vmul.f32 0.044715, %v541_v48 }
 0x101   :  { %v792_v50 = vpop.f32.mrf.mxu0  ;;  %v570_v51 = vmul.f32 0.7978846, %v560_v44 }
 0x102   :  { %v793_v53 = vadd.f32 %v792_v50, %v791_v43  ;;  %v470_v55 = vpop.f32.mrf.mxu1  ;;  %v542_v58 = vmul.f32 %v532_v52, %v1112_v45  ;;  %v1119_v59 = vadd.f32 %v1076_v49, %v463_v46  ;;  %v561_v0 = vadd.f32 %v551_v56, %v1106_v36 }
 0x103   :  { %v794_v57 = vpop.f32.mrf.mxu0  ;;  %901 = vtanh.f32 %v570_v51  ;;  %v896_v62 = vpop.eup %895 }
 0x104   :  { %v466_v60 = vadd.f32 %v793_v53, %v465_v41  ;;  %v847_v61 = vpop.f32.mrf.mxu1  ;;  %v587_v2 = vadd.f32 1.0, %v896_v62  ;;  %v552_v3 = vmul.f32 0.044715, %v542_v58  ;;  %v533_v4 = vmul.f32 %v1119_v59, %v1119_v59 }
 0x105   :  { %v795_v1 = vpop.f32.mrf.mxu0  ;;  %v571_v6 = vmul.f32 0.7978846, %v561_v0 }
 0x106   :  { %v473_v5 = vpop.f32.mrf.mxu1  ;;  %v796_v7 = vadd.f32 %v795_v1, %v794_v57  ;;  %v562_v9 = vadd.f32 %v552_v3, %v1112_v45  ;;  %v543_v11 = vmul.f32 %v533_v4, %v1119_v59  ;;  %v1127_v12 = vadd.f32 %v1076_v49, %v466_v60 }
 0x107   :  { %v797_v8 = vpop.f32.mrf.mxu0  ;;  %v898_v14 = vpop.eup %897  ;;  %903 = vtanh.f32 %v571_v6  ;;  %v597_v17 = vmul.f32 0.5, %v587_v2 }
 0x108   :  { %v848_v13 = vpop.f32.mrf.mxu1  ;;  %v471_v15 = vadd.f32 %v796_v7, %v470_v55  ;;  %v588_v18 = vadd.f32 1.0, %v898_v14  ;;  %v572_v19 = vmul.f32 0.7978846, %v562_v9  ;;  %v553_v20 = vmul.f32 0.044715, %v543_v11 }
 0x109   :  { %v798_v16 = vpop.f32.mrf.mxu0  ;;  %v534_v21 = vmul.f32 %v1127_v12, %v1127_v12  ;;  %v607_v31 = vmul.f32 %v597_v17, %v1079_v54 }
 0x10a   :  { %v799_v23 = vadd.f32 %v798_v16, %v797_v8  ;;  %v598_v24 = vmul.f32 0.5, %v588_v18  ;;  %905 = vtanh.f32 %v572_v19  ;;  %v563_v25 = vadd.f32 %v553_v20, %v1119_v59 }
 0x10b   :  { %v900_v27 = vpop.eup %899  ;;  %v544_v28 = vmul.f32 %v534_v21, %v1127_v12  ;;  %v525_v29 = vadd.f32 %v1076_v49, %v471_v15 }
 0x10c   :  { %v474_v30 = vadd.f32 %v799_v23, %v473_v5  ;;  %v608_v32 = vmul.f32 %v598_v24, %v1085_v63  ;;  %v589_v33 = vadd.f32 1.0, %v900_v27  ;;  %v573_v34 = vmul.f32 0.7978846, %v563_v25 }
 0x10d   :  { %v554_v35 = vmul.f32 0.044715, %v544_v28  ;;  %v535_v37 = vmul.f32 %v525_v29, %v525_v29 }
 0x10e   :  { %v486_v38 = vadd.f32 %v474_v30, %v38_v26  ;;  %v734_v39 = vpack.c.bf16 %v608_v32, %v607_v31  ;;  %907 = vtanh.f32 %v573_v34  ;;  %v599_v43 = vmul.f32 0.5, %v589_v33 }
 0x10f   :  { %v564_v41 = vadd.f32 %v554_v35, %v1127_v12  ;;  %v545_v42 = vmul.f32 %v535_v37, %v525_v29 }
 0x110   :  { %v902_v40 = vpop.eup %901  ;;  %496 = vst [vmem:[#allocation2 + $0x38] sm:$0x3f] %v486_v38  ;;  %735 = vst [vmem:[%s1165_s3] sm:$0xff] %v734_v39   ;;  %v609_v50 = vmul.f32 %v599_v43, %v1092_v10 }
 0x111   :  { %v590_v54 = vadd.f32 1.0, %v902_v40  ;;  %v574_v44 = vmul.f32 0.7978846, %v564_v41  ;;  %v555_v63 = vmul.f32 0.044715, %v545_v42 }
 0x113   :  { %v600_v46 = vmul.f32 0.5, %v590_v54  ;;  %909 = vtanh.f32 %v574_v44  ;;  %v565_v47 = vadd.f32 %v555_v63, %v525_v29 }
 0x114   :  { %v904_v48 = vpop.eup %903 }
 0x115   :  { %v610_v51 = vmul.f32 %v600_v46, %v1099_v22  ;;  %v591_v52 = vadd.f32 1.0, %v904_v48  ;;  %v575_v53 = vmul.f32 0.7978846, %v565_v47 }
 0x117   :  { %v739_v55 = vpack.c.bf16 %v610_v51, %v609_v50  ;;  %v509_v56 = vld [vmem:[#allocation2 + $0x38] sm:$0x3f]  ;;  %v906_v57 = vpop.eup %905  ;;  %911 = vtanh.f32 %v575_v53  ;;  %v601_v60 = vmul.f32 0.5, %v591_v52 }
 0x118   :  { %v526_v58 = vadd.f32 %v1076_v49, %v509_v56  ;;  %v592_v61 = vadd.f32 1.0, %v906_v57 }
 0x119   :  { %751 = vst [vmem:[%s1165_s3 + $0x8] sm:$0xff] %v739_v55   ;;  %v611_v22 = vmul.f32 %v601_v60, %v1106_v36 }
 0x11a   :  { %v536_v62 = vmul.f32 %v526_v58, %v526_v58  ;;  %v602_v0 = vmul.f32 0.5, %v592_v61 }
 0x11b   :  { %v908_v1 = vpop.eup %907 }
 0x11c   :  { %v546_v10 = vmul.f32 %v536_v62, %v526_v58  ;;  %v612_v2 = vmul.f32 %v602_v0, %v1112_v45  ;;  %v593_v3 = vadd.f32 1.0, %v908_v1 }
 0x11e   :  { %v556_v4 = vmul.f32 0.044715, %v546_v10  ;;  %v744_v5 = vpack.c.bf16 %v612_v2, %v611_v22  ;;  %v603_v49 = vmul.f32 0.5, %v593_v3 }
 0x120   :  { %v566_v6 = vadd.f32 %v556_v4, %v526_v58  ;;  %v910_v7 = vpop.eup %909  ;;  %752 = vst [vmem:[%s1165_s3 + $0x10] sm:$0xff] %v744_v5   ;;  %v613_v14 = vmul.f32 %v603_v49, %v1119_v59 }
 0x121   :  { %v594_v8 = vadd.f32 1.0, %v910_v7 }
 0x122   :  { %v576_v9 = vmul.f32 0.7978846, %v566_v6 }
 0x123   :  { %v604_v11 = vmul.f32 0.5, %v594_v8 }
 0x124   :  { %913 = vtanh.f32 %v576_v9  ;;  %v912_v13 = vpop.eup %911 }
 0x125   :  { %v614_v36 = vmul.f32 %v604_v11, %v1127_v12  ;;  %v595_v45 = vadd.f32 1.0, %v912_v13 }
 0x127   :  { %v749_v15 = vpack.c.bf16 %v614_v36, %v613_v14  ;;  %v605_v16 = vmul.f32 0.5, %v595_v45 }
 0x129   :  { %753 = vst [vmem:[%s1165_s3 + $0x18] sm:$0xff] %v749_v15   ;;  %v615_v17 = vmul.f32 %v605_v16, %v525_v29 }
 0x12b   :  { %v729_v18 = vpack.c.bf16 %v615_v17, %v615_v17 }
 0x12d   :  { %665 = vst [vmem:[%s1165_s3 + $0x20] sm:$0xf] %v729_v18 }
 0x131   :  { %v914_v19 = vpop.eup %913 }
 0x132   :  { %v596_v20 = vadd.f32 1.0, %v914_v19 }
 0x134   :  { %v606_v21 = vmul.f32 0.5, %v596_v20 }
 0x136   :  { %v616_v23 = vmul.f32 %v606_v21, %v526_v58 }
 0x138   :  { %v730_v59 = vpack.c.bf16 %v616_v23, %v616_v23 }
 0x13a   :  { %666 = vst [vmem:[%s1165_s3 + $0x24] sm:$0x7] %v730_v59 }

// kernel: _lambda_.49
= control target key start
LH: loop header
LB: loop body
LE: loop exit
PB: predicated region body
PF: predicated region fallthrough
CT: control target
= control target key end

     0   :  { %vm85_vm0 = vcmask 1045504   ;;  %s513_s0 = inlined_call_operand.vmem [shape: bf16[78,128], index: 0, kind: input, shape index: {}]   ;;  %s514_s3 = inlined_call_operand.vmem [shape: bf16[78,128], index: 3, kind: input, shape index: {}]   ;;  %s515_s1 = inlined_call_operand.vmem [shape: f32[1,128], index: 1, kind: input, shape index: {}]   ;;  %s516_s2 = inlined_call_operand.vmem [shape: f32[1,128], index: 2, kind: input, shape index: {}]   ;;  %s517_s4 = inlined_call_operand.vmem [shape: bf16[78,128], index: 4, kind: output, shape index: {}]  }
   0x1   :  { %v292_v0 = vld [vmem:[%s513_s0] sm:$0xff]   ;;  %v343_v2 = vld [vmem:[%s513_s0 + $0x8] sm:$0xff]   ;;  %v344_v14 = vld [vmem:[%s513_s0 + $0x10] sm:$0xff]  }
   0x2   :  { %v308_v1 = vld [vmem:[%s514_s3] sm:$0xff]   ;;  %v294_v3 = vunpack.c.h.bf16 %v292_v0  ;;  %v293_v5 = vunpack.c.l.bf16 %v292_v0  ;;  %v346_v7 = vld [vmem:[%s514_s3 + $0x8] sm:$0xff]   ;;  %v297_v10 = vunpack.c.l.bf16 %v343_v2  ;;  %v347_v15 = vld [vmem:[%s514_s3 + $0x10] sm:$0xff]   ;;  %v301_v19 = vunpack.c.l.bf16 %v344_v14 }
   0x3   :  { %v310_v4 = vunpack.c.h.bf16 %v308_v1  ;;  %v309_v6 = vunpack.c.l.bf16 %v308_v1  ;;  %v26_v8 = vld [vmem:[%s513_s0 + $0x24] sm:$0x7]  ;;  %v313_v11 = vunpack.c.l.bf16 %v346_v7  ;;  %v317_v21 = vunpack.c.l.bf16 %v347_v15  ;;  %v345_v24 = vld [vmem:[%s513_s0 + $0x18] sm:$0xff]   ;;  %v25_v33 = vld [vmem:[%s513_s0 + $0x20] sm:$0xf] }
   0x4   :  { %v46_v9 = vld [vmem:[%s514_s3 + $0x24] sm:$0x7]  ;;  %v36_v12 = vunpack.c.l.bf16 %v26_v8  ;;  %v298_v22 = vunpack.c.h.bf16 %v343_v2  ;;  %v314_v23 = vunpack.c.h.bf16 %v346_v7  ;;  %v348_v25 = vld [vmem:[%s514_s3 + $0x18] sm:$0xff]   ;;  %v305_v27 = vunpack.c.l.bf16 %v345_v24  ;;  %v45_v34 = vld [vmem:[%s514_s3 + $0x20] sm:$0xf] }
   0x5   :  { %v56_v13 = vunpack.c.l.bf16 %v46_v9  ;;  %v58_v16 = vadd.f32 %v310_v4, %v294_v3  ;;  %v57_v17 = vadd.f32 %v309_v6, %v293_v5  ;;  %v59_v20 = vadd.f32 %v313_v11, %v297_v10 }
   0x6   :  { %v321_v28 = vunpack.c.l.bf16 %v348_v25  ;;  %v61_v29 = vadd.f32 %v317_v21, %v301_v19  ;;  %v60_v30 = vadd.f32 %v314_v23, %v298_v22  ;;  %v302_v31 = vunpack.c.h.bf16 %v344_v14 }
   0x7   :  { %v421_v18 = vadd.f32 %v56_v13, %v36_v12  ;;  %69 = vadd.xlane.f32.xlu1 %v58_v16  ;;  %67 = vadd.xlane.f32.xlu0 %v57_v17  ;;  %v318_v32 = vunpack.c.h.bf16 %v347_v15  ;;  %v35_v36 = vunpack.c.l.bf16 %v25_v33  ;;  %v55_v38 = vunpack.c.l.bf16 %v45_v34 }
   0x8   :  { %v63_v35 = vadd.f32 %v321_v28, %v305_v27  ;;  %v306_v39 = vunpack.c.h.bf16 %v345_v24  ;;  %v322_v40 = vunpack.c.h.bf16 %v348_v25 }
   0x9   :  { %v86_v26 = vsel %vm85_vm0, %v421_v18, 0.0  ;;  %v62_v37 = vadd.f32 %v318_v32, %v302_v31  ;;  %v65_v41 = vadd.f32 %v55_v38, %v35_v36 }
   0xa   :  { %v64_v42 = vadd.f32 %v322_v40, %v306_v39 }
   0xb   :  { %71 = vadd.xlane.f32.xlu1 %v59_v20  ;;  %87 = vadd.xlane.f32.xlu0 %v86_v26 }
   0xf   :  { %75 = vadd.xlane.f32.xlu1 %v61_v29  ;;  %73 = vadd.xlane.f32.xlu0 %v60_v30 }
  0x13   :  { %79 = vadd.xlane.f32.xlu1 %v63_v35  ;;  %77 = vadd.xlane.f32.xlu0 %v62_v37 }
  0x17   :  { %83 = vadd.xlane.f32.xlu1 %v65_v41  ;;  %81 = vadd.xlane.f32.xlu0 %v64_v42 }
  0x90   :  { %v70_v43 = vpop.xlane.xlu1 %69  ;;  %v68_v44 = vpop.xlane.xlu0 %67 }
  0x91   :  { %v91_v45 = vmul.f32 0.0078125, %v70_v43  ;;  %v90_v46 = vmul.f32 0.0078125, %v68_v44 }
  0x93   :  { %v437_v47 = vsub.f32 %v58_v16, %v91_v45  ;;  %v439_v48 = vsub.f32 %v57_v17, %v90_v46  ;;  %v269_v46 = vld [vmem:[%s515_s1] ss:$0 sm:$0xff] }
  0x94   :  { %v72_v49 = vpop.xlane.xlu1 %71  ;;  %v88_v50 = vpop.xlane.xlu0 %87 }
  0x95   :  { %v92_v51 = vmul.f32 0.0078125, %v72_v49  ;;  %v111_v52 = vmul.f32 %v437_v47, %v437_v47  ;;  %v110_v53 = vmul.f32 %v439_v48, %v439_v48  ;;  %v99_v4 = vmul.f32 0.0078125, %v88_v50 }
  0x97   :  { %v445_v54 = vsub.f32 %v59_v20, %v92_v51  ;;  %122 = vadd.xlane.f32.xlu1 %v111_v52  ;;  %120 = vadd.xlane.f32.xlu0 %v110_v53  ;;  %v466_v13 = vsub.f32 %v421_v18, %v99_v4  ;;  %v270_v53 = vld [vmem:[%s516_s2] ss:$0 sm:$0xff] }
  0x98   :  { %v76_v55 = vpop.xlane.xlu1 %75  ;;  %v74_v56 = vpop.xlane.xlu0 %73 }
  0x99   :  { %v94_v57 = vmul.f32 0.0078125, %v76_v55  ;;  %v93_v58 = vmul.f32 0.0078125, %v74_v56  ;;  %v112_v59 = vmul.f32 %v445_v54, %v445_v54  ;;  %v119_v19 = vmul.f32 %v466_v13, %v466_v13 }
  0x9b   :  { %v449_v60 = vsub.f32 %v61_v29, %v94_v57  ;;  %v451_v61 = vsub.f32 %v60_v30, %v93_v58  ;;  %124 = vadd.xlane.f32.xlu0 %v112_v59  ;;  %v138_v18 = vsel %vm85_vm0, %v119_v19, 0.0 }
  0x9c   :  { %v80_v62 = vpop.xlane.xlu1 %79  ;;  %v78_v63 = vpop.xlane.xlu0 %77 }
  0x9d   :  { %v96_v0 = vmul.f32 0.0078125, %v80_v62  ;;  %v95_v1 = vmul.f32 0.0078125, %v78_v63  ;;  %v114_v2 = vmul.f32 %v449_v60, %v449_v60  ;;  %v113_v3 = vmul.f32 %v451_v61, %v451_v61 }
  0x9f   :  { %v457_v5 = vsub.f32 %v63_v35, %v96_v0  ;;  %v459_v6 = vsub.f32 %v62_v37, %v95_v1  ;;  %128 = vadd.xlane.f32.xlu0 %v114_v2  ;;  %126 = vadd.xlane.f32.xlu1 %v113_v3 }
  0xa0   :  { %v84_v7 = vpop.xlane.xlu1 %83  ;;  %v82_v8 = vpop.xlane.xlu0 %81 }
  0xa1   :  { %v98_v9 = vmul.f32 0.0078125, %v84_v7  ;;  %v97_v10 = vmul.f32 0.0078125, %v82_v8  ;;  %v116_v11 = vmul.f32 %v457_v5, %v457_v5  ;;  %v115_v12 = vmul.f32 %v459_v6, %v459_v6 }
  0xa3   :  { %v468_v14 = vsub.f32 %v65_v41, %v98_v9  ;;  %v470_v15 = vsub.f32 %v64_v42, %v97_v10  ;;  %132 = vadd.xlane.f32.xlu0 %v116_v11  ;;  %130 = vadd.xlane.f32.xlu1 %v115_v12 }
  0xa5   :  { %v118_v16 = vmul.f32 %v468_v14, %v468_v14  ;;  %v117_v17 = vmul.f32 %v470_v15, %v470_v15 }
  0xa7   :  { %136 = vadd.xlane.f32.xlu0 %v118_v16  ;;  %134 = vadd.xlane.f32.xlu1 %v117_v17 }
  0xab   :  { %139 = vadd.xlane.f32.xlu1 %v138_v18 }
 0x120   :  { %v123_v20 = vpop.xlane.xlu1 %122  ;;  %v121_v21 = vpop.xlane.xlu0 %120 }
 0x121   :  { %v142_v22 = vmul.f32 0.0078125, %v123_v20  ;;  %v141_v23 = vmul.f32 0.0078125, %v121_v21 }
 0x123   :  { %v152_v24 = vadd.f32 1e-05, %v142_v22  ;;  %v151_v25 = vadd.f32 1e-05, %v141_v23 }
 0x124   :  { %v125_v26 = vpop.xlane.xlu0 %124 }
 0x125   :  { %352 = vrsqrt.f32 %v152_v24  ;;  %v143_v27 = vmul.f32 0.0078125, %v125_v26 }
 0x126   :  { %354 = vrsqrt.f32 %v151_v25 }
 0x127   :  { %v153_v28 = vadd.f32 1e-05, %v143_v27 }
 0x128   :  { %v127_v29 = vpop.xlane.xlu1 %126  ;;  %v129_v30 = vpop.xlane.xlu0 %128 }
 0x129   :  { %356 = vrsqrt.f32 %v153_v28  ;;  %v144_v31 = vmul.f32 0.0078125, %v127_v29  ;;  %v145_v32 = vmul.f32 0.0078125, %v129_v30 }
 0x12b   :  { %v154_v33 = vadd.f32 1e-05, %v144_v31  ;;  %v155_v34 = vadd.f32 1e-05, %v145_v32 }
 0x12c   :  { %v131_v35 = vpop.xlane.xlu1 %130  ;;  %v133_v36 = vpop.xlane.xlu0 %132 }
 0x12d   :  { %358 = vrsqrt.f32 %v154_v33  ;;  %v146_v37 = vmul.f32 0.0078125, %v131_v35  ;;  %v147_v38 = vmul.f32 0.0078125, %v133_v36 }
 0x12e   :  { %360 = vrsqrt.f32 %v155_v34 }
 0x12f   :  { %v156_v39 = vadd.f32 1e-05, %v146_v37  ;;  %v157_v40 = vadd.f32 1e-05, %v147_v38 }
 0x130   :  { %v135_v41 = vpop.xlane.xlu1 %134  ;;  %v137_v42 = vpop.xlane.xlu0 %136 }
 0x131   :  { %362 = vrsqrt.f32 %v156_v39  ;;  %v148_v43 = vmul.f32 0.0078125, %v135_v41  ;;  %v149_v44 = vmul.f32 0.0078125, %v137_v42 }
 0x132   :  { %v353_v45 = vpop.eup %352  ;;  %364 = vrsqrt.f32 %v157_v40 }
 0x133   :  { %v355_v49 = vpop.eup %354  ;;  %v172_v50 = vmul.f32 %v353_v45, %v437_v47  ;;  %v158_v51 = vadd.f32 1e-05, %v148_v43  ;;  %v159_v52 = vadd.f32 1e-05, %v149_v44 }
 0x134   :  { %v171_v55 = vmul.f32 %v355_v49, %v439_v48  ;;  %v140_v56 = vpop.xlane.xlu1 %139 }
 0x135   :  { %v189_v57 = vmul.f32 %v269_v46, %v172_v50  ;;  %366 = vrsqrt.f32 %v158_v51  ;;  %v150_v58 = vmul.f32 0.0078125, %v140_v56 }
 0x136   :  { %v357_v59 = vpop.eup %356  ;;  %v188_v62 = vmul.f32 %v269_v46, %v171_v55  ;;  %368 = vrsqrt.f32 %v159_v52 }
 0x137   :  { %v206_v63 = vadd.f32 %v270_v53, %v189_v57  ;;  %v173_v0 = vmul.f32 %v357_v59, %v445_v54  ;;  %v160_v1 = vadd.f32 1e-05, %v150_v58 }
 0x138   :  { %v205_v47 = vadd.f32 %v270_v53, %v188_v62 }
 0x139   :  { %370 = vrsqrt.f32 %v160_v1  ;;  %v190_v7 = vmul.f32 %v269_v46, %v173_v0 }
 0x13a   :  { %v359_v2 = vpop.eup %358  ;;  %v326_v3 = vpack.c.bf16 %v206_v63, %v205_v47 }
 0x13b   :  { %v361_v4 = vpop.eup %360  ;;  %v174_v8 = vmul.f32 %v359_v2, %v451_v61  ;;  %v207_v12 = vadd.f32 %v270_v53, %v190_v7 }
 0x13c   :  { %327 = vst [vmem:[%s517_s4] sm:$0xff] %v326_v3   ;;  %v175_v48 = vmul.f32 %v361_v4, %v449_v60 }
 0x13d   :  { %v191_v9 = vmul.f32 %v269_v46, %v174_v8 }
 0x13e   :  { %v363_v10 = vpop.eup %362  ;;  %v192_v16 = vmul.f32 %v269_v46, %v175_v48 }
 0x13f   :  { %v365_v11 = vpop.eup %364  ;;  %v208_v54 = vadd.f32 %v270_v53, %v191_v9  ;;  %v176_v17 = vmul.f32 %v363_v10, %v459_v6 }
 0x140   :  { %v177_v19 = vmul.f32 %v365_v11, %v457_v5  ;;  %v209_v22 = vadd.f32 %v270_v53, %v192_v16 }
 0x141   :  { %v331_v18 = vpack.c.bf16 %v208_v54, %v207_v12  ;;  %v193_v20 = vmul.f32 %v269_v46, %v176_v17 }
 0x142   :  { %v367_v21 = vpop.eup %366  ;;  %v194_v23 = vmul.f32 %v269_v46, %v177_v19 }
 0x143   :  { %v369_v61 = vpop.eup %368  ;;  %349 = vst [vmem:[%s517_s4 + $0x8] sm:$0xff] %v331_v18   ;;  %v210_v60 = vadd.f32 %v270_v53, %v193_v20  ;;  %v178_v24 = vmul.f32 %v367_v21, %v470_v15 }
 0x144   :  { %v179_v25 = vmul.f32 %v369_v61, %v468_v14  ;;  %v211_v5 = vadd.f32 %v270_v53, %v194_v23 }
 0x145   :  { %v336_v26 = vpack.c.bf16 %v210_v60, %v209_v22  ;;  %v195_v27 = vmul.f32 %v269_v46, %v178_v24 }
 0x146   :  { %v371_v6 = vpop.eup %370  ;;  %v196_v28 = vmul.f32 %v269_v46, %v179_v25 }
 0x147   :  { %350 = vst [vmem:[%s517_s4 + $0x10] sm:$0xff] %v336_v26   ;;  %v212_v29 = vadd.f32 %v270_v53, %v195_v27  ;;  %v180_v30 = vmul.f32 %v371_v6, %v466_v13 }
 0x148   :  { %v213_v31 = vadd.f32 %v270_v53, %v196_v28 }
 0x149   :  { %v341_v32 = vpack.c.bf16 %v212_v29, %v211_v5  ;;  %v197_v33 = vmul.f32 %v269_v46, %v180_v30 }
 0x14a   :  { %v289_v34 = vpack.c.bf16 %v213_v31, %v213_v31 }
 0x14b   :  { %351 = vst [vmem:[%s517_s4 + $0x18] sm:$0xff] %v341_v32   ;;  %v214_v14 = vadd.f32 %v270_v53, %v197_v33 }
 0x14c   :  { %263 = vst [vmem:[%s517_s4 + $0x20] sm:$0xf] %v289_v34 }
 0x14d   :  { %v290_v15 = vpack.c.bf16 %v214_v14, %v214_v14 }
 0x14f   :  { %264 = vst [vmem:[%s517_s4 + $0x24] sm:$0x7] %v290_v15 }

// kernel: _lambda_.50
= control target key start
LH: loop header
LB: loop body
LE: loop exit
PB: predicated region body
PF: predicated region fallthrough
CT: control target
= control target key end

     0   :  { %s1085_s12 = smov 0   ;;  %s1087_s13 = smov 0   ;;  %s1232_s0 = inlined_call_operand.vmem [shape: bf16[78,128], index: 0, kind: input, shape index: {}]   ;;  %s1233_s1 = inlined_call_operand.vmem [shape: bf16[128,384], index: 1, kind: input, shape index: {}]   ;;  %s1234_s2 = inlined_call_operand.vmem [shape: f32[1,384], index: 2, kind: input, shape index: {}]   ;;  %s1235_s3 = inlined_call_operand.vmem [shape: bf16[78,384], index: 3, kind: output, shape index: {}]  }
   0x1   :  { %s1089_s14 = smov 0   ;;  %s1091_s15 = smov 0  }
   0x2   :  { %s1093_s16 = smov 0  }
   0x3 LB: > { %s28_s17 = sadd.s32 1, %s1057_s15  ;;  %s833_s18 = sadd.s32 4294967295, %s1061_s16   ;;  %s1061_s16 = sphi %s1093_s16, %s13_s16   ;;  %s1057_s15 = sphi %s1091_s15, %s1240_s15   ;;  %s1053_s14 = sphi %s1089_s14, %s1239_s14   ;;  %s1049_s13 = sphi %s1087_s13, %s1238_s13   ;;  %s1045_s12 = sphi %s1085_s12, %s1237_s12  }
   0x4   : > { %p30_p0 = scmp.ge.s32.totalorder %s28_s17, 3  ;;  %p76_p1 = scmp.ne.s32.totalorder %s1049_s13, %s1045_s12 }
   0x5   : > { %p77_p2 = scmp.eq.s32.totalorder %s1061_s16, 0  ;;  %p134_p4 = scmp.eq.s32.totalorder %s833_s18, 2 }
   0x6   : > { %s1242_s17 = smov (%p30_p0, %s28_s17), 0  ;;  %s69_s20 = sadd.s32 1, %s1049_s13 }
   0x7   : > { %p78_p3 = por %p77_p2, %p76_p1  ;;  %s65_s19 = ssub.s32 %s1057_s15, %s1242_s17 }
   0x8   : > { %p67_p5 = scmp.eq.s32.totalorder %s65_s19, 0  ;;  %p1120_p6 = por %p134_p4, %p76_p1 }
   0x9   : > { %p837_p7 = scmp.ge.s32.totalorder %s1061_s16, 3 }
   0xa   : > { %s1125_s22 = scalar_select %p67_p5, %s1049_s13, %s69_s20  }
   0xb   : > { %168 = sbr.rel (%p837_p7) target bundleno = 30 (0x1e), region = 20 }
  0x10   : > { %171 = sbr.rel (!%p78_p3) target bundleno = 30 (0x1e), region = 24  ;;  %s173_s23 = sand.u32 (%p78_p3), 1, %s1049_s13  }
  0x11   : > { %s839_s24 = sshll.u32 (%p78_p3), %s1057_s15, 2  ;;  %s838_s25 = sshll.u32 (%p78_p3), %s173_s23, 6 }
  0x12   : > { %s1133_s28 = scalar_lea.vmem (%p78_p3), %s1233_s1, %s839_s24  ;;  %s175_s29 = scalar_lea.vmem (%p78_p3), [#allocation3], %s838_s25 }
  0x13   : > { %v197_v0 = vld [vmem:[%s1133_s28] sm:$0xf] (%p78_p3)  ;;  %v199_v1 = vld [vmem:[%s1133_s28 + $0xc] sm:$0xf] (%p78_p3)  ;;  %v201_v2 = vld [vmem:[%s1133_s28 + $0x18] sm:$0xf] (%p78_p3) }
  0x14   : > { %198 = vst [vmem:[%s175_s29] sm:$0xf] (%p78_p3), %v197_v0  ;;  %200 = vst [vmem:[%s175_s29 + $0x4] sm:$0xf] (%p78_p3), %v199_v1  ;;  %v203_v3 = vld [vmem:[%s1133_s28 + $0x24] sm:$0xf] (%p78_p3) }
  0x15   : > { %v205_v4 = vld [vmem:[%s1133_s28 + $0x30] sm:$0xf]  ;;  %202 = vst [vmem:[%s175_s29 + $0x8] sm:$0xf] %v201_v2  ;;  %204 = vst [vmem:[%s175_s29 + $0xc] sm:$0xf] %v203_v3 }
  0x16   : > { %206 = vst [vmem:[%s175_s29 + $0x10] sm:$0xf] %v205_v4  ;;  %v207_v5 = vld [vmem:[%s1133_s28 + $0x3c] sm:$0xf]  ;;  %v209_v6 = vld [vmem:[%s1133_s28 + $0x48] sm:$0xf] }
  0x17   : > { %v211_v7 = vld [vmem:[%s1133_s28 + $0x54] sm:$0xf]  ;;  %208 = vst [vmem:[%s175_s29 + $0x14] sm:$0xf] %v207_v5  ;;  %210 = vst [vmem:[%s175_s29 + $0x18] sm:$0xf] %v209_v6 }
  0x18   : > { %212 = vst [vmem:[%s175_s29 + $0x1c] sm:$0xf] %v211_v7  ;;  %v213_v8 = vld [vmem:[%s1133_s28 + $0x60] sm:$0xf]  ;;  %v215_v9 = vld [vmem:[%s1133_s28 + $0x6c] sm:$0xf] }
  0x19   : > { %v217_v10 = vld [vmem:[%s1133_s28 + $0x78] sm:$0xf]  ;;  %214 = vst [vmem:[%s175_s29 + $0x20] sm:$0xf] %v213_v8  ;;  %216 = vst [vmem:[%s175_s29 + $0x24] sm:$0xf] %v215_v9 }
  0x1a   : > { %218 = vst [vmem:[%s175_s29 + $0x28] sm:$0xf] %v217_v10  ;;  %v219_v11 = vld [vmem:[%s1133_s28 + $0x84] sm:$0xf]  ;;  %v221_v12 = vld [vmem:[%s1133_s28 + $0x90] sm:$0xf] }
  0x1b   : > { %v223_v13 = vld [vmem:[%s1133_s28 + $0x9c] sm:$0xf]  ;;  %220 = vst [vmem:[%s175_s29 + $0x2c] sm:$0xf] %v219_v11  ;;  %222 = vst [vmem:[%s175_s29 + $0x30] sm:$0xf] %v221_v12 }
  0x1c   : > { %224 = vst [vmem:[%s175_s29 + $0x34] sm:$0xf] %v223_v13  ;;  %v225_v14 = vld [vmem:[%s1133_s28 + $0xa8] sm:$0xf]  ;;  %v227_v15 = vld [vmem:[%s1133_s28 + $0xb4] sm:$0xf] }
  0x1d   : > { %226 = vst [vmem:[%s175_s29 + $0x38] sm:$0xf] %v225_v14  ;;  %228 = vst [vmem:[%s175_s29 + $0x3c] sm:$0xf] %v227_v15 }
  0x1e PF: > { %p840_p8 = scmp.ge.s32.totalorder %s1061_s16, 1  ;;  %p289_p9 = scmp.lt.s32.totalorder %s1061_s16, 4 }
  0x20   : > { %p290_p10 = pnand %p840_p8, %p289_p9 }
  0x21   : > { %s296_s30 = sand.u32 (!%p290_p10), 1, %s1045_s12   ;;  %p339_p11 = scmp.lt.s32.totalorder (!%p290_p10), %s1053_s14, 2 }
  0x22   : > { %293 = sbr.rel (%p290_p10) target bundleno = 301 (0x12d), region = 69  ;;  %s841_s4 = sshll.u32 (!%p290_p10), %s296_s30, 6 }
  0x23   : > { %s1158_s5 = scalar_lea.vmem (!%p290_p10), [#allocation3], %s841_s4  ;;  %s967_s28 = smul.u32 (!%p290_p10), 40, %s296_s30 }
  0x25   : > { %s1193_s29 = scalar_lea.vmem (!%p290_p10), [#allocation4], %s967_s28 }
  0x27   : > { %v1063_v16 = vmov 0.0   ;;  %vm1064_vm0 = vmmov 0   ;;  %v1010_v17 = vld [vmem:[%s1158_s5 + $0x38] sm:$0xff]   ;;  %v1011_v18 = vld [vmem:[%s1158_s5 + $0x30] sm:$0xff]   ;;  %v1012_v19 = vld [vmem:[%s1158_s5 + $0x28] sm:$0xff]   ;;  %s340_s24 = scalar_select %p339_p11, %s1053_s14, 2 }
  0x28   : > { %915 = vmatprep.subr.bf16.mxu0 %v1063_v16  ;;  %357 = vst [vmem:[#allocation2 + $0x38] sm:$0x3f] %v1063_v16  ;;  %951 = vmatprep.subr.bf16.mxu1 %v1063_v16  ;;  %v1013_v20 = vld [vmem:[%s1158_s5 + $0x20] sm:$0xff]   ;;  %v1014_v21 = vld [vmem:[%s1158_s5 + $0x18] sm:$0xff]   ;;  %v1015_v22 = vld [vmem:[%s1158_s5 + $0x10] sm:$0xff]   ;;  %s866_s12 = sshll.u32 (%p1120_p6), %s1053_s14, 2 }
  0x29   : > { %931 = vmatprep.mubr.msk.bf16.mxu0 %vm1064_vm0, %v1063_v16  ;;  %943 = vmatprep.mubr.msk.bf16.mxu1 %vm1064_vm0, %v1063_v16  ;;  %v1016_v23 = vld [vmem:[%s1158_s5 + $0x8] sm:$0xff]   ;;  %v1017_v24 = vld [vmem:[%s1158_s5] sm:$0xff]   ;;  %v1018_v25 = vld [vmem:[%s1232_s0] sm:$0xff]   ;;  %s341_s27 = scalar_lea.vmem %s1234_s2, %s340_s24  ;;  %s656_s5 = scalar_lea.vmem (%p1120_p6), %s1235_s3, %s866_s12 }
  0x2a   : > { %916 = vmatpush3.bf16.msra.mxu0 %v1010_v17  ;;  %959 = vmatpush3.bf16.msra.mxu1 %v1010_v17  ;;  %v1019_v26 = vld [vmem:[%s1232_s0 + $0x18] sm:$0xff]   ;;  %v1020_v27 = vld [vmem:[%s1232_s0 + $0x8] sm:$0xff]   ;;  %v1021_v28 = vld [vmem:[%s1232_s0 + $0x20] sm:$0x7f]  }
  0x2b   : > { %917 = vmatprep.subr.bf16.mxu0 %v1063_v16  ;;  %952 = vmatprep.subr.bf16.mxu1 %v1063_v16  ;;  %v1022_v29 = vld [vmem:[%s1232_s0 + $0x10] sm:$0xff]   ;;  %v855_v34 = vld [vmem:[%s341_s27] ss:$0 sm:$0xff] }
  0x2e   : > { %918 = vmatpush3.bf16.msra.mxu0 %v1011_v18  ;;  %960 = vmatpush3.bf16.msra.mxu1 %v1011_v18 }
  0x2f   : > { %919 = vmatprep.subr.bf16.mxu0 %v1063_v16  ;;  %953 = vmatprep.subr.bf16.mxu1 %v1063_v16  ;;  %v367_v49 = vld [vmem:[#allocation2 + $0x38] sm:$0x3f] }
  0x32   : > { %920 = vmatpush3.bf16.msra.mxu0 %v1012_v19  ;;  %961 = vmatpush3.bf16.msra.mxu1 %v1012_v19 }
  0x33   : > { %921 = vmatprep.subr.bf16.mxu0 %v1063_v16  ;;  %954 = vmatprep.subr.bf16.mxu1 %v1063_v16 }
  0x36   : > { %922 = vmatpush3.bf16.msra.mxu0 %v1013_v20  ;;  %962 = vmatpush3.bf16.msra.mxu1 %v1013_v20 }
  0x37   : > { %923 = vmatprep.subr.bf16.mxu0 %v1063_v16  ;;  %955 = vmatprep.subr.bf16.mxu1 %v1063_v16 }
  0x3a   : > { %924 = vmatpush3.bf16.msra.mxu0 %v1014_v21  ;;  %963 = vmatpush3.bf16.msra.mxu1 %v1014_v21 }
  0x3b   : > { %925 = vmatprep.subr.bf16.mxu0 %v1063_v16  ;;  %956 = vmatprep.subr.bf16.mxu1 %v1063_v16 }
  0x3e   : > { %926 = vmatpush3.bf16.msra.mxu0 %v1015_v22  ;;  %964 = vmatpush3.bf16.msra.mxu1 %v1015_v22 }
  0x3f   : > { %927 = vmatprep.subr.bf16.mxu0 %v1063_v16  ;;  %957 = vmatprep.subr.bf16.mxu1 %v1063_v16 }
  0x42   : > { %928 = vmatpush3.bf16.msra.mxu0 %v1016_v23  ;;  %965 = vmatpush3.bf16.msra.mxu1 %v1016_v23 }
  0x43   : > { %929 = vmatprep.subr.bf16.mxu0 %v1063_v16  ;;  %958 = vmatprep.subr.bf16.mxu1 %v1063_v16 }
  0x46   : > { %930 = vmatpush3.bf16.msra.mxu0 %v1017_v24  ;;  %966 = vmatpush3.bf16.msra.mxu1 %v1017_v24 }
  0x49   : > { %932 = vmatmul.mubr.bf16.vlgmr.msra.gmra.mxu0 %v1018_v25  ;;  %944 = vmatmul.mubr.bf16.vlgmr.msra.gmra.mxu1 %v1019_v26 }
  0x4a   : > { %935 = vmatprep.mubr.msk.bf16.mxu0 %vm1064_vm0, %v1063_v16  ;;  %947 = vmatprep.mubr.msk.bf16.mxu1 %vm1064_vm0, %v1063_v16 }
  0x51   : > { %936 = vmatmul.mubr.bf16.gmra.mxu0 %v1020_v27  ;;  %948 = vmatmul.mubr.bf16.gmra.mxu1 %v1021_v28 }
  0x52   : > { %939 = vmatprep.mubr.msk.bf16.mxu0 %vm1064_vm0, %v1063_v16 }
  0x59   : > { %940 = vmatmul.mubr.bf16.gmra.mxu0 %v1022_v29 }
 0x109   : > { %v506_v30 = vpop.f32.mrf.mxu0  ;;  %v530_v31 = vpop.f32.mrf.mxu1 }
 0x10a   : > { %v585_v39 = vadd.f32 %v855_v34, %v506_v30  ;;  %v591_v40 = vadd.f32 %v855_v34, %v530_v31 }
 0x10b   : > { %v933_v32 = vpop.f32.mrf.mxu0  ;;  %v945_v33 = vpop.f32.mrf.mxu1 }
 0x10d   : > { %v509_v35 = vpop.f32.mrf.mxu0  ;;  %v533_v36 = vpop.f32.mrf.mxu1 }
 0x10e   : > { %v586_v41 = vadd.f32 %v855_v34, %v509_v35  ;;  %v592_v42 = vadd.f32 %v855_v34, %v533_v36 }
 0x10f   : > { %v934_v37 = vpop.f32.mrf.mxu0  ;;  %v946_v38 = vpop.f32.mrf.mxu1 }
 0x110   : > { %v882_v45 = vpack.c.bf16 %v586_v41, %v585_v39  ;;  %v897_v46 = vpack.c.bf16 %v592_v42, %v591_v40 }
 0x111   : > { %v514_v43 = vpop.f32.mrf.mxu0  ;;  %v538_v44 = vpop.f32.mrf.mxu1 }
 0x112   : > { %883 = vst [vmem:[%s1193_s29] sm:$0xff] %v882_v45   ;;  %901 = vst [vmem:[%s1193_s29 + $0x18] sm:$0xff] %v897_v46   ;;  %v593_v50 = vadd.f32 %v855_v34, %v538_v44  ;;  %v587_v57 = vadd.f32 %v855_v34, %v514_v43 }
 0x113   : > { %v937_v47 = vpop.f32.mrf.mxu0  ;;  %v949_v48 = vpop.f32.mrf.mxu1 }
 0x114   : > { %v877_v53 = vpack.c.bf16 %v593_v50, %v593_v50 }
 0x115   : > { %v517_v51 = vpop.f32.mrf.mxu0  ;;  %v541_v52 = vpop.f32.mrf.mxu1 }
 0x116   : > { %v554_v54 = vadd.f32 %v541_v52, %v367_v49  ;;  %643 = vst [vmem:[%s1193_s29 + $0x20] sm:$0xf] %v877_v53  ;;  %v588_v58 = vadd.f32 %v855_v34, %v517_v51 }
 0x117   : > { %v938_v55 = vpop.f32.mrf.mxu0  ;;  %v950_v56 = vpop.f32.mrf.mxu1 }
 0x118   : > { %564 = vst [vmem:[#allocation2 + $0x38] sm:$0x3f] %v554_v54  ;;  %v887_v60 = vpack.c.bf16 %v588_v58, %v587_v57 }
 0x119   : > { %v522_v59 = vpop.f32.mrf.mxu0  ;;  %v673_v6 = vld [vmem:[%s1193_s29] sm:$0xf] (%p1120_p6)  ;;  %v675_v7 = vld [vmem:[%s1193_s29 + $0x4] sm:$0xf] (%p1120_p6)  ;;  %v685_v12 = vld [vmem:[%s1193_s29 + $0x18] sm:$0xf] (%p1120_p6) }
 0x11a   : > { %899 = vst [vmem:[%s1193_s29 + $0x8] sm:$0xff] %v887_v60   ;;  %v589_v2 = vadd.f32 %v855_v34, %v522_v59  ;;  %674 = vst [vmem:[%s656_s5] sm:$0xf] (%p1120_p6), %v673_v6  ;;  %v687_v13 = vld [vmem:[%s1193_s29 + $0x1c] sm:$0xf] (%p1120_p6) }
 0x11b   : > { %v941_v61 = vpop.f32.mrf.mxu0  ;;  %676 = vst [vmem:[%s656_s5 + $0xc] sm:$0xf] (%p1120_p6), %v675_v7  ;;  %686 = vst [vmem:[%s656_s5 + $0x48] sm:$0xf] (%p1120_p6), %v685_v12 }
 0x11c   : > { %688 = vst [vmem:[%s656_s5 + $0x54] sm:$0xf] (%p1120_p6), %v687_v13 }
 0x11d   : > { %v525_v62 = vpop.f32.mrf.mxu0  ;;  %v689_v14 = vld [vmem:[%s1193_s29 + $0x20] sm:$0xf] (%p1120_p6) }
 0x11e   : > { %v590_v3 = vadd.f32 %v855_v34, %v525_v62  ;;  %690 = vst [vmem:[%s656_s5 + $0x60] sm:$0xf] (%p1120_p6), %v689_v14 }
 0x11f   : > { %v577_v63 = vld [vmem:[#allocation2 + $0x38] sm:$0x3f]  ;;  %v942_v0 = vpop.f32.mrf.mxu0 }
 0x120   : > { %v594_v1 = vadd.f32 %v855_v34, %v577_v63  ;;  %v892_v5 = vpack.c.bf16 %v590_v3, %v589_v2  ;;  %651 = sbr.rel (!%p1120_p6) target bundleno = 301 (0x12d), region = 85 }
 0x121   : > { %v677_v8 = vld [vmem:[%s1193_s29 + $0x8] sm:$0xf] (%p1120_p6)  ;;  %v679_v9 = vld [vmem:[%s1193_s29 + $0xc] sm:$0xf] (%p1120_p6) }
 0x122   : > { %v878_v4 = vpack.c.bf16 %v594_v1, %v594_v1  ;;  %900 = vst [vmem:[%s1193_s29 + $0x10] sm:$0xff] %v892_v5   ;;  %678 = vst [vmem:[%s656_s5 + $0x18] sm:$0xf] (%p1120_p6), %v677_v8 }
 0x123   : > { %680 = vst [vmem:[%s656_s5 + $0x24] sm:$0xf] (%p1120_p6), %v679_v9 }
 0x124   : > { %644 = vst [vmem:[%s1193_s29 + $0x24] sm:$0x7] %v878_v4 }
 0x129   : > { %v681_v10 = vld [vmem:[%s1193_s29 + $0x10] sm:$0xf]  ;;  %v683_v11 = vld [vmem:[%s1193_s29 + $0x14] sm:$0xf] }
 0x12a   : > { %682 = vst [vmem:[%s656_s5 + $0x30] sm:$0xf] %v681_v10  ;;  %684 = vst [vmem:[%s656_s5 + $0x3c] sm:$0xf] %v683_v11 }
 0x12b   : > { %v691_v15 = vld [vmem:[%s1193_s29 + $0x24] sm:$0xf] }
 0x12c   : > { %692 = vst [vmem:[%s656_s5 + $0x6c] sm:$0xf] %v691_v15 }
 0x12d PF: > { %s13_s16 = sadd.s32 1, %s1061_s16   ;;  %s1237_s12 = smov %s1049_s13 }
 0x12e   : > { %p10_p12 = scmp.ge.s32.totalorder %s13_s16, 5   ;;  %s1238_s13 = smov %s1125_s22 }
 0x12f   : > { %s1239_s14 = smov %s1057_s15  ;;  %s1240_s15 = smov %s1242_s17 }
 0x130   :  { %12 = sbr.rel (!%p10_p12) target bundleno = 3 (0x3), region = 163 }

// kernel: _lambda_.48
= control target key start
LH: loop header
LB: loop body
LE: loop exit
PB: predicated region body
PF: predicated region fallthrough
CT: control target
= control target key end

     0   :  { %s1550_s12 = smov 0   ;;  %s1552_s13 = smov 0   ;;  %s1808_s0 = inlined_call_operand.vmem [shape: bf16[78,1024], index: 0, kind: input, shape index: {}]   ;;  %s1809_s1 = inlined_call_operand.vmem [shape: bf16[1024,128], index: 1, kind: input, shape index: {}]   ;;  %s1810_s2 = inlined_call_operand.vmem [shape: f32[1,128], index: 2, kind: input, shape index: {}]   ;;  %s1811_s3 = inlined_call_operand.vmem [shape: bf16[78,128], index: 3, kind: output, shape index: {}]  }
   0x1   :  { %s1554_s14 = smov 0   ;;  %s1556_s15 = smov 0  }
   0x2   :  { %s1558_s16 = smov 0  }
   0x3 LB: > { %s25_s17 = sadd.s32 1, %s1523_s15  ;;  %p48_p1 = scmp.ne.s32.totalorder %s1515_s13, %s1511_s12  ;;  %s1527_s16 = sphi %s1558_s16, %s13_s16   ;;  %s1523_s15 = sphi %s1556_s15, %s1815_s15   ;;  %s1519_s14 = sphi %s1554_s14, %s1814_s14   ;;  %s1515_s13 = sphi %s1552_s13, %s1813_s13   ;;  %s1511_s12 = sphi %s1550_s12, %s1812_s12  }
   0x4   : > { %p26_p0 = scmp.ge.s32.totalorder %s25_s17, 2  ;;  %p49_p2 = scmp.eq.s32.totalorder %s1527_s16, 0 }
   0x5   : > { %s41_s19 = sadd.s32 1, %s1515_s13  ;;  %p1163_p5 = scmp.ge.s32.totalorder %s1527_s16, 2 }
   0x6   : > { %s1817_s17 = smov (%p26_p0, %s25_s17), 0  ;;  %p50_p3 = por %p49_p2, %p48_p1 }
   0x7   : > { %s37_s18 = ssub.s32 %s1523_s15, %s1817_s17  ;;  %162 = sbr.rel (%p1163_p5) target bundleno = 26 (0x1a), region = 20 }
   0x8   : > { %p39_p4 = scmp.eq.s32.totalorder %s37_s18, 0 }
   0xa   : > { %s1585_s20 = scalar_select %p39_p4, %s1515_s13, %s41_s19  }
   0xc   : > { %165 = sbr.rel (!%p50_p3) target bundleno = 26 (0x1a), region = 24  ;;  %s167_s21 = sand.u32 (%p50_p3), 1, %s1515_s13  }
   0xd   : > { %s1238_s22 = sshll.u32 (%p50_p3), %s1523_s15, 4  ;;  %s1364_s23 = smul.u32 (%p50_p3), 160, %s167_s21 }
   0xe   : > { %s1593_s26 = scalar_lea.vmem (%p50_p3), %s1808_s0, %s1238_s22 }
   0xf   : > { %v188_v0 = vld [vmem:[%s1593_s26] sm:$0xff] (%p50_p3)  ;;  %v190_v1 = vld [vmem:[%s1593_s26 + $0x8] sm:$0xff] (%p50_p3)  ;;  %s1601_s27 = scalar_lea.vmem (%p50_p3), [#allocation3], %s1364_s23 }
  0x10   : > { %v192_v2 = vld [vmem:[%s1593_s26 + $0x20] sm:$0xff] (%p50_p3)  ;;  %v194_v3 = vld [vmem:[%s1593_s26 + $0x28] sm:$0xff] (%p50_p3)  ;;  %189 = vst [vmem:[%s1601_s27] sm:$0xff] (%p50_p3), %v188_v0  ;;  %191 = vst [vmem:[%s1601_s27 + $0x8] sm:$0xff] (%p50_p3), %v190_v1 }
  0x11   : > { %v196_v4 = vld [vmem:[%s1593_s26 + $0x40] sm:$0xff]  ;;  %v198_v5 = vld [vmem:[%s1593_s26 + $0x48] sm:$0xff]  ;;  %193 = vst [vmem:[%s1601_s27 + $0x10] sm:$0xff] %v192_v2  ;;  %195 = vst [vmem:[%s1601_s27 + $0x18] sm:$0xff] %v194_v3 }
  0x12   : > { %197 = vst [vmem:[%s1601_s27 + $0x20] sm:$0xff] %v196_v4  ;;  %199 = vst [vmem:[%s1601_s27 + $0x28] sm:$0xff] %v198_v5  ;;  %v200_v6 = vld [vmem:[%s1593_s26 + $0x60] sm:$0xff]  ;;  %v202_v7 = vld [vmem:[%s1593_s26 + $0x68] sm:$0xff] }
  0x13   : > { %v204_v8 = vld [vmem:[%s1593_s26 + $0x80] sm:$0xff]  ;;  %201 = vst [vmem:[%s1601_s27 + $0x30] sm:$0xff] %v200_v6  ;;  %203 = vst [vmem:[%s1601_s27 + $0x38] sm:$0xff] %v202_v7  ;;  %v206_v9 = vld [vmem:[%s1593_s26 + $0x88] sm:$0xff] }
  0x14   : > { %205 = vst [vmem:[%s1601_s27 + $0x40] sm:$0xff] %v204_v8  ;;  %v208_v10 = vld [vmem:[%s1593_s26 + $0xa0] sm:$0xff]  ;;  %v210_v11 = vld [vmem:[%s1593_s26 + $0xa8] sm:$0xff]  ;;  %207 = vst [vmem:[%s1601_s27 + $0x48] sm:$0xff] %v206_v9 }
  0x15   : > { %209 = vst [vmem:[%s1601_s27 + $0x50] sm:$0xff] %v208_v10  ;;  %211 = vst [vmem:[%s1601_s27 + $0x58] sm:$0xff] %v210_v11  ;;  %v212_v12 = vld [vmem:[%s1593_s26 + $0xc0] sm:$0xff]  ;;  %v214_v13 = vld [vmem:[%s1593_s26 + $0xc8] sm:$0xff] }
  0x16   : > { %v216_v14 = vld [vmem:[%s1593_s26 + $0xe0] sm:$0xff]  ;;  %213 = vst [vmem:[%s1601_s27 + $0x60] sm:$0xff] %v212_v12  ;;  %215 = vst [vmem:[%s1601_s27 + $0x68] sm:$0xff] %v214_v13  ;;  %v218_v15 = vld [vmem:[%s1593_s26 + $0xe8] sm:$0xff] }
  0x17   : > { %217 = vst [vmem:[%s1601_s27 + $0x70] sm:$0xff] %v216_v14  ;;  %v220_v16 = vld [vmem:[%s1593_s26 + $0x100] sm:$0xff]  ;;  %v222_v17 = vld [vmem:[%s1593_s26 + $0x108] sm:$0xff]  ;;  %219 = vst [vmem:[%s1601_s27 + $0x78] sm:$0xff] %v218_v15 }
  0x18   : > { %221 = vst [vmem:[%s1601_s27 + $0x80] sm:$0xff] %v220_v16  ;;  %223 = vst [vmem:[%s1601_s27 + $0x88] sm:$0xff] %v222_v17  ;;  %v224_v18 = vld [vmem:[%s1593_s26 + $0x120] sm:$0xff]  ;;  %v226_v19 = vld [vmem:[%s1593_s26 + $0x128] sm:$0xff] }
  0x19   : > { %225 = vst [vmem:[%s1601_s27 + $0x90] sm:$0xff] %v224_v18  ;;  %227 = vst [vmem:[%s1601_s27 + $0x98] sm:$0xff] %v226_v19 }
  0x1a PF: > { %p1166_p6 = scmp.ge.s32.totalorder %s1527_s16, 1  ;;  %p244_p7 = scmp.lt.s32.totalorder %s1527_s16, 3 }
  0x1c   : > { %p245_p8 = pnand %p1166_p6, %p244_p7 }
  0x1d   : > { %s251_s28 = sand.u32 (!%p245_p8), 1, %s1511_s12   ;;  %s1167_s29 = sshll.u32 (!%p245_p8), %s1519_s14, 6 }
  0x1e   : > { %248 = sbr.rel (%p245_p8) target bundleno = 368 (0x170), region = 51  ;;  %p291_p9 = scmp.lt.s32.totalorder (!%p245_p8), %s1167_s29, 127 }
  0x1f   : > { %s1365_s30 = smul.u32 (!%p245_p8), 160, %s251_s28  ;;  %p1169_p10 = scmp.ne.s32.totalorder (!%p245_p8), %s1519_s14, 0 }
  0x21   : > { %s1646_s8 = scalar_lea.vmem (!%p245_p8), [#allocation3], %s1365_s30 }
  0x23   : > { %s1819_s29 = smov (!%p291_p9, %s1167_s29), 127  ;;  %315 = sbr.rel (%p1169_p10) target bundleno = 46 (0x2e), region = 59 }
  0x24   : > { %s1168_s4 = sshll.u32 %s1819_s29, 2 }
  0x25   : > { %s1644_s7 = scalar_lea.vmem %s1809_s1, %s1168_s4 }
  0x28   : > { %v1529_v20 = vmov 0.0  }
  0x29   : > { %316 = vst [vmem:[#allocation2 + $0x30] sm:$0xff] %v1529_v20  ;;  %317 = vst [vmem:[#allocation2] sm:$0xff] %v1529_v20 }
  0x2a   : > { %318 = vst [vmem:[#allocation2 + $0x18] sm:$0xff] %v1529_v20  ;;  %319 = vst [vmem:[#allocation2 + $0x10] sm:$0xff] %v1529_v20 }
  0x2b   : > { %320 = vst [vmem:[#allocation2 + $0x48] sm:$0xff] %v1529_v20  ;;  %321 = vst [vmem:[#allocation2 + $0x28] sm:$0xff] %v1529_v20 }
  0x2c   : > { %322 = vst [vmem:[#allocation2 + $0x8] sm:$0xff] %v1529_v20  ;;  %323 = vst [vmem:[#allocation2 + $0x20] sm:$0xff] %v1529_v20 }
  0x2d   : > { %324 = vst [vmem:[#allocation2 + $0x40] sm:$0xff] %v1529_v20  ;;  %325 = vst [vmem:[#allocation2 + $0x38] sm:$0x3f] %v1529_v20 }
  0x2e PF: > { %v1407_v21 = vld [vmem:[%s1644_s7 + $0x78] sm:$0xff]   ;;  %v1411_v25 = vld [vmem:[%s1644_s7 + $0x70] sm:$0xff]   ;;  %v1415_v29 = vld [vmem:[%s1644_s7 + $0x68] sm:$0xff]   ;;  %p1222_p11 = scmp.ne.s32.totalorder %s1519_s14, 1 }
  0x2f   : > { %v1408_v22 = vld [vmem:[%s1644_s7 + $0xf8] sm:$0xff]   ;;  %1272 = vmatprep.subr.bf16.mxu0 %v1407_v21  ;;  %v1412_v26 = vld [vmem:[%s1644_s7 + $0xf0] sm:$0xff]   ;;  %v1416_v30 = vld [vmem:[%s1644_s7 + $0xe8] sm:$0xff]  }
  0x30   : > { %v1409_v23 = vld [vmem:[%s1644_s7 + $0x38] sm:$0xff]   ;;  %1318 = vmatprep.subr.bf16.mxu1 %v1408_v22  ;;  %v1413_v27 = vld [vmem:[%s1644_s7 + $0x30] sm:$0xff]   ;;  %v1417_v31 = vld [vmem:[%s1644_s7 + $0x28] sm:$0xff]  }
  0x31   : > { %v1410_v24 = vld [vmem:[%s1644_s7 + $0xb8] sm:$0xff]   ;;  %1273 = vmatpush3.bf16.msra.mxu0 %v1409_v23  ;;  %v1414_v28 = vld [vmem:[%s1644_s7 + $0xb0] sm:$0xff]   ;;  %v1418_v32 = vld [vmem:[%s1644_s7 + $0xa8] sm:$0xff]  }
  0x32   : > { %1319 = vmatpush3.bf16.msra.mxu1 %v1410_v24  ;;  %1274 = vmatprep.subr.bf16.mxu0 %v1411_v25  ;;  %v1419_v33 = vld [vmem:[%s1644_s7 + $0x60] sm:$0xff]   ;;  %v1423_v37 = vld [vmem:[%s1644_s7 + $0x58] sm:$0xff]   ;;  %v1427_v41 = vld [vmem:[%s1644_s7 + $0x50] sm:$0xff]  }
  0x33   : > { %1320 = vmatprep.subr.bf16.mxu1 %v1412_v26  ;;  %v1420_v34 = vld [vmem:[%s1644_s7 + $0xe0] sm:$0xff]   ;;  %v1424_v38 = vld [vmem:[%s1644_s7 + $0xd8] sm:$0xff]   ;;  %v1428_v42 = vld [vmem:[%s1644_s7 + $0xd0] sm:$0xff]  }
  0x34   : > { %v1421_v35 = vld [vmem:[%s1644_s7 + $0x20] sm:$0xff]   ;;  %v1425_v39 = vld [vmem:[%s1644_s7 + $0x18] sm:$0xff]   ;;  %v1429_v43 = vld [vmem:[%s1644_s7 + $0x10] sm:$0xff]  }
  0x35   : > { %1275 = vmatpush3.bf16.msra.mxu0 %v1413_v27  ;;  %v1422_v36 = vld [vmem:[%s1644_s7 + $0xa0] sm:$0xff]   ;;  %v1426_v40 = vld [vmem:[%s1644_s7 + $0x98] sm:$0xff]   ;;  %v1430_v44 = vld [vmem:[%s1644_s7 + $0x90] sm:$0xff]  }
  0x36   : > { %1321 = vmatpush3.bf16.msra.mxu1 %v1414_v28  ;;  %1276 = vmatprep.subr.bf16.mxu0 %v1415_v29  ;;  %v1431_v45 = vld [vmem:[%s1644_s7 + $0x48] sm:$0xff]   ;;  %v1435_v49 = vld [vmem:[%s1644_s7 + $0x40] sm:$0xff]   ;;  %v326_v16 = vld [vmem:[#allocation2 + $0x30] sm:$0xff] }
  0x37   : > { %1322 = vmatprep.subr.bf16.mxu1 %v1416_v30  ;;  %v1432_v46 = vld [vmem:[%s1644_s7 + $0xc8] sm:$0xff]   ;;  %v1436_v50 = vld [vmem:[%s1644_s7 + $0xc0] sm:$0xff]  }
  0x38   : > { %v1433_v47 = vld [vmem:[%s1644_s7 + $0x8] sm:$0xff]   ;;  %v1437_v51 = vld [vmem:[%s1644_s7] sm:$0xff]  }
  0x39   : > { %1277 = vmatpush3.bf16.msra.mxu0 %v1417_v31  ;;  %v1434_v48 = vld [vmem:[%s1644_s7 + $0x88] sm:$0xff]   ;;  %v1438_v52 = vld [vmem:[%s1644_s7 + $0x80] sm:$0xff]  }
  0x3a   : > { %1323 = vmatpush3.bf16.msra.mxu1 %v1418_v32  ;;  %1278 = vmatprep.subr.bf16.mxu0 %v1419_v33  ;;  %v1439_v53 = vld [vmem:[%s1646_s8] ss:$16 sps:$4 sm:$0xff]   ;;  %v1441_v54 = vld [vmem:[%s1646_s8 + $0x4] ss:$16 sps:$4 sm:$0xff]   ;;  %v1442_v55 = vld [vmem:[%s1646_s8 + $0x8] ss:$16 sps:$4 sm:$0xff]  }
  0x3b   : > { %1324 = vmatprep.subr.bf16.mxu1 %v1420_v34  ;;  %v1444_v56 = vld [vmem:[%s1646_s8 + $0xc] ss:$16 sps:$4 sm:$0xff]   ;;  %744 = vmatprep.mubr.bf16.mxu0 %v1441_v54  ;;  %v1445_v57 = vld [vmem:[%s1646_s8 + $0x24] ss:$16 sps:$4 sm:$0xff]   ;;  %v1449_v59 = vld [vmem:[%s1646_s8 + $0x20] ss:$16 sps:$4 sm:$0xff]  }
  0x3c   : > { %817 = vmatprep.mubr.bf16.mxu1 %v1444_v56  ;;  %v1447_v58 = vld [vmem:[%s1646_s8 + $0x2c] ss:$16 sps:$4 sm:$0xff]   ;;  %v1450_v60 = vld [vmem:[%s1646_s8 + $0x28] ss:$16 sps:$4 sm:$0xff]   ;;  %v1451_v61 = vld [vmem:[%s1646_s8 + $0x44] ss:$16 sps:$4 sm:$0xff]  }
  0x3d   : > { %1279 = vmatpush3.bf16.msra.mxu0 %v1421_v35  ;;  %v1453_v62 = vld [vmem:[%s1646_s8 + $0x4c] ss:$16 sps:$4 sm:$0xff]   ;;  %v1455_v63 = vld [vmem:[%s1646_s8 + $0x40] ss:$16 sps:$4 sm:$0xff]   ;;  %v1456_v0 = vld [vmem:[%s1646_s8 + $0x48] ss:$16 sps:$4 sm:$0xff]  }
  0x3e   : > { %1325 = vmatpush3.bf16.msra.mxu1 %v1422_v36  ;;  %1280 = vmatprep.subr.bf16.mxu0 %v1423_v37  ;;  %v1457_v1 = vld [vmem:[%s1646_s8 + $0x64] ss:$16 sps:$4 sm:$0xff]   ;;  %v1459_v2 = vld [vmem:[%s1646_s8 + $0x6c] ss:$16 sps:$4 sm:$0xff]   ;;  %v1461_v3 = vld [vmem:[%s1646_s8 + $0x60] ss:$16 sps:$4 sm:$0xff]  }
  0x3f   : > { %1326 = vmatprep.subr.bf16.mxu1 %v1424_v38  ;;  %v1462_v4 = vld [vmem:[%s1646_s8 + $0x68] ss:$16 sps:$4 sm:$0xff]   ;;  %v1463_v5 = vld [vmem:[%s1646_s8 + $0x84] ss:$16 sps:$4 sm:$0x7f]  }
  0x40   : > { %v1465_v6 = vld [vmem:[%s1646_s8 + $0x8c] ss:$16 sps:$4 sm:$0x7f]   ;;  %v1467_v7 = vld [vmem:[%s1646_s8 + $0x80] ss:$16 sps:$4 sm:$0x7f]  }
  0x41   : > { %1281 = vmatpush3.bf16.msra.mxu0 %v1425_v39  ;;  %v1468_v8 = vld [vmem:[%s1646_s8 + $0x88] ss:$16 sps:$4 sm:$0x7f]   ;;  %v327_v25 = vld [vmem:[#allocation2] sm:$0xff] }
  0x42   : > { %1327 = vmatpush3.bf16.msra.mxu1 %v1426_v40  ;;  %1282 = vmatprep.subr.bf16.mxu0 %v1427_v41  ;;  %v328_v34 = vld [vmem:[#allocation2 + $0x18] sm:$0xff] }
  0x43   : > { %1328 = vmatprep.subr.bf16.mxu1 %v1428_v42 }
  0x45   : > { %1283 = vmatpush3.bf16.msra.mxu0 %v1429_v43  ;;  %v329_v43 = vld [vmem:[#allocation2 + $0x10] sm:$0xff] }
  0x46   : > { %1329 = vmatpush3.bf16.msra.mxu1 %v1430_v44  ;;  %1284 = vmatprep.subr.bf16.mxu0 %v1431_v45 }
  0x47   : > { %1330 = vmatprep.subr.bf16.mxu1 %v1432_v46 }
  0x49   : > { %1285 = vmatpush3.bf16.msra.mxu0 %v1433_v47 }
  0x4a   : > { %1331 = vmatpush3.bf16.msra.mxu1 %v1434_v48  ;;  %1286 = vmatprep.subr.bf16.mxu0 %v1435_v49 }
  0x4b   : > { %1332 = vmatprep.subr.bf16.mxu1 %v1436_v50 }
  0x4d   : > { %1287 = vmatpush3.bf16.msra.mxu0 %v1437_v51 }
  0x4e   : > { %1333 = vmatpush3.bf16.msra.mxu1 %v1438_v52  ;;  %v330_v52 = vld [vmem:[#allocation2 + $0x48] sm:$0xff] }
  0x50   : > { %745 = vmatmul.mubr.bf16.vlgmr.msra.gmra.mxu0 %v1439_v53 }
  0x51   : > { %818 = vmatmul.mubr.bf16.vlgmr.msra.gmra.mxu1 %v1442_v55  ;;  %752 = vmatprep.mubr.bf16.mxu0 %v1445_v57 }
  0x52   : > { %825 = vmatprep.mubr.bf16.mxu1 %v1447_v58 }
  0x58   : > { %753 = vmatmul.mubr.bf16.gmra.mxu0 %v1449_v59 }
  0x59   : > { %826 = vmatmul.mubr.bf16.gmra.mxu1 %v1450_v60  ;;  %760 = vmatprep.mubr.bf16.mxu0 %v1451_v61  ;;  %v331_v61 = vld [vmem:[#allocation2 + $0x28] sm:$0xff] }
  0x5a   : > { %833 = vmatprep.mubr.bf16.mxu1 %v1453_v62 }
  0x60   : > { %761 = vmatmul.mubr.bf16.gmra.mxu0 %v1455_v63 }
  0x61   : > { %834 = vmatmul.mubr.bf16.gmra.mxu1 %v1456_v0  ;;  %768 = vmatprep.mubr.bf16.mxu0 %v1457_v1 }
  0x62   : > { %841 = vmatprep.mubr.bf16.mxu1 %v1459_v2 }
  0x68   : > { %769 = vmatmul.mubr.bf16.gmra.mxu0 %v1461_v3 }
  0x69   : > { %842 = vmatmul.mubr.bf16.gmra.mxu1 %v1462_v4  ;;  %776 = vmatprep.mubr.bf16.mxu0 %v1463_v5 }
  0x6a   : > { %849 = vmatprep.mubr.bf16.mxu1 %v1465_v6  ;;  %v332_v6 = vld [vmem:[#allocation2 + $0x8] sm:$0xff] }
  0x70   : > { %777 = vmatmul.mubr.bf16.gmra.mxu0 %v1467_v7 }
  0x71   : > { %850 = vmatmul.mubr.bf16.gmra.mxu1 %v1468_v8 }
 0x110   : > { %v1288_v9 = vpop.f32.mrf.mxu0 }
 0x111   : > { %v1334_v10 = vpop.f32.mrf.mxu1 }
 0x112   : > { %v1289_v11 = vpop.f32.mrf.mxu0 }
 0x113   : > { %v1290_v12 = vadd.f32 %v1289_v11, %v1288_v9  ;;  %v1335_v13 = vpop.f32.mrf.mxu1 }
 0x114   : > { %v1336_v14 = vadd.f32 %v1335_v13, %v1334_v10  ;;  %v1291_v15 = vpop.f32.mrf.mxu0 }
 0x115   : > { %v1337_v17 = vpop.f32.mrf.mxu1 }
 0x116   : > { %v820_v18 = vadd.f32 %v1336_v14, %v1290_v12  ;;  %v1292_v19 = vpop.f32.mrf.mxu0 }
 0x117   : > { %v1293_v20 = vadd.f32 %v1292_v19, %v1291_v15  ;;  %v1338_v21 = vpop.f32.mrf.mxu1  ;;  %v333_v15 = vld [vmem:[#allocation2 + $0x20] sm:$0xff] }
 0x118   : > { %v858_v22 = vadd.f32 %v820_v18, %v326_v16  ;;  %v1339_v23 = vadd.f32 %v1338_v21, %v1337_v17  ;;  %v1294_v24 = vpop.f32.mrf.mxu0 }
 0x119   : > { %v1340_v26 = vpop.f32.mrf.mxu1 }
 0x11a   : > { %868 = vst [vmem:[#allocation2 + $0x30] sm:$0xff] %v858_v22  ;;  %v823_v27 = vadd.f32 %v1339_v23, %v1293_v20  ;;  %v1295_v28 = vpop.f32.mrf.mxu0 }
 0x11b   : > { %v1296_v29 = vadd.f32 %v1295_v28, %v1294_v24  ;;  %v1341_v30 = vpop.f32.mrf.mxu1  ;;  %v334_v24 = vld [vmem:[#allocation2 + $0x40] sm:$0xff] }
 0x11c   : > { %v859_v31 = vadd.f32 %v823_v27, %v327_v25  ;;  %v1342_v32 = vadd.f32 %v1341_v30, %v1340_v26  ;;  %v1297_v33 = vpop.f32.mrf.mxu0 }
 0x11d   : > { %v1343_v35 = vpop.f32.mrf.mxu1 }
 0x11e   : > { %869 = vst [vmem:[#allocation2] sm:$0xff] %v859_v31  ;;  %v828_v36 = vadd.f32 %v1342_v32, %v1296_v29  ;;  %v1298_v37 = vpop.f32.mrf.mxu0  ;;  %v335_v32 = vld [vmem:[#allocation2 + $0x38] sm:$0x3f] }
 0x11f   : > { %v1299_v38 = vadd.f32 %v1298_v37, %v1297_v33  ;;  %v1344_v39 = vpop.f32.mrf.mxu1 }
 0x120   : > { %v860_v40 = vadd.f32 %v828_v36, %v328_v34  ;;  %v1345_v41 = vadd.f32 %v1344_v39, %v1343_v35  ;;  %v1300_v42 = vpop.f32.mrf.mxu0 }
 0x121   : > { %v1346_v44 = vpop.f32.mrf.mxu1 }
 0x122   : > { %870 = vst [vmem:[#allocation2 + $0x18] sm:$0xff] %v860_v40  ;;  %v831_v45 = vadd.f32 %v1345_v41, %v1299_v38  ;;  %v1301_v46 = vpop.f32.mrf.mxu0 }
 0x123   : > { %v1302_v47 = vadd.f32 %v1301_v46, %v1300_v42  ;;  %v1347_v48 = vpop.f32.mrf.mxu1 }
 0x124   : > { %v861_v49 = vadd.f32 %v831_v45, %v329_v43  ;;  %v1348_v50 = vadd.f32 %v1347_v48, %v1346_v44  ;;  %v1303_v51 = vpop.f32.mrf.mxu0 }
 0x125   : > { %v1349_v53 = vpop.f32.mrf.mxu1 }
 0x126   : > { %871 = vst [vmem:[#allocation2 + $0x10] sm:$0xff] %v861_v49  ;;  %v836_v54 = vadd.f32 %v1348_v50, %v1302_v47  ;;  %v1304_v55 = vpop.f32.mrf.mxu0 }
 0x127   : > { %v1305_v56 = vadd.f32 %v1304_v55, %v1303_v51  ;;  %v1350_v57 = vpop.f32.mrf.mxu1 }
 0x128   : > { %v862_v58 = vadd.f32 %v836_v54, %v330_v52  ;;  %v1351_v59 = vadd.f32 %v1350_v57, %v1349_v53  ;;  %v1306_v60 = vpop.f32.mrf.mxu0 }
 0x129   : > { %v1352_v62 = vpop.f32.mrf.mxu1 }
 0x12a   : > { %872 = vst [vmem:[#allocation2 + $0x48] sm:$0xff] %v862_v58  ;;  %v839_v63 = vadd.f32 %v1351_v59, %v1305_v56  ;;  %v1307_v0 = vpop.f32.mrf.mxu0 }
 0x12b   : > { %v1308_v1 = vadd.f32 %v1307_v0, %v1306_v60  ;;  %v1353_v2 = vpop.f32.mrf.mxu1 }
 0x12c   : > { %v863_v3 = vadd.f32 %v839_v63, %v331_v61  ;;  %v1354_v4 = vadd.f32 %v1353_v2, %v1352_v62  ;;  %v1309_v5 = vpop.f32.mrf.mxu0 }
 0x12d   : > { %v1355_v7 = vpop.f32.mrf.mxu1 }
 0x12e   : > { %873 = vst [vmem:[#allocation2 + $0x28] sm:$0xff] %v863_v3  ;;  %v844_v8 = vadd.f32 %v1354_v4, %v1308_v1  ;;  %v1310_v9 = vpop.f32.mrf.mxu0 }
 0x12f   : > { %v1311_v10 = vadd.f32 %v1310_v9, %v1309_v5  ;;  %v1356_v11 = vpop.f32.mrf.mxu1 }
 0x130   : > { %v864_v12 = vadd.f32 %v844_v8, %v332_v6  ;;  %v1357_v13 = vadd.f32 %v1356_v11, %v1355_v7  ;;  %v1312_v14 = vpop.f32.mrf.mxu0 }
 0x131   : > { %v1358_v16 = vpop.f32.mrf.mxu1 }
 0x132   : > { %874 = vst [vmem:[#allocation2 + $0x8] sm:$0xff] %v864_v12  ;;  %v847_v17 = vadd.f32 %v1357_v13, %v1311_v10  ;;  %v1313_v18 = vpop.f32.mrf.mxu0 }
 0x133   : > { %v1314_v19 = vadd.f32 %v1313_v18, %v1312_v14  ;;  %v1359_v20 = vpop.f32.mrf.mxu1 }
 0x134   : > { %v865_v21 = vadd.f32 %v847_v17, %v333_v15  ;;  %v1360_v22 = vadd.f32 %v1359_v20, %v1358_v16  ;;  %v1315_v23 = vpop.f32.mrf.mxu0 }
 0x135   : > { %v1361_v25 = vpop.f32.mrf.mxu1 }
 0x136   : > { %875 = vst [vmem:[#allocation2 + $0x20] sm:$0xff] %v865_v21  ;;  %v852_v26 = vadd.f32 %v1360_v22, %v1314_v19  ;;  %v1316_v27 = vpop.f32.mrf.mxu0 }
 0x137   : > { %v1317_v28 = vadd.f32 %v1316_v27, %v1315_v23  ;;  %v1362_v29 = vpop.f32.mrf.mxu1 }
 0x138   : > { %v866_v30 = vadd.f32 %v852_v26, %v334_v24  ;;  %v1363_v31 = vadd.f32 %v1362_v29, %v1361_v25 }
 0x13a   : > { %876 = vst [vmem:[#allocation2 + $0x40] sm:$0xff] %v866_v30  ;;  %v855_v33 = vadd.f32 %v1363_v31, %v1317_v28  ;;  %881 = sbr.rel (%p1222_p11) target bundleno = 368 (0x170), region = 63 }
 0x13c   : > { %v867_v34 = vadd.f32 %v855_v33, %v335_v32 }
 0x13e   : > { %877 = vst [vmem:[#allocation2 + $0x38] sm:$0x3f] %v867_v34 }
 0x13f   : > { %v882_v35 = vld [vmem:[#allocation2 + $0x30] sm:$0xff]  ;;  %v883_v36 = vld [vmem:[#allocation2] sm:$0xff]  ;;  %v884_v40 = vld [vmem:[#allocation2 + $0x18] sm:$0xff] }
 0x140   : > { %v1223_v37 = vld [vmem:[%s1810_s2] ss:$0 sm:$0xff]  ;;  %v885_v41 = vld [vmem:[#allocation2 + $0x10] sm:$0xff]  ;;  %v886_v42 = vld [vmem:[#allocation2 + $0x48] sm:$0xff] }
 0x141   : > { %v1705_v38 = vadd.f32 %v1223_v37, %v882_v35  ;;  %v1707_v39 = vadd.f32 %v1223_v37, %v883_v36  ;;  %v1709_v43 = vadd.f32 %v1223_v37, %v884_v40  ;;  %v1711_v44 = vadd.f32 %v1223_v37, %v885_v41  ;;  %v887_v45 = vld [vmem:[#allocation2 + $0x28] sm:$0xff]  ;;  %v889_v48 = vld [vmem:[#allocation2 + $0x20] sm:$0xff] }
 0x142   : > { %v1713_v46 = vadd.f32 %v1223_v37, %v886_v42  ;;  %v888_v47 = vld [vmem:[#allocation2 + $0x8] sm:$0xff]  ;;  %v1719_v51 = vadd.f32 %v1223_v37, %v887_v45  ;;  %v1729_v56 = vadd.f32 %v1223_v37, %v889_v48  ;;  %v890_v17 = vld [vmem:[#allocation2 + $0x40] sm:$0xff] }
 0x143   : > { %v909_v49 = vmul.f32 %v1705_v38, %v1705_v38  ;;  %v910_v50 = vmul.f32 %v1707_v39, %v1707_v39  ;;  %v1721_v52 = vadd.f32 %v1223_v37, %v888_v47  ;;  %v911_v53 = vmul.f32 %v1709_v43, %v1709_v43 }
 0x144   : > { %v912_v54 = vmul.f32 %v1711_v44, %v1711_v44  ;;  %v913_v55 = vmul.f32 %v1713_v46, %v1713_v46  ;;  %v914_v59 = vmul.f32 %v1719_v51, %v1719_v51  ;;  %v916_v0 = vmul.f32 %v1729_v56, %v1729_v56 }
 0x145   : > { %v919_v57 = vmul.f32 %v909_v49, %v1705_v38  ;;  %v920_v58 = vmul.f32 %v910_v50, %v1707_v39  ;;  %v915_v60 = vmul.f32 %v1721_v52, %v1721_v52  ;;  %v921_v61 = vmul.f32 %v911_v53, %v1709_v43  ;;  %v891_v22 = vld [vmem:[#allocation2 + $0x38] sm:$0x3f] }
 0x146   : > { %v922_v62 = vmul.f32 %v912_v54, %v1711_v44  ;;  %v923_v63 = vmul.f32 %v913_v55, %v1713_v46  ;;  %v924_v3 = vmul.f32 %v914_v59, %v1719_v51  ;;  %v926_v8 = vmul.f32 %v916_v0, %v1729_v56 }
 0x147   : > { %v929_v1 = vmul.f32 0.044715, %v919_v57  ;;  %v930_v2 = vmul.f32 0.044715, %v920_v58  ;;  %v925_v4 = vmul.f32 %v915_v60, %v1721_v52  ;;  %v931_v5 = vmul.f32 0.044715, %v921_v61 }
 0x148   : > { %v932_v6 = vmul.f32 0.044715, %v922_v62  ;;  %v933_v7 = vmul.f32 0.044715, %v923_v63  ;;  %v934_v11 = vmul.f32 0.044715, %v924_v3  ;;  %v1753_v27 = vadd.f32 %v1223_v37, %v890_v17 }
 0x149   : > { %v939_v9 = vadd.f32 %v929_v1, %v1705_v38  ;;  %v940_v10 = vadd.f32 %v930_v2, %v1707_v39  ;;  %v935_v12 = vmul.f32 0.044715, %v925_v4  ;;  %v941_v13 = vadd.f32 %v931_v5, %v1709_v43 }
 0x14a   : > { %v942_v14 = vadd.f32 %v932_v6, %v1711_v44  ;;  %v943_v15 = vadd.f32 %v933_v7, %v1713_v46  ;;  %v936_v16 = vmul.f32 0.044715, %v926_v8  ;;  %v944_v20 = vadd.f32 %v934_v11, %v1719_v51 }
 0x14b   : > { %v949_v18 = vmul.f32 0.7978846, %v939_v9  ;;  %v950_v19 = vmul.f32 0.7978846, %v940_v10  ;;  %v945_v21 = vadd.f32 %v935_v12, %v1721_v52  ;;  %v951_v23 = vmul.f32 0.7978846, %v941_v13 }
 0x14c   : > { %v952_v24 = vmul.f32 0.7978846, %v942_v14  ;;  %v946_v25 = vadd.f32 %v936_v16, %v1729_v56  ;;  %v953_v26 = vmul.f32 0.7978846, %v943_v15  ;;  %v954_v28 = vmul.f32 0.7978846, %v944_v20 }
 0x14d   : > { %1469 = vtanh.f32 %v949_v18  ;;  %v1755_v29 = vadd.f32 %v1223_v37, %v891_v22  ;;  %v955_v30 = vmul.f32 0.7978846, %v945_v21  ;;  %v917_v31 = vmul.f32 %v1753_v27, %v1753_v27 }
 0x14e   : > { %1471 = vtanh.f32 %v950_v19  ;;  %v956_v32 = vmul.f32 0.7978846, %v946_v25 }
 0x14f   : > { %1473 = vtanh.f32 %v951_v23  ;;  %v918_v33 = vmul.f32 %v1755_v29, %v1755_v29  ;;  %v927_v34 = vmul.f32 %v917_v31, %v1753_v27 }
 0x150   : > { %1475 = vtanh.f32 %v952_v24 }
 0x151   : > { %1477 = vtanh.f32 %v953_v26  ;;  %v928_v35 = vmul.f32 %v918_v33, %v1755_v29  ;;  %v937_v36 = vmul.f32 0.044715, %v927_v34 }
 0x152   : > { %1479 = vtanh.f32 %v954_v28 }
 0x153   : > { %1481 = vtanh.f32 %v955_v30  ;;  %v938_v37 = vmul.f32 0.044715, %v928_v35  ;;  %v947_v40 = vadd.f32 %v937_v36, %v1753_v27 }
 0x154   : > { %1483 = vtanh.f32 %v956_v32 }
 0x155   : > { %v948_v41 = vadd.f32 %v938_v37, %v1755_v29  ;;  %v957_v42 = vmul.f32 0.7978846, %v947_v40 }
 0x157   : > { %v958_v45 = vmul.f32 0.7978846, %v948_v41  ;;  %1485 = vtanh.f32 %v957_v42 }
 0x159   : > { %1487 = vtanh.f32 %v958_v45 }
 0x15a   : > { %v1470_v47 = vpop.eup %1469 }
 0x15b   : > { %v1472_v48 = vpop.eup %1471  ;;  %v969_v49 = vadd.f32 1.0, %v1470_v47 }
 0x15c   : > { %v1474_v50 = vpop.eup %1473  ;;  %v970_v53 = vadd.f32 1.0, %v1472_v48 }
 0x15d   : > { %v1476_v54 = vpop.eup %1475  ;;  %v979_v55 = vmul.f32 0.5, %v969_v49  ;;  %v971_v57 = vadd.f32 1.0, %v1474_v50 }
 0x15e   : > { %v1478_v58 = vpop.eup %1477  ;;  %v980_v59 = vmul.f32 0.5, %v970_v53  ;;  %v972_v60 = vadd.f32 1.0, %v1476_v54 }
 0x15f   : > { %v1480_v61 = vpop.eup %1479  ;;  %v989_v62 = vmul.f32 %v979_v55, %v1705_v38  ;;  %v981_v63 = vmul.f32 0.5, %v971_v57  ;;  %v973_v0 = vadd.f32 1.0, %v1478_v58 }
 0x160   : > { %v1482_v1 = vpop.eup %1481  ;;  %v990_v2 = vmul.f32 %v980_v59, %v1707_v39  ;;  %v982_v3 = vmul.f32 0.5, %v972_v60  ;;  %v974_v4 = vadd.f32 1.0, %v1480_v61 }
 0x161   : > { %v1484_v5 = vpop.eup %1483  ;;  %v991_v6 = vmul.f32 %v981_v63, %v1709_v43  ;;  %v983_v7 = vmul.f32 0.5, %v973_v0  ;;  %v975_v8 = vadd.f32 1.0, %v1482_v1 }
 0x162   : > { %v1252_v9 = vpack.c.bf16 %v990_v2, %v989_v62  ;;  %v992_v10 = vmul.f32 %v982_v3, %v1711_v44  ;;  %v984_v11 = vmul.f32 0.5, %v974_v4  ;;  %v976_v12 = vadd.f32 1.0, %v1484_v5 }
 0x163   : > { %v993_v13 = vmul.f32 %v983_v7, %v1713_v46  ;;  %v985_v38 = vmul.f32 0.5, %v975_v8 }
 0x164   : > { %1253 = vst [vmem:[%s1811_s3] sm:$0xff] %v1252_v9   ;;  %v1257_v39 = vpack.c.bf16 %v992_v10, %v991_v6  ;;  %v994_v14 = vmul.f32 %v984_v11, %v1719_v51  ;;  %v986_v15 = vmul.f32 0.5, %v976_v12  ;;  %v1486_v16 = vpop.eup %1485 }
 0x165   : > { %v995_v43 = vmul.f32 %v985_v38, %v1721_v52  ;;  %v977_v18 = vadd.f32 1.0, %v1486_v16 }
 0x166   : > { %1269 = vst [vmem:[%s1811_s3 + $0x8] sm:$0xff] %v1257_v39   ;;  %v1262_v44 = vpack.c.bf16 %v994_v14, %v993_v13  ;;  %v996_v17 = vmul.f32 %v986_v15, %v1729_v56  ;;  %v1488_v46 = vpop.eup %1487 }
 0x167   : > { %v978_v20 = vadd.f32 1.0, %v1488_v46  ;;  %v987_v51 = vmul.f32 0.5, %v977_v18 }
 0x168   : > { %1270 = vst [vmem:[%s1811_s3 + $0x10] sm:$0xff] %v1262_v44   ;;  %v1267_v19 = vpack.c.bf16 %v996_v17, %v995_v43 }
 0x169   : > { %v988_v52 = vmul.f32 0.5, %v978_v20  ;;  %v997_v21 = vmul.f32 %v987_v51, %v1753_v27 }
 0x16a   : > { %1271 = vst [vmem:[%s1811_s3 + $0x18] sm:$0xff] %v1267_v19  }
 0x16b   : > { %v998_v22 = vmul.f32 %v988_v52, %v1755_v29  ;;  %v1247_v23 = vpack.c.bf16 %v997_v21, %v997_v21 }
 0x16d   : > { %v1248_v56 = vpack.c.bf16 %v998_v22, %v998_v22  ;;  %1047 = vst [vmem:[%s1811_s3 + $0x20] sm:$0xf] %v1247_v23 }
 0x16f   : > { %1048 = vst [vmem:[%s1811_s3 + $0x24] sm:$0x7] %v1248_v56 }
 0x170 PF: > { %s13_s16 = sadd.s32 1, %s1527_s16   ;;  %s1812_s12 = smov %s1515_s13 }
 0x171   : > { %p10_p12 = scmp.ge.s32.totalorder %s13_s16, 4   ;;  %s1813_s13 = smov %s1585_s20 }
 0x172   : > { %s1814_s14 = smov %s1523_s15  ;;  %s1815_s15 = smov %s1817_s17 }
 0x173   :  { %12 = sbr.rel (!%p10_p12) target bundleno = 3 (0x3), region = 104 }

// kernel: _lambda_.55
= control target key start
LH: loop header
LB: loop body
LE: loop exit
PB: predicated region body
PF: predicated region fallthrough
CT: control target
= control target key end

     0   :  { %v568_v26 = vmov 0.0   ;;  %s688_s1 = inlined_call_operand.vmem [shape: bf16[256,128], index: 1, kind: input, shape index: {}]   ;;  %s689_s0 = inlined_call_operand.vmem [shape: bf16[78,256], index: 0, kind: input, shape index: {}]   ;;  %s690_s2 = inlined_call_operand.vmem [shape: f32[1,128], index: 2, kind: input, shape index: {}]   ;;  %s691_s3 = inlined_call_operand.vmem [shape: bf16[78,128], index: 3, kind: output, shape index: {}]  }
   0x1   :  { %v537_v0 = vld [vmem:[%s688_s1 + $0x78] sm:$0xff]   ;;  %v539_v2 = vld [vmem:[%s688_s1 + $0x70] sm:$0xff]   ;;  %v541_v4 = vld [vmem:[%s688_s1 + $0x68] sm:$0xff]   ;;  %28 = vst [vmem:[#allocation2 + $0x38] sm:$0x3f] %v568_v26 }
   0x2   :  { %v538_v1 = vld [vmem:[%s688_s1 + $0x38] sm:$0xff]   ;;  %474 = vmatprep.subr.bf16.mxu0 %v537_v0  ;;  %520 = vmatprep.subr.bf16.mxu1 %v537_v0  ;;  %v540_v3 = vld [vmem:[%s688_s1 + $0x30] sm:$0xff]   ;;  %v542_v5 = vld [vmem:[%s688_s1 + $0x28] sm:$0xff]  }
   0x3   :  { %475 = vmatpush3.bf16.msra.mxu0 %v538_v1  ;;  %528 = vmatpush3.bf16.msra.mxu1 %v538_v1  ;;  %v543_v6 = vld [vmem:[%s688_s1 + $0x60] sm:$0xff]   ;;  %v545_v8 = vld [vmem:[%s688_s1 + $0x58] sm:$0xff]   ;;  %v547_v10 = vld [vmem:[%s688_s1 + $0x50] sm:$0xff]  }
   0x4   :  { %476 = vmatprep.subr.bf16.mxu0 %v539_v2  ;;  %521 = vmatprep.subr.bf16.mxu1 %v539_v2  ;;  %v544_v7 = vld [vmem:[%s688_s1 + $0x20] sm:$0xff]   ;;  %v546_v9 = vld [vmem:[%s688_s1 + $0x18] sm:$0xff]   ;;  %v548_v13 = vld [vmem:[%s688_s1 + $0x10] sm:$0xff]  }
   0x5   :  { %v555_v11 = vld [vmem:[%s689_s0 + $0x4] ss:$8 sps:$4 sm:$0xff]   ;;  %v558_v12 = vld [vmem:[%s689_s0 + $0x34] ss:$8 sps:$4 sm:$0xff]   ;;  %v553_v18 = vld [vmem:[%s689_s0] ss:$8 sps:$4 sm:$0xff]  }
   0x6   :  { %v549_v14 = vld [vmem:[%s688_s1 + $0x48] sm:$0xff]   ;;  %259 = vmatprep.mubr.bf16.mxu0 %v555_v11  ;;  %283 = vmatprep.mubr.bf16.mxu1 %v558_v12  ;;  %v551_v16 = vld [vmem:[%s688_s1 + $0x40] sm:$0xff]   ;;  %v556_v19 = vld [vmem:[%s689_s0 + $0x30] ss:$8 sps:$4 sm:$0xff]  }
   0x7   :  { %477 = vmatpush3.bf16.msra.mxu0 %v540_v3  ;;  %529 = vmatpush3.bf16.msra.mxu1 %v540_v3  ;;  %v550_v15 = vld [vmem:[%s688_s1 + $0x8] sm:$0xff]   ;;  %v552_v17 = vld [vmem:[%s688_s1] sm:$0xff]   ;;  %v559_v20 = vld [vmem:[%s689_s0 + $0x14] ss:$8 sps:$4 sm:$0xff]  }
   0x8   :  { %478 = vmatprep.subr.bf16.mxu0 %v541_v4  ;;  %522 = vmatprep.subr.bf16.mxu1 %v541_v4  ;;  %v562_v21 = vld [vmem:[%s689_s0 + $0x44] ss:$8 sps:$4 sm:$0x7f]   ;;  %v561_v22 = vld [vmem:[%s689_s0 + $0x10] ss:$8 sps:$4 sm:$0xff]  }
   0x9   :  { %v564_v23 = vld [vmem:[%s689_s0 + $0x40] ss:$8 sps:$4 sm:$0x7f]   ;;  %v565_v24 = vld [vmem:[%s689_s0 + $0x24] ss:$8 sps:$4 sm:$0xff]  }
   0xa   :  { %v567_v25 = vld [vmem:[%s689_s0 + $0x20] ss:$8 sps:$4 sm:$0xff]   ;;  %v38_v55 = vld [vmem:[#allocation2 + $0x38] sm:$0x3f] }
   0xb   :  { %479 = vmatpush3.bf16.msra.mxu0 %v542_v5  ;;  %530 = vmatpush3.bf16.msra.mxu1 %v542_v5  ;;  %v430_v37 = vld [vmem:[%s690_s2] ss:$0 sm:$0xff] }
   0xc   :  { %480 = vmatprep.subr.bf16.mxu0 %v543_v6  ;;  %523 = vmatprep.subr.bf16.mxu1 %v543_v6 }
   0xf   :  { %481 = vmatpush3.bf16.msra.mxu0 %v544_v7  ;;  %531 = vmatpush3.bf16.msra.mxu1 %v544_v7 }
  0x10   :  { %482 = vmatprep.subr.bf16.mxu0 %v545_v8  ;;  %524 = vmatprep.subr.bf16.mxu1 %v545_v8 }
  0x13   :  { %483 = vmatpush3.bf16.msra.mxu0 %v546_v9  ;;  %532 = vmatpush3.bf16.msra.mxu1 %v546_v9 }
  0x14   :  { %484 = vmatprep.subr.bf16.mxu0 %v547_v10  ;;  %525 = vmatprep.subr.bf16.mxu1 %v547_v10 }
  0x17   :  { %485 = vmatpush3.bf16.msra.mxu0 %v548_v13  ;;  %533 = vmatpush3.bf16.msra.mxu1 %v548_v13 }
  0x18   :  { %486 = vmatprep.subr.bf16.mxu0 %v549_v14  ;;  %526 = vmatprep.subr.bf16.mxu1 %v549_v14 }
  0x1b   :  { %487 = vmatpush3.bf16.msra.mxu0 %v550_v15  ;;  %534 = vmatpush3.bf16.msra.mxu1 %v550_v15 }
  0x1c   :  { %488 = vmatprep.subr.bf16.mxu0 %v551_v16  ;;  %527 = vmatprep.subr.bf16.mxu1 %v551_v16 }
  0x1f   :  { %489 = vmatpush3.bf16.msra.mxu0 %v552_v17  ;;  %535 = vmatpush3.bf16.msra.mxu1 %v552_v17 }
  0x22   :  { %260 = vmatmul.mubr.bf16.vlgmr.msra.gmra.mxu0 %v553_v18  ;;  %284 = vmatmul.mubr.bf16.vlgmr.msra.gmra.mxu1 %v556_v19 }
  0x23   :  { %267 = vmatprep.mubr.bf16.mxu0 %v559_v20  ;;  %291 = vmatprep.mubr.bf16.mxu1 %v562_v21 }
  0x2a   :  { %268 = vmatmul.mubr.bf16.gmra.mxu0 %v561_v22  ;;  %292 = vmatmul.mubr.bf16.gmra.mxu1 %v564_v23 }
  0x2b   :  { %275 = vmatprep.mubr.bf16.mxu0 %v565_v24 }
  0x32   :  { %276 = vmatmul.mubr.bf16.gmra.mxu0 %v567_v25 }
  0xe2   :  { %v490_v27 = vpop.f32.mrf.mxu0  ;;  %v508_v28 = vpop.f32.mrf.mxu1 }
  0xe4   :  { %v491_v29 = vpop.f32.mrf.mxu0  ;;  %v509_v30 = vpop.f32.mrf.mxu1 }
  0xe5   :  { %v492_v31 = vadd.f32 %v491_v29, %v490_v27  ;;  %v510_v32 = vadd.f32 %v509_v30, %v508_v28 }
  0xe6   :  { %v493_v33 = vpop.f32.mrf.mxu0  ;;  %v511_v34 = vpop.f32.mrf.mxu1 }
  0xe7   :  { %v340_v42 = vadd.f32 %v492_v31, %v430_v37  ;;  %v346_v43 = vadd.f32 %v510_v32, %v430_v37 }
  0xe8   :  { %v494_v35 = vpop.f32.mrf.mxu0  ;;  %v512_v36 = vpop.f32.mrf.mxu1 }
  0xe9   :  { %v495_v38 = vadd.f32 %v494_v35, %v493_v33  ;;  %v513_v39 = vadd.f32 %v512_v36, %v511_v34 }
  0xea   :  { %v496_v40 = vpop.f32.mrf.mxu0  ;;  %v514_v41 = vpop.f32.mrf.mxu1 }
  0xeb   :  { %v341_v46 = vadd.f32 %v495_v38, %v430_v37  ;;  %v347_v47 = vadd.f32 %v513_v39, %v430_v37 }
  0xec   :  { %v497_v44 = vpop.f32.mrf.mxu0  ;;  %v515_v45 = vpop.f32.mrf.mxu1 }
  0xed   :  { %v498_v48 = vadd.f32 %v497_v44, %v496_v40  ;;  %v516_v49 = vadd.f32 %v515_v45, %v514_v41  ;;  %v454_v52 = vpack.c.bf16 %v341_v46, %v340_v42  ;;  %v469_v53 = vpack.c.bf16 %v347_v47, %v346_v43 }
  0xee   :  { %v499_v50 = vpop.f32.mrf.mxu0  ;;  %v517_v51 = vpop.f32.mrf.mxu1 }
  0xef   :  { %455 = vst [vmem:[%s691_s3] sm:$0xff] %v454_v52   ;;  %473 = vst [vmem:[%s691_s3 + $0x18] sm:$0xff] %v469_v53   ;;  %v348_v57 = vadd.f32 %v516_v49, %v430_v37  ;;  %v342_v0 = vadd.f32 %v498_v48, %v430_v37 }
  0xf0   :  { %v500_v54 = vpop.f32.mrf.mxu0  ;;  %v518_v56 = vpop.f32.mrf.mxu1 }
  0xf1   :  { %v501_v58 = vadd.f32 %v500_v54, %v499_v50  ;;  %v519_v59 = vadd.f32 %v518_v56, %v517_v51  ;;  %v449_v61 = vpack.c.bf16 %v348_v57, %v348_v57 }
  0xf2   :  { %v502_v60 = vpop.f32.mrf.mxu0 }
  0xf3   :  { %v309_v62 = vadd.f32 %v519_v59, %v38_v55  ;;  %398 = vst [vmem:[%s691_s3 + $0x20] sm:$0xf] %v449_v61  ;;  %v343_v1 = vadd.f32 %v501_v58, %v430_v37 }
  0xf4   :  { %v503_v63 = vpop.f32.mrf.mxu0 }
  0xf5   :  { %319 = vst [vmem:[#allocation2 + $0x38] sm:$0x3f] %v309_v62  ;;  %v504_v2 = vadd.f32 %v503_v63, %v502_v60  ;;  %v459_v4 = vpack.c.bf16 %v343_v1, %v342_v0 }
  0xf6   :  { %v505_v3 = vpop.f32.mrf.mxu0 }
  0xf7   :  { %471 = vst [vmem:[%s691_s3 + $0x8] sm:$0xff] %v459_v4   ;;  %v344_v9 = vadd.f32 %v504_v2, %v430_v37 }
  0xf8   :  { %v506_v5 = vpop.f32.mrf.mxu0 }
  0xf9   :  { %v507_v6 = vadd.f32 %v506_v5, %v505_v3 }
  0xfb   :  { %v345_v10 = vadd.f32 %v507_v6, %v430_v37 }
  0xfc   :  { %v332_v7 = vld [vmem:[#allocation2 + $0x38] sm:$0x3f] }
  0xfd   :  { %v349_v8 = vadd.f32 %v430_v37, %v332_v7  ;;  %v464_v12 = vpack.c.bf16 %v345_v10, %v344_v9 }
  0xff   :  { %v450_v11 = vpack.c.bf16 %v349_v8, %v349_v8  ;;  %472 = vst [vmem:[%s691_s3 + $0x10] sm:$0xff] %v464_v12  }
 0x101   :  { %399 = vst [vmem:[%s691_s3 + $0x24] sm:$0x7] %v450_v11 }

// kernel: _lambda_.54
= control target key start
LH: loop header
LB: loop body
LE: loop exit
PB: predicated region body
PF: predicated region fallthrough
CT: control target
= control target key end

     0   :  { %v755_v1 = vmov 0   ;;  %v756_v2 = vmov 0.0   ;;  %v343_v23 = vlaneseq  ;;  %s1045_s1 = inlined_call_operand.vmem [shape: bf16[128,256], index: 1, kind: input, shape index: {}]   ;;  %s1046_s0 = inlined_call_operand.vmem [shape: bf16[78,128], index: 0, kind: input, shape index: {}]   ;;  %s1047_s2 = inlined_call_operand.vmem [shape: f32[1,256], index: 2, kind: input, shape index: {}]   ;;  %s1048_s3 = inlined_call_operand.vmem [shape: bf16[78,256], index: 3, kind: output, shape index: {}]  }
   0x1   :  { %v686_v0 = vld [vmem:[%s1045_s1 + $0x74] ss:$8 sps:$4 sm:$0xff]   ;;  %227 = vmatprep.mubr.bf16.mxu0 %v755_v1  ;;  %257 = vmatprep.mubr.bf16.mxu1 %v755_v1  ;;  %37 = vst [vmem:[#allocation2 + $0x70] sm:$0x3f] %v756_v2  ;;  %38 = vst [vmem:[#allocation2 + $0x90] sm:$0x3f] %v756_v2 }
   0x2   :  { %v688_v3 = vld [vmem:[%s1045_s1 + $0x70] ss:$8 sps:$4 sm:$0xff]   ;;  %195 = vmatprep.subr.bf16.mxu0 %v686_v0  ;;  %668 = vmatprep.subr.bf16.mxu1 %v686_v0  ;;  %v689_v4 = vld [vmem:[%s1045_s1 + $0x64] ss:$8 sps:$4 sm:$0xff]   ;;  %v691_v5 = vld [vmem:[%s1045_s1 + $0x60] ss:$8 sps:$4 sm:$0xff]  }
   0x3   :  { %196 = vmatpush1.bf16.msra.mxu0 %v688_v3  ;;  %676 = vmatpush1.bf16.msra.mxu1 %v688_v3  ;;  %v692_v6 = vld [vmem:[%s1045_s1 + $0x54] ss:$8 sps:$4 sm:$0xff]   ;;  %v694_v7 = vld [vmem:[%s1045_s1 + $0x50] ss:$8 sps:$4 sm:$0xff]   ;;  %v695_v8 = vld [vmem:[%s1045_s1 + $0x44] ss:$8 sps:$4 sm:$0xff]  }
   0x4   :  { %197 = vmatprep.subr.bf16.mxu0 %v689_v4  ;;  %669 = vmatprep.subr.bf16.mxu1 %v689_v4  ;;  %v697_v9 = vld [vmem:[%s1045_s1 + $0x40] ss:$8 sps:$4 sm:$0xff]   ;;  %v698_v10 = vld [vmem:[%s1045_s1 + $0x34] ss:$8 sps:$4 sm:$0xff]   ;;  %v700_v11 = vld [vmem:[%s1045_s1 + $0x30] ss:$8 sps:$4 sm:$0xff]  }
   0x5   :  { %v701_v12 = vld [vmem:[%s1045_s1 + $0x24] ss:$8 sps:$4 sm:$0xff]   ;;  %v703_v13 = vld [vmem:[%s1045_s1 + $0x20] ss:$8 sps:$4 sm:$0xff]   ;;  %v704_v14 = vld [vmem:[%s1045_s1 + $0x14] ss:$8 sps:$4 sm:$0xff]  }
   0x6   :  { %v706_v15 = vld [vmem:[%s1045_s1 + $0x10] ss:$8 sps:$4 sm:$0xff]   ;;  %v707_v16 = vld [vmem:[%s1045_s1 + $0x4] ss:$8 sps:$4 sm:$0xff]   ;;  %v709_v17 = vld [vmem:[%s1045_s1] ss:$8 sps:$4 sm:$0xff]  }
   0x7   :  { %198 = vmatpush1.bf16.msra.mxu0 %v691_v5  ;;  %677 = vmatpush1.bf16.msra.mxu1 %v691_v5  ;;  %v710_v18 = vld [vmem:[%s1046_s0] sm:$0xff]   ;;  %v711_v19 = vld [vmem:[%s1046_s0 + $0x18] sm:$0xff]   ;;  %v712_v20 = vld [vmem:[%s1046_s0 + $0x8] sm:$0xff]   ;;  %v344_v24 = vshrl.u32 %v343_v23, 7 }
   0x8   :  { %199 = vmatprep.subr.bf16.mxu0 %v692_v6  ;;  %670 = vmatprep.subr.bf16.mxu1 %v692_v6  ;;  %v713_v21 = vld [vmem:[%s1046_s0 + $0x20] sm:$0x7f]   ;;  %v714_v22 = vld [vmem:[%s1046_s0 + $0x10] sm:$0xff]  }
   0x9   :  { %v345_v25 = vsub.s32 0, %v344_v24  ;;  %v341_v26 = vld [vmem:[%s1047_s2] sm:$0x3]  ;;  %v349_v27 = vsub.s32 1, %v344_v24 }
   0xb   :  { %200 = vmatpush1.bf16.msra.mxu0 %v694_v7  ;;  %678 = vmatpush1.bf16.msra.mxu1 %v694_v7  ;;  %v848_v28 = vrot.slane %v341_v26, %v345_v25  ;;  %v850_v31 = vrot.slane %v341_v26, %v349_v27 }
   0xc   :  { %201 = vmatprep.subr.bf16.mxu0 %v695_v8  ;;  %671 = vmatprep.subr.bf16.mxu1 %v695_v8 }
   0xf   :  { %202 = vmatpush1.bf16.msra.mxu0 %v697_v9  ;;  %679 = vmatpush1.bf16.msra.mxu1 %v697_v9 }
  0x10   :  { %203 = vmatprep.subr.bf16.mxu0 %v698_v10  ;;  %672 = vmatprep.subr.bf16.mxu1 %v698_v10 }
  0x13   :  { %204 = vmatpush1.bf16.msra.mxu0 %v700_v11  ;;  %680 = vmatpush1.bf16.msra.mxu1 %v700_v11 }
  0x14   :  { %205 = vmatprep.subr.bf16.mxu0 %v701_v12  ;;  %673 = vmatprep.subr.bf16.mxu1 %v701_v12 }
  0x17   :  { %206 = vmatpush1.bf16.msra.mxu0 %v703_v13  ;;  %681 = vmatpush1.bf16.msra.mxu1 %v703_v13 }
  0x18   :  { %207 = vmatprep.subr.bf16.mxu0 %v704_v14  ;;  %674 = vmatprep.subr.bf16.mxu1 %v704_v14 }
  0x1b   :  { %208 = vmatpush1.bf16.msra.mxu0 %v706_v15  ;;  %682 = vmatpush1.bf16.msra.mxu1 %v706_v15 }
  0x1c   :  { %209 = vmatprep.subr.bf16.mxu0 %v707_v16  ;;  %675 = vmatprep.subr.bf16.mxu1 %v707_v16 }
  0x1f   :  { %210 = vmatpush1.bf16.msra.mxu0 %v709_v17  ;;  %683 = vmatpush1.bf16.msra.mxu1 %v709_v17 }
  0x22   :  { %228 = vmatmul.mubr.bf16.vlgmr.msra.gmra.mxu0 %v710_v18  ;;  %258 = vmatmul.mubr.bf16.vlgmr.msra.gmra.mxu1 %v711_v19 }
  0x23   :  { %237 = vmatprep.mubr.bf16.mxu0 %v755_v1  ;;  %267 = vmatprep.mubr.bf16.mxu1 %v755_v1 }
  0x2a   :  { %238 = vmatmul.mubr.bf16.gmra.mxu0 %v712_v20  ;;  %268 = vmatmul.mubr.bf16.gmra.mxu1 %v713_v21 }
  0x2b   :  { %247 = vmatprep.mubr.bf16.mxu0 %v755_v1 }
  0x32   :  { %248 = vmatmul.mubr.bf16.gmra.mxu0 %v714_v22 }
  0xe2   :  { %v229_v29 = vpop.f32.mrf.mxu0  ;;  %v259_v30 = vpop.f32.mrf.mxu1 }
  0xe3   :  { %v853_v34 = vadd.f32 %v848_v28, %v229_v29  ;;  %v856_v35 = vadd.f32 %v848_v28, %v259_v30 }
  0xe4   :  { %v231_v32 = vpop.f32.mrf.mxu0  ;;  %v261_v33 = vpop.f32.mrf.mxu1 }
  0xe5   :  { %v373_v38 = vmul.f32 %v853_v34, %v853_v34  ;;  %v385_v39 = vmul.f32 %v856_v35, %v856_v35  ;;  %v863_v40 = vadd.f32 %v850_v31, %v231_v32  ;;  %v866_v41 = vadd.f32 %v850_v31, %v261_v33  ;;  %v57_v33 = vld [vmem:[#allocation2 + $0x70] sm:$0x3f] }
  0xe6   :  { %v233_v36 = vpop.f32.mrf.mxu0  ;;  %v263_v37 = vpop.f32.mrf.mxu1 }
  0xe7   :  { %v393_v44 = vmul.f32 %v373_v38, %v853_v34  ;;  %v405_v45 = vmul.f32 %v385_v39, %v856_v35  ;;  %v374_v46 = vmul.f32 %v863_v40, %v863_v40  ;;  %v386_v47 = vmul.f32 %v866_v41, %v866_v41 }
  0xe8   :  { %v235_v42 = vpop.f32.mrf.mxu0  ;;  %v265_v43 = vpop.f32.mrf.mxu1  ;;  %v875_v48 = vadd.f32 %v848_v28, %v233_v36  ;;  %v878_v49 = vadd.f32 %v848_v28, %v263_v37 }
  0xe9   :  { %v413_v51 = vmul.f32 0.044715, %v393_v44  ;;  %v425_v52 = vmul.f32 0.044715, %v405_v45  ;;  %v394_v53 = vmul.f32 %v374_v46, %v863_v40  ;;  %v406_v54 = vmul.f32 %v386_v47, %v866_v41  ;;  %v58_v45 = vld [vmem:[#allocation2 + $0x90] sm:$0x3f] }
  0xea   :  { %v239_v50 = vpop.f32.mrf.mxu0  ;;  %v375_v55 = vmul.f32 %v875_v48, %v875_v48  ;;  %v387_v56 = vmul.f32 %v878_v49, %v878_v49  ;;  %v887_v57 = vadd.f32 %v850_v31, %v235_v42  ;;  %v890_v58 = vadd.f32 %v850_v31, %v265_v43  ;;  %v269_v59 = vpop.f32.mrf.mxu1 }
  0xeb   :  { %v433_v61 = vadd.f32 %v413_v51, %v853_v34  ;;  %v445_v62 = vadd.f32 %v425_v52, %v856_v35  ;;  %v414_v63 = vmul.f32 0.044715, %v394_v53  ;;  %v426_v0 = vmul.f32 0.044715, %v406_v54 }
  0xec   :  { %v241_v60 = vpop.f32.mrf.mxu0  ;;  %v395_v1 = vmul.f32 %v375_v55, %v875_v48  ;;  %v407_v2 = vmul.f32 %v387_v56, %v878_v49  ;;  %v376_v3 = vmul.f32 %v887_v57, %v887_v57  ;;  %v388_v4 = vmul.f32 %v890_v58, %v890_v58  ;;  %v271_v14 = vpop.f32.mrf.mxu1 }
  0xed   :  { %v453_v6 = vmul.f32 0.7978846, %v433_v61  ;;  %v465_v7 = vmul.f32 0.7978846, %v445_v62  ;;  %v434_v8 = vadd.f32 %v414_v63, %v863_v40  ;;  %v446_v9 = vadd.f32 %v426_v0, %v866_v41 }
  0xee   :  { %v243_v5 = vpop.f32.mrf.mxu0  ;;  %v415_v10 = vmul.f32 0.044715, %v395_v1  ;;  %v427_v11 = vmul.f32 0.044715, %v407_v2  ;;  %v396_v12 = vmul.f32 %v376_v3, %v887_v57  ;;  %v408_v13 = vmul.f32 %v388_v4, %v890_v58  ;;  %v273_v26 = vpop.f32.mrf.mxu1 }
  0xef   :  { %715 = vtanh.f32 %v453_v6  ;;  %v454_v15 = vmul.f32 0.7978846, %v434_v8  ;;  %v466_v16 = vmul.f32 0.7978846, %v446_v9  ;;  %v907_v22 = vadd.f32 %v848_v28, %v239_v50 }
  0xf0   :  { %717 = vtanh.f32 %v465_v7  ;;  %v435_v17 = vadd.f32 %v415_v10, %v875_v48  ;;  %v447_v18 = vadd.f32 %v427_v11, %v878_v49  ;;  %v416_v19 = vmul.f32 0.044715, %v396_v12  ;;  %v245_v20 = vpop.f32.mrf.mxu0  ;;  %v275_v46 = vpop.f32.mrf.mxu1 }
  0xf1   :  { %719 = vtanh.f32 %v454_v15  ;;  %v428_v21 = vmul.f32 0.044715, %v408_v13  ;;  %v377_v29 = vmul.f32 %v907_v22, %v907_v22  ;;  %v914_v30 = vadd.f32 %v848_v28, %v269_v59 }
  0xf2   :  { %721 = vtanh.f32 %v466_v16  ;;  %v455_v23 = vmul.f32 0.7978846, %v435_v17  ;;  %v467_v24 = vmul.f32 0.7978846, %v447_v18  ;;  %v436_v25 = vadd.f32 %v416_v19, %v887_v57  ;;  %v249_v36 = vpop.f32.mrf.mxu0 }
  0xf3   :  { %v448_v27 = vadd.f32 %v428_v21, %v890_v58  ;;  %v397_v38 = vmul.f32 %v377_v29, %v907_v22  ;;  %v389_v39 = vmul.f32 %v914_v30, %v914_v30  ;;  %v920_v42 = vadd.f32 %v850_v31, %v241_v60 }
  0xf4   :  { %723 = vtanh.f32 %v455_v23  ;;  %v456_v32 = vmul.f32 0.7978846, %v436_v25  ;;  %v923_v43 = vadd.f32 %v850_v31, %v271_v14  ;;  %v926_v44 = vadd.f32 %v848_v28, %v243_v5  ;;  %v935_v55 = vpop.f32.mrf.mxu0 }
  0xf5   :  { %725 = vtanh.f32 %v467_v24  ;;  %v468_v37 = vmul.f32 0.7978846, %v448_v27  ;;  %v417_v47 = vmul.f32 0.044715, %v397_v38  ;;  %v409_v50 = vmul.f32 %v389_v39, %v914_v30 }
  0xf6   :  { %727 = vtanh.f32 %v456_v32  ;;  %v296_v51 = vadd.f32 %v273_v26, %v57_v33  ;;  %v378_v52 = vmul.f32 %v920_v42, %v920_v42  ;;  %v390_v53 = vmul.f32 %v923_v43, %v923_v43 }
  0xf7   :  { %729 = vtanh.f32 %v468_v37  ;;  %v379_v54 = vmul.f32 %v926_v44, %v926_v44  ;;  %v437_v56 = vadd.f32 %v417_v47, %v907_v22  ;;  %v429_v59 = vmul.f32 0.044715, %v409_v50 }
  0xf8   :  { %316 = vst [vmem:[#allocation2 + $0x70] sm:$0x3f] %v296_v51  ;;  %v297_v60 = vadd.f32 %v275_v46, %v58_v45  ;;  %v398_v61 = vmul.f32 %v378_v52, %v920_v42  ;;  %v410_v62 = vmul.f32 %v390_v53, %v923_v43  ;;  %v942_v0 = vadd.f32 %v850_v31, %v245_v20 }
  0xf9   :  { %v399_v63 = vmul.f32 %v379_v54, %v926_v44  ;;  %v457_v1 = vmul.f32 0.7978846, %v437_v56  ;;  %v449_v2 = vadd.f32 %v429_v59, %v914_v30  ;;  %v946_v3 = vadd.f32 %v848_v28, %v249_v36 }
  0xfa   :  { %317 = vst [vmem:[#allocation2 + $0x90] sm:$0x3f] %v297_v60  ;;  %v418_v5 = vmul.f32 0.044715, %v398_v61  ;;  %v430_v6 = vmul.f32 0.044715, %v410_v62  ;;  %v380_v8 = vmul.f32 %v942_v0, %v942_v0 }
  0xfb   :  { %v419_v7 = vmul.f32 0.044715, %v399_v63  ;;  %731 = vtanh.f32 %v457_v1  ;;  %v469_v11 = vmul.f32 0.7978846, %v449_v2  ;;  %v381_v12 = vmul.f32 %v946_v3, %v946_v3 }
  0xfc   :  { %v716_v4 = vpop.eup %715  ;;  %v438_v15 = vadd.f32 %v418_v5, %v920_v42  ;;  %v450_v16 = vadd.f32 %v430_v6, %v923_v43  ;;  %v400_v21 = vmul.f32 %v380_v8, %v942_v0 }
  0xfd   :  { %v718_v9 = vpop.eup %717  ;;  %v493_v10 = vadd.f32 1.0, %v716_v4  ;;  %v439_v17 = vadd.f32 %v419_v7, %v926_v44  ;;  %733 = vtanh.f32 %v469_v11  ;;  %v401_v37 = vmul.f32 %v381_v12, %v946_v3  ;;  %v253_v4 = vpop.f32.mrf.mxu0 }
  0xfe   :  { %v720_v13 = vpop.eup %719  ;;  %v505_v14 = vadd.f32 1.0, %v718_v9  ;;  %v458_v25 = vmul.f32 0.7978846, %v438_v15  ;;  %v470_v26 = vmul.f32 0.7978846, %v450_v16 }
  0xff   :  { %v722_v18 = vpop.eup %721  ;;  %v513_v19 = vmul.f32 0.5, %v493_v10  ;;  %v494_v20 = vadd.f32 1.0, %v720_v13  ;;  %v459_v33 = vmul.f32 0.7978846, %v439_v17  ;;  %v339_v36 = vld [vmem:[#allocation2 + $0x70] sm:$0x3f]  ;;  %v982_v10 = vadd.f32 %v850_v31, %v935_v55 }
 0x100   :  { %v525_v23 = vmul.f32 0.5, %v505_v14  ;;  %v506_v24 = vadd.f32 1.0, %v722_v18  ;;  %735 = vtanh.f32 %v458_v25  ;;  %v961_v52 = vadd.f32 %v848_v28, %v339_v36 }
 0x101   :  { %v724_v27 = vpop.eup %723  ;;  %v533_v29 = vmul.f32 %v513_v19, %v853_v34  ;;  %v514_v32 = vmul.f32 0.5, %v494_v20  ;;  %737 = vtanh.f32 %v470_v26  ;;  %v340_v59 = vld [vmem:[#allocation2 + $0x90] sm:$0x3f]  ;;  %v420_v2 = vmul.f32 0.044715, %v400_v21  ;;  %v255_v20 = vpop.f32.mrf.mxu0 }
 0x102   :  { %v726_v38 = vpop.eup %725  ;;  %v545_v39 = vmul.f32 %v525_v23, %v856_v35  ;;  %v526_v45 = vmul.f32 0.5, %v506_v24  ;;  %v495_v46 = vadd.f32 1.0, %v724_v27  ;;  %739 = vtanh.f32 %v459_v33 }
 0x103   :  { %v728_v47 = vpop.eup %727  ;;  %v534_v50 = vmul.f32 %v514_v32, %v863_v40  ;;  %v507_v51 = vadd.f32 1.0, %v726_v38  ;;  %v391_v62 = vmul.f32 %v961_v52, %v961_v52  ;;  %v973_v7 = vadd.f32 %v850_v31, %v340_v59 }
 0x104   :  { %v730_v34 = vpop.eup %729  ;;  %v546_v53 = vmul.f32 %v526_v45, %v866_v41  ;;  %v515_v54 = vmul.f32 0.5, %v495_v46  ;;  %v496_v56 = vadd.f32 1.0, %v728_v47  ;;  %v440_v8 = vadd.f32 %v420_v2, %v942_v0 }
 0x105   :  { %v658_v60 = vpack.c.bf16 %v534_v50, %v533_v29  ;;  %v527_v35 = vmul.f32 0.5, %v507_v51  ;;  %v508_v61 = vadd.f32 1.0, %v730_v34  ;;  %v411_v6 = vmul.f32 %v391_v62, %v961_v52 }
 0x106   :  { %v664_v63 = vpack.c.bf16 %v546_v53, %v545_v39  ;;  %v535_v40 = vmul.f32 %v515_v54, %v875_v48  ;;  %v516_v1 = vmul.f32 0.5, %v496_v56  ;;  %v421_v9 = vmul.f32 0.044715, %v401_v37 }
 0x107   :  { %613 = vst [vmem:[%s1048_s3] sm:$0xff] %v658_v60  ;;  %v547_v41 = vmul.f32 %v527_v35, %v878_v49  ;;  %v528_v5 = vmul.f32 0.5, %v508_v61  ;;  %v431_v11 = vmul.f32 0.044715, %v411_v6  ;;  %v392_v12 = vmul.f32 %v973_v7, %v973_v7 }
 0x108   :  { %619 = vst [vmem:[%s1048_s3 + $0x30] sm:$0xff] %v664_v63  ;;  %v536_v48 = vmul.f32 %v516_v1, %v887_v57  ;;  %v732_v13 = vpop.eup %731  ;;  %v460_v15 = vmul.f32 0.7978846, %v440_v8  ;;  %v441_v16 = vadd.f32 %v421_v9, %v946_v3  ;;  %v382_v57 = vmul.f32 %v982_v10, %v982_v10 }
 0x109   :  { %v548_v49 = vmul.f32 %v528_v5, %v890_v58  ;;  %v497_v18 = vadd.f32 1.0, %v732_v13  ;;  %v451_v19 = vadd.f32 %v431_v11, %v961_v52  ;;  %v412_v55 = vmul.f32 %v392_v12, %v973_v7 }
 0x10a   :  { %v659_v14 = vpack.c.bf16 %v536_v48, %v535_v40  ;;  %v734_v58 = vpop.eup %733  ;;  %741 = vtanh.f32 %v460_v15  ;;  %v461_v21 = vmul.f32 0.7978846, %v441_v16  ;;  %v402_v23 = vmul.f32 %v382_v57, %v982_v10 }
 0x10b   :  { %v665_v17 = vpack.c.bf16 %v548_v49, %v547_v41  ;;  %v997_v24 = vadd.f32 %v848_v28, %v253_v4  ;;  %v509_v25 = vadd.f32 1.0, %v734_v58  ;;  %v471_v26 = vmul.f32 0.7978846, %v451_v19 }
 0x10c   :  { %614 = vst [vmem:[%s1048_s3 + $0x8] sm:$0xff] %v659_v14  ;;  %v432_v27 = vmul.f32 0.044715, %v412_v55  ;;  %743 = vtanh.f32 %v461_v21  ;;  %v422_v29 = vmul.f32 0.044715, %v402_v23  ;;  %v517_v36 = vmul.f32 0.5, %v497_v18 }
 0x10d   :  { %620 = vst [vmem:[%s1048_s3 + $0x38] sm:$0xff] %v665_v17  ;;  %v383_v32 = vmul.f32 %v997_v24, %v997_v24  ;;  %v736_v33 = vpop.eup %735  ;;  %745 = vtanh.f32 %v471_v26  ;;  %v1008_v46 = vadd.f32 %v850_v31, %v255_v20  ;;  %v529_v50 = vmul.f32 0.5, %v509_v25 }
 0x10e   :  { %v452_v37 = vadd.f32 %v432_v27, %v973_v7  ;;  %v738_v38 = vpop.eup %737  ;;  %v498_v28 = vadd.f32 1.0, %v736_v33  ;;  %v442_v39 = vadd.f32 %v422_v29, %v982_v10  ;;  %v537_v35 = vmul.f32 %v517_v36, %v907_v22 }
 0x10f   :  { %v403_v45 = vmul.f32 %v383_v32, %v997_v24  ;;  %v740_v47 = vpop.eup %739  ;;  %v510_v51 = vadd.f32 1.0, %v738_v38  ;;  %v384_v60 = vmul.f32 %v1008_v46, %v1008_v46  ;;  %v549_v62 = vmul.f32 %v529_v50, %v914_v30 }
 0x110   :  { %v472_v34 = vmul.f32 0.7978846, %v452_v37  ;;  %v518_v53 = vmul.f32 0.5, %v498_v28  ;;  %v462_v54 = vmul.f32 0.7978846, %v442_v39  ;;  %v499_v2 = vadd.f32 1.0, %v740_v47 }
 0x111   :  { %v423_v56 = vmul.f32 0.044715, %v403_v45  ;;  %v530_v59 = vmul.f32 0.5, %v510_v51  ;;  %v404_v40 = vmul.f32 %v384_v60, %v1008_v46 }
 0x112   :  { %747 = vtanh.f32 %v472_v34  ;;  %v538_v61 = vmul.f32 %v518_v53, %v920_v42  ;;  %v519_v42 = vmul.f32 0.5, %v499_v2 }
 0x113   :  { %749 = vtanh.f32 %v462_v54  ;;  %v443_v31 = vadd.f32 %v423_v56, %v997_v24  ;;  %v550_v63 = vmul.f32 %v530_v59, %v923_v43  ;;  %v424_v5 = vmul.f32 0.044715, %v404_v40 }
 0x114   :  { %v660_v1 = vpack.c.bf16 %v538_v61, %v537_v35  ;;  %v539_v11 = vmul.f32 %v519_v42, %v926_v44 }
 0x115   :  { %v463_v4 = vmul.f32 0.7978846, %v443_v31  ;;  %v666_v41 = vpack.c.bf16 %v550_v63, %v549_v62  ;;  %v444_v30 = vadd.f32 %v424_v5, %v1008_v46 }
 0x116   :  { %615 = vst [vmem:[%s1048_s3 + $0x10] sm:$0xff] %v660_v1 }
 0x117   :  { %751 = vtanh.f32 %v463_v4  ;;  %v742_v22 = vpop.eup %741  ;;  %621 = vst [vmem:[%s1048_s3 + $0x40] sm:$0xff] %v666_v41  ;;  %v464_v48 = vmul.f32 0.7978846, %v444_v30 }
 0x118   :  { %v500_v43 = vadd.f32 1.0, %v742_v22 }
 0x119   :  { %v744_v6 = vpop.eup %743  ;;  %753 = vtanh.f32 %v464_v48 }
 0x11a   :  { %v746_v8 = vpop.eup %745  ;;  %v520_v9 = vmul.f32 0.5, %v500_v43  ;;  %v501_v13 = vadd.f32 1.0, %v744_v6 }
 0x11b   :  { %v511_v49 = vadd.f32 1.0, %v746_v8 }
 0x11c   :  { %v540_v12 = vmul.f32 %v520_v9, %v942_v0  ;;  %v521_v18 = vmul.f32 0.5, %v501_v13 }
 0x11d   :  { %v531_v57 = vmul.f32 0.5, %v511_v49 }
 0x11e   :  { %v661_v15 = vpack.c.bf16 %v540_v12, %v539_v11  ;;  %v541_v0 = vmul.f32 %v521_v18, %v946_v3 }
 0x11f   :  { %v748_v14 = vpop.eup %747  ;;  %v551_v21 = vmul.f32 %v531_v57, %v961_v52 }
 0x120   :  { %v750_v16 = vpop.eup %749  ;;  %v512_v17 = vadd.f32 1.0, %v748_v14  ;;  %616 = vst [vmem:[%s1048_s3 + $0x18] sm:$0xff] %v661_v15 }
 0x121   :  { %v502_v19 = vadd.f32 1.0, %v750_v16 }
 0x122   :  { %v532_v55 = vmul.f32 0.5, %v512_v17 }
 0x123   :  { %v522_v20 = vmul.f32 0.5, %v502_v19 }
 0x124   :  { %v752_v58 = vpop.eup %751  ;;  %v552_v44 = vmul.f32 %v532_v55, %v973_v7 }
 0x125   :  { %v542_v23 = vmul.f32 %v522_v20, %v982_v10  ;;  %v503_v26 = vadd.f32 1.0, %v752_v58 }
 0x126   :  { %v667_v25 = vpack.c.bf16 %v552_v44, %v551_v21  ;;  %v754_v29 = vpop.eup %753 }
 0x127   :  { %v662_v27 = vpack.c.bf16 %v542_v23, %v541_v0  ;;  %v523_v32 = vmul.f32 0.5, %v503_v26  ;;  %v504_v52 = vadd.f32 1.0, %v754_v29 }
 0x128   :  { %622 = vst [vmem:[%s1048_s3 + $0x48] sm:$0x77] %v667_v25 }
 0x129   :  { %617 = vst [vmem:[%s1048_s3 + $0x20] sm:$0xff] %v662_v27  ;;  %v524_v33 = vmul.f32 0.5, %v504_v52  ;;  %v543_v7 = vmul.f32 %v523_v32, %v997_v24 }
 0x12b   :  { %v544_v3 = vmul.f32 %v524_v33, %v1008_v46 }
 0x12d   :  { %v663_v10 = vpack.c.bf16 %v544_v3, %v543_v7 }
 0x12f   :  { %618 = vst [vmem:[%s1048_s3 + $0x28] sm:$0xff] %v663_v10 }

// kernel: _lambda_.51
= control target key start
LH: loop header
LB: loop body
LE: loop exit
PB: predicated region body
PF: predicated region fallthrough
CT: control target
= control target key end

     0   :  { %s2919_s12 = smov 0   ;;  %s2921_s13 = smov 0   ;;  %s3855_s0 = inlined_call_operand.vmem [shape: bf16[2,39,384], index: 0, kind: input, shape index: {}, may-alias: {0,1,2}]   ;;  %s3856_s1 = inlined_call_operand.vmem [shape: bf16[2,39,384], index: 1, kind: input, shape index: {}, may-alias: {0,1,2}]   ;;  %s3857_s2 = inlined_call_operand.vmem [shape: bf16[2,39,384], index: 2, kind: input, shape index: {}, may-alias: {0,1,2}]   ;;  %s3858_s3 = inlined_call_operand.vmem [shape: bf16[2,39,128], index: 3, kind: output, shape index: {}]  }
   0x1   :  { %s2923_s14 = smov 0   ;;  %s2925_s15 = smov 0  }
   0x2   :  { %s2927_s16 = smov 0  }
   0x3 LB: > { %s32_s17 = sadd.s32 1, %s2885_s15  ;;  %p48_p1 = scmp.ne.s32.totalorder %s2877_s13, %s2873_s12  ;;  %s2889_s16 = sphi %s2927_s16, %s13_s16   ;;  %s2885_s15 = sphi %s2925_s15, %s3876_s15   ;;  %s2881_s14 = sphi %s2923_s14, %s3875_s14   ;;  %s2877_s13 = sphi %s2921_s13, %s3874_s13   ;;  %s2873_s12 = sphi %s2919_s12, %s3873_s12  }
   0x4   : > { %p34_p0 = scmp.ge.s32.totalorder %s32_s17, 2  ;;  %p49_p2 = scmp.eq.s32.totalorder %s2889_s16, 0 }
   0x5   : > { %s41_s20 = sadd.s32 1, %s2877_s13  ;;  %p2383_p5 = scmp.ge.s32.totalorder %s2889_s16, 2 }
   0x6   : > { %s3878_s17 = smov (%p34_p0, %s32_s17), 0  ;;  %p2950_p3 = por %p49_p2, %p48_p1 }
   0x7   : > { %s36_s19 = ssub.s32 %s2885_s15, %s3878_s17  ;;  %158 = sbr.rel (%p2383_p5) target bundleno = 36 (0x24), region = 16 }
   0x8   : > { %p39_p4 = scmp.eq.s32.totalorder %s36_s19, 0 }
   0xa   : > { %s2958_s21 = scalar_select %p39_p4, %s2877_s13, %s41_s20  }
   0xc   : > { %161 = sbr.rel (!%p2950_p3) target bundleno = 20 (0x14), region = 20  ;;  %s163_s22 = sand.u32 (%p2950_p3), 1, %s2877_s13  }
   0xd   : > { %s2667_s23 = smul.u32 (%p2950_p3), 60, %s2885_s15 }
   0xe   : > { %s2666_s24 = smul.u32 (%p2950_p3), 20, %s163_s22 }
   0xf   : > { %s171_s27 = scalar_lea.vmem (%p2950_p3), %s3855_s0, %s2667_s23 }
  0x10   : > { %v188_v0 = vld [vmem:[%s171_s27] sm:$0xf] (%p2950_p3)  ;;  %v190_v1 = vld [vmem:[%s171_s27 + $0xc] sm:$0xf] (%p2950_p3)  ;;  %s165_s28 = scalar_lea.vmem (%p2950_p3), [#allocation5], %s2666_s24 }
  0x11   : > { %189 = vst [vmem:[%s165_s28] sm:$0xf] %v188_v0  ;;  %191 = vst [vmem:[%s165_s28 + $0x4] sm:$0xf] %v190_v1  ;;  %v192_v2 = vld [vmem:[%s171_s27 + $0x18] sm:$0xf] }
  0x12   : > { %v194_v3 = vld [vmem:[%s171_s27 + $0x24] sm:$0xf]  ;;  %v196_v4 = vld [vmem:[%s171_s27 + $0x30] sm:$0xf]  ;;  %193 = vst [vmem:[%s165_s28 + $0x8] sm:$0xf] %v192_v2 }
  0x13   : > { %195 = vst [vmem:[%s165_s28 + $0xc] sm:$0xf] %v194_v3  ;;  %197 = vst [vmem:[%s165_s28 + $0x10] sm:$0xf] %v196_v4 }
  0x14 PF: > { %231 = sbr.rel (!%p2950_p3) target bundleno = 28 (0x1c), region = 61  ;;  %s233_s29 = sand.u32 (%p2950_p3), 1, %s2877_s13  }
  0x15   : > { %s2385_s30 = smul.u32 (%p2950_p3), 60, %s2885_s15 }
  0x16   : > { %s2668_s4 = smul.u32 (%p2950_p3), 20, %s233_s29 }
  0x17   : > { %s2286_s7 = scalar_lea.vmem (%p2950_p3), %s3856_s1, %s2385_s30 }
  0x18   : > { %v2386_v5 = vld [vmem:[%s2286_s7 + $0x4] sm:$0xf] (%p2950_p3)  ;;  %v2387_v6 = vld [vmem:[%s2286_s7 + $0x10] sm:$0xf] (%p2950_p3)  ;;  %s235_s8 = scalar_lea.vmem (%p2950_p3), [#allocation6], %s2668_s4 }
  0x19   : > { %260 = vst [vmem:[%s235_s8] sm:$0xf] %v2386_v5  ;;  %262 = vst [vmem:[%s235_s8 + $0x4] sm:$0xf] %v2387_v6  ;;  %v2388_v7 = vld [vmem:[%s2286_s7 + $0x1c] sm:$0xf] }
  0x1a   : > { %v2389_v8 = vld [vmem:[%s2286_s7 + $0x28] sm:$0xf]  ;;  %v2390_v9 = vld [vmem:[%s2286_s7 + $0x34] sm:$0xf]  ;;  %264 = vst [vmem:[%s235_s8 + $0x8] sm:$0xf] %v2388_v7 }
  0x1b   : > { %266 = vst [vmem:[%s235_s8 + $0xc] sm:$0xf] %v2389_v8  ;;  %268 = vst [vmem:[%s235_s8 + $0x10] sm:$0xf] %v2390_v9 }
  0x1c PF: > { %302 = sbr.rel (!%p2950_p3) target bundleno = 36 (0x24), region = 102  ;;  %s304_s9 = sand.u32 (%p2950_p3), 1, %s2877_s13  }
  0x1d   : > { %s2391_s10 = smul.u32 (%p2950_p3), 60, %s2885_s15 }
  0x1e   : > { %s2669_s11 = smul.u32 (%p2950_p3), 20, %s304_s9 }
  0x1f   : > { %s2294_s22 = scalar_lea.vmem (%p2950_p3), %s3857_s2, %s2391_s10 }
  0x20   : > { %v2392_v10 = vld [vmem:[%s2294_s22 + $0x8] sm:$0xf] (%p2950_p3)  ;;  %v2393_v11 = vld [vmem:[%s2294_s22 + $0x14] sm:$0xf] (%p2950_p3)  ;;  %s306_s23 = scalar_lea.vmem (%p2950_p3), [#allocation7], %s2669_s11 }
  0x21   : > { %331 = vst [vmem:[%s306_s23] sm:$0xf] %v2392_v10  ;;  %333 = vst [vmem:[%s306_s23 + $0x4] sm:$0xf] %v2393_v11  ;;  %v2394_v12 = vld [vmem:[%s2294_s22 + $0x20] sm:$0xf] }
  0x22   : > { %v2395_v13 = vld [vmem:[%s2294_s22 + $0x2c] sm:$0xf]  ;;  %v2396_v14 = vld [vmem:[%s2294_s22 + $0x38] sm:$0xf]  ;;  %335 = vst [vmem:[%s306_s23 + $0x8] sm:$0xf] %v2394_v12 }
  0x23   : > { %337 = vst [vmem:[%s306_s23 + $0xc] sm:$0xf] %v2395_v13  ;;  %339 = vst [vmem:[%s306_s23 + $0x10] sm:$0xf] %v2396_v14 }
  0x24 PF: > { %p2397_p6 = scmp.ge.s32.totalorder %s2889_s16, 1  ;;  %p372_p7 = scmp.lt.s32.totalorder %s2889_s16, 3 }
  0x26   : > { %p373_p8 = pnand %p2397_p6, %p372_p7 }
  0x27   : > { %s379_s18 = sand.u32 (!%p373_p8), 1, %s2873_s12   ;;  %s2896_s27 = smov (!%p373_p8), 96  }
  0x28   : > { %376 = sbr.rel (%p373_p8) target bundleno = 1644 (0x66c), region = 143  ;;  %s2897_s28 = smov (!%p373_p8), 64  }
  0x29   : > { %s2986_s24 = smul.u32 (!%p373_p8), 20, %s379_s18  ;;  %s2898_s29 = smov (!%p373_p8), 32  }
  0x2a   : > { %p432_p9 = scmp.lt.s32.totalorder (!%p373_p8), %s2881_s14, 1 }
  0x2b   : > { %s388_s12 = scalar_lea.vmem (!%p373_p8), [#allocation6], %s2986_s24  ;;  %s381_s25 = scalar_lea.vmem (!%p373_p8), [#allocation5], %s2986_s24 }
  0x2c   : > { %s395_s26 = scalar_lea.vmem (!%p373_p8), [#allocation7], %s2986_s24 }
  0x2d   : > { %vm488_vm0 = vcmask 261120   ;;  %v2891_v15 = vmov 0.0   ;;  %vm2892_vm1 = vmmov 0   ;;  %v3026_v16 = vld [vmem:[%s388_s12 + $0x10] ss:$0 sps:$4 sm:$0xff]   ;;  %v3032_v18 = vld [vmem:[%s388_s12 + $0x8] sm:$0xff]  }
  0x2e   : > { %2522 = vmatprep.subr.bf16.mxu0 %v2891_v15  ;;  %489 = vst.msk [vmem:[#allocation4] sm:$0xff] %vm488_vm0, %v2891_v15  ;;  %490 = vst.msk [vmem:[#allocation4 + $0x8] sm:$0xff] %vm488_vm0, %v2891_v15  ;;  %2528 = vmatprep.mubr.msk.bf16.mxu0 %vm2892_vm1, %v2891_v15  ;;  %v568_v17 = vsel %vm488_vm0, %v3026_v16, 0  ;;  %v565_v19 = vsel %vm488_vm0, %v3032_v18, 0  ;;  %v3037_v20 = vld [vmem:[%s388_s12] sm:$0xff]   ;;  %v3042_v22 = vld [vmem:[%s381_s25] sm:$0xff]  }
  0x2f   : > { %491 = vst.msk [vmem:[#allocation4 + $0x10] sm:$0xff] %vm488_vm0, %v2891_v15  ;;  %492 = vst.msk [vmem:[#allocation4 + $0x18] sm:$0xff] %vm488_vm0, %v2891_v15  ;;  %2540 = vmatprep.subr.bf16.mxu1 %v2891_v15  ;;  %2546 = vmatprep.mubr.msk.bf16.mxu1 %vm2892_vm1, %v2891_v15  ;;  %v562_v21 = vsel %vm488_vm0, %v3037_v20, 0  ;;  %v3048_v23 = vld [vmem:[%s381_s25 + $0x8] sm:$0xff]   ;;  %v3054_v24 = vld [vmem:[%s381_s25 + $0x10] ss:$0 sps:$4 sm:$0xff]  }
  0x30   : > { %495 = vst.msk [vmem:[#allocation4 + $0x28] sm:$0xff] %vm488_vm0, %v2891_v15  ;;  %496 = vst.msk [vmem:[#allocation4 + $0x30] sm:$0xff] %vm488_vm0, %v2891_v15  ;;  %2523 = vmatpush3.bf16.xpose.msra.mxu0 %v568_v17  ;;  %vm446_vm2 = vcmask 7168   ;;  %v2893_v25 = vmov -1e+30   ;;  %vm636_vm3 = vcmask 318464  }
  0x31   : > { %497 = vst.msk [vmem:[#allocation4 + $0x38] sm:$0xff] %vm488_vm0, %v2891_v15  ;;  %498 = vst.msk [vmem:[#allocation4 + $0x40] sm:$0xff] %vm488_vm0, %v2891_v15  ;;  %2524 = vmatprep.subr.bf16.mxu0 %v2891_v15  ;;  %v2894_v42 = vmov 0   ;;  %vm649_vm4 = vcmask 317440   ;;  %vm451_vm5 = vcmask 6144   ;;  %vm812_vm6 = vcmask 1042432  }
  0x32   : > { %500 = vst.msk [vmem:[#allocation4 + $0x50] sm:$0xff] %vm488_vm0, %v2891_v15  ;;  %501 = vst.msk [vmem:[#allocation4 + $0x58] sm:$0xff] %vm488_vm0, %v2891_v15  ;;  %2720 = vset.pattern.permute.xlu1 %v2894_v42  ;;  %2721 = vset.pattern.permute.xlu0 %v2894_v42  ;;  %v3172_v57 = vld [vmem:[%s395_s26 + $0x10] ss:$0 sps:$4 sm:$0xff]   ;;  %vm813_vm7 = vcmask 1043456   ;;  %v2895_v58 = vmov 65535  }
  0x33   : > { %502 = vst.msk [vmem:[#allocation4 + $0x60] sm:$0xff] %vm488_vm0, %v2891_v15  ;;  %503 = vst.msk [vmem:[#allocation4 + $0x68] sm:$0xff] %vm488_vm0, %v2891_v15  ;;  %v814_v59 = vsel %vm812_vm6, 4294967295, %v2895_v58  ;;  %v3186_v3 = vld [vmem:[%s395_s26 + $0x8] sm:$0xff]   ;;  %v3193_v7 = vld [vmem:[%s395_s26] sm:$0xff]   ;;  %vm493_vm8 = vcmask 260096  }
  0x34   : > { %505 = vst.msk [vmem:[#allocation4 + $0x78] sm:$0xff] %vm488_vm0, %v2891_v15  ;;  %506 = vst.msk [vmem:[#allocation4 + $0x80] sm:$0xff] %vm488_vm0, %v2891_v15  ;;  %v3177_v62 = vsel %vm813_vm7, %v814_v59, 0  ;;  %s3880_s14 = smov (!%p432_p9, %s2881_s14), 1  ;;  %vm1974_vm9 = vcmask 257024   ;;  %vm2061_vm12 = vcmask 519424  }
  0x35   : > { %507 = vst.msk [vmem:[#allocation4 + $0x88] sm:$0xff] %vm488_vm0, %v2891_v15  ;;  %508 = vst.msk [vmem:[#allocation4 + $0x90] sm:$0xff] %vm488_vm0, %v2891_v15  ;;  %v817_v63 = vand.u32 %v3172_v57, %v3177_v62  ;;  %s2671_s30 = smul.u32 20, %s3880_s14  ;;  %vm1980_vm10 = vsmask.f32 3328  ;;  %vm2147_vm14 = vcmask 781824  }
  0x36   : > { %447 = vst.msk [vmem:[#allocation2] sm:$0xff] %vm446_vm2, %v2893_v25  ;;  %448 = vst.msk [vmem:[#allocation2 + $0x8] sm:$0xff] %vm446_vm2, %v2893_v25 }
  0x37   : > { %449 = vst.msk [vmem:[#allocation2 + $0x10] sm:$0xff] %vm446_vm2, %v2893_v25  ;;  %450 = vst.msk [vmem:[#allocation2 + $0x18] sm:$0xff] %vm446_vm2, %v2893_v25  ;;  %2541 = vmatpush3.bf16.msra.mxu1 %v817_v63  ;;  %s3767_s6 = scalar_lea.vmem %s3858_s3, %s2671_s30 }
  0x38   : > { %2525 = vmatpush3.bf16.xpose.msra.mxu0 %v565_v19  ;;  %453 = vst.msk [vmem:[#allocation2 + $0x28] sm:$0xff] %vm446_vm2, %v2893_v25  ;;  %454 = vst.msk [vmem:[#allocation2 + $0x30] sm:$0xff] %vm446_vm2, %v2893_v25  ;;  %2542 = vmatprep.subr.bf16.mxu1 %v2891_v15 }
  0x39   : > { %2526 = vmatprep.subr.bf16.mxu0 %v2891_v15  ;;  %455 = vst.msk [vmem:[#allocation2 + $0x38] sm:$0xff] %vm446_vm2, %v2893_v25  ;;  %456 = vst.msk [vmem:[#allocation2 + $0x40] sm:$0xff] %vm446_vm2, %v2893_v25 }
  0x3a   : > { %458 = vst.msk [vmem:[#allocation2 + $0x50] sm:$0xff] %vm446_vm2, %v2893_v25  ;;  %459 = vst.msk [vmem:[#allocation2 + $0x58] sm:$0xff] %vm446_vm2, %v2893_v25 }
  0x3b   : > { %460 = vst.msk [vmem:[#allocation2 + $0x60] sm:$0xff] %vm446_vm2, %v2893_v25  ;;  %461 = vst.msk [vmem:[#allocation2 + $0x68] sm:$0xff] %vm446_vm2, %v2893_v25  ;;  %2543 = vmatpush3.bf16.msra.mxu1 %v3186_v3 }
  0x3c   : > { %463 = vst.msk [vmem:[#allocation2 + $0x78] sm:$0xff] %vm446_vm2, %v2893_v25  ;;  %464 = vst.msk [vmem:[#allocation2 + $0x80] sm:$0xff] %vm446_vm2, %v2893_v25  ;;  %2544 = vmatprep.subr.bf16.mxu1 %v2891_v15 }
  0x3d   : > { %465 = vst.msk [vmem:[#allocation2 + $0x88] sm:$0xff] %vm446_vm2, %v2893_v25  ;;  %466 = vst.msk [vmem:[#allocation2 + $0x90] sm:$0xff] %vm446_vm2, %v2893_v25  ;;  %v3160_v49 = vld [vmem:[#allocation2] sm:$0xff]  ;;  %v632_v52 = vld [vmem:[#allocation2 + $0x8] sm:$0xff] }
  0x3e   : > { %468 = vst.msk [vmem:[#allocation3] sm:$0xff] %vm446_vm2, %v2891_v15  ;;  %469 = vst.msk [vmem:[#allocation3 + $0x8] sm:$0xff] %vm446_vm2, %v2891_v15  ;;  %v3168_v55 = vld [vmem:[#allocation2 + $0x10] sm:$0xff]  ;;  %v3175_v61 = vld [vmem:[#allocation2 + $0x18] sm:$0xff] }
  0x3f   : > { %470 = vst.msk [vmem:[#allocation3 + $0x10] sm:$0xff] %vm446_vm2, %v2891_v15  ;;  %471 = vst.msk [vmem:[#allocation3 + $0x18] sm:$0xff] %vm446_vm2, %v2891_v15  ;;  %2545 = vmatpush3.bf16.msra.mxu1 %v3193_v7 }
  0x40   : > { %2527 = vmatpush3.bf16.xpose.msra.mxu0 %v562_v21  ;;  %473 = vst.msk [vmem:[#allocation3 + $0x28] sm:$0xff] %vm446_vm2, %v2891_v15  ;;  %474 = vst.msk [vmem:[#allocation3 + $0x30] sm:$0xff] %vm446_vm2, %v2891_v15  ;;  %2558 = vmatprep.subr.bf16.mxu1 %v2891_v15 }
  0x41   : > { %2576 = vmatprep.subr.bf16.mxu0 %v2891_v15  ;;  %475 = vst.msk [vmem:[#allocation3 + $0x38] sm:$0xff] %vm446_vm2, %v2891_v15  ;;  %476 = vst.msk [vmem:[#allocation3 + $0x40] sm:$0xff] %vm446_vm2, %v2891_v15 }
  0x42   : > { %478 = vst.msk [vmem:[#allocation3 + $0x50] sm:$0xff] %vm446_vm2, %v2891_v15  ;;  %479 = vst.msk [vmem:[#allocation3 + $0x58] sm:$0xff] %vm446_vm2, %v2891_v15 }
  0x43   : > { %480 = vst.msk [vmem:[#allocation3 + $0x60] sm:$0xff] %vm446_vm2, %v2891_v15  ;;  %481 = vst.msk [vmem:[#allocation3 + $0x68] sm:$0xff] %vm446_vm2, %v2891_v15 }
  0x44   : > { %483 = vst.msk [vmem:[#allocation3 + $0x78] sm:$0xff] %vm446_vm2, %v2891_v15  ;;  %484 = vst.msk [vmem:[#allocation3 + $0x80] sm:$0xff] %vm446_vm2, %v2891_v15 }
  0x45   : > { %485 = vst.msk [vmem:[#allocation3 + $0x88] sm:$0xff] %vm446_vm2, %v2891_v15  ;;  %486 = vst.msk [vmem:[#allocation3 + $0x90] sm:$0xff] %vm446_vm2, %v2891_v15 }
  0x46   : > { %452 = vst.msk [vmem:[#allocation2 + $0x20] sm:$0x7f] %vm451_vm5, %v2893_v25  ;;  %457 = vst.msk [vmem:[#allocation2 + $0x48] sm:$0x7f] %vm451_vm5, %v2893_v25 }
  0x47   : > { %2529 = vmatmul.mubr.msk.bf16.vlgmr.msra.gmra.mxu0 %vm488_vm0, %v3042_v22  ;;  %462 = vst.msk [vmem:[#allocation2 + $0x70] sm:$0x7f] %vm451_vm5, %v2893_v25  ;;  %467 = vst.msk [vmem:[#allocation2 + $0x98] sm:$0x7f] %vm451_vm5, %v2893_v25 }
  0x48   : > { %2532 = vmatprep.mubr.msk.bf16.mxu0 %vm2892_vm1, %v2891_v15  ;;  %472 = vst.msk [vmem:[#allocation3 + $0x20] sm:$0x7f] %vm451_vm5, %v2891_v15  ;;  %477 = vst.msk [vmem:[#allocation3 + $0x48] sm:$0x7f] %vm451_vm5, %v2891_v15 }
  0x49   : > { %482 = vst.msk [vmem:[#allocation3 + $0x70] sm:$0x7f] %vm451_vm5, %v2891_v15  ;;  %487 = vst.msk [vmem:[#allocation3 + $0x98] sm:$0x7f] %vm451_vm5, %v2891_v15 }
  0x4a   : > { %494 = vst.msk [vmem:[#allocation4 + $0x20] sm:$0x7f] %vm493_vm8, %v2891_v15  ;;  %499 = vst.msk [vmem:[#allocation4 + $0x48] sm:$0x7f] %vm493_vm8, %v2891_v15 }
  0x4b   : > { %504 = vst.msk [vmem:[#allocation4 + $0x70] sm:$0x7f] %vm493_vm8, %v2891_v15  ;;  %509 = vst.msk [vmem:[#allocation4 + $0x98] sm:$0x7f] %vm493_vm8, %v2891_v15 }
  0x4c   : > { %vm1981_vm11 = vmand %vm1974_vm9, %vm1980_vm10 }
  0x4d   : > { %v635_v2 = vld [vmem:[#allocation2 + $0x20] sm:$0x7f]  ;;  %vm2067_vm13 = vmand %vm2061_vm12, %vm1980_vm10 }
  0x4e   : > { %vm2153_vm15 = vmand %vm2147_vm14, %vm1980_vm10 }
  0x4f   : > { %2533 = vmatmul.mubr.msk.bf16.gmra.mxu0 %vm488_vm0, %v3048_v23 }
  0x50   : > { %2536 = vmatprep.mubr.msk.bf16.mxu0 %vm2892_vm1, %v2891_v15 }
  0x57   : > { %2537 = vmatmul.mubr.msk.bf16.gmra.mxu0 %vm488_vm0, %v3054_v24 }
  0x58   : > { %2582 = vmatprep.mubr.msk.bf16.mxu0 %vm2892_vm1, %v2891_v15 }
 0x107   : > { %v604_v26 = vpop.f32.mrf.mxu0 }
 0x108   : > { %v3124_v27 = vmul.f32 0.17677669, %v604_v26 }
 0x109   : > { %v2530_v28 = vpop.f32.mrf.mxu0 }
 0x10a   : > { %v637_v29 = vsel %vm636_vm3, %v3124_v27, -inf }
 0x10b   : > { %638 = vmax.xlane.f32.xlu0 %v637_v29  ;;  %v607_v30 = vpop.f32.mrf.mxu0 }
 0x10c   : > { %v3128_v31 = vmul.f32 0.17677669, %v607_v30 }
 0x10d   : > { %v2531_v32 = vpop.f32.mrf.mxu0 }
 0x10e   : > { %v640_v33 = vsel %vm636_vm3, %v3128_v31, -inf }
 0x10f   : > { %641 = vmax.xlane.f32.xlu0 %v640_v33  ;;  %v612_v34 = vpop.f32.mrf.mxu0 }
 0x110   : > { %v3132_v35 = vmul.f32 0.17677669, %v612_v34 }
 0x111   : > { %v2534_v36 = vpop.f32.mrf.mxu0 }
 0x112   : > { %v643_v37 = vsel %vm636_vm3, %v3132_v35, -inf }
 0x113   : > { %644 = vmax.xlane.f32.xlu1 %v643_v37  ;;  %v615_v38 = vpop.f32.mrf.mxu0 }
 0x114   : > { %v3136_v39 = vmul.f32 0.17677669, %v615_v38 }
 0x115   : > { %v2535_v40 = vpop.f32.mrf.mxu0 }
 0x116   : > { %v646_v41 = vsel %vm636_vm3, %v3136_v39, -inf }
 0x117   : > { %647 = vmax.xlane.f32.xlu1 %v646_v41  ;;  %v620_v43 = vpop.f32.mrf.mxu0 }
 0x118   : > { %v3140_v44 = vmul.f32 0.17677669, %v620_v43 }
 0x119   : > { %v2538_v45 = vpop.f32.mrf.mxu0 }
 0x11a   : > { %v650_v46 = vsel %vm649_vm4, %v3140_v44, -inf }
 0x11b   : > { %651 = vmax.xlane.f32.xlu0 %v650_v46  ;;  %v623_v47 = vpop.f32.mrf.mxu0 }
 0x11d   : > { %v2539_v48 = vpop.f32.mrf.mxu0 }
 0x194   : > { %v639_v50 = vpop.xlane.xlu0 %638 }
 0x195   : > { %v3163_v51 = vmax.f32 %v3160_v49, %v639_v50 }
 0x197   : > { %886 = vst.msk [vmem:[#allocation2] sm:$0xff] %vm446_vm2, %v3163_v51  ;;  %675 = vperm.xlu1 %2720, %v3163_v51   ;;  %v658_v13 = vsub.f32 %v3160_v49, %v3163_v51 }
 0x198   : > { %v642_v53 = vpop.xlane.xlu0 %641 }
 0x199   : > { %v654_v54 = vmax.f32 %v632_v52, %v642_v53  ;;  %v663_v14 = vmul.f32 1.442695, %v658_v13 }
 0x19b   : > { %887 = vst.msk [vmem:[#allocation2 + $0x8] sm:$0xff] %vm446_vm2, %v654_v54  ;;  %680 = vperm.xlu0 %2721, %v654_v54   ;;  %v659_v5 = vsub.f32 %v632_v52, %v654_v54 }
 0x19c   : > { %v645_v56 = vpop.xlane.xlu1 %644 }
 0x19d   : > { %v655_v60 = vmax.f32 %v3168_v55, %v645_v56  ;;  %v665_v8 = vmul.f32 1.442695, %v659_v5 }
 0x19f   : > { %888 = vst.msk [vmem:[#allocation2 + $0x10] sm:$0xff] %vm446_vm2, %v655_v60  ;;  %685 = vperm.xlu1 %2720, %v655_v60   ;;  %893 = vrot.lane.b32.xlu0 %v3048_v23, %s2896_s27  ;;  %2731 = vpow2.f32 %v665_v8  ;;  %v660_v17 = vsub.f32 %v3168_v55, %v655_v60 }
 0x1a0   : > { %v648_v0 = vpop.xlane.xlu1 %647 }
 0x1a1   : > { %v656_v1 = vmax.f32 %v3175_v61, %v648_v0  ;;  %v667_v19 = vmul.f32 1.442695, %v660_v17 }
 0x1a3   : > { %889 = vst.msk [vmem:[#allocation2 + $0x18] sm:$0xff] %vm446_vm2, %v656_v1  ;;  %690 = vperm.xlu1 %2720, %v656_v1   ;;  %895 = vrot.lane.b32.xlu0 %v3054_v24, %s2896_s27  ;;  %v661_v21 = vsub.f32 %v3175_v61, %v656_v1 }
 0x1a4   : > { %v652_v4 = vpop.xlane.xlu0 %651 }
 0x1a5   : > { %v657_v6 = vmax.f32 %v635_v2, %v652_v4 }
 0x1a7   : > { %890 = vst.msk [vmem:[#allocation2 + $0x20] sm:$0x7f] %vm451_vm5, %v657_v6  ;;  %1229 = vrot.lane.b32.xlu0 %v3042_v22, %s2897_s28  ;;  %695 = vperm.xlu1 %2720, %v657_v6   ;;  %v662_v9 = vsub.f32 %v635_v2, %v657_v6 }
 0x1a9   : > { %v671_v10 = vmul.f32 1.442695, %v662_v9 }
 0x1ab   : > { %1231 = vrot.lane.b32.xlu0 %v3048_v23, %s2897_s28  ;;  %901 = vrot.lane.b32.xlu1 %v3026_v16, %s2896_s27  ;;  %2733 = vpow2.f32 %v671_v10 }
 0x1ac   : > { %v3224_v11 = vpop.eup %2731  ;;  %2735 = vpow2.f32 %v663_v14 }
 0x1ad   : > { %2737 = vpow2.f32 %v667_v19 }
 0x1af   : > { %1233 = vrot.lane.b32.xlu0 %v3054_v24, %s2897_s28  ;;  %899 = vrot.lane.b32.xlu1 %v3032_v18, %s2896_s27 }
 0x1b3   : > { %1567 = vrot.lane.b32.xlu0 %v3042_v22, %s2898_s29  ;;  %897 = vrot.lane.b32.xlu1 %v3037_v20, %s2896_s27 }
 0x1b7   : > { %1571 = vrot.lane.b32.xlu0 %v3054_v24, %s2898_s29  ;;  %891 = vrot.lane.b32.xlu1 %v3042_v22, %s2896_s27  ;;  %v669_v22 = vmul.f32 1.442695, %v661_v21 }
 0x1b8   : > { %v3229_v12 = vpop.eup %2733 }
 0x1b9   : > { %2739 = vpow2.f32 %v669_v22  ;;  %v3248_v24 = vpop.eup %2735 }
 0x1bb   : > { %762 = vperm.xlu0 %2721, %v3224_v11   ;;  %1239 = vrot.lane.b32.xlu1 %v3026_v16, %s2897_s28 }
 0x1bf   : > { %1237 = vrot.lane.b32.xlu1 %v3032_v18, %s2897_s28  ;;  %777 = vperm.xlu0 %2721, %v3229_v12  }
 0x1c3   : > { %1235 = vrot.lane.b32.xlu1 %v3037_v20, %s2897_s28 }
 0x1c7   : > { %1577 = vrot.lane.b32.xlu1 %v3026_v16, %s2898_s29  ;;  %v3251_v16 = vpop.eup %2737 }
 0x1c8   : > { %v3254_v25 = vpop.eup %2739 }
 0x1cb   : > { %1575 = vrot.lane.b32.xlu1 %v3032_v18, %s2898_s29 }
 0x1cf   : > { %1573 = vrot.lane.b32.xlu1 %v3037_v20, %s2898_s29 }
 0x1d3   : > { %1569 = vrot.lane.b32.xlu1 %v3048_v23, %s2898_s29 }
 0x1d7   : > { %757 = vperm.xlu1 %2720, %v3248_v24  }
 0x1db   : > { %767 = vperm.xlu1 %2720, %v3251_v16  }
 0x1df   : > { %772 = vperm.xlu1 %2720, %v3254_v25  }
 0x212   : > { %v676_v18 = vpop.permute.xlu1 %675 }
 0x213   : > { %v698_v26 = vsub.f32 %v3124_v27, %v676_v18 }
 0x215   : > { %v703_v20 = vmul.f32 1.442695, %v698_v26 }
 0x216   : > { %v681_v28 = vpop.permute.xlu0 %680 }
 0x217   : > { %2741 = vpow2.f32 %v703_v20  ;;  %v699_v23 = vsub.f32 %v3128_v31, %v681_v28 }
 0x219   : > { %v705_v29 = vmul.f32 1.442695, %v699_v23 }
 0x21a   : > { %v686_v30 = vpop.permute.xlu1 %685  ;;  %v894_v0 = vpop.permute.xlu0 %893 }
 0x21b   : > { %2743 = vpow2.f32 %v705_v29  ;;  %v700_v32 = vsub.f32 %v3132_v35, %v686_v30  ;;  %v713_v29 = vld [vmem:[#allocation3] sm:$0xff] }
 0x21c   : > { %v718_v30 = vmul.f32 %v3248_v24, %v713_v29 }
 0x21d   : > { %v707_v33 = vmul.f32 1.442695, %v700_v32 }
 0x21e   : > { %v691_v34 = vpop.permute.xlu1 %690  ;;  %v896_v4 = vpop.permute.xlu0 %895 }
 0x21f   : > { %2745 = vpow2.f32 %v707_v33  ;;  %v701_v36 = vsub.f32 %v3136_v39, %v691_v34  ;;  %v714_v34 = vld [vmem:[#allocation3 + $0x8] sm:$0xff] }
 0x221   : > { %v709_v37 = vmul.f32 1.442695, %v701_v36 }
 0x222   : > { %v696_v38 = vpop.permute.xlu1 %695  ;;  %v1230_v8 = vpop.permute.xlu0 %1229 }
 0x223   : > { %2747 = vpow2.f32 %v709_v37  ;;  %v702_v27 = vsub.f32 %v3140_v44, %v696_v38  ;;  %v719_v37 = vmul.f32 %v3224_v11, %v714_v34 }
 0x224   : > { %v2742_v40 = vpop.eup %2741 }
 0x225   : > { %v711_v41 = vmul.f32 1.442695, %v702_v27  ;;  %v723_v42 = vsel %vm636_vm3, %v2742_v40, 0.0  ;;  %v715_v27 = vld [vmem:[#allocation3 + $0x10] sm:$0xff] }
 0x226   : > { %724 = vadd.xlane.f32.xlu1 %v723_v42  ;;  %v902_v43 = vpop.permute.xlu1 %901  ;;  %v1232_v13 = vpop.permute.xlu0 %1231 }
 0x227   : > { %2749 = vpow2.f32 %v711_v41  ;;  %v919_v35 = vsel %vm488_vm0, %v902_v43, 0  ;;  %v720_v41 = vmul.f32 %v3251_v16, %v715_v27 }
 0x228   : > { %v2744_v31 = vpop.eup %2743 }
 0x229   : > { %v726_v45 = vsel %vm636_vm3, %v2744_v31, 0.0  ;;  %v785_v46 = vpack.c.bf16 %v2744_v31, %v2742_v40  ;;  %v716_v31 = vld [vmem:[#allocation3 + $0x18] sm:$0xff] }
 0x22a   : > { %727 = vadd.xlane.f32.xlu0 %v726_v45  ;;  %v900_v47 = vpop.permute.xlu1 %899  ;;  %v1234_v19 = vpop.permute.xlu0 %1233  ;;  %v721_v24 = vmul.f32 %v3254_v25, %v716_v31  ;;  %v717_v45 = vld [vmem:[#allocation3 + $0x20] sm:$0x7f]  ;;  %v752_v25 = vld [vmem:[#allocation4 + $0x10] sm:$0xff] }
 0x22b   : > { %2547 = vmatmul.mubr.msk.bf16.vlgmr.msra.gmra.mxu1 %vm636_vm3, %v785_v46  ;;  %v916_v49 = vsel %vm488_vm0, %v900_v47, 0  ;;  %v722_v11 = vmul.f32 %v3229_v12, %v717_v45  ;;  %v750_v47 = vld [vmem:[#allocation4] sm:$0xff]  ;;  %v753_v12 = vld [vmem:[#allocation4 + $0x18] sm:$0xff] }
 0x22c   : > { %v2746_v39 = vpop.eup %2745  ;;  %2559 = vmatpush3.bf16.xpose.msra.mxu1 %v919_v35  ;;  %2550 = vmatprep.mubr.msk.bf16.mxu1 %vm2892_vm1, %v2891_v15 }
 0x22d   : > { %v729_v44 = vsel %vm636_vm3, %v2746_v39, 0.0  ;;  %2560 = vmatprep.subr.bf16.mxu1 %v2891_v15 }
 0x22e   : > { %730 = vadd.xlane.f32.xlu0 %v729_v44  ;;  %v898_v53 = vpop.permute.xlu1 %897  ;;  %v1568_v21 = vpop.permute.xlu0 %1567 }
 0x22f   : > { %v913_v55 = vsel %vm488_vm0, %v898_v53, 0 }
 0x230   : > { %v2748_v48 = vpop.eup %2747 }
 0x231   : > { %v732_v50 = vsel %vm636_vm3, %v2748_v48, 0.0  ;;  %v786_v51 = vpack.c.bf16 %v2748_v48, %v2746_v39  ;;  %v751_v48 = vld [vmem:[#allocation4 + $0x8] sm:$0xff] }
 0x232   : > { %733 = vadd.xlane.f32.xlu1 %v732_v50  ;;  %v892_v58 = vpop.permute.xlu1 %891  ;;  %v1572_v18 = vpop.permute.xlu0 %1571 }
 0x233   : > { %2551 = vmatmul.mubr.msk.bf16.gmra.mxu1 %vm636_vm3, %v786_v51 }
 0x234   : > { %v2750_v52 = vpop.eup %2749  ;;  %2561 = vmatpush3.bf16.xpose.msra.mxu1 %v916_v49  ;;  %2554 = vmatprep.mubr.msk.bf16.mxu1 %vm2892_vm1, %v2891_v15 }
 0x235   : > { %v735_v54 = vsel %vm649_vm4, %v2750_v52, 0.0  ;;  %2562 = vmatprep.subr.bf16.mxu1 %v2891_v15  ;;  %v787_v56 = vpack.c.bf16 %v2750_v52, %v2750_v52 }
 0x236   : > { %736 = vadd.xlane.f32.xlu0 %v735_v54  ;;  %v1240_v59 = vpop.permute.xlu1 %1239  ;;  %v763_v28 = vpop.permute.xlu0 %762 }
 0x237   : > { %v1257_v60 = vsel %vm488_vm0, %v1240_v59, 0  ;;  %v781_v52 = vmul.f32 %v763_v28, %v751_v48 }
 0x23a   : > { %v1238_v61 = vpop.permute.xlu1 %1237  ;;  %v778_v32 = vpop.permute.xlu0 %777 }
 0x23b   : > { %2555 = vmatmul.mubr.msk.bf16.gmra.mxu1 %vm636_vm3, %v787_v56  ;;  %v1254_v63 = vsel %vm488_vm0, %v1238_v61, 0 }
 0x23c   : > { %2563 = vmatpush3.bf16.xpose.msra.mxu1 %v913_v55  ;;  %2564 = vmatprep.mubr.msk.bf16.mxu1 %vm2892_vm1, %v2891_v15 }
 0x23d   : > { %2594 = vmatprep.subr.bf16.mxu1 %v2891_v15 }
 0x23e   : > { %v1236_v1 = vpop.permute.xlu1 %1235 }
 0x23f   : > { %v1251_v2 = vsel %vm488_vm0, %v1236_v1, 0 }
 0x242   : > { %v1578_v5 = vpop.permute.xlu1 %1577 }
 0x243   : > { %2565 = vmatmul.mubr.msk.bf16.vlgmr.msra.gmra.mxu1 %vm488_vm0, %v892_v58  ;;  %v1595_v6 = vsel %vm488_vm0, %v1578_v5, 0 }
 0x244   : > { %2595 = vmatpush3.bf16.xpose.msra.mxu1 %v1257_v60  ;;  %2568 = vmatprep.mubr.msk.bf16.mxu1 %vm2892_vm1, %v2891_v15 }
 0x245   : > { %2596 = vmatprep.subr.bf16.mxu1 %v2891_v15 }
 0x246   : > { %v1576_v9 = vpop.permute.xlu1 %1575 }
 0x247   : > { %v1592_v10 = vsel %vm488_vm0, %v1576_v9, 0 }
 0x24a   : > { %v1574_v14 = vpop.permute.xlu1 %1573 }
 0x24b   : > { %2569 = vmatmul.mubr.msk.bf16.gmra.mxu1 %vm488_vm0, %v894_v0  ;;  %v1589_v17 = vsel %vm488_vm0, %v1574_v14, 0 }
 0x24c   : > { %2597 = vmatpush3.bf16.xpose.msra.mxu1 %v1254_v63  ;;  %2572 = vmatprep.mubr.msk.bf16.mxu1 %vm2892_vm1, %v2891_v15  ;;  %v754_v63 = vld [vmem:[#allocation4 + $0x20] sm:$0x7f] }
 0x24d   : > { %2598 = vmatprep.subr.bf16.mxu1 %v2891_v15 }
 0x24e   : > { %v1570_v22 = vpop.permute.xlu1 %1569 }
 0x252   : > { %v758_v26 = vpop.permute.xlu1 %757 }
 0x253   : > { %2573 = vmatmul.mubr.msk.bf16.gmra.mxu1 %vm488_vm0, %v896_v4  ;;  %v780_v16 = vmul.f32 %v758_v26, %v750_v47  ;;  %v784_v4 = vmul.f32 %v778_v32, %v754_v63 }
 0x254   : > { %2599 = vmatpush3.bf16.xpose.msra.mxu1 %v1251_v2  ;;  %2600 = vmatprep.mubr.msk.bf16.mxu1 %vm2892_vm1, %v2891_v15 }
 0x255   : > { %2630 = vmatprep.subr.bf16.mxu1 %v2891_v15 }
 0x256   : > { %v768_v20 = vpop.permute.xlu1 %767 }
 0x257   : > { %v782_v56 = vmul.f32 %v768_v20, %v752_v25 }
 0x25a   : > { %v773_v23 = vpop.permute.xlu1 %772 }
 0x25b   : > { %2601 = vmatmul.mubr.msk.bf16.vlgmr.msra.gmra.mxu1 %vm488_vm0, %v1230_v8  ;;  %v783_v61 = vmul.f32 %v773_v23, %v753_v12 }
 0x25c   : > { %2631 = vmatpush3.bf16.xpose.msra.mxu1 %v1595_v6  ;;  %2604 = vmatprep.mubr.msk.bf16.mxu1 %vm2892_vm1, %v2891_v15 }
 0x25d   : > { %2632 = vmatprep.subr.bf16.mxu1 %v2891_v15 }
 0x263   : > { %2605 = vmatmul.mubr.msk.bf16.gmra.mxu1 %vm488_vm0, %v1232_v13 }
 0x264   : > { %2633 = vmatpush3.bf16.xpose.msra.mxu1 %v1592_v10  ;;  %2608 = vmatprep.mubr.msk.bf16.mxu1 %vm2892_vm1, %v2891_v15 }
 0x265   : > { %2634 = vmatprep.subr.bf16.mxu1 %v2891_v15 }
 0x26b   : > { %2609 = vmatmul.mubr.msk.bf16.gmra.mxu1 %vm488_vm0, %v1234_v19 }
 0x26c   : > { %2635 = vmatpush3.bf16.xpose.msra.mxu1 %v1589_v17  ;;  %2636 = vmatprep.mubr.msk.bf16.mxu1 %vm2892_vm1, %v2891_v15 }
 0x273   : > { %2637 = vmatmul.mubr.msk.bf16.vlgmr.msra.gmra.mxu1 %vm488_vm0, %v1568_v21 }
 0x274   : > { %2640 = vmatprep.mubr.msk.bf16.mxu1 %vm2892_vm1, %v2891_v15 }
 0x27b   : > { %2641 = vmatmul.mubr.msk.bf16.gmra.mxu1 %vm488_vm0, %v1570_v22 }
 0x27c   : > { %2644 = vmatprep.mubr.msk.bf16.mxu1 %vm2892_vm1, %v2891_v15 }
 0x283   : > { %2645 = vmatmul.mubr.msk.bf16.gmra.mxu1 %vm488_vm0, %v1572_v18 }
 0x2af   : > { %v725_v33 = vpop.xlane.xlu1 %724 }
 0x2b0   : > { %v738_v36 = vadd.f32 %v725_v33, %v718_v30 }
 0x2b2   : > { %744 = vst.msk [vmem:[#allocation3] sm:$0xff] %vm446_vm2, %v738_v36 }
 0x2b3   : > { %v728_v38 = vpop.xlane.xlu0 %727 }
 0x2b4   : > { %v739_v40 = vadd.f32 %v728_v38, %v719_v37 }
 0x2b6   : > { %745 = vst.msk [vmem:[#allocation3 + $0x8] sm:$0xff] %vm446_vm2, %v739_v40 }
 0x2b7   : > { %v731_v42 = vpop.xlane.xlu0 %730 }
 0x2b8   : > { %v740_v43 = vadd.f32 %v731_v42, %v720_v41 }
 0x2ba   : > { %746 = vst.msk [vmem:[#allocation3 + $0x10] sm:$0xff] %vm446_vm2, %v740_v43 }
 0x2bb   : > { %v734_v35 = vpop.xlane.xlu1 %733 }
 0x2bc   : > { %v741_v46 = vadd.f32 %v734_v35, %v721_v24 }
 0x2be   : > { %747 = vst.msk [vmem:[#allocation3 + $0x18] sm:$0xff] %vm446_vm2, %v741_v46 }
 0x2bf   : > { %v737_v39 = vpop.xlane.xlu0 %736 }
 0x2c0   : > { %v742_v44 = vadd.f32 %v737_v39, %v722_v11 }
 0x2c2   : > { %749 = vst.msk [vmem:[#allocation3 + $0x20] sm:$0x7f] %vm451_vm5, %v742_v44 }
 0x2eb   : > { %v853_v49 = vpop.f32.mrf.mxu1 }
 0x2ec   : > { %v875_v50 = vadd.f32 %v853_v49, %v780_v16 }
 0x2ed   : > { %v2548_v51 = vpop.f32.mrf.mxu1 }
 0x2ee   : > { %880 = vst.msk [vmem:[#allocation4] sm:$0xff] %vm488_vm0, %v875_v50 }
 0x2ef   : > { %v856_v53 = vpop.f32.mrf.mxu1 }
 0x2f0   : > { %v876_v54 = vadd.f32 %v856_v53, %v781_v52 }
 0x2f1   : > { %v2549_v55 = vpop.f32.mrf.mxu1 }
 0x2f2   : > { %881 = vst.msk [vmem:[#allocation4 + $0x8] sm:$0xff] %vm488_vm0, %v876_v54 }
 0x2f3   : > { %v861_v58 = vpop.f32.mrf.mxu1 }
 0x2f4   : > { %v877_v59 = vadd.f32 %v861_v58, %v782_v56 }
 0x2f5   : > { %v2552_v60 = vpop.f32.mrf.mxu1 }
 0x2f6   : > { %882 = vst.msk [vmem:[#allocation4 + $0x10] sm:$0xff] %vm488_vm0, %v877_v59 }
 0x2f7   : > { %v864_v0 = vpop.f32.mrf.mxu1 }
 0x2f8   : > { %v878_v1 = vadd.f32 %v864_v0, %v783_v61 }
 0x2f9   : > { %v2553_v2 = vpop.f32.mrf.mxu1 }
 0x2fa   : > { %883 = vst.msk [vmem:[#allocation4 + $0x18] sm:$0xff] %vm488_vm0, %v878_v1 }
 0x2fb   : > { %v869_v5 = vpop.f32.mrf.mxu1 }
 0x2fc   : > { %v879_v6 = vadd.f32 %v869_v5, %v784_v4 }
 0x2fd   : > { %v2556_v8 = vpop.f32.mrf.mxu1 }
 0x2fe   : > { %885 = vst.msk [vmem:[#allocation4 + $0x20] sm:$0x7f] %vm493_vm8, %v879_v6 }
 0x2ff   : > { %v872_v9 = vpop.f32.mrf.mxu1 }
 0x301   : > { %v2557_v10 = vpop.f32.mrf.mxu1 }
 0x303   : > { %v955_v13 = vpop.f32.mrf.mxu1 }
 0x304   : > { %v3333_v14 = vmul.f32 0.17677669, %v955_v13 }
 0x305   : > { %v2566_v17 = vpop.f32.mrf.mxu1 }
 0x306   : > { %v988_v19 = vsel %vm636_vm3, %v3333_v14, -inf }
 0x307   : > { %989 = vmax.xlane.f32.xlu1 %v988_v19  ;;  %v958_v21 = vpop.f32.mrf.mxu1 }
 0x308   : > { %v3337_v22 = vmul.f32 0.17677669, %v958_v21 }
 0x309   : > { %v2567_v18 = vpop.f32.mrf.mxu1 }
 0x30a   : > { %v991_v26 = vsel %vm636_vm3, %v3337_v22, -inf }
 0x30b   : > { %992 = vmax.xlane.f32.xlu0 %v991_v26  ;;  %v963_v20 = vpop.f32.mrf.mxu1  ;;  %v3389_v26 = vld [vmem:[#allocation2 + $0x28] sm:$0xff] }
 0x30c   : > { %v3341_v28 = vmul.f32 0.17677669, %v963_v20 }
 0x30d   : > { %v2570_v23 = vpop.f32.mrf.mxu1 }
 0x30e   : > { %v994_v29 = vsel %vm636_vm3, %v3341_v28, -inf }
 0x30f   : > { %995 = vmax.xlane.f32.xlu0 %v994_v29  ;;  %v966_v30 = vpop.f32.mrf.mxu1  ;;  %v3394_v29 = vld [vmem:[#allocation2 + $0x30] sm:$0xff] }
 0x310   : > { %v3345_v32 = vmul.f32 0.17677669, %v966_v30 }
 0x311   : > { %v2571_v33 = vpop.f32.mrf.mxu1 }
 0x312   : > { %v997_v34 = vsel %vm636_vm3, %v3345_v32, -inf }
 0x313   : > { %v971_v36 = vpop.f32.mrf.mxu1  ;;  %998 = vmax.xlane.f32.xlu1 %v997_v34 }
 0x314   : > { %v3349_v37 = vmul.f32 0.17677669, %v971_v36  ;;  %v3404_v36 = vld [vmem:[#allocation2 + $0x38] sm:$0xff] }
 0x315   : > { %v2574_v38 = vpop.f32.mrf.mxu1 }
 0x316   : > { %v1000_v27 = vsel %vm649_vm4, %v3349_v37, -inf }
 0x317   : > { %v974_v40 = vpop.f32.mrf.mxu1  ;;  %1001 = vmax.xlane.f32.xlu0 %v1000_v27 }
 0x319   : > { %v2575_v41 = vpop.f32.mrf.mxu1 }
 0x31a   : > { %v3414_v41 = vld [vmem:[#allocation2 + $0x40] sm:$0xff] }
 0x31b   : > { %v1293_v42 = vpop.f32.mrf.mxu1 }
 0x31c   : > { %v3353_v31 = vmul.f32 0.17677669, %v1293_v42 }
 0x31d   : > { %v2602_v43 = vpop.f32.mrf.mxu1 }
 0x31e   : > { %v1326_v24 = vsel %vm636_vm3, %v3353_v31, -inf }
 0x31f   : > { %1327 = vmax.xlane.f32.xlu0 %v1326_v24  ;;  %v1296_v35 = vpop.f32.mrf.mxu1 }
 0x320   : > { %v3357_v45 = vmul.f32 0.17677669, %v1296_v35  ;;  %v3424_v35 = vld [vmem:[#allocation2 + $0x48] sm:$0x7f] }
 0x321   : > { %v2603_v46 = vpop.f32.mrf.mxu1 }
 0x322   : > { %v1329_v11 = vsel %vm636_vm3, %v3357_v45, -inf }
 0x323   : > { %1330 = vmax.xlane.f32.xlu0 %v1329_v11  ;;  %v1301_v39 = vpop.f32.mrf.mxu1 }
 0x324   : > { %v3361_v44 = vmul.f32 0.17677669, %v1301_v39 }
 0x325   : > { %v2606_v47 = vpop.f32.mrf.mxu1 }
 0x326   : > { %v1332_v16 = vsel %vm636_vm3, %v3361_v44, -inf }
 0x327   : > { %1333 = vmax.xlane.f32.xlu0 %v1332_v16  ;;  %v1304_v48 = vpop.f32.mrf.mxu1  ;;  %v3441_v16 = vld [vmem:[#allocation2 + $0x50] sm:$0xff] }
 0x328   : > { %v3365_v49 = vmul.f32 0.17677669, %v1304_v48 }
 0x329   : > { %v2607_v50 = vpop.f32.mrf.mxu1 }
 0x32a   : > { %v1335_v51 = vsel %vm636_vm3, %v3365_v49, -inf }
 0x32b   : > { %1336 = vmax.xlane.f32.xlu0 %v1335_v51  ;;  %v1309_v52 = vpop.f32.mrf.mxu1  ;;  %v3447_v51 = vld [vmem:[#allocation2 + $0x58] sm:$0xff] }
 0x32c   : > { %v3369_v25 = vmul.f32 0.17677669, %v1309_v52 }
 0x32d   : > { %v2610_v53 = vpop.f32.mrf.mxu1 }
 0x32e   : > { %v1338_v54 = vsel %vm649_vm4, %v3369_v25, -inf }
 0x32f   : > { %1339 = vmax.xlane.f32.xlu1 %v1338_v54  ;;  %v1312_v55 = vpop.f32.mrf.mxu1 }
 0x330   : > { %v3458_v55 = vld [vmem:[#allocation2 + $0x60] sm:$0xff] }
 0x331   : > { %v2611_v56 = vpop.f32.mrf.mxu1 }
 0x333   : > { %v1631_v12 = vpop.f32.mrf.mxu1 }
 0x334   : > { %v3373_v58 = vmul.f32 0.17677669, %v1631_v12 }
 0x335   : > { %v2638_v59 = vpop.f32.mrf.mxu1 }
 0x336   : > { %v1664_v60 = vsel %vm636_vm3, %v3373_v58, -inf }
 0x337   : > { %1665 = vmax.xlane.f32.xlu0 %v1664_v60  ;;  %v1634_v61 = vpop.f32.mrf.mxu1 }
 0x338   : > { %v3377_v63 = vmul.f32 0.17677669, %v1634_v61  ;;  %v3470_v61 = vld [vmem:[#allocation2 + $0x68] sm:$0xff] }
 0x339   : > { %v2639_v0 = vpop.f32.mrf.mxu1 }
 0x33a   : > { %v1667_v1 = vsel %vm636_vm3, %v3377_v63, -inf }
 0x33b   : > { %1668 = vmax.xlane.f32.xlu0 %v1667_v1  ;;  %v1639_v2 = vpop.f32.mrf.mxu1 }
 0x33c   : > { %v3381_v4 = vmul.f32 0.17677669, %v1639_v2 }
 0x33d   : > { %v2642_v5 = vpop.f32.mrf.mxu1 }
 0x33e   : > { %v1670_v6 = vsel %vm636_vm3, %v3381_v4, -inf }
 0x33f   : > { %1671 = vmax.xlane.f32.xlu0 %v1670_v6  ;;  %v1642_v8 = vpop.f32.mrf.mxu1  ;;  %v3481_v6 = vld [vmem:[#allocation2 + $0x70] sm:$0x7f] }
 0x340   : > { %v3385_v9 = vmul.f32 0.17677669, %v1642_v8 }
 0x341   : > { %v2643_v10 = vpop.f32.mrf.mxu1 }
 0x342   : > { %v1673_v13 = vsel %vm636_vm3, %v3385_v9, -inf }
 0x343   : > { %1674 = vmax.xlane.f32.xlu0 %v1673_v13  ;;  %v1647_v17 = vpop.f32.mrf.mxu1 }
 0x344   : > { %v3465_v12 = vmul.f32 0.17677669, %v1647_v17 }
 0x345   : > { %v2646_v19 = vpop.f32.mrf.mxu1 }
 0x346   : > { %v1676_v2 = vsel %vm649_vm4, %v3465_v12, -inf  ;;  %v3496_v19 = vld [vmem:[#allocation2 + $0x78] sm:$0xff] }
 0x347   : > { %v1650_v21 = vpop.f32.mrf.mxu1 }
 0x349   : > { %v2647_v18 = vpop.f32.mrf.mxu1 }
 0x390   : > { %v990_v20 = vpop.xlane.xlu1 %989 }
 0x391   : > { %v3392_v23 = vmax.f32 %v3389_v26, %v990_v20  ;;  %v3503_v20 = vld [vmem:[#allocation2 + $0x80] sm:$0xff] }
 0x393   : > { %v1008_v30 = vsub.f32 %v3389_v26, %v3392_v23  ;;  %1224 = vst.msk [vmem:[#allocation2 + $0x28] sm:$0xff] %vm446_vm2, %v3392_v23  ;;  %1025 = vperm.xlu1 %2720, %v3392_v23  }
 0x394   : > { %v993_v33 = vpop.xlane.xlu0 %992 }
 0x395   : > { %v3402_v34 = vmax.f32 %v3394_v29, %v993_v33 }
 0x397   : > { %v1009_v38 = vsub.f32 %v3394_v29, %v3402_v34  ;;  %1225 = vst.msk [vmem:[#allocation2 + $0x30] sm:$0xff] %vm446_vm2, %v3402_v34  ;;  %1030 = vperm.xlu0 %2721, %v3402_v34  }
 0x398   : > { %v996_v27 = vpop.xlane.xlu0 %995 }
 0x399   : > { %v3412_v40 = vmax.f32 %v3404_v36, %v996_v27 }
 0x39b   : > { %1226 = vst.msk [vmem:[#allocation2 + $0x38] sm:$0xff] %vm446_vm2, %v3412_v40  ;;  %1035 = vperm.xlu0 %2721, %v3412_v40  }
 0x39c   : > { %v999_v43 = vpop.xlane.xlu1 %998 }
 0x39d   : > { %v3422_v24 = vmax.f32 %v3414_v41, %v999_v43 }
 0x39f   : > { %1142 = vrot.lane.b32.xlu0 %v3172_v57, %s2896_s27  ;;  %1227 = vst.msk [vmem:[#allocation2 + $0x40] sm:$0xff] %vm446_vm2, %v3422_v24 }
 0x3a0   : > { %v1002_v11 = vpop.xlane.xlu0 %1001 }
 0x3a1   : > { %v3433_v39 = vmax.f32 %v3424_v35, %v1002_v11  ;;  %v3512_v11 = vld [vmem:[#allocation2 + $0x88] sm:$0xff] }
 0x3a3   : > { %1140 = vrot.lane.b32.xlu0 %v3186_v3, %s2896_s27  ;;  %1228 = vst.msk [vmem:[#allocation2 + $0x48] sm:$0x7f] %vm451_vm5, %v3433_v39 }
 0x3a7   : > { %1045 = vperm.xlu0 %2721, %v3433_v39  }
 0x3a8   : > { %v1328_v48 = vpop.xlane.xlu0 %1327 }
 0x3a9   : > { %v3445_v50 = vmax.f32 %v3441_v16, %v1328_v48 }
 0x3ab   : > { %1562 = vst.msk [vmem:[#allocation2 + $0x50] sm:$0xff] %vm446_vm2, %v3445_v50  ;;  %1138 = vrot.lane.b32.xlu0 %v3193_v7, %s2896_s27 }
 0x3ac   : > { %v1331_v53 = vpop.xlane.xlu0 %1330 }
 0x3ad   : > { %v3456_v54 = vmax.f32 %v3447_v51, %v1331_v53 }
 0x3af   : > { %1563 = vst.msk [vmem:[#allocation2 + $0x58] sm:$0xff] %vm446_vm2, %v3456_v54  ;;  %1368 = vperm.xlu0 %2721, %v3456_v54  }
 0x3b0   : > { %v1334_v59 = vpop.xlane.xlu0 %1333 }
 0x3b1   : > { %v3468_v60 = vmax.f32 %v3458_v55, %v1334_v59 }
 0x3b3   : > { %1564 = vst.msk [vmem:[#allocation2 + $0x60] sm:$0xff] %vm446_vm2, %v3468_v60 }
 0x3b4   : > { %v1337_v1 = vpop.xlane.xlu0 %1336 }
 0x3b5   : > { %v3479_v5 = vmax.f32 %v3470_v61, %v1337_v1  ;;  %v3523_v1 = vld [vmem:[#allocation2 + $0x90] sm:$0xff] }
 0x3b7   : > { %1565 = vst.msk [vmem:[#allocation2 + $0x68] sm:$0xff] %vm446_vm2, %v3479_v5  ;;  %1677 = vmax.xlane.f32.xlu1 %v1676_v2  ;;  %1378 = vperm.xlu0 %2721, %v3479_v5  }
 0x3b8   : > { %v1340_v10 = vpop.xlane.xlu1 %1339 }
 0x3b9   : > { %v3489_v13 = vmax.f32 %v3481_v6, %v1340_v10 }
 0x3bb   : > { %1566 = vst.msk [vmem:[#allocation2 + $0x70] sm:$0x7f] %vm451_vm5, %v3489_v13  ;;  %1383 = vperm.xlu0 %2721, %v3489_v13  }
 0x3bf   : > { %1476 = vrot.lane.b32.xlu0 %v3193_v7, %s2897_s28 }
 0x3c0   : > { %v1666_v21 = vpop.xlane.xlu0 %1665 }
 0x3c1   : > { %v3501_v18 = vmax.f32 %v3496_v19, %v1666_v21 }
 0x3c3   : > { %1900 = vst.msk [vmem:[#allocation2 + $0x78] sm:$0xff] %vm446_vm2, %v3501_v18  ;;  %v3863_v29 = vsub.f32 %v3496_v19, %v3501_v18 }
 0x3c4   : > { %v1669_v27 = vpop.xlane.xlu0 %1668 }
 0x3c5   : > { %v3510_v43 = vmax.f32 %v3503_v20, %v1669_v27  ;;  %v1689_v34 = vmul.f32 1.442695, %v3863_v29 }
 0x3c7   : > { %1901 = vst.msk [vmem:[#allocation2 + $0x80] sm:$0xff] %vm446_vm2, %v3510_v43  ;;  %1706 = vperm.xlu0 %2721, %v3510_v43  }
 0x3c8   : > { %1040 = vperm.xlu1 %2720, %v3422_v24   ;;  %v1672_v53 = vpop.xlane.xlu0 %1671 }
 0x3c9   : > { %v3521_v59 = vmax.f32 %v3512_v11, %v1672_v53  ;;  %v1013_v53 = vmul.f32 1.442695, %v1008_v30 }
 0x3cb   : > { %1902 = vst.msk [vmem:[#allocation2 + $0x88] sm:$0xff] %vm446_vm2, %v3521_v59  ;;  %2751 = vpow2.f32 %v1013_v53 }
 0x3cc   : > { %1363 = vperm.xlu1 %2720, %v3445_v50   ;;  %v1675_v10 = vpop.xlane.xlu0 %1674 }
 0x3cd   : > { %v3531_v21 = vmax.f32 %v3523_v1, %v1675_v10 }
 0x3cf   : > { %1903 = vst.msk [vmem:[#allocation2 + $0x90] sm:$0xff] %vm446_vm2, %v3531_v21  ;;  %1716 = vperm.xlu0 %2721, %v3531_v21  }
 0x3d0   : > { %1373 = vperm.xlu1 %2720, %v3468_v60  }
 0x3d4   : > { %1480 = vrot.lane.b32.xlu1 %v3172_v57, %s2897_s28 }
 0x3d8   : > { %1478 = vrot.lane.b32.xlu1 %v3186_v3, %s2897_s28  ;;  %v3552_v10 = vpop.eup %2751 }
 0x3dc   : > { %1701 = vperm.xlu1 %2720, %v3501_v18   ;;  %v1913_v18 = vld [vmem:[#allocation3] sm:$0xff] }
 0x3e0   : > { %1711 = vperm.xlu1 %2720, %v3521_v59  }
 0x3e4   : > { %1818 = vrot.lane.b32.xlu1 %v3172_v57, %s2898_s29 }
 0x3e8   : > { %1816 = vrot.lane.b32.xlu1 %v3186_v3, %s2898_s29 }
 0x3ec   : > { %1107 = vperm.xlu1 %2720, %v3552_v10  }
 0x40e   : > { %v1026_v17 = vpop.permute.xlu1 %1025 }
 0x40f   : > { %v1048_v27 = vsub.f32 %v3333_v14, %v1026_v17 }
 0x411   : > { %v1053_v26 = vmul.f32 1.442695, %v1048_v27 }
 0x412   : > { %v1031_v23 = vpop.permute.xlu0 %1030 }
 0x413   : > { %2753 = vpow2.f32 %v1053_v26  ;;  %v1049_v30 = vsub.f32 %v3337_v22, %v1031_v23 }
 0x415   : > { %v1055_v53 = vmul.f32 1.442695, %v1049_v30 }
 0x416   : > { %v1036_v56 = vpop.permute.xlu0 %1035 }
 0x417   : > { %2755 = vpow2.f32 %v1055_v53  ;;  %v1050_v30 = vsub.f32 %v3341_v28, %v1036_v56 }
 0x41a   : > { %v1143_v48 = vpop.permute.xlu0 %1142 }
 0x41b   : > { %v1156_v57 = vand.u32 %v1143_v48, %v3177_v62 }
 0x41d   : > { %2577 = vmatpush3.bf16.msra.mxu0 %v1156_v57 }
 0x41e   : > { %v1141_v3 = vpop.permute.xlu0 %1140  ;;  %2578 = vmatprep.subr.bf16.mxu0 %v2891_v15 }
 0x420   : > { %v2754_v0 = vpop.eup %2753 }
 0x421   : > { %v1074_v42 = vsel %vm636_vm3, %v2754_v0, 0.0  ;;  %2579 = vmatpush3.bf16.msra.mxu0 %v1141_v3 }
 0x422   : > { %1075 = vadd.xlane.f32.xlu1 %v1074_v42  ;;  %v1046_v14 = vpop.permute.xlu0 %1045  ;;  %2580 = vmatprep.subr.bf16.mxu0 %v2891_v15  ;;  %v3570_v42 = vld [vmem:[#allocation2 + $0x98] sm:$0x7f] }
 0x423   : > { %v1052_v2 = vsub.f32 %v3349_v37, %v1046_v14 }
 0x424   : > { %v3561_v17 = vpop.eup %2755 }
 0x425   : > { %v1135_v27 = vpack.c.bf16 %v3561_v17, %v2754_v0  ;;  %v1061_v33 = vmul.f32 1.442695, %v1052_v2 }
 0x426   : > { %v1139_v22 = vpop.permute.xlu0 %1138 }
 0x427   : > { %2581 = vmatpush3.bf16.msra.mxu0 %v1139_v22  ;;  %v1057_v22 = vmul.f32 1.442695, %v1050_v30 }
 0x428   : > { %2612 = vmatprep.subr.bf16.mxu0 %v2891_v15 }
 0x429   : > { %2757 = vpow2.f32 %v1057_v22 }
 0x42a   : > { %2583 = vmatmul.mubr.msk.bf16.vlgmr.msra.gmra.mxu0 %vm636_vm3, %v1135_v27  ;;  %v1369_v48 = vpop.permute.xlu0 %1368 }
 0x42b   : > { %2586 = vmatprep.mubr.msk.bf16.mxu0 %vm2892_vm1, %v2891_v15  ;;  %v1387_v22 = vsub.f32 %v3357_v45, %v1369_v48 }
 0x432   : > { %v1379_v26 = vpop.permute.xlu0 %1378 }
 0x436   : > { %v3568_v23 = vpop.permute.xlu0 %1383 }
 0x43a   : > { %v1477_v0 = vpop.permute.xlu0 %1476 }
 0x440   : > { %v1678_v53 = vpop.xlane.xlu1 %1677 }
 0x441   : > { %v3574_v57 = vmax.f32 %v3570_v42, %v1678_v53 }
 0x442   : > { %v1707_v56 = vpop.permute.xlu0 %1706 }
 0x443   : > { %1904 = vst.msk [vmem:[#allocation2 + $0x98] sm:$0x7f] %vm451_vm5, %v3574_v57  ;;  %1721 = vperm.xlu0 %2721, %v3574_v57   ;;  %v1725_v8 = vsub.f32 %v3377_v63, %v1707_v56 }
 0x444   : > { %v1041_v27 = vpop.permute.xlu1 %1040 }
 0x445   : > { %v1051_v46 = vsub.f32 %v3345_v32, %v1041_v27  ;;  %v1731_v37 = vmul.f32 1.442695, %v1725_v8  ;;  %v1389_v8 = vsub.f32 %v3365_v49, %v1379_v26  ;;  %v1390_v26 = vsub.f32 %v3369_v25, %v3568_v23 }
 0x446   : > { %v1077_v23 = vsel %vm636_vm3, %v3561_v17, 0.0 }
 0x447   : > { %v1059_v28 = vmul.f32 1.442695, %v1051_v46  ;;  %1814 = vrot.lane.b32.xlu0 %v3193_v7, %s2898_s29 }
 0x448   : > { %v1364_v53 = vpop.permute.xlu1 %1363 }
 0x449   : > { %2759 = vpow2.f32 %v1059_v28  ;;  %v1386_v3 = vsub.f32 %v3353_v31, %v1364_v53  ;;  %v1397_v53 = vmul.f32 1.442695, %v1389_v8 }
 0x44a   : > { %v1717_v30 = vpop.permute.xlu0 %1716 }
 0x44b   : > { %v1391_v52 = vmul.f32 1.442695, %v1386_v3  ;;  %v1727_v46 = vsub.f32 %v3385_v9, %v1717_v30  ;;  %v1393_v3 = vmul.f32 1.442695, %v1387_v22 }
 0x44c   : > { %v1374_v47 = vpop.permute.xlu1 %1373 }
 0x44d   : > { %2761 = vpow2.f32 %v1391_v52  ;;  %v1388_v32 = vsub.f32 %v3361_v44, %v1374_v47  ;;  %v1735_v2 = vmul.f32 1.442695, %v1727_v46  ;;  %v2758_v52 = vpop.eup %2757 }
 0x44e   : > { %2763 = vpow2.f32 %v1061_v33 }
 0x44f   : > { %v1395_v7 = vmul.f32 1.442695, %v1388_v32 }
 0x450   : > { %v1481_v14 = vpop.permute.xlu1 %1480 }
 0x451   : > { %2765 = vpow2.f32 %v1395_v7  ;;  %v1494_v31 = vand.u32 %v1481_v14, %v3177_v62 }
 0x452   : > { %2767 = vpow2.f32 %v1731_v37 }
 0x453   : > { %2613 = vmatpush3.bf16.msra.mxu0 %v1494_v31  ;;  %2769 = vpow2.f32 %v1735_v2 }
 0x454   : > { %v1479_v63 = vpop.permute.xlu1 %1478  ;;  %2614 = vmatprep.subr.bf16.mxu0 %v2891_v15  ;;  %2771 = vpow2.f32 %v1393_v3  ;;  %v1080_v3 = vsel %vm636_vm3, %v2758_v52, 0.0 }
 0x456   : > { %v2760_v44 = vpop.eup %2759 }
 0x457   : > { %v1083_v47 = vsel %vm636_vm3, %v2760_v44, 0.0  ;;  %v1136_v9 = vpack.c.bf16 %v2760_v44, %v2758_v52  ;;  %2615 = vmatpush3.bf16.msra.mxu0 %v1479_v63 }
 0x458   : > { %v1702_v45 = vpop.permute.xlu1 %1701  ;;  %1084 = vadd.xlane.f32.xlu1 %v1083_v47  ;;  %2616 = vmatprep.subr.bf16.mxu0 %v2891_v15 }
 0x459   : > { %v1724_v33 = vsub.f32 %v3373_v58, %v1702_v45  ;;  %2587 = vmatmul.mubr.msk.bf16.gmra.mxu0 %vm636_vm3, %v1136_v9 }
 0x45a   : > { %v2762_v48 = vpop.eup %2761  ;;  %2590 = vmatprep.mubr.msk.bf16.mxu0 %vm2892_vm1, %v2891_v15 }
 0x45b   : > { %v1729_v27 = vmul.f32 1.442695, %v1724_v33  ;;  %v1412_v28 = vsel %vm636_vm3, %v2762_v48, 0.0  ;;  %2617 = vmatpush3.bf16.msra.mxu0 %v1477_v0  ;;  %v2764_v56 = vpop.eup %2763  ;;  %v1399_v0 = vmul.f32 1.442695, %v1390_v26 }
 0x45c   : > { %1413 = vadd.xlane.f32.xlu1 %v1412_v28  ;;  %v1712_v49 = vpop.permute.xlu1 %1711  ;;  %2648 = vmatprep.subr.bf16.mxu0 %v2891_v15  ;;  %v1137_v46 = vpack.c.bf16 %v2764_v56, %v2764_v56  ;;  %v1086_v47 = vsel %vm649_vm4, %v2764_v56, 0.0  ;;  %v1015_v26 = vmul.f32 1.442695, %v1009_v38 }
 0x45d   : > { %2773 = vpow2.f32 %v1729_v27  ;;  %v1726_v58 = vsub.f32 %v3381_v4, %v1712_v49 }
 0x45e   : > { %v2766_v30 = vpop.eup %2765  ;;  %2775 = vpow2.f32 %v1397_v53 }
 0x45f   : > { %v1733_v32 = vmul.f32 1.442695, %v1726_v58  ;;  %v1418_v37 = vsel %vm636_vm3, %v2766_v30, 0.0  ;;  %v3605_v7 = vpop.eup %2767  ;;  %v3860_v58 = vsub.f32 %v3424_v35, %v3433_v39  ;;  %v3864_v35 = vsub.f32 %v3512_v11, %v3521_v59  ;;  %v1914_v59 = vld [vmem:[#allocation3 + $0x8] sm:$0xff] }
 0x460   : > { %1419 = vadd.xlane.f32.xlu1 %v1418_v37  ;;  %v1753_v25 = vsel %vm636_vm3, %v3605_v7, 0.0  ;;  %v3612_v4 = vpop.eup %2769  ;;  %v1819_v22 = vpop.permute.xlu1 %1818 }
 0x461   : > { %2777 = vpow2.f32 %v1733_v32  ;;  %2591 = vmatmul.mubr.msk.bf16.gmra.mxu0 %vm636_vm3, %v1137_v46  ;;  %v2772_v14 = vpop.eup %2771  ;;  %v1832_v2 = vand.u32 %v1819_v22, %v3177_v62  ;;  %v1759_v63 = vsel %vm636_vm3, %v3612_v4, 0.0  ;;  %v3861_v32 = vsub.f32 %v3441_v16, %v3445_v50 }
 0x462   : > { %2618 = vmatprep.mubr.msk.bf16.mxu0 %vm2892_vm1, %v2891_v15  ;;  %2779 = vpow2.f32 %v1399_v0  ;;  %v1473_v31 = vpack.c.bf16 %v2772_v14, %v2762_v48  ;;  %v1415_v33 = vsel %vm636_vm3, %v2772_v14, 0.0  ;;  %v3862_v46 = vsub.f32 %v3470_v61, %v3479_v5 }
 0x463   : > { %2781 = vpow2.f32 %v1015_v26  ;;  %v1351_v37 = vmul.f32 1.442695, %v3861_v32  ;;  %v1693_v39 = vmul.f32 1.442695, %v3864_v35  ;;  %v3865_v50 = vsub.f32 %v3570_v42, %v3574_v57  ;;  %v1741_v32 = vld [vmem:[#allocation3 + $0x80] sm:$0xff] }
 0x464   : > { %1754 = vadd.xlane.f32.xlu1 %v1753_v25  ;;  %v1817_v8 = vpop.permute.xlu1 %1816  ;;  %v1357_v0 = vmul.f32 1.442695, %v3862_v46 }
 0x465   : > { %v1697_v61 = vmul.f32 1.442695, %v3865_v50 }
 0x466   : > { %1078 = vadd.xlane.f32.xlu0 %v1077_v23  ;;  %v1064_v23 = vld [vmem:[#allocation3 + $0x28] sm:$0xff] }
 0x467   : > { %v1069_v42 = vmul.f32 %v3552_v10, %v1064_v23 }
 0x468   : > { %1760 = vadd.xlane.f32.xlu1 %v1759_v63  ;;  %v3679_v25 = vpop.permute.xlu1 %1107 }
 0x469   : > { %2619 = vmatmul.mubr.msk.bf16.vlgmr.msra.gmra.mxu0 %vm636_vm3, %v1473_v31 }
 0x46a   : > { %v3621_v44 = vpop.eup %2773  ;;  %1081 = vadd.xlane.f32.xlu0 %v1080_v3  ;;  %2622 = vmatprep.mubr.msk.bf16.mxu0 %vm2892_vm1, %v2891_v15 }
 0x46b   : > { %v1811_v17 = vpack.c.bf16 %v3605_v7, %v3621_v44  ;;  %2649 = vmatpush3.bf16.msra.mxu0 %v1832_v2  ;;  %v2776_v62 = vpop.eup %2775  ;;  %v1750_v53 = vsel %vm636_vm3, %v3621_v44, 0.0  ;;  %v3867_v7 = vsub.f32 %v3404_v36, %v3412_v40  ;;  %v3870_v36 = vsub.f32 %v3447_v51, %v3456_v54 }
 0x46c   : > { %2650 = vmatprep.subr.bf16.mxu0 %v2891_v15  ;;  %v1474_v52 = vpack.c.bf16 %v2776_v62, %v2766_v30  ;;  %v1421_v56 = vsel %vm636_vm3, %v2776_v62, 0.0  ;;  %v1021_v30 = vmul.f32 1.442695, %v3860_v58 }
 0x46d   : > { %v1017_v44 = vmul.f32 1.442695, %v3867_v7  ;;  %v1353_v40 = vmul.f32 1.442695, %v3870_v36 }
 0x46e   : > { %v3629_v9 = vpop.eup %2777  ;;  %1087 = vadd.xlane.f32.xlu0 %v1086_v47  ;;  %2783 = vpow2.f32 %v1021_v30 }
 0x46f   : > { %2651 = vmatpush3.bf16.msra.mxu0 %v1817_v8  ;;  %v1812_v45 = vpack.c.bf16 %v3612_v4, %v3629_v9  ;;  %v2780_v48 = vpop.eup %2779  ;;  %v1756_v49 = vsel %vm636_vm3, %v3629_v9, 0.0  ;;  %2785 = vpow2.f32 %v1351_v37  ;;  %v3866_v8 = vsub.f32 %v3414_v41, %v3422_v24 }
 0x470   : > { %2652 = vmatprep.subr.bf16.mxu0 %v2891_v15  ;;  %v1424_v27 = vsel %vm649_vm4, %v2780_v48, 0.0  ;;  %v1475_v28 = vpack.c.bf16 %v2780_v48, %v2780_v48  ;;  %2787 = vpow2.f32 %v1357_v0  ;;  %v3662_v38 = vpop.eup %2781  ;;  %v3868_v41 = vsub.f32 %v3458_v55, %v3468_v60  ;;  %v1067_v60 = vld [vmem:[#allocation3 + $0x40] sm:$0xff] }
 0x471   : > { %2623 = vmatmul.mubr.msk.bf16.gmra.mxu0 %vm636_vm3, %v1474_v52  ;;  %2789 = vpow2.f32 %v1689_v34  ;;  %v1019_v52 = vmul.f32 1.442695, %v3866_v8  ;;  %v3871_v9 = vsub.f32 %v3523_v1, %v3531_v21  ;;  %v1404_v21 = vld [vmem:[#allocation3 + $0x60] sm:$0xff]  ;;  %v1065_v34 = vld [vmem:[#allocation3 + $0x30] sm:$0xff] }
 0x472   : > { %1416 = vadd.xlane.f32.xlu0 %v1415_v33  ;;  %2626 = vmatprep.mubr.msk.bf16.mxu0 %vm2892_vm1, %v2891_v15  ;;  %2791 = vpow2.f32 %v1693_v39  ;;  %v1355_v24 = vmul.f32 1.442695, %v3868_v41  ;;  %v1070_v23 = vmul.f32 %v3662_v38, %v1065_v34 }
 0x473   : > { %2793 = vpow2.f32 %v1697_v61 }
 0x474   : > { %2795 = vrcp.f32 %v1913_v18 }
 0x475   : > { %2797 = vrcp.f32 %v1914_v59 }
 0x476   : > { %1425 = vadd.xlane.f32.xlu0 %v1424_v27  ;;  %v3872_v27 = vsub.f32 %v3481_v6, %v3489_v13 }
 0x479   : > { %2627 = vmatmul.mubr.msk.bf16.gmra.mxu0 %vm636_vm3, %v1475_v28  ;;  %v1359_v28 = vmul.f32 1.442695, %v3872_v27 }
 0x47a   : > { %1422 = vadd.xlane.f32.xlu0 %v1421_v56  ;;  %2654 = vmatprep.mubr.msk.bf16.mxu0 %vm2892_vm1, %v2891_v15 }
 0x47b   : > { %v3668_v16 = vpop.eup %2783 }
 0x47c   : > { %v2786_v5 = vpop.eup %2785 }
 0x47d   : > { %v3674_v19 = vpop.eup %2787 }
 0x47e   : > { %1751 = vadd.xlane.f32.xlu0 %v1750_v53  ;;  %v3677_v11 = vpop.eup %2789 }
 0x47f   : > { %v3683_v57 = vpop.eup %2791 }
 0x480   : > { %v3687_v31 = vpop.eup %2793 }
 0x481   : > { %v2796_v2 = vpop.eup %2795 }
 0x482   : > { %1757 = vadd.xlane.f32.xlu0 %v1756_v49  ;;  %v2798_v63 = vpop.eup %2797  ;;  %v1100_v49 = vld [vmem:[#allocation4 + $0x28] sm:$0xff] }
 0x483   : > { %v1130_v13 = vmul.f32 %v3679_v25, %v1100_v49  ;;  %v1742_v49 = vld [vmem:[#allocation3 + $0x88] sm:$0xff] }
 0x498   : > { %1112 = vperm.xlu0 %2721, %v3662_v38  }
 0x49c   : > { %1127 = vperm.xlu0 %2721, %v3668_v16  }
 0x4a0   : > { %1445 = vperm.xlu0 %2721, %v2786_v5  }
 0x4a4   : > { %1460 = vperm.xlu0 %2721, %v3674_v19  }
 0x4a8   : > { %1783 = vperm.xlu0 %2721, %v3677_v11  }
 0x4ab   : > { %v1076_v14 = vpop.xlane.xlu1 %1075 }
 0x4ac   : > { %v1089_v22 = vadd.f32 %v1076_v14, %v1069_v42  ;;  %1793 = vperm.xlu0 %2721, %v3683_v57   ;;  %v1066_v14 = vld [vmem:[#allocation3 + $0x38] sm:$0xff] }
 0x4ae   : > { %1094 = vst.msk [vmem:[#allocation3 + $0x28] sm:$0xff] %vm446_vm2, %v1089_v22 }
 0x4b0   : > { %1803 = vperm.xlu0 %2721, %v3687_v31  }
 0x4b4   : > { %1925 = vperm.xlu0 %2721, %v2796_v2  }
 0x4b5   : > { %v1990_v18 = vld [vmem:[#allocation3 + $0x28] sm:$0xff] }
 0x4b8   : > { %1930 = vperm.xlu0 %2721, %v2798_v63  }
 0x4be   : > { %v1722_v3 = vpop.permute.xlu0 %1721 }
 0x4bf   : > { %v1728_v62 = vsub.f32 %v3465_v12, %v1722_v3 }
 0x4c1   : > { %v1737_v10 = vmul.f32 1.442695, %v1728_v62 }
 0x4c2   : > { %v1815_v47 = vpop.permute.xlu0 %1814 }
 0x4c3   : > { %2799 = vpow2.f32 %v1737_v10  ;;  %2653 = vmatpush3.bf16.msra.mxu0 %v1815_v47 }
 0x4c4   : > { %2801 = vpow2.f32 %v1019_v52  ;;  %v1068_v52 = vld [vmem:[#allocation3 + $0x48] sm:$0x7f] }
 0x4c5   : > { %2803 = vpow2.f32 %v1017_v44  ;;  %v1403_v44 = vld [vmem:[#allocation3 + $0x58] sm:$0xff] }
 0x4c6   : > { %2655 = vmatmul.mubr.msk.bf16.vlgmr.msra.gmra.mxu0 %vm636_vm3, %v1811_v17  ;;  %2805 = vpow2.f32 %v1355_v24 }
 0x4c7   : > { %2658 = vmatprep.mubr.msk.bf16.mxu0 %vm2892_vm1, %v2891_v15 }
 0x4ce   : > { %2659 = vmatmul.mubr.msk.bf16.gmra.mxu0 %vm636_vm3, %v1812_v45  ;;  %v1695_v45 = vmul.f32 1.442695, %v3871_v9 }
 0x4cf   : > { %2662 = vmatprep.mubr.msk.bf16.mxu0 %vm2892_vm1, %v2891_v15  ;;  %v3869_v15 = vsub.f32 %v3503_v20, %v3510_v43  ;;  %v1402_v43 = vld [vmem:[#allocation3 + $0x50] sm:$0xff] }
 0x4d0   : > { %v2800_v12 = vpop.eup %2799  ;;  %v1407_v51 = vmul.f32 %v2786_v5, %v1402_v43  ;;  %v1743_v5 = vld [vmem:[#allocation3 + $0x90] sm:$0xff]  ;;  %v1740_v43 = vld [vmem:[#allocation3 + $0x78] sm:$0xff] }
 0x4d1   : > { %v1762_v17 = vsel %vm649_vm4, %v2800_v12, 0.0  ;;  %v1813_v33 = vpack.c.bf16 %v2800_v12, %v2800_v12  ;;  %v1691_v4 = vmul.f32 1.442695, %v3869_v15  ;;  %v2802_v55 = vpop.eup %2801  ;;  %v1073_v12 = vmul.f32 %v3668_v16, %v1068_v52 }
 0x4d2   : > { %1763 = vadd.xlane.f32.xlu1 %v1762_v17  ;;  %v1072_v48 = vmul.f32 %v2802_v55, %v1067_v60  ;;  %v2804_v56 = vpop.eup %2803 }
 0x4d3   : > { %2807 = vpow2.f32 %v1691_v4  ;;  %v2806_v54 = vpop.eup %2805  ;;  %v1071_v47 = vmul.f32 %v2804_v56, %v1066_v14  ;;  %v1406_v4 = vld [vmem:[#allocation3 + $0x70] sm:$0x7f] }
 0x4d4   : > { %2809 = vpow2.f32 %v1353_v40  ;;  %v1409_v58 = vmul.f32 %v2806_v54, %v1404_v21 }
 0x4d5   : > { %2811 = vpow2.f32 %v1695_v45 }
 0x4d6   : > { %2663 = vmatmul.mubr.msk.bf16.gmra.mxu0 %vm636_vm3, %v1813_v33  ;;  %2813 = vpow2.f32 %v1359_v28 }
 0x4d7   : > { %2815 = vrcp.f32 %v1990_v18  ;;  %v1917_v18 = vld [vmem:[#allocation3 + $0x20] sm:$0x7f] }
 0x4e0   : > { %v2808_v6 = vpop.eup %2807 }
 0x4e1   : > { %v1085_v20 = vpop.xlane.xlu1 %1084  ;;  %v2810_v37 = vpop.eup %2809  ;;  %v1746_v39 = vmul.f32 %v2808_v6, %v1741_v32 }
 0x4e2   : > { %v1092_v53 = vadd.f32 %v1085_v20, %v1072_v48  ;;  %v2812_v50 = vpop.eup %2811  ;;  %v1408_v33 = vmul.f32 %v2810_v37, %v1403_v44 }
 0x4e3   : > { %1117 = vperm.xlu1 %2720, %v2804_v56   ;;  %v1748_v63 = vmul.f32 %v2812_v50, %v1743_v5  ;;  %v2814_v62 = vpop.eup %2813 }
 0x4e4   : > { %1097 = vst.msk [vmem:[#allocation3 + $0x40] sm:$0xff] %vm446_vm2, %v1092_v53  ;;  %v2816_v9 = vpop.eup %2815  ;;  %v1411_v16 = vmul.f32 %v2814_v62, %v1406_v4 }
 0x4e5   : > { %v1414_v1 = vpop.xlane.xlu1 %1413 }
 0x4e6   : > { %v1427_v26 = vadd.f32 %v1414_v1, %v1407_v51  ;;  %v1745_v51 = vmul.f32 %v3677_v11, %v1740_v43  ;;  %v1441_v43 = vld [vmem:[#allocation4 + $0x68] sm:$0xff] }
 0x4e7   : > { %1122 = vperm.xlu1 %2720, %v2802_v55   ;;  %v1405_v55 = vld [vmem:[#allocation3 + $0x68] sm:$0xff] }
 0x4e8   : > { %1432 = vst.msk [vmem:[#allocation3 + $0x50] sm:$0xff] %vm446_vm2, %v1427_v26  ;;  %v1410_v28 = vmul.f32 %v3674_v19, %v1405_v55  ;;  %v1747_v19 = vmul.f32 %v3683_v57, %v1742_v49 }
 0x4e9   : > { %v1420_v30 = vpop.xlane.xlu1 %1419 }
 0x4ea   : > { %v1429_v46 = vadd.f32 %v1420_v30, %v1409_v58  ;;  %v1192_v0 = vpop.f32.mrf.mxu0 }
 0x4eb   : > { %v1214_v29 = vadd.f32 %v1192_v0, %v1130_v13  ;;  %1450 = vperm.xlu1 %2720, %v2810_v37   ;;  %v1993_v24 = vld [vmem:[#allocation3 + $0x40] sm:$0xff] }
 0x4ec   : > { %1434 = vst.msk [vmem:[#allocation3 + $0x60] sm:$0xff] %vm446_vm2, %v1429_v46  ;;  %v2584_v35 = vpop.f32.mrf.mxu0 }
 0x4ed   : > { %1219 = vst.msk [vmem:[#allocation4 + $0x28] sm:$0xff] %vm488_vm0, %v1214_v29  ;;  %v1755_v61 = vpop.xlane.xlu1 %1754  ;;  %v1101_v29 = vld [vmem:[#allocation4 + $0x30] sm:$0xff] }
 0x4ee   : > { %v1766_v59 = vadd.f32 %v1755_v61, %v1746_v39  ;;  %v3731_v25 = vpop.f32.mrf.mxu0 }
 0x4ef   : > { %1455 = vperm.xlu1 %2720, %v2806_v54   ;;  %v1079_v42 = vpop.xlane.xlu0 %1078  ;;  %v2076_v27 = vld [vmem:[#allocation3 + $0x50] sm:$0xff] }
 0x4f0   : > { %1771 = vst.msk [vmem:[#allocation3 + $0x80] sm:$0xff] %vm446_vm2, %v1766_v59  ;;  %v1090_v22 = vadd.f32 %v1079_v42, %v1070_v23  ;;  %v2585_v2 = vpop.f32.mrf.mxu0 }
 0x4f1   : > { %v1761_v3 = vpop.xlane.xlu1 %1760 }
 0x4f2   : > { %1095 = vst.msk [vmem:[#allocation3 + $0x30] sm:$0xff] %vm446_vm2, %v1090_v22  ;;  %v1768_v10 = vadd.f32 %v1761_v3, %v1748_v63  ;;  %v1915_v22 = vld [vmem:[#allocation3 + $0x10] sm:$0xff]  ;;  %v1104_v3 = vld [vmem:[#allocation4 + $0x48] sm:$0x7f] }
 0x4f3   : > { %1465 = vperm.xlu1 %2720, %v2814_v62   ;;  %v1082_v8 = vpop.xlane.xlu0 %1081  ;;  %v2078_v1 = vld [vmem:[#allocation3 + $0x60] sm:$0xff] }
 0x4f4   : > { %1773 = vst.msk [vmem:[#allocation3 + $0x90] sm:$0xff] %vm446_vm2, %v1768_v10  ;;  %v1091_v38 = vadd.f32 %v1082_v8, %v1071_v47 }
 0x4f6   : > { %1096 = vst.msk [vmem:[#allocation3 + $0x38] sm:$0xff] %vm446_vm2, %v1091_v38 }
 0x4f7   : > { %1788 = vperm.xlu1 %2720, %v2808_v6   ;;  %v1088_v7 = vpop.xlane.xlu0 %1087  ;;  %v2163_v37 = vld [vmem:[#allocation3 + $0x80] sm:$0xff] }
 0x4f8   : > { %v1093_v17 = vadd.f32 %v1088_v7, %v1073_v12 }
 0x4f9   : > { %v1991_v41 = vld [vmem:[#allocation3 + $0x30] sm:$0xff] }
 0x4fa   : > { %2817 = vrcp.f32 %v1991_v41  ;;  %1098 = vst.msk [vmem:[#allocation3 + $0x48] sm:$0x7f] %vm451_vm5, %v1093_v17  ;;  %v1438_v41 = vld [vmem:[#allocation4 + $0x50] sm:$0xff] }
 0x4fb   : > { %1798 = vperm.xlu1 %2720, %v2812_v50   ;;  %v1417_v15 = vpop.xlane.xlu0 %1416  ;;  %2819 = vrcp.f32 %v1993_v24 }
 0x4fc   : > { %v1428_v36 = vadd.f32 %v1417_v15, %v1408_v33 }
 0x4fd   : > { %v1992_v40 = vld [vmem:[#allocation3 + $0x38] sm:$0xff] }
 0x4fe   : > { %2821 = vrcp.f32 %v1992_v40  ;;  %1433 = vst.msk [vmem:[#allocation3 + $0x58] sm:$0xff] %vm446_vm2, %v1428_v36 }
 0x4ff   : > { %2002 = vperm.xlu1 %2720, %v2816_v9   ;;  %v1426_v45 = vpop.xlane.xlu0 %1425 }
 0x500   : > { %v1431_v60 = vadd.f32 %v1426_v45, %v1411_v16 }
 0x501   : > { %v1994_v48 = vld [vmem:[#allocation3 + $0x48] sm:$0x7f] }
 0x502   : > { %2823 = vrcp.f32 %v1994_v48  ;;  %1436 = vst.msk [vmem:[#allocation3 + $0x70] sm:$0x7f] %vm451_vm5, %v1431_v60  ;;  %v1908_v48 = vld [vmem:[#allocation4] sm:$0xff] }
 0x503   : > { %v1423_v20 = vpop.xlane.xlu0 %1422  ;;  %2825 = vrcp.f32 %v2076_v27 }
 0x504   : > { %v1430_v56 = vadd.f32 %v1423_v20, %v1410_v28 }
 0x505   : > { %v2077_v53 = vld [vmem:[#allocation3 + $0x58] sm:$0xff] }
 0x506   : > { %2827 = vrcp.f32 %v2077_v53  ;;  %1435 = vst.msk [vmem:[#allocation3 + $0x68] sm:$0xff] %vm446_vm2, %v1430_v56 }
 0x507   : > { %v2818_v54 = vpop.eup %2817  ;;  %v1752_v21 = vpop.xlane.xlu0 %1751  ;;  %2829 = vrcp.f32 %v2078_v1 }
 0x508   : > { %v1765_v26 = vadd.f32 %v1752_v21, %v1745_v51  ;;  %2007 = vperm.xlu0 %2721, %v2818_v54   ;;  %v2820_v58 = vpop.eup %2819  ;;  %v1909_v51 = vld [vmem:[#allocation4 + $0x8] sm:$0xff] }
 0x509   : > { %v2080_v6 = vld [vmem:[#allocation3 + $0x70] sm:$0x7f] }
 0x50a   : > { %1770 = vst.msk [vmem:[#allocation3 + $0x78] sm:$0xff] %vm446_vm2, %v1765_v26  ;;  %2831 = vrcp.f32 %v2080_v6 }
 0x50b   : > { %v2822_v13 = vpop.eup %2821  ;;  %v1758_v30 = vpop.xlane.xlu0 %1757 }
 0x50c   : > { %v1767_v32 = vadd.f32 %v1758_v30, %v1747_v19  ;;  %2017 = vperm.xlu0 %2721, %v2820_v58   ;;  %2012 = vperm.xlu1 %2720, %v2822_v13  }
 0x50d   : > { %v2079_v11 = vld [vmem:[#allocation3 + $0x68] sm:$0xff] }
 0x50e   : > { %2833 = vrcp.f32 %v2079_v11  ;;  %1772 = vst.msk [vmem:[#allocation3 + $0x88] sm:$0xff] %vm446_vm2, %v1767_v32 }
 0x50f   : > { %v2824_v46 = vpop.eup %2823  ;;  %2835 = vrcp.f32 %v2163_v37  ;;  %v1744_v37 = vld [vmem:[#allocation3 + $0x98] sm:$0x7f] }
 0x510   : > { %2022 = vperm.xlu1 %2720, %v2824_v46   ;;  %v2826_v34 = vpop.eup %2825  ;;  %v1749_v46 = vmul.f32 %v3687_v31, %v1744_v37  ;;  %v2165_v31 = vld [vmem:[#allocation3 + $0x90] sm:$0xff] }
 0x511   : > { %v2162_v0 = vld [vmem:[#allocation3 + $0x78] sm:$0xff] }
 0x512   : > { %2837 = vrcp.f32 %v2162_v0 }
 0x513   : > { %v2828_v35 = vpop.eup %2827  ;;  %v1113_v57 = vpop.permute.xlu0 %1112 }
 0x514   : > { %v1131_v39 = vmul.f32 %v1113_v57, %v1101_v29  ;;  %2088 = vperm.xlu1 %2720, %v2826_v34   ;;  %2093 = vperm.xlu0 %2721, %v2828_v35   ;;  %v2830_v5 = vpop.eup %2829  ;;  %v1102_v34 = vld [vmem:[#allocation4 + $0x38] sm:$0xff] }
 0x515   : > { %v2164_v50 = vld [vmem:[#allocation3 + $0x88] sm:$0xff] }
 0x516   : > { %2839 = vrcp.f32 %v2164_v50  ;;  %v1215_v61 = vadd.f32 %v3731_v25, %v1131_v39  ;;  %v1103_v39 = vld [vmem:[#allocation4 + $0x40] sm:$0xff] }
 0x517   : > { %v1128_v59 = vpop.permute.xlu0 %1127  ;;  %v2832_v42 = vpop.eup %2831  ;;  %2841 = vrcp.f32 %v1917_v18 }
 0x518   : > { %1220 = vst.msk [vmem:[#allocation4 + $0x30] sm:$0xff] %vm488_vm0, %v1215_v61  ;;  %2098 = vperm.xlu1 %2720, %v2830_v5   ;;  %2843 = vrcp.f32 %v1915_v22  ;;  %v1134_v52 = vmul.f32 %v1128_v59, %v1104_v3  ;;  %v1439_v59 = vld [vmem:[#allocation4 + $0x58] sm:$0xff] }
 0x519   : > { %v3750_v23 = vpop.f32.mrf.mxu0  ;;  %v1916_v3 = vld [vmem:[#allocation3 + $0x18] sm:$0xff] }
 0x51b   : > { %v2834_v14 = vpop.eup %2833  ;;  %v1446_v2 = vpop.permute.xlu0 %1445 }
 0x51c   : > { %v2588_v63 = vpop.f32.mrf.mxu0  ;;  %2108 = vperm.xlu1 %2720, %v2832_v42   ;;  %2103 = vperm.xlu0 %2721, %v2834_v14   ;;  %v2836_v25 = vpop.eup %2835  ;;  %v1468_v36 = vmul.f32 %v1446_v2, %v1438_v41  ;;  %v1440_v2 = vld [vmem:[#allocation4 + $0x60] sm:$0xff] }
 0x51e   : > { %v3752_v62 = vpop.f32.mrf.mxu0 }
 0x51f   : > { %v2838_v10 = vpop.eup %2837  ;;  %v1461_v47 = vpop.permute.xlu0 %1460 }
 0x520   : > { %v2589_v8 = vpop.f32.mrf.mxu0  ;;  %2179 = vperm.xlu1 %2720, %v2836_v25   ;;  %2174 = vperm.xlu0 %2721, %v2838_v10   ;;  %v1471_v21 = vmul.f32 %v1461_v47, %v1441_v43  ;;  %v1442_v10 = vld [vmem:[#allocation4 + $0x70] sm:$0x7f] }
 0x522   : > { %v1208_v38 = vpop.f32.mrf.mxu0 }
 0x523   : > { %v1218_v12 = vadd.f32 %v1208_v38, %v1134_v52  ;;  %v2840_v7 = vpop.eup %2839  ;;  %v3754_v44 = vpop.permute.xlu0 %1783 }
 0x524   : > { %v2592_v17 = vpop.f32.mrf.mxu0  ;;  %2184 = vperm.xlu0 %2721, %v2840_v7   ;;  %v2842_v33 = vpop.eup %2841 }
 0x525   : > { %1223 = vst.msk [vmem:[#allocation4 + $0x48] sm:$0x7f] %vm493_vm8, %v1218_v12  ;;  %v2844_v16 = vpop.eup %2843 }
 0x526   : > { %v1211_v24 = vpop.f32.mrf.mxu0 }
 0x527   : > { %v3758_v15 = vpop.permute.xlu0 %1793 }
 0x528   : > { %v2593_v4 = vpop.f32.mrf.mxu0  ;;  %1945 = vperm.xlu0 %2721, %v2842_v33   ;;  %v1985_v33 = vld [vmem:[#allocation4 + $0x28] sm:$0xff] }
 0x52a   : > { %v1530_v40 = vpop.f32.mrf.mxu0 }
 0x52b   : > { %v1552_v9 = vadd.f32 %v1530_v40, %v1468_v36  ;;  %v3761_v45 = vpop.permute.xlu0 %1803  ;;  %v1776_v40 = vld [vmem:[#allocation4 + $0x78] sm:$0xff] }
 0x52c   : > { %v2620_v55 = vpop.f32.mrf.mxu0  ;;  %1935 = vperm.xlu0 %2721, %v2844_v16   ;;  %v1986_v16 = vld [vmem:[#allocation4 + $0x30] sm:$0xff] }
 0x52d   : > { %1557 = vst.msk [vmem:[#allocation4 + $0x50] sm:$0xff] %vm488_vm0, %v1552_v9 }
 0x52e   : > { %v1533_v60 = vpop.f32.mrf.mxu0 }
 0x52f   : > { %v1926_v27 = vpop.permute.xlu0 %1925 }
 0x530   : > { %v2621_v28 = vpop.f32.mrf.mxu0  ;;  %v1948_v20 = vmul.f32 %v1926_v27, %v1908_v48  ;;  %v1777_v48 = vld [vmem:[#allocation4 + $0x80] sm:$0xff] }
 0x532   : > { %v1538_v56 = vpop.f32.mrf.mxu0  ;;  %v2454_v53 = vpack.c.bf16 %v1948_v20, %v1948_v20 }
 0x533   : > { %v1931_v54 = vpop.permute.xlu0 %1930 }
 0x534   : > { %v2624_v1 = vpop.f32.mrf.mxu0  ;;  %1975 = vst.msk [vmem:[%s3767_s6] sm:$0xf] %vm1974_vm9, %v2454_v53  ;;  %v1949_v49 = vmul.f32 %v1931_v54, %v1909_v51 }
 0x536   : > { %v1541_v26 = vpop.f32.mrf.mxu0  ;;  %v2455_v58 = vpack.c.bf16 %v1949_v49, %v1949_v49 }
 0x537   : > { %v1555_v6 = vadd.f32 %v1541_v26, %v1471_v21  ;;  %v1778_v26 = vld [vmem:[#allocation4 + $0x88] sm:$0xff] }
 0x538   : > { %v2625_v19 = vpop.f32.mrf.mxu0  ;;  %1976 = vst.msk [vmem:[%s3767_s6 + $0x4] sm:$0xf] %vm1974_vm9, %v2455_v58  ;;  %v1808_v37 = vmul.f32 %v3758_v15, %v1778_v26 }
 0x539   : > { %1560 = vst.msk [vmem:[#allocation4 + $0x68] sm:$0xff] %vm488_vm0, %v1555_v6 }
 0x53a   : > { %v1546_v13 = vpop.f32.mrf.mxu0 }
 0x53c   : > { %v2628_v30 = vpop.f32.mrf.mxu0 }
 0x53d   : > { %v1989_v30 = vld [vmem:[#allocation4 + $0x48] sm:$0x7f] }
 0x53e   : > { %v1549_v32 = vpop.f32.mrf.mxu0 }
 0x540   : > { %v2629_v11 = vpop.f32.mrf.mxu0 }
 0x55b   : > { %v1764_v0 = vpop.xlane.xlu1 %1763 }
 0x55c   : > { %v1769_v29 = vadd.f32 %v1764_v0, %v1749_v46  ;;  %v1779_v46 = vld [vmem:[#allocation4 + $0x90] sm:$0xff] }
 0x55e   : > { %1774 = vst.msk [vmem:[#allocation3 + $0x98] sm:$0x7f] %vm451_vm5, %v1769_v29 }
 0x55f   : > { %v1118_v35 = vpop.permute.xlu1 %1117 }
 0x560   : > { %v1132_v57 = vmul.f32 %v1118_v35, %v1102_v34 }
 0x562   : > { %v1216_v50 = vadd.f32 %v3750_v23, %v1132_v57  ;;  %v2071_v57 = vld [vmem:[#allocation4 + $0x50] sm:$0xff] }
 0x563   : > { %v1123_v61 = vpop.permute.xlu1 %1122 }
 0x564   : > { %1221 = vst.msk [vmem:[#allocation4 + $0x38] sm:$0xff] %vm488_vm0, %v1216_v50  ;;  %v1133_v5 = vmul.f32 %v1123_v61, %v1103_v39 }
 0x565   : > { %v2166_v18 = vld [vmem:[#allocation3 + $0x98] sm:$0x7f] }
 0x566   : > { %2845 = vrcp.f32 %v2166_v18  ;;  %v1217_v42 = vadd.f32 %v3752_v62, %v1133_v5 }
 0x567   : > { %v1451_v14 = vpop.permute.xlu1 %1450  ;;  %2847 = vrcp.f32 %v2165_v31 }
 0x568   : > { %1222 = vst.msk [vmem:[#allocation4 + $0x40] sm:$0xff] %vm488_vm0, %v1217_v42  ;;  %v1469_v22 = vmul.f32 %v1451_v14, %v1439_v59  ;;  %2849 = vrcp.f32 %v1916_v3  ;;  %v1780_v42 = vld [vmem:[#allocation4 + $0x98] sm:$0x7f] }
 0x56a   : > { %v1553_v63 = vadd.f32 %v1533_v60, %v1469_v22  ;;  %v1806_v60 = vmul.f32 %v3754_v44, %v1776_v40 }
 0x56b   : > { %v1456_v25 = vpop.permute.xlu1 %1455 }
 0x56c   : > { %1558 = vst.msk [vmem:[#allocation4 + $0x58] sm:$0xff] %vm488_vm0, %v1553_v63  ;;  %v1470_v23 = vmul.f32 %v1456_v25, %v1440_v2 }
 0x56e   : > { %v1554_v47 = vadd.f32 %v1538_v56, %v1470_v23  ;;  %v1987_v56 = vld [vmem:[#allocation4 + $0x38] sm:$0xff]  ;;  %v1810_v23 = vmul.f32 %v3761_v45, %v1780_v42 }
 0x56f   : > { %v1466_v8 = vpop.permute.xlu1 %1465  ;;  %v1988_v51 = vld [vmem:[#allocation4 + $0x40] sm:$0xff] }
 0x570   : > { %1559 = vst.msk [vmem:[#allocation4 + $0x60] sm:$0xff] %vm488_vm0, %v1554_v47  ;;  %v1472_v62 = vmul.f32 %v1466_v8, %v1442_v10 }
 0x572   : > { %v1556_v52 = vadd.f32 %v1546_v13, %v1472_v62 }
 0x573   : > { %v2846_v38 = vpop.eup %2845  ;;  %v1789_v12 = vpop.permute.xlu1 %1788  ;;  %v2072_v50 = vld [vmem:[#allocation4 + $0x58] sm:$0xff] }
 0x574   : > { %1561 = vst.msk [vmem:[#allocation4 + $0x70] sm:$0x7f] %vm493_vm8, %v1556_v52  ;;  %2194 = vperm.xlu1 %2720, %v2846_v38   ;;  %v2848_v7 = vpop.eup %2847  ;;  %v1807_v49 = vmul.f32 %v1789_v12, %v1777_v48 }
 0x575   : > { %v2850_v41 = vpop.eup %2849 }
 0x577   : > { %v1799_v17 = vpop.permute.xlu1 %1798  ;;  %v2073_v63 = vld [vmem:[#allocation4 + $0x60] sm:$0xff] }
 0x578   : > { %2189 = vperm.xlu1 %2720, %v2848_v7   ;;  %v1809_v59 = vmul.f32 %v1799_v17, %v1779_v46  ;;  %v2074_v17 = vld [vmem:[#allocation4 + $0x68] sm:$0xff] }
 0x57b   : > { %v2003_v24 = vpop.permute.xlu1 %2002  ;;  %v2075_v52 = vld [vmem:[#allocation4 + $0x70] sm:$0x7f] }
 0x57c   : > { %v2025_v4 = vmul.f32 %v2003_v24, %v1985_v33  ;;  %1940 = vperm.xlu1 %2720, %v2850_v41  }
 0x57e   : > { %v2459_v36 = vpack.c.bf16 %v2025_v4, %v2025_v4 }
 0x580   : > { %2046 = vrot.lane.b32.xlu1 %v2459_v36, %s2898_s29 }
 0x583   : > { %v2008_v9 = vpop.permute.xlu0 %2007 }
 0x584   : > { %v2026_v55 = vmul.f32 %v2008_v9, %v1986_v16 }
 0x586   : > { %v2460_v27 = vpack.c.bf16 %v2026_v55, %v2026_v55  ;;  %v1868_v28 = vpop.f32.mrf.mxu0 }
 0x587   : > { %v1890_v20 = vadd.f32 %v1868_v28, %v1806_v60  ;;  %v2013_v43 = vpop.permute.xlu1 %2012  ;;  %v2018_v53 = vpop.permute.xlu0 %2017 }
 0x588   : > { %v2027_v54 = vmul.f32 %v2013_v43, %v1987_v56  ;;  %v2028_v1 = vmul.f32 %v2018_v53, %v1988_v51  ;;  %2048 = vrot.lane.b32.xlu0 %v2460_v27, %s2898_s29  ;;  %v2656_v21 = vpop.f32.mrf.mxu0  ;;  %v1912_v56 = vld [vmem:[#allocation4 + $0x20] sm:$0x7f] }
 0x589   : > { %1895 = vst.msk [vmem:[#allocation4 + $0x78] sm:$0xff] %vm488_vm0, %v1890_v20 }
 0x58a   : > { %v2461_v58 = vpack.c.bf16 %v2027_v54, %v2027_v54  ;;  %v2462_v6 = vpack.c.bf16 %v2028_v1, %v2028_v1  ;;  %v1871_v44 = vpop.f32.mrf.mxu0  ;;  %v1982_v54 = vld [vmem:[%s3767_s6 + $0x10] sm:$0xf] }
 0x58b   : > { %v1891_v19 = vadd.f32 %v1871_v44, %v1807_v49  ;;  %v2023_v13 = vpop.permute.xlu1 %2022  ;;  %v1910_v49 = vld [vmem:[#allocation4 + $0x10] sm:$0xff] }
 0x58c   : > { %v2029_v32 = vmul.f32 %v2023_v13, %v1989_v30  ;;  %2050 = vrot.lane.b32.xlu1 %v2461_v58, %s2898_s29  ;;  %2052 = vrot.lane.b32.xlu0 %v2462_v6, %s2898_s29  ;;  %v2657_v11 = vpop.f32.mrf.mxu0 }
 0x58d   : > { %1896 = vst.msk [vmem:[#allocation4 + $0x80] sm:$0xff] %vm488_vm0, %v1891_v19 }
 0x58e   : > { %v2463_v0 = vpack.c.bf16 %v2029_v32, %v2029_v32  ;;  %v1876_v29 = vpop.f32.mrf.mxu0 }
 0x58f   : > { %v1892_v34 = vadd.f32 %v1876_v29, %v1808_v37  ;;  %v2089_v35 = vpop.permute.xlu1 %2088  ;;  %v2094_v39 = vpop.permute.xlu0 %2093  ;;  %v1911_v29 = vld [vmem:[#allocation4 + $0x18] sm:$0xff] }
 0x590   : > { %v2111_v61 = vmul.f32 %v2089_v35, %v2071_v57  ;;  %v2112_v5 = vmul.f32 %v2094_v39, %v2072_v50  ;;  %2054 = vrot.lane.b32.xlu1 %v2463_v0, %s2898_s29  ;;  %v2660_v18 = vpop.f32.mrf.mxu0  ;;  %v2157_v16 = vld [vmem:[#allocation4 + $0x78] sm:$0xff] }
 0x591   : > { %1897 = vst.msk [vmem:[#allocation4 + $0x88] sm:$0xff] %vm488_vm0, %v1892_v34 }
 0x592   : > { %v2464_v15 = vpack.c.bf16 %v2111_v61, %v2111_v61  ;;  %v2465_v31 = vpack.c.bf16 %v2112_v5, %v2112_v5  ;;  %v1879_v14 = vpop.f32.mrf.mxu0 }
 0x593   : > { %v1893_v22 = vadd.f32 %v1879_v14, %v1809_v59  ;;  %v2099_v2 = vpop.permute.xlu1 %2098 }
 0x594   : > { %v2113_v3 = vmul.f32 %v2099_v2, %v2073_v63  ;;  %2132 = vrot.lane.b32.xlu1 %v2464_v15, %s2897_s28  ;;  %2134 = vrot.lane.b32.xlu0 %v2465_v31, %s2897_s28  ;;  %v2661_v25 = vpop.f32.mrf.mxu0  ;;  %v2158_v45 = vld [vmem:[#allocation4 + $0x80] sm:$0xff] }
 0x595   : > { %1898 = vst.msk [vmem:[#allocation4 + $0x90] sm:$0xff] %vm488_vm0, %v1893_v22  ;;  %vm2233_vm0 = vcmask 1044224  }
 0x596   : > { %v2466_v10 = vpack.c.bf16 %v2113_v3, %v2113_v3  ;;  %v1884_v47 = vpop.f32.mrf.mxu0  ;;  %vm2239_vm1 = vmand %vm2233_vm0, %vm1980_vm10 }
 0x597   : > { %v1894_v8 = vadd.f32 %v1884_v47, %v1810_v23  ;;  %v2109_v62 = vpop.permute.xlu1 %2108  ;;  %v2104_v38 = vpop.permute.xlu0 %2103 }
 0x598   : > { %v2115_v12 = vmul.f32 %v2109_v62, %v2075_v52  ;;  %2136 = vrot.lane.b32.xlu1 %v2466_v10, %s2897_s28  ;;  %v2664_v7 = vpop.f32.mrf.mxu0  ;;  %v2114_v24 = vmul.f32 %v2104_v38, %v2074_v17  ;;  %v2159_v28 = vld [vmem:[#allocation4 + $0x88] sm:$0xff] }
 0x599   : > { %1899 = vst.msk [vmem:[#allocation4 + $0x98] sm:$0x7f] %vm493_vm8, %v1894_v8 }
 0x59a   : > { %v2468_v41 = vpack.c.bf16 %v2115_v12, %v2115_v12  ;;  %v1887_v33 = vpop.f32.mrf.mxu0  ;;  %v2467_v55 = vpack.c.bf16 %v2114_v24, %v2114_v24 }
 0x59b   : > { %v2180_v4 = vpop.permute.xlu1 %2179  ;;  %v2175_v36 = vpop.permute.xlu0 %2174 }
 0x59c   : > { %v2198_v40 = vmul.f32 %v2180_v4, %v2158_v45  ;;  %2140 = vrot.lane.b32.xlu0 %v2468_v41, %s2897_s28  ;;  %v2665_v9 = vpop.f32.mrf.mxu0  ;;  %v2197_v48 = vmul.f32 %v2175_v36, %v2157_v16  ;;  %v2160_v37 = vld [vmem:[#allocation4 + $0x90] sm:$0xff] }
 0x59e   : > { %v2470_v60 = vpack.c.bf16 %v2198_v40, %v2198_v40  ;;  %v2469_v20 = vpack.c.bf16 %v2197_v48, %v2197_v48 }
 0x59f   : > { %v2185_v27 = vpop.permute.xlu0 %2184 }
 0x5a0   : > { %2138 = vrot.lane.b32.xlu0 %v2467_v55, %s2897_s28  ;;  %2220 = vrot.lane.b32.xlu1 %v2470_v60, %s2896_s27  ;;  %v2199_v43 = vmul.f32 %v2185_v27, %v2159_v28  ;;  %v2161_v13 = vld [vmem:[#allocation4 + $0x98] sm:$0x7f] }
 0x5a2   : > { %v2471_v1 = vpack.c.bf16 %v2199_v43, %v2199_v43 }
 0x5a3   : > { %v1946_v53 = vpop.permute.xlu0 %1945 }
 0x5a4   : > { %v1952_v51 = vmul.f32 %v1946_v53, %v1912_v56  ;;  %2218 = vrot.lane.b32.xlu0 %v2469_v20, %s2896_s27 }
 0x5a6   : > { %v2458_v21 = vpack.c.bf16 %v1952_v51, %v1952_v51 }
 0x5a7   : > { %v1936_v26 = vpop.permute.xlu0 %1935 }
 0x5a8   : > { %v1983_v58 = vsel %vm1981_vm11, %v2458_v21, %v1982_v54  ;;  %v1950_v6 = vmul.f32 %v1936_v26, %v1910_v49  ;;  %2222 = vrot.lane.b32.xlu0 %v2471_v1, %s2896_s27 }
 0x5a9   : > { %1984 = vst [vmem:[%s3767_s6 + $0x10] sm:$0xf] %v1983_v58 }
 0x5aa   : > { %v2456_v44 = vpack.c.bf16 %v1950_v6, %v1950_v6 }
 0x5ac   : > { %1977 = vst.msk [vmem:[%s3767_s6 + $0x8] sm:$0xf] %vm1974_vm9, %v2456_v44 }
 0x5b0   : > { %v2068_v18 = vld [vmem:[%s3767_s6 + $0x10] sm:$0xf] }
 0x5ef   : > { %v2195_v19 = vpop.permute.xlu1 %2194 }
 0x5f0   : > { %v2201_v30 = vmul.f32 %v2195_v19, %v2161_v13 }
 0x5f2   : > { %v2473_v32 = vpack.c.bf16 %v2201_v30, %v2201_v30 }
 0x5f3   : > { %v2190_v11 = vpop.permute.xlu1 %2189 }
 0x5f4   : > { %v2200_v46 = vmul.f32 %v2190_v11, %v2160_v37  ;;  %2226 = vrot.lane.b32.xlu1 %v2473_v32, %s2896_s27 }
 0x5f6   : > { %v2472_v0 = vpack.c.bf16 %v2200_v46, %v2200_v46 }
 0x5f7   : > { %v1941_v34 = vpop.permute.xlu1 %1940 }
 0x5f8   : > { %v1951_v35 = vmul.f32 %v1941_v34, %v1911_v29  ;;  %2224 = vrot.lane.b32.xlu1 %v2472_v0, %s2896_s27 }
 0x5fa   : > { %v2457_v57 = vpack.c.bf16 %v1951_v35, %v1951_v35  ;;  %v2049_v39 = vpop.permute.xlu0 %2048 }
 0x5fb   : > { %2063 = vst.msk [vmem:[%s3767_s6 + $0x4] sm:$0xf] %vm2061_vm12, %v2049_v39  ;;  %v2047_v50 = vpop.permute.xlu1 %2046 }
 0x5fc   : > { %1978 = vst.msk [vmem:[%s3767_s6 + $0xc] sm:$0xf] %vm1974_vm9, %v2457_v57 }
 0x5fd   : > { %2062 = vst.msk [vmem:[%s3767_s6] sm:$0xf] %vm2061_vm12, %v2047_v50 }
 0x5fe   : > { %v2053_v61 = vpop.permute.xlu0 %2052 }
 0x5ff   : > { %2065 = vst.msk [vmem:[%s3767_s6 + $0xc] sm:$0xf] %vm2061_vm12, %v2053_v61  ;;  %v2051_v5 = vpop.permute.xlu1 %2050 }
 0x600   : > { %2064 = vst.msk [vmem:[%s3767_s6 + $0x8] sm:$0xf] %vm2061_vm12, %v2051_v5 }
 0x603   : > { %v2055_v59 = vpop.permute.xlu1 %2054 }
 0x604   : > { %v2069_v42 = vsel %vm2067_vm13, %v2055_v59, %v2068_v18 }
 0x605   : > { %2070 = vst [vmem:[%s3767_s6 + $0x10] sm:$0xf] %v2069_v42 }
 0x606   : > { %v2135_v15 = vpop.permute.xlu0 %2134 }
 0x607   : > { %2149 = vst.msk [vmem:[%s3767_s6 + $0x4] sm:$0xf] %vm2147_vm14, %v2135_v15  ;;  %v2133_v31 = vpop.permute.xlu1 %2132 }
 0x608   : > { %2148 = vst.msk [vmem:[%s3767_s6] sm:$0xf] %vm2147_vm14, %v2133_v31 }
 0x60b   : > { %v2137_v14 = vpop.permute.xlu1 %2136 }
 0x60c   : > { %2150 = vst.msk [vmem:[%s3767_s6 + $0x8] sm:$0xf] %vm2147_vm14, %v2137_v14  ;;  %v2154_v22 = vld [vmem:[%s3767_s6 + $0x10] sm:$0xf] }
 0x60e   : > { %v2141_v2 = vpop.permute.xlu0 %2140 }
 0x60f   : > { %v2155_v63 = vsel %vm2153_vm15, %v2141_v2, %v2154_v22 }
 0x610   : > { %2156 = vst [vmem:[%s3767_s6 + $0x10] sm:$0xf] %v2155_v63 }
 0x612   : > { %v2139_v3 = vpop.permute.xlu0 %2138  ;;  %v2221_v25 = vpop.permute.xlu1 %2220 }
 0x613   : > { %2151 = vst.msk [vmem:[%s3767_s6 + $0xc] sm:$0xf] %vm2147_vm14, %v2139_v3 }
 0x614   : > { %2235 = vst.msk [vmem:[%s3767_s6 + $0x4] sm:$0xf] %vm2233_vm0, %v2221_v25 }
 0x616   : > { %v2219_v23 = vpop.permute.xlu0 %2218 }
 0x617   : > { %2234 = vst.msk [vmem:[%s3767_s6] sm:$0xf] %vm2233_vm0, %v2219_v23  ;;  %v2240_v47 = vld [vmem:[%s3767_s6 + $0x10] sm:$0xf] }
 0x61a   : > { %v2223_v10 = vpop.permute.xlu0 %2222 }
 0x61b   : > { %2236 = vst.msk [vmem:[%s3767_s6 + $0x8] sm:$0xf] %vm2233_vm0, %v2223_v10 }
 0x666   : > { %v2227_v8 = vpop.permute.xlu1 %2226 }
 0x667   : > { %v2241_v62 = vsel %vm2239_vm1, %v2227_v8, %v2240_v47 }
 0x668   : > { %2242 = vst [vmem:[%s3767_s6 + $0x10] sm:$0xf] %v2241_v62 }
 0x66a   : > { %v2225_v52 = vpop.permute.xlu1 %2224 }
 0x66b   : > { %2237 = vst.msk [vmem:[%s3767_s6 + $0xc] sm:$0xf] %vm2233_vm0, %v2225_v52 }
 0x66c PF: > { %s13_s16 = sadd.s32 1, %s2889_s16   ;;  %s3873_s12 = smov %s2877_s13 }
 0x66d   : > { %p10_p10 = scmp.ge.s32.totalorder %s13_s16, 4   ;;  %s3874_s13 = smov %s2958_s21 }
 0x66e   : > { %s3875_s14 = smov %s2885_s15  ;;  %s3876_s15 = smov %s3878_s17 }
 0x66f   :  { %12 = sbr.rel (!%p10_p10) target bundleno = 3 (0x3), region = 223 }

// kernel: _lambda_.78
= control target key start
LH: loop header
LB: loop body
LE: loop exit
PB: predicated region body
PF: predicated region fallthrough
CT: control target
= control target key end

     0   :  { %vm162_vm0 = vcmask 1045504   ;;  %s531_s0 = inlined_call_operand.vmem [shape: bf16[390,128], index: 0, kind: input, shape index: {}]   ;;  %s532_s1 = inlined_call_operand.vmem [shape: f32[1,1,128], index: 1, kind: output, shape index: {0}]   ;;  %s533_s2 = inlined_call_operand.vmem [shape: f32[1,1,128], index: 2, kind: output, shape index: {1}]  }
   0x1   :  { %v297_v0 = vld [vmem:[%s531_s0] sm:$0xff]   ;;  %v392_v1 = vld [vmem:[%s531_s0 + $0x8] sm:$0xff]   ;;  %v393_v5 = vld [vmem:[%s531_s0 + $0x10] sm:$0xff]  }
   0x2   :  { %v298_v2 = vunpack.c.l.bf16 %v297_v0  ;;  %v299_v3 = vunpack.c.h.bf16 %v297_v0  ;;  %v302_v4 = vunpack.c.l.bf16 %v392_v1  ;;  %v303_v6 = vunpack.c.h.bf16 %v392_v1  ;;  %v394_v10 = vld [vmem:[%s531_s0 + $0x18] sm:$0xff]   ;;  %v395_v15 = vld [vmem:[%s531_s0 + $0x20] sm:$0xff]   ;;  %v396_v22 = vld [vmem:[%s531_s0 + $0x28] sm:$0xff]  }
   0x3   :  { %v306_v8 = vunpack.c.l.bf16 %v393_v5  ;;  %v307_v11 = vunpack.c.h.bf16 %v393_v5  ;;  %v310_v13 = vunpack.c.l.bf16 %v394_v10  ;;  %v311_v16 = vunpack.c.h.bf16 %v394_v10  ;;  %v397_v30 = vld [vmem:[%s531_s0 + $0x30] sm:$0xff]   ;;  %v398_v39 = vld [vmem:[%s531_s0 + $0x38] sm:$0xff]   ;;  %v399_v48 = vld [vmem:[%s531_s0 + $0x40] sm:$0xff]  }
   0x4   :  { %v115_v7 = vadd.f32 %v299_v3, %v298_v2  ;;  %v314_v18 = vunpack.c.l.bf16 %v395_v15  ;;  %v178_v20 = vmul.f32 %v298_v2, %v298_v2  ;;  %v179_v21 = vmul.f32 %v299_v3, %v299_v3  ;;  %v400_v57 = vld [vmem:[%s531_s0 + $0x48] sm:$0xff]   ;;  %v401_v2 = vld [vmem:[%s531_s0 + $0x50] sm:$0xff]  }
   0x5   :  { %v315_v23 = vunpack.c.h.bf16 %v395_v15  ;;  %v180_v25 = vmul.f32 %v302_v4, %v302_v4  ;;  %v318_v26 = vunpack.c.l.bf16 %v396_v22  ;;  %v181_v28 = vmul.f32 %v303_v6, %v303_v6 }
   0x6   :  { %v116_v9 = vadd.f32 %v302_v4, %v115_v7  ;;  %v227_v29 = vadd.f32 %v179_v21, %v178_v20  ;;  %v319_v31 = vunpack.c.h.bf16 %v396_v22  ;;  %v182_v33 = vmul.f32 %v306_v8, %v306_v8  ;;  %v403_v20 = vld [vmem:[%s531_s0 + $0x60] sm:$0xff]  }
   0x7   :  { %v322_v35 = vunpack.c.l.bf16 %v397_v30  ;;  %v183_v37 = vmul.f32 %v307_v11, %v307_v11  ;;  %v323_v40 = vunpack.c.h.bf16 %v397_v30  ;;  %v184_v42 = vmul.f32 %v310_v13, %v310_v13 }
   0x8   :  { %v117_v12 = vadd.f32 %v303_v6, %v116_v9  ;;  %v228_v34 = vadd.f32 %v227_v29, %v180_v25  ;;  %v326_v44 = vunpack.c.l.bf16 %v398_v39  ;;  %v185_v46 = vmul.f32 %v311_v16, %v311_v16  ;;  %v404_v29 = vld [vmem:[%s531_s0 + $0x68] sm:$0xff]  }
   0x9   :  { %v327_v49 = vunpack.c.h.bf16 %v398_v39  ;;  %v186_v51 = vmul.f32 %v314_v18, %v314_v18  ;;  %v330_v53 = vunpack.c.l.bf16 %v399_v48  ;;  %v187_v55 = vmul.f32 %v315_v23, %v315_v23 }
   0xa   :  { %v118_v14 = vadd.f32 %v306_v8, %v117_v12  ;;  %v229_v38 = vadd.f32 %v228_v34, %v181_v28  ;;  %v331_v58 = vunpack.c.h.bf16 %v399_v48  ;;  %v188_v60 = vmul.f32 %v318_v26, %v318_v26 }
   0xb   :  { %v334_v62 = vunpack.c.l.bf16 %v400_v57  ;;  %v189_v0 = vmul.f32 %v319_v31, %v319_v31  ;;  %v335_v3 = vunpack.c.h.bf16 %v400_v57  ;;  %v190_v5 = vmul.f32 %v322_v35, %v322_v35 }
   0xc   :  { %v119_v17 = vadd.f32 %v307_v11, %v118_v14  ;;  %v230_v43 = vadd.f32 %v229_v38, %v182_v33  ;;  %v338_v7 = vunpack.c.l.bf16 %v401_v2  ;;  %v191_v9 = vmul.f32 %v323_v40, %v323_v40  ;;  %v402_v11 = vld [vmem:[%s531_s0 + $0x58] sm:$0xff]   ;;  %v405_v38 = vld [vmem:[%s531_s0 + $0x70] sm:$0xff]  }
   0xd   :  { %v339_v12 = vunpack.c.h.bf16 %v401_v2  ;;  %v192_v14 = vmul.f32 %v326_v44, %v326_v44  ;;  %v343_v21 = vunpack.c.h.bf16 %v402_v11  ;;  %v346_v25 = vunpack.c.l.bf16 %v403_v20 }
   0xe   :  { %v120_v19 = vadd.f32 %v310_v13, %v119_v17  ;;  %v231_v47 = vadd.f32 %v230_v43, %v183_v37  ;;  %v347_v30 = vunpack.c.h.bf16 %v403_v20  ;;  %v350_v34 = vunpack.c.l.bf16 %v404_v29 }
   0xf   :  { %v351_v39 = vunpack.c.h.bf16 %v404_v29  ;;  %v354_v43 = vunpack.c.l.bf16 %v405_v38  ;;  %v355_v48 = vunpack.c.h.bf16 %v405_v38 }
  0x10   :  { %v121_v24 = vadd.f32 %v311_v16, %v120_v19  ;;  %v232_v52 = vadd.f32 %v231_v47, %v184_v42  ;;  %v342_v16 = vunpack.c.l.bf16 %v402_v11  ;;  %v406_v47 = vld [vmem:[%s531_s0 + $0x78] sm:$0xff]  }
  0x11   :  { %v359_v57 = vunpack.c.h.bf16 %v406_v47 }
  0x12   :  { %v122_v27 = vadd.f32 %v314_v18, %v121_v24  ;;  %v233_v56 = vadd.f32 %v232_v52, %v185_v46  ;;  %v193_v18 = vmul.f32 %v327_v49, %v327_v49  ;;  %v358_v52 = vunpack.c.l.bf16 %v406_v47 }
  0x14   :  { %v123_v32 = vadd.f32 %v315_v23, %v122_v27  ;;  %v234_v61 = vadd.f32 %v233_v56, %v186_v51  ;;  %v194_v23 = vmul.f32 %v330_v53, %v330_v53  ;;  %v195_v27 = vmul.f32 %v331_v58, %v331_v58  ;;  %v407_v56 = vld [vmem:[%s531_s0 + $0x80] sm:$0xff]  }
  0x15   :  { %v363_v2 = vunpack.c.h.bf16 %v407_v56 }
  0x16   :  { %v124_v36 = vadd.f32 %v318_v26, %v123_v32  ;;  %v235_v1 = vadd.f32 %v234_v61, %v187_v55  ;;  %v196_v32 = vmul.f32 %v334_v62, %v334_v62  ;;  %v362_v61 = vunpack.c.l.bf16 %v407_v56 }
  0x18   :  { %v125_v41 = vadd.f32 %v319_v31, %v124_v36  ;;  %v236_v6 = vadd.f32 %v235_v1, %v188_v60  ;;  %v197_v36 = vmul.f32 %v335_v3, %v335_v3  ;;  %v408_v1 = vld [vmem:[%s531_s0 + $0x88] sm:$0xff]  }
  0x19   :  { %v367_v11 = vunpack.c.h.bf16 %v408_v1 }
  0x1a   :  { %v126_v45 = vadd.f32 %v322_v35, %v125_v41  ;;  %v237_v10 = vadd.f32 %v236_v6, %v189_v0  ;;  %v198_v41 = vmul.f32 %v338_v7, %v338_v7  ;;  %v366_v6 = vunpack.c.l.bf16 %v408_v1 }
  0x1c   :  { %v127_v50 = vadd.f32 %v323_v40, %v126_v45  ;;  %v238_v15 = vadd.f32 %v237_v10, %v190_v5  ;;  %v199_v45 = vmul.f32 %v339_v12, %v339_v12  ;;  %v409_v10 = vld [vmem:[%s531_s0 + $0x90] sm:$0xff]  }
  0x1d   :  { %v371_v20 = vunpack.c.h.bf16 %v409_v10 }
  0x1e   :  { %v128_v54 = vadd.f32 %v326_v44, %v127_v50  ;;  %v239_v19 = vadd.f32 %v238_v15, %v191_v9  ;;  %v200_v50 = vmul.f32 %v342_v16, %v342_v16  ;;  %v370_v15 = vunpack.c.l.bf16 %v409_v10 }
  0x20   :  { %v129_v59 = vadd.f32 %v327_v49, %v128_v54  ;;  %v240_v24 = vadd.f32 %v239_v19, %v192_v14  ;;  %v201_v54 = vmul.f32 %v343_v21, %v343_v21  ;;  %v410_v19 = vld [vmem:[%s531_s0 + $0x98] sm:$0xff]  }
  0x21   :  { %v375_v29 = vunpack.c.h.bf16 %v410_v19 }
  0x22   :  { %v130_v63 = vadd.f32 %v330_v53, %v129_v59  ;;  %v241_v28 = vadd.f32 %v240_v24, %v193_v18  ;;  %v202_v59 = vmul.f32 %v346_v25, %v346_v25  ;;  %v374_v24 = vunpack.c.l.bf16 %v410_v19 }
  0x24   :  { %v131_v4 = vadd.f32 %v331_v58, %v130_v63  ;;  %v242_v33 = vadd.f32 %v241_v28, %v194_v23  ;;  %v203_v63 = vmul.f32 %v347_v30, %v347_v30  ;;  %v411_v28 = vld [vmem:[%s531_s0 + $0xa0] sm:$0xff]  }
  0x25   :  { %v379_v38 = vunpack.c.h.bf16 %v411_v28 }
  0x26   :  { %v132_v8 = vadd.f32 %v334_v62, %v131_v4  ;;  %v243_v37 = vadd.f32 %v242_v33, %v195_v27  ;;  %v204_v4 = vmul.f32 %v350_v34, %v350_v34  ;;  %v378_v33 = vunpack.c.l.bf16 %v411_v28 }
  0x28   :  { %v133_v13 = vadd.f32 %v335_v3, %v132_v8  ;;  %v244_v42 = vadd.f32 %v243_v37, %v196_v32  ;;  %v205_v8 = vmul.f32 %v351_v39, %v351_v39  ;;  %v412_v37 = vld [vmem:[%s531_s0 + $0xa8] sm:$0xff]  }
  0x29   :  { %v383_v47 = vunpack.c.h.bf16 %v412_v37 }
  0x2a   :  { %v134_v17 = vadd.f32 %v338_v7, %v133_v13  ;;  %v245_v46 = vadd.f32 %v244_v42, %v197_v36  ;;  %v206_v13 = vmul.f32 %v354_v43, %v354_v43  ;;  %v382_v42 = vunpack.c.l.bf16 %v412_v37 }
  0x2c   :  { %v135_v22 = vadd.f32 %v339_v12, %v134_v17  ;;  %v246_v51 = vadd.f32 %v245_v46, %v198_v41  ;;  %v207_v17 = vmul.f32 %v355_v48, %v355_v48  ;;  %v413_v46 = vld [vmem:[%s531_s0 + $0xb0] sm:$0xff]  }
  0x2d   :  { %v387_v56 = vunpack.c.h.bf16 %v413_v46 }
  0x2e   :  { %v136_v26 = vadd.f32 %v342_v16, %v135_v22  ;;  %v247_v55 = vadd.f32 %v246_v51, %v199_v45  ;;  %v208_v22 = vmul.f32 %v358_v52, %v358_v52  ;;  %v386_v51 = vunpack.c.l.bf16 %v413_v46 }
  0x30   :  { %v137_v31 = vadd.f32 %v343_v21, %v136_v26  ;;  %v248_v60 = vadd.f32 %v247_v55, %v200_v50  ;;  %v209_v26 = vmul.f32 %v359_v57, %v359_v57  ;;  %v414_v55 = vld [vmem:[%s531_s0 + $0xb8] sm:$0xff]  }
  0x32   :  { %v138_v35 = vadd.f32 %v346_v25, %v137_v31  ;;  %v249_v0 = vadd.f32 %v248_v60, %v201_v54  ;;  %v210_v31 = vmul.f32 %v362_v61, %v362_v61 }
  0x34   :  { %v139_v40 = vadd.f32 %v347_v30, %v138_v35  ;;  %v250_v5 = vadd.f32 %v249_v0, %v202_v59  ;;  %v211_v35 = vmul.f32 %v363_v2, %v363_v2  ;;  %v216_v59 = vmul.f32 %v374_v24, %v374_v24 }
  0x36   :  { %v140_v44 = vadd.f32 %v350_v34, %v139_v40  ;;  %v251_v9 = vadd.f32 %v250_v5, %v203_v63  ;;  %v212_v40 = vmul.f32 %v366_v6, %v366_v6  ;;  %v217_v63 = vmul.f32 %v375_v29, %v375_v29 }
  0x38   :  { %v141_v49 = vadd.f32 %v351_v39, %v140_v44  ;;  %v252_v14 = vadd.f32 %v251_v9, %v204_v4  ;;  %v213_v44 = vmul.f32 %v367_v11, %v367_v11  ;;  %v218_v4 = vmul.f32 %v378_v33, %v378_v33 }
  0x3a   :  { %v142_v53 = vadd.f32 %v354_v43, %v141_v49  ;;  %v253_v18 = vadd.f32 %v252_v14, %v205_v8  ;;  %v214_v49 = vmul.f32 %v370_v15, %v370_v15  ;;  %v221_v14 = vmul.f32 %v383_v47, %v383_v47 }
  0x3c   :  { %v143_v58 = vadd.f32 %v355_v48, %v142_v53  ;;  %v254_v23 = vadd.f32 %v253_v18, %v206_v13  ;;  %v215_v53 = vmul.f32 %v371_v20, %v371_v20  ;;  %v223_v18 = vmul.f32 %v387_v56, %v387_v56 }
  0x3e   :  { %v144_v62 = vadd.f32 %v358_v52, %v143_v58  ;;  %v255_v27 = vadd.f32 %v254_v23, %v207_v17 }
  0x40   :  { %v145_v3 = vadd.f32 %v359_v57, %v144_v62  ;;  %v256_v32 = vadd.f32 %v255_v27, %v208_v22  ;;  %v64_v57 = vld [vmem:[%s531_s0 + $0xc0] sm:$0x7] }
  0x41   :  { %v113_v1 = vunpack.c.l.bf16 %v64_v57 }
  0x42   :  { %v146_v7 = vadd.f32 %v362_v61, %v145_v3  ;;  %v257_v36 = vadd.f32 %v256_v32, %v209_v26  ;;  %v390_v61 = vunpack.c.l.bf16 %v414_v55 }
  0x43   :  { %v163_v9 = vsel %vm162_vm0, %v113_v1, 0.0  ;;  %v226_v22 = vmul.f32 %v113_v1, %v113_v1 }
  0x44   :  { %v147_v12 = vadd.f32 %v363_v2, %v146_v7  ;;  %v258_v41 = vadd.f32 %v257_v36, %v210_v31  ;;  %v391_v2 = vunpack.c.h.bf16 %v414_v55  ;;  %v219_v7 = vmul.f32 %v379_v38, %v379_v38 }
  0x45   :  { %v274_v26 = vsel %vm162_vm0, %v226_v22, 0.0 }
  0x46   :  { %v148_v16 = vadd.f32 %v366_v6, %v147_v12  ;;  %v259_v45 = vadd.f32 %v258_v41, %v211_v35  ;;  %v225_v23 = vmul.f32 %v391_v2, %v391_v2 }
  0x48   :  { %v149_v21 = vadd.f32 %v367_v11, %v148_v16  ;;  %v260_v50 = vadd.f32 %v259_v45, %v212_v40  ;;  %v220_v11 = vmul.f32 %v382_v42, %v382_v42  ;;  %v222_v16 = vmul.f32 %v386_v51, %v386_v51 }
  0x4a   :  { %v150_v25 = vadd.f32 %v370_v15, %v149_v21  ;;  %v261_v54 = vadd.f32 %v260_v50, %v213_v44 }
  0x4c   :  { %v151_v30 = vadd.f32 %v371_v20, %v150_v25  ;;  %v262_v60 = vadd.f32 %v261_v54, %v214_v49  ;;  %v224_v20 = vmul.f32 %v390_v61, %v390_v61 }
  0x4e   :  { %v152_v34 = vadd.f32 %v374_v24, %v151_v30  ;;  %v263_v0 = vadd.f32 %v262_v60, %v215_v53 }
  0x50   :  { %v153_v39 = vadd.f32 %v375_v29, %v152_v34  ;;  %v264_v5 = vadd.f32 %v263_v0, %v216_v59  ;;  %v420_v29 = vmov 0.0  }
  0x51   :  { %14 = vst [vmem:[%s532_s1] sm:$0x1] %v420_v29  ;;  %15 = vst [vmem:[%s533_s2] sm:$0x1] %v420_v29 }
  0x52   :  { %v154_v43 = vadd.f32 %v378_v33, %v153_v39  ;;  %v265_v8 = vadd.f32 %v264_v5, %v217_v63 }
  0x54   :  { %v155_v48 = vadd.f32 %v379_v38, %v154_v43  ;;  %v266_v12 = vadd.f32 %v265_v8, %v218_v4 }
  0x56   :  { %v156_v52 = vadd.f32 %v382_v42, %v155_v48  ;;  %v267_v15 = vadd.f32 %v266_v12, %v219_v7 }
  0x58   :  { %v157_v58 = vadd.f32 %v383_v47, %v156_v52  ;;  %v268_v17 = vadd.f32 %v267_v15, %v220_v11  ;;  %v114_v44 = vld [vmem:[%s532_s1] sm:$0x1] }
  0x59   :  { %v177_v47 = vld [vmem:[%s533_s2] sm:$0x1] }
  0x5a   :  { %v158_v62 = vadd.f32 %v386_v51, %v157_v58  ;;  %v269_v19 = vadd.f32 %v268_v17, %v221_v14 }
  0x5c   :  { %v159_v3 = vadd.f32 %v387_v56, %v158_v62  ;;  %v270_v21 = vadd.f32 %v269_v19, %v222_v16 }
  0x5e   :  { %v160_v6 = vadd.f32 %v390_v61, %v159_v3  ;;  %v271_v24 = vadd.f32 %v270_v21, %v223_v18 }
  0x60   :  { %v161_v10 = vadd.f32 %v391_v2, %v160_v6  ;;  %v272_v25 = vadd.f32 %v271_v24, %v224_v20 }
  0x62   :  { %v164_v13 = vadd.f32 %v163_v9, %v161_v10  ;;  %v273_v27 = vadd.f32 %v272_v25, %v225_v23 }
  0x64   :  { %165 = vadd.xlane.f32.xlu0 %v164_v13  ;;  %v275_v28 = vadd.f32 %v274_v26, %v273_v27 }
  0x68   :  { %276 = vadd.xlane.f32.xlu0 %v275_v28 }
  0xed   :  { %v166_v30 = vpop.xlane.xlu0 %165 }
  0xee   :  { %v167_v31 = vrot.slane %v166_v30, 4 }
  0xf0   :  { %v168_v32 = vadd.f32 %v167_v31, %v166_v30 }
  0xf1   :  { %v277_v37 = vpop.xlane.xlu0 %276 }
  0xf2   :  { %v169_v33 = vrot.slane %v168_v32, 2  ;;  %v278_v38 = vrot.slane %v277_v37, 4 }
  0xf4   :  { %v170_v34 = vadd.f32 %v169_v33, %v168_v32  ;;  %v279_v39 = vadd.f32 %v278_v38, %v277_v37 }
  0xf6   :  { %v171_v35 = vrot.slane %v170_v34, 1  ;;  %v280_v40 = vrot.slane %v279_v39, 2 }
  0xf8   :  { %v172_v36 = vadd.f32 %v171_v35, %v170_v34  ;;  %v281_v41 = vadd.f32 %v280_v40, %v279_v39 }
  0xfa   :  { %415 = vpush %v172_v36  ;;  %v282_v42 = vrot.slane %v281_v41, 1 }
  0xfc   :  { %v283_v43 = vadd.f32 %v282_v42, %v281_v41 }
  0xfe   :  { %417 = vpush %v283_v43 }
 0x12b   :  { %s416_s8 = spop %415 }
 0x12c   :  { %v174_v45 = vstv %s416_s8 }
 0x12d   :  { %v175_v46 = vadd.f32 %v174_v45, %v114_v44 }
 0x12f   :  { %176 = vst [vmem:[%s532_s1] sm:$0x1] %v175_v46  ;;  %s418_s13 = spop %417 }
 0x130   :  { %v285_v48 = vstv %s418_s13 }
 0x131   :  { %v286_v49 = vadd.f32 %v285_v48, %v177_v47 }
 0x133   :  { %287 = vst [vmem:[%s533_s2] sm:$0x1] %v286_v49 }

// kernel: _lambda_.79
= control target key start
LH: loop header
LB: loop body
LE: loop exit
PB: predicated region body
PF: predicated region fallthrough
CT: control target
= control target key end

     0   :  { %7 = vsyncpa [#allocation3], 0  ;;  %s778_s0 = inlined_call_operand.vmem [shape: bf16[390,128], index: 0, kind: input, shape index: {}]   ;;  %s779_s1 = inlined_call_operand.vmem [shape: f32[2], index: 1, kind: input, shape index: {}]   ;;  %s780_s2 = inlined_call_operand.vmem [shape: f32[390,128], index: 2, kind: output, shape index: {}]  }
   0x1   :  { %s16_s11 = sshll.u32 %s779_s1, 4  ;;  %s17_s11 = int_to_ptr.vmem [resolvable:$true] %s16_s11 }
   0x2   :  { %s399_s12 = scalar_lea.vmem %s17_s11, 16  ;;  %p404_p1 = scmp.lt.s32.totalorder %s17_s11, %s17_s11 }
   0x3   :  { %p400_p0 = scmp.ne.s32.totalorder %s17_s11, %s399_s12  ;;  %p405_p2 = scmp.lt.s32.totalorder %s399_s12, %s399_s12 }
   0x5   :  { %p406_p3 = por %p405_p2, %p404_p1 }
   0x7   :  { %p407_p4 = pnand %p406_p3, %p400_p0 }
   0x9   :  { %410 = shalt.err (!%p407_p4)
}
   0xa   :  { %s413_s13 = smov [#allocation2]  }
   0xb   :  { %19 = dma.vmem_to_smem %s17_s11, 16, %s413_s13, [#allocation3]  }
   0xc   :  { %411 = dma.done.wait [#allocation3], 16  }
   0xd   :  { %412 = vsyncadd [#allocation3], 4294967280 }
   0xe   :  { %23 = sfence }
   0xf   :  { %s432_s14 = sld [smem:[#allocation2]]  ;;  %v280_v0 = vld [vmem:[%s778_s0] sm:$0xff]   ;;  %v375_v1 = vld [vmem:[%s778_s0 + $0x8] sm:$0xff]   ;;  %v376_v2 = vld [vmem:[%s778_s0 + $0x10] sm:$0xff]  }
  0x10   :  { %s443_s20 = sld [smem:[#allocation2 + $0x1]]  ;;  %v281_v3 = vunpack.c.l.bf16 %v280_v0  ;;  %v282_v4 = vunpack.c.h.bf16 %v280_v0  ;;  %v285_v5 = vunpack.c.l.bf16 %v375_v1  ;;  %v286_v6 = vunpack.c.h.bf16 %v375_v1  ;;  %v377_v7 = vld [vmem:[%s778_s0 + $0x18] sm:$0xff]   ;;  %v378_v8 = vld [vmem:[%s778_s0 + $0x20] sm:$0xff]   ;;  %v379_v9 = vld [vmem:[%s778_s0 + $0x28] sm:$0xff]  }
  0x11   :  { %v289_v10 = vunpack.c.l.bf16 %v376_v2  ;;  %v290_v11 = vunpack.c.h.bf16 %v376_v2  ;;  %v293_v12 = vunpack.c.l.bf16 %v377_v7  ;;  %v294_v13 = vunpack.c.h.bf16 %v377_v7  ;;  %v380_v14 = vld [vmem:[%s778_s0 + $0x30] sm:$0xff]   ;;  %v381_v15 = vld [vmem:[%s778_s0 + $0x38] sm:$0xff]   ;;  %v463_v16 = vld [vmem:[%s778_s0 + $0x40] sm:$0xff]  }
  0x12   :  { %v297_v17 = vunpack.c.l.bf16 %v378_v8  ;;  %v298_v18 = vunpack.c.h.bf16 %v378_v8  ;;  %v301_v19 = vunpack.c.l.bf16 %v379_v9  ;;  %v302_v20 = vunpack.c.h.bf16 %v379_v9  ;;  %v468_v21 = vld [vmem:[%s778_s0 + $0x48] sm:$0xff]   ;;  %v473_v22 = vld [vmem:[%s778_s0 + $0x50] sm:$0xff]   ;;  %v478_v23 = vld [vmem:[%s778_s0 + $0x58] sm:$0xff]  }
  0x13   :  { %v305_v24 = vunpack.c.l.bf16 %v380_v14  ;;  %v306_v25 = vunpack.c.h.bf16 %v380_v14  ;;  %v309_v26 = vunpack.c.l.bf16 %v381_v15  ;;  %v310_v27 = vunpack.c.h.bf16 %v381_v15 }
  0x14   :  { %v313_v28 = vunpack.c.l.bf16 %v463_v16  ;;  %v314_v29 = vunpack.c.h.bf16 %v463_v16  ;;  %v317_v30 = vunpack.c.l.bf16 %v468_v21  ;;  %v318_v31 = vunpack.c.h.bf16 %v468_v21 }
  0x15   :  { %v485_v32 = vstv %s432_s14  ;;  %v321_v33 = vunpack.c.l.bf16 %v473_v22  ;;  %v322_v34 = vunpack.c.h.bf16 %v473_v22  ;;  %v325_v35 = vunpack.c.l.bf16 %v478_v23 }
  0x16   :  { %v125_v36 = vsub.f32 %v281_v3, %v485_v32  ;;  %v492_v37 = vstv %s443_s20  ;;  %v126_v38 = vsub.f32 %v282_v4, %v485_v32  ;;  %v127_v39 = vsub.f32 %v285_v5, %v485_v32 }
  0x17   :  { %v128_v40 = vsub.f32 %v286_v6, %v485_v32  ;;  %v129_v41 = vsub.f32 %v289_v10, %v485_v32  ;;  %v130_v42 = vsub.f32 %v290_v11, %v485_v32  ;;  %v131_v43 = vsub.f32 %v293_v12, %v485_v32  ;;  %v386_v12 = vld [vmem:[%s778_s0 + $0x60] sm:$0xff]  }
  0x18   :  { %v175_v44 = vmul.f32 %v492_v37, %v125_v36  ;;  %v176_v45 = vmul.f32 %v492_v37, %v126_v38  ;;  %v177_v46 = vmul.f32 %v492_v37, %v127_v39  ;;  %v132_v47 = vsub.f32 %v294_v13, %v485_v32  ;;  %v387_v13 = vld [vmem:[%s778_s0 + $0x68] sm:$0xff]  }
  0x19   :  { %v178_v48 = vmul.f32 %v492_v37, %v128_v40  ;;  %v179_v49 = vmul.f32 %v492_v37, %v129_v41  ;;  %v180_v50 = vmul.f32 %v492_v37, %v130_v42  ;;  %v181_v51 = vmul.f32 %v492_v37, %v131_v43  ;;  %v390_v42 = vld [vmem:[%s778_s0 + $0x80] sm:$0xff]   ;;  %v391_v43 = vld [vmem:[%s778_s0 + $0x88] sm:$0xff]  }
  0x1a   :  { %224 = vst [vmem:[%s780_s2] sm:$0xff] %v175_v44  ;;  %225 = vst [vmem:[%s780_s2 + $0x8] sm:$0xff] %v176_v45  ;;  %v182_v52 = vmul.f32 %v492_v37, %v132_v47  ;;  %v133_v53 = vsub.f32 %v297_v17, %v485_v32  ;;  %v134_v54 = vsub.f32 %v298_v18, %v485_v32  ;;  %v326_v17 = vunpack.c.h.bf16 %v478_v23  ;;  %v388_v18 = vld [vmem:[%s778_s0 + $0x70] sm:$0xff]  }
  0x1b   :  { %226 = vst [vmem:[%s780_s2 + $0x10] sm:$0xff] %v177_v46  ;;  %v135_v55 = vsub.f32 %v301_v19, %v485_v32  ;;  %227 = vst [vmem:[%s780_s2 + $0x18] sm:$0xff] %v178_v48  ;;  %v136_v56 = vsub.f32 %v302_v20, %v485_v32  ;;  %v137_v57 = vsub.f32 %v305_v24, %v485_v32  ;;  %v389_v19 = vld [vmem:[%s778_s0 + $0x78] sm:$0xff]   ;;  %v392_v48 = vld [vmem:[%s778_s0 + $0x90] sm:$0xff]  }
  0x1c   :  { %228 = vst [vmem:[%s780_s2 + $0x20] sm:$0xff] %v179_v49  ;;  %229 = vst [vmem:[%s780_s2 + $0x28] sm:$0xff] %v180_v50  ;;  %v138_v58 = vsub.f32 %v306_v25, %v485_v32  ;;  %v139_v59 = vsub.f32 %v309_v26, %v485_v32  ;;  %v183_v60 = vmul.f32 %v492_v37, %v133_v53  ;;  %v329_v25 = vunpack.c.l.bf16 %v386_v12  ;;  %v393_v49 = vld [vmem:[%s778_s0 + $0x98] sm:$0xff]  }
  0x1d   :  { %230 = vst [vmem:[%s780_s2 + $0x30] sm:$0xff] %v181_v51  ;;  %231 = vst [vmem:[%s780_s2 + $0x38] sm:$0xff] %v182_v52  ;;  %v184_v61 = vmul.f32 %v492_v37, %v134_v54  ;;  %v185_v62 = vmul.f32 %v492_v37, %v135_v55  ;;  %v140_v63 = vsub.f32 %v310_v27, %v485_v32  ;;  %v330_v26 = vunpack.c.h.bf16 %v386_v12  ;;  %v396_v12 = vld [vmem:[%s778_s0 + $0xb0] sm:$0xff]  }
  0x1e   :  { %v186_v0 = vmul.f32 %v492_v37, %v136_v56  ;;  %v187_v1 = vmul.f32 %v492_v37, %v137_v57  ;;  %v188_v2 = vmul.f32 %v492_v37, %v138_v58  ;;  %v189_v3 = vmul.f32 %v492_v37, %v139_v59  ;;  %232 = vst [vmem:[%s780_s2 + $0x40] sm:$0xff] %v183_v60 }
  0x1f   :  { %233 = vst [vmem:[%s780_s2 + $0x48] sm:$0xff] %v184_v61  ;;  %234 = vst [vmem:[%s780_s2 + $0x50] sm:$0xff] %v185_v62  ;;  %v190_v4 = vmul.f32 %v492_v37, %v140_v63  ;;  %v141_v5 = vsub.f32 %v313_v28, %v485_v32  ;;  %v142_v6 = vsub.f32 %v314_v29, %v485_v32  ;;  %v333_v27 = vunpack.c.l.bf16 %v387_v13 }
  0x20   :  { %v143_v7 = vsub.f32 %v317_v30, %v485_v32  ;;  %235 = vst [vmem:[%s780_s2 + $0x58] sm:$0xff] %v186_v0  ;;  %236 = vst [vmem:[%s780_s2 + $0x60] sm:$0xff] %v187_v1  ;;  %v144_v8 = vsub.f32 %v318_v31, %v485_v32  ;;  %v145_v9 = vsub.f32 %v321_v33, %v485_v32  ;;  %v334_v28 = vunpack.c.h.bf16 %v387_v13  ;;  %v397_v13 = vld [vmem:[%s778_s0 + $0xb8] sm:$0xff]  }
  0x21   :  { %237 = vst [vmem:[%s780_s2 + $0x68] sm:$0xff] %v188_v2  ;;  %238 = vst [vmem:[%s780_s2 + $0x70] sm:$0xff] %v189_v3  ;;  %v146_v10 = vsub.f32 %v322_v34, %v485_v32  ;;  %v147_v11 = vsub.f32 %v325_v35, %v485_v32  ;;  %v191_v14 = vmul.f32 %v492_v37, %v141_v5  ;;  %v337_v29 = vunpack.c.l.bf16 %v388_v18 }
  0x22   :  { %239 = vst [vmem:[%s780_s2 + $0x78] sm:$0xff] %v190_v4  ;;  %v192_v15 = vmul.f32 %v492_v37, %v142_v6  ;;  %v193_v16 = vmul.f32 %v492_v37, %v143_v7  ;;  %v194_v20 = vmul.f32 %v492_v37, %v144_v8  ;;  %v195_v21 = vmul.f32 %v492_v37, %v145_v9  ;;  %v394_v6 = vld [vmem:[%s778_s0 + $0xa0] sm:$0xff]   ;;  %v395_v7 = vld [vmem:[%s778_s0 + $0xa8] sm:$0xff]  }
  0x23   :  { %v196_v22 = vmul.f32 %v492_v37, %v146_v10  ;;  %v197_v24 = vmul.f32 %v492_v37, %v147_v11  ;;  %240 = vst [vmem:[%s780_s2 + $0x80] sm:$0xff] %v191_v14  ;;  %v148_v23 = vsub.f32 %v326_v17, %v485_v32  ;;  %v338_v30 = vunpack.c.h.bf16 %v388_v18 }
  0x24   :  { %241 = vst [vmem:[%s780_s2 + $0x88] sm:$0xff] %v192_v15  ;;  %242 = vst [vmem:[%s780_s2 + $0x90] sm:$0xff] %v193_v16  ;;  %v341_v31 = vunpack.c.l.bf16 %v389_v19  ;;  %v149_v34 = vsub.f32 %v329_v25, %v485_v32  ;;  %v150_v35 = vsub.f32 %v330_v26, %v485_v32  ;;  %v151_v36 = vsub.f32 %v333_v27, %v485_v32 }
  0x25   :  { %243 = vst [vmem:[%s780_s2 + $0x98] sm:$0xff] %v194_v20  ;;  %244 = vst [vmem:[%s780_s2 + $0xa0] sm:$0xff] %v195_v21  ;;  %v198_v33 = vmul.f32 %v492_v37, %v148_v23  ;;  %v152_v38 = vsub.f32 %v334_v28, %v485_v32  ;;  %v153_v39 = vsub.f32 %v337_v29, %v485_v32  ;;  %v342_v47 = vunpack.c.h.bf16 %v389_v19 }
  0x26   :  { %245 = vst [vmem:[%s780_s2 + $0xa8] sm:$0xff] %v196_v22  ;;  %246 = vst [vmem:[%s780_s2 + $0xb0] sm:$0xff] %v197_v24  ;;  %v154_v40 = vsub.f32 %v338_v30, %v485_v32  ;;  %v155_v41 = vsub.f32 %v341_v31, %v485_v32  ;;  %v199_v44 = vmul.f32 %v492_v37, %v149_v34  ;;  %v345_v55 = vunpack.c.l.bf16 %v390_v42 }
  0x27   :  { %247 = vst [vmem:[%s780_s2 + $0xb8] sm:$0xff] %v198_v33  ;;  %v200_v45 = vmul.f32 %v492_v37, %v150_v35  ;;  %v201_v46 = vmul.f32 %v492_v37, %v151_v36  ;;  %v202_v50 = vmul.f32 %v492_v37, %v152_v38  ;;  %v203_v51 = vmul.f32 %v492_v37, %v153_v39  ;;  %v74_v35 = vld [vmem:[%s778_s0 + $0xc0] sm:$0x7] }
  0x28   :  { %v204_v52 = vmul.f32 %v492_v37, %v154_v40  ;;  %v205_v53 = vmul.f32 %v492_v37, %v155_v41  ;;  %248 = vst [vmem:[%s780_s2 + $0xc0] sm:$0xff] %v199_v44  ;;  %v156_v54 = vsub.f32 %v342_v47, %v485_v32  ;;  %v346_v56 = vunpack.c.h.bf16 %v390_v42 }
  0x29   :  { %249 = vst [vmem:[%s780_s2 + $0xc8] sm:$0xff] %v200_v45  ;;  %250 = vst [vmem:[%s780_s2 + $0xd0] sm:$0xff] %v201_v46  ;;  %v349_v57 = vunpack.c.l.bf16 %v391_v43  ;;  %v350_v58 = vunpack.c.h.bf16 %v391_v43  ;;  %v353_v59 = vunpack.c.l.bf16 %v392_v48  ;;  %v354_v60 = vunpack.c.h.bf16 %v392_v48 }
  0x2a   :  { %251 = vst [vmem:[%s780_s2 + $0xd8] sm:$0xff] %v202_v50  ;;  %252 = vst [vmem:[%s780_s2 + $0xe0] sm:$0xff] %v203_v51  ;;  %v357_v61 = vunpack.c.l.bf16 %v393_v49  ;;  %v206_v62 = vmul.f32 %v492_v37, %v156_v54  ;;  %v157_v63 = vsub.f32 %v345_v55, %v485_v32  ;;  %v158_v0 = vsub.f32 %v346_v56, %v485_v32 }
  0x2b   :  { %253 = vst [vmem:[%s780_s2 + $0xe8] sm:$0xff] %v204_v52  ;;  %254 = vst [vmem:[%s780_s2 + $0xf0] sm:$0xff] %v205_v53  ;;  %v159_v1 = vsub.f32 %v349_v57, %v485_v32  ;;  %v160_v2 = vsub.f32 %v350_v58, %v485_v32  ;;  %v161_v3 = vsub.f32 %v353_v59, %v485_v32  ;;  %v358_v11 = vunpack.c.h.bf16 %v393_v49 }
  0x2c   :  { %v162_v4 = vsub.f32 %v354_v60, %v485_v32  ;;  %v163_v5 = vsub.f32 %v357_v61, %v485_v32  ;;  %255 = vst [vmem:[%s780_s2 + $0xf8] sm:$0xff] %v206_v62  ;;  %v207_v8 = vmul.f32 %v492_v37, %v157_v63  ;;  %v208_v9 = vmul.f32 %v492_v37, %v158_v0 }
  0x2d   :  { %v209_v10 = vmul.f32 %v492_v37, %v159_v1  ;;  %v210_v14 = vmul.f32 %v492_v37, %v160_v2  ;;  %v211_v15 = vmul.f32 %v492_v37, %v161_v3  ;;  %v164_v18 = vsub.f32 %v358_v11, %v485_v32 }
  0x2e   :  { %v212_v16 = vmul.f32 %v492_v37, %v162_v4  ;;  %v213_v17 = vmul.f32 %v492_v37, %v163_v5  ;;  %256 = vst [vmem:[%s780_s2 + $0x100] sm:$0xff] %v207_v8  ;;  %257 = vst [vmem:[%s780_s2 + $0x108] sm:$0xff] %v208_v9  ;;  %v361_v19 = vunpack.c.l.bf16 %v394_v6  ;;  %v362_v20 = vunpack.c.h.bf16 %v394_v6 }
  0x2f   :  { %258 = vst [vmem:[%s780_s2 + $0x110] sm:$0xff] %v209_v10  ;;  %v365_v21 = vunpack.c.l.bf16 %v395_v7  ;;  %259 = vst [vmem:[%s780_s2 + $0x118] sm:$0xff] %v210_v14  ;;  %v366_v22 = vunpack.c.h.bf16 %v395_v7  ;;  %v369_v24 = vunpack.c.l.bf16 %v396_v12  ;;  %v370_v23 = vunpack.c.h.bf16 %v396_v12 }
  0x30   :  { %260 = vst [vmem:[%s780_s2 + $0x120] sm:$0xff] %v211_v15  ;;  %261 = vst [vmem:[%s780_s2 + $0x128] sm:$0xff] %v212_v16  ;;  %v373_v25 = vunpack.c.l.bf16 %v397_v13  ;;  %v214_v26 = vmul.f32 %v492_v37, %v164_v18  ;;  %v165_v27 = vsub.f32 %v361_v19, %v485_v32  ;;  %v166_v28 = vsub.f32 %v362_v20, %v485_v32 }
  0x31   :  { %262 = vst [vmem:[%s780_s2 + $0x130] sm:$0xff] %v213_v17  ;;  %v167_v29 = vsub.f32 %v365_v21, %v485_v32  ;;  %v168_v30 = vsub.f32 %v366_v22, %v485_v32  ;;  %v169_v31 = vsub.f32 %v369_v24, %v485_v32  ;;  %v170_v33 = vsub.f32 %v370_v23, %v485_v32 }
  0x32   :  { %v171_v34 = vsub.f32 %v373_v25, %v485_v32  ;;  %263 = vst [vmem:[%s780_s2 + $0x138] sm:$0xff] %v214_v26  ;;  %v215_v36 = vmul.f32 %v492_v37, %v165_v27  ;;  %v216_v38 = vmul.f32 %v492_v37, %v166_v28  ;;  %v374_v40 = vunpack.c.h.bf16 %v397_v13 }
  0x33   :  { %v217_v39 = vmul.f32 %v492_v37, %v167_v29  ;;  %v218_v41 = vmul.f32 %v492_v37, %v168_v30  ;;  %v219_v42 = vmul.f32 %v492_v37, %v169_v31  ;;  %v220_v43 = vmul.f32 %v492_v37, %v170_v33 }
  0x34   :  { %v221_v44 = vmul.f32 %v492_v37, %v171_v34  ;;  %264 = vst [vmem:[%s780_s2 + $0x140] sm:$0xff] %v215_v36  ;;  %265 = vst [vmem:[%s780_s2 + $0x148] sm:$0xff] %v216_v38  ;;  %v172_v45 = vsub.f32 %v374_v40, %v485_v32  ;;  %v123_v46 = vunpack.c.l.bf16 %v74_v35 }
  0x35   :  { %266 = vst [vmem:[%s780_s2 + $0x150] sm:$0xff] %v217_v39  ;;  %267 = vst [vmem:[%s780_s2 + $0x158] sm:$0xff] %v218_v41 }
  0x36   :  { %268 = vst [vmem:[%s780_s2 + $0x160] sm:$0xff] %v219_v42  ;;  %269 = vst [vmem:[%s780_s2 + $0x168] sm:$0xff] %v220_v43  ;;  %v222_v47 = vmul.f32 %v492_v37, %v172_v45  ;;  %v173_v48 = vsub.f32 %v123_v46, %v485_v32 }
  0x37   :  { %270 = vst [vmem:[%s780_s2 + $0x170] sm:$0xff] %v221_v44 }
  0x38   :  { %271 = vst [vmem:[%s780_s2 + $0x178] sm:$0xff] %v222_v47  ;;  %v223_v49 = vmul.f32 %v492_v37, %v173_v48 }
  0x3a   :  { %272 = vst [vmem:[%s780_s2 + $0x180] sm:$0x3f] %v223_v49 }
  0x3b   :  { %277 = vsyncpa [#allocation3], 1 }

</bundles_post_ra>
